<compile_context>
chip_gen: v6e
topology: v6e:2x2x1
jax: 0.10.0
libtpu: 0.0.40
codegen_flags: <defaults>
</compile_context>

<pallas_src>
from functools import partial

import numpy as np
import jax
import jax.numpy as jnp
from jax.experimental import pallas as pl
from jax.experimental.pallas import tpu as pltpu


# ----------------------------------------------------------------------------
# Pallas kernels
# ----------------------------------------------------------------------------
def _dual_lenet_kernel(xp_ref, t1_ref, b1_ref, s1e_ref, s1o_ref, c1e_ref, c1o_ref,
                       t2_ref, b2_ref, s2e_ref, s2o_ref, c2e_ref, c2o_ref,
                       r0_ref, r1_ref, wfc_ref, bfc_ref,
                       emb_ref, pool1_ref):
    """Both LeNet encoders (inv+spec packed) for one modality, fully in VMEM.

    Layouts: feature maps are 2-D with rows=(b, y) and lanes=(x, channel).
    Convs = 5 row-shifted matmuls vs Toeplitz weights; pools/flatten = matmuls
    vs constant 0/1 selection matrices; bias adds + ReLU on the VPU.
    """
    f32 = jnp.float32
    B20 = s1e_ref.shape[1]   # B * 20 (padded conv1 row grid)
    B8 = s2e_ref.shape[1]    # B * 8  (pooled conv1 / conv2 row grid)

    # ---- conv1 (+ ReLU) over the full padded row-grid: 5 shifted matmuls ----
    acc1 = jnp.dot(xp_ref[pl.ds(0, B20), :], t1_ref[0], preferred_element_type=f32)
    for ky in range(1, 5):
        acc1 = acc1 + jnp.dot(xp_ref[pl.ds(ky, B20), :], t1_ref[ky],
                              preferred_element_type=f32)
    acc1 = jnp.maximum(acc1 + b1_ref[...], 0.0)                  # (B*20, 16*12)

    # ---- 2x2 maxpool via 0/1 selection matmuls (rows then lanes) ----
    rmax = jnp.maximum(jnp.dot(s1e_ref[...], acc1, preferred_element_type=f32),
                       jnp.dot(s1o_ref[...], acc1, preferred_element_type=f32))
    pool1_ref[...] = jnp.maximum(
        jnp.dot(rmax, c1e_ref[...], preferred_element_type=f32),
        jnp.dot(rmax, c1o_ref[...], preferred_element_type=f32))  # (B*8+4, 8*12)

    # ---- conv2 (+ ReLU): 5 shifted matmuls over the pooled grid ----
    acc2 = jnp.dot(pool1_ref[pl.ds(0, B8), :], t2_ref[0], preferred_element_type=f32)
    for ky in range(1, 5):
        acc2 = acc2 + jnp.dot(pool1_ref[pl.ds(ky, B8), :], t2_ref[ky],
                              preferred_element_type=f32)
    acc2 = jnp.maximum(acc2 + b2_ref[...], 0.0)                   # (B*8, 4*32)

    # ---- 2x2 maxpool ----
    rmax2 = jnp.maximum(jnp.dot(s2e_ref[...], acc2, preferred_element_type=f32),
                        jnp.dot(s2o_ref[...], acc2, preferred_element_type=f32))
    pool2 = jnp.maximum(jnp.dot(rmax2, c2e_ref[...], preferred_element_type=f32),
                        jnp.dot(rmax2, c2o_ref[...], preferred_element_type=f32))
    # pool2: (B*2, 2*32), rows=(b, y4), lanes=(x4, packed_channel)

    # ---- fc1 (+ ReLU): torch flatten(C,H,W) order folded into Wfc at init ----
    row0 = jnp.dot(r0_ref[...], pool2, preferred_element_type=f32)   # (B, 64)
    row1 = jnp.dot(r1_ref[...], pool2, preferred_element_type=f32)   # (B, 64)
    emb = (jnp.dot(row0, wfc_ref[0], preferred_element_type=f32)
           + jnp.dot(row1, wfc_ref[1], preferred_element_type=f32)
           + bfc_ref[...])
    emb_ref[...] = jnp.maximum(emb, 0.0)                             # (B, 1024)


def _heads_kernel(femb_ref, semb_ref,
                  wpf_ref, bpf_ref, gpf_ref, betpf_ref,
                  wps_ref, bps_ref, gps_ref, betps_ref,
                  wh_ref, bh_ref,
                  fsh_ref, ssh_ref, heads_ref):
    """Projection heads (linear + BN(train) + ReLU) + all small FC heads.

    All small heads are packed into one (6*256, 128) weight so a single
    accumulated matmul produces a lane-dense (B, 128) slab.
    """
    f32 = jnp.float32
    femb = femb_ref[...]                     # (B, 1024)  [inv | spec]
    semb = semb_ref[...]

    def proj_bn_relu(x, w, b, g, be):
        h = jnp.dot(x, w, preferred_element_type=f32) + b
        mean = jnp.mean(h, axis=0, keepdims=True)
        var = jnp.mean((h - mean) ** 2, axis=0, keepdims=True)   # biased (train mode)
        hn = (h - mean) * jax.lax.rsqrt(var + 1e-5)
        return jnp.maximum(hn * g + be, 0.0)

    f_sh = proj_bn_relu(femb[:, 0:512], wpf_ref[...], bpf_ref[...],
                        gpf_ref[...], betpf_ref[...])
    s_sh = proj_bn_relu(semb[:, 0:512], wps_ref[...], bps_ref[...],
                        gps_ref[...], betps_ref[...])

    # Base activations in the same order as the packed head-weight blocks.
    acts = (f_sh, s_sh,
            femb[:, 512:768], femb[:, 768:1024],
            semb[:, 512:768], semb[:, 768:1024])
    acc = jnp.dot(acts[0], wh_ref[pl.ds(0, 256), :], preferred_element_type=f32)
    for i in range(1, 6):
        acc = acc + jnp.dot(acts[i], wh_ref[pl.ds(i * 256, 256), :],
                            preferred_element_type=f32)

    fsh_ref[...] = f_sh
    ssh_ref[...] = s_sh
    heads_ref[...] = acc + bh_ref[...]


# ----------------------------------------------------------------------------
# pallas_call wrappers
# ----------------------------------------------------------------------------
def _fullblock(a):
    nd = a.ndim
    return pl.BlockSpec(a.shape, lambda i, _nd=nd: (0,) * _nd)


def _encoder_call(xp, enc, sel, B):
    args = (xp, enc["T1"], enc["b1"], sel["S1e"], sel["S1o"], sel["C1e"], sel["C1o"],
            enc["T2"], enc["b2"], sel["S2e"], sel["S2o"], sel["C2e"], sel["C2o"],
            sel["R0"], sel["R1"], enc["Wfc"], enc["bfc"])
    return pl.pallas_call(
        _dual_lenet_kernel,
        out_shape=jax.ShapeDtypeStruct((B, 1024), jnp.float32),
        grid=(1,),
        in_specs=[_fullblock(a) for a in args],
        out_specs=pl.BlockSpec((B, 1024), lambda i: (0, 0)),
        scratch_shapes=[pltpu.VMEM((B * 8 + 4, 96), jnp.float32)],
    )(*args)


def _heads_call(femb, semb, projF, projS, heads, B):
    args = (femb, semb,
            projF["W"], projF["b"], projF["gamma"], projF["beta"],
            projS["W"], projS["b"], projS["gamma"], projS["beta"],
            heads["WH"], heads["BH"])
    out_shapes = (jax.ShapeDtypeStruct((B, 256), jnp.float32),
                  jax.ShapeDtypeStruct((B, 256), jnp.float32),
                  jax.ShapeDtypeStruct((B, 128), jnp.float32))
    return pl.pallas_call(
        _heads_kernel,
        out_shape=out_shapes,
        grid=(1,),
        in_specs=[_fullblock(a) for a in args],
        out_specs=[pl.BlockSpec((B, 256), lambda i: (0, 0)),
                   pl.BlockSpec((B, 256), lambda i: (0, 0)),
                   pl.BlockSpec((B, 128), lambda i: (0, 0))],
    )(*args)


# ----------------------------------------------------------------------------
# Parameter init + packing (one-time, host-side numpy)
# ----------------------------------------------------------------------------
def _lenet_raw(rng, c_in):
    def uni(shape, fan_in):
        b = 1.0 / np.sqrt(fan_in)
        return rng.uniform(-b, b, size=shape).astype(np.float32)
    return dict(
        w1=uni((6, c_in, 5, 5), c_in * 25), b1=uni((6,), c_in * 25),
        w2=uni((16, 6, 5, 5), 6 * 25),      b2=uni((16,), 6 * 25),
        wf=uni((512, 64), 64),              bf=uni((512,), 64),
    )


def _pack_dual_encoder(inv, spec, c_in):
    C = c_in
    # conv1 packed along output channels: [inv(6) | spec(6)]
    w1p = np.concatenate([inv["w1"], spec["w1"]], axis=0)        # (12, C, 5, 5)
    b1p = np.concatenate([inv["b1"], spec["b1"]], axis=0)        # (12,)
    # conv2 packed block-diagonally over input channels
    w2p = np.zeros((32, 12, 5, 5), np.float32)
    w2p[0:16, 0:6] = inv["w2"]
    w2p[16:32, 6:12] = spec["w2"]
    b2p = np.concatenate([inv["b2"], spec["b2"]], axis=0)        # (32,)

    # Toeplitz conv1 weights: T1[ky, xin*C + c, xo*12 + o] = w1p[o, c, ky, xin-xo]
    T1 = np.zeros((5, 20 * C, 16 * 12), np.float32)
    for ky in range(5):
        for xo in range(16):
            for kx in range(5):
                xin = xo + kx
                T1[ky, xin * C:(xin + 1) * C, xo * 12:(xo + 1) * 12] = \
                    w1p[:, :, ky, kx].T
    b1row = np.tile(b1p, 16)[None, :]                            # (1, 192)

    # Toeplitz conv2 weights: T2[ky, x2*12 + cin, x3*32 + cout] = w2p[cout, cin, ky, x2-x3]
    T2 = np.zeros((5, 96, 128), np.float32)
    for ky in range(5):
        for xo in range(4):
            for kx in range(5):
                xin = xo + kx
                T2[ky, xin * 12:(xin + 1) * 12, xo * 32:(xo + 1) * 32] = \
                    w2p[:, :, ky, kx].T
    b2row = np.tile(b2p, 4)[None, :]                             # (1, 128)

    # fc1 packed, split by pooled row y4 in {0,1}; torch flatten order
    # (index = c*4 + h*2 + w) folded into the weight permutation.
    Wfc = np.zeros((2, 64, 1024), np.float32)
    for e, enc in enumerate((inv, spec)):
        wf = enc["wf"]                                           # (512, 64)
        for y4 in range(2):
            for x4 in range(2):
                for c in range(16):
                    Wfc[y4, x4 * 32 + e * 16 + c, e * 512:(e + 1) * 512] = \
                        wf[:, c * 4 + y4 * 2 + x4]
    bfc = np.concatenate([inv["bf"], spec["bf"]])[None, :]       # (1, 1024)
    return dict(T1=T1, b1=b1row, T2=T2, b2=b2row, Wfc=Wfc, bfc=bfc)


def _pool_selectors(B):
    """0/1 selection matrices for the maxpools / flatten (built once)."""
    S1e = np.zeros((B * 8 + 4, B * 20), np.float32)   # +4 zero slack rows for conv2 shifts
    S1o = np.zeros((B * 8 + 4, B * 20), np.float32)
    for b in range(B):
        for yo in range(8):
            S1e[b * 8 + yo, b * 20 + 2 * yo] = 1.0
            S1o[b * 8 + yo, b * 20 + 2 * yo + 1] = 1.0
    C1e = np.zeros((192, 96), np.float32)
    C1o = np.zeros((192, 96), np.float32)
    for xo in range(8):
        for o in range(12):
            C1e[(2 * xo) * 12 + o, xo * 12 + o] = 1.0
            C1o[(2 * xo + 1) * 12 + o, xo * 12 + o] = 1.0
    S2e = np.zeros((B * 2, B * 8), np.float32)
    S2o = np.zeros((B * 2, B * 8), np.float32)
    for b in range(B):
        for y4 in range(2):
            S2e[b * 2 + y4, b * 8 + 2 * y4] = 1.0
            S2o[b * 2 + y4, b * 8 + 2 * y4 + 1] = 1.0
    C2e = np.zeros((128, 64), np.float32)
    C2o = np.zeros((128, 64), np.float32)
    for x4 in range(2):
        for c in range(32):
            C2e[(2 * x4) * 32 + c, x4 * 32 + c] = 1.0
            C2o[(2 * x4 + 1) * 32 + c, x4 * 32 + c] = 1.0
    R0 = np.zeros((B, B * 2), np.float32)
    R1 = np.zeros((B, B * 2), np.float32)
    for b in range(B):
        R0[b, 2 * b] = 1.0
        R1[b, 2 * b + 1] = 1.0
    return dict(S1e=S1e, S1o=S1o, C1e=C1e, C1o=C1o,
                S2e=S2e, S2o=S2o, C2e=C2e, C2o=C2o, R0=R0, R1=R1)


def _pack_proj(rng):
    b = 1.0 / np.sqrt(512)
    W = rng.uniform(-b, b, (256, 512)).astype(np.float32).T      # stored (512, 256)
    bb = rng.uniform(-b, b, (256,)).astype(np.float32)[None, :]
    return dict(W=np.ascontiguousarray(W), b=bb,
                gamma=np.ones((1, 256), np.float32),
                beta=np.zeros((1, 256), np.float32))


def _pack_heads(rng, num_classes):
    def lin(out_dim, in_dim):
        b = 1.0 / np.sqrt(in_dim)
        W = rng.uniform(-b, b, (out_dim, in_dim)).astype(np.float32)
        bb = rng.uniform(-b, b, (out_dim,)).astype(np.float32)
        return W, bb
    W_dom, b_dom = lin(2, 256)
    W_dom2, b_dom2 = lin(2, 256)
    W_cl, b_cl = lin(num_classes, 512)
    W_cl2, b_cl2 = lin(num_classes, 512)
    W_cl3, b_cl3 = lin(num_classes, 256)
    W_dis, b_dis = lin(2, 256)
    nc = num_classes
    ncols = 12 + 6 * nc
    assert ncols <= 128, "packed head slab must fit in 128 lanes"
    NCOL = 128                                                    # lane-dense output slab
    WH = np.zeros((6 * 256, NCOL), np.float32)
    BH = np.zeros((1, NCOL), np.float32)

    # activation blocks: 0 f_shared, 1 s_shared, 2 f_dd, 3 f_du, 4 s_dd, 5 s_du
    def put(col, width, blocks, bias):
        for blk, Wt in blocks:                                    # Wt: (256, width)
            WH[blk * 256:(blk + 1) * 256, col:col + width] = Wt
        BH[0, col:col + width] = bias
        return col + width

    col = 0
    col = put(col, 2, [(2, W_dom.T)], b_dom)                      # task_dom(f_dd)
    col = put(col, 2, [(3, W_dom2.T)], b_dom2)                    # task_dom2(f_du)
    col = put(col, 2, [(4, W_dom.T)], b_dom)                      # task_dom(s_dd)
    col = put(col, 2, [(5, W_dom2.T)], b_dom2)                    # task_dom2(s_du)
    col = put(col, nc, [(0, W_cl.T[:256]), (2, W_cl.T[256:])], b_cl)    # task_cl
    col = put(col, nc, [(1, W_cl2.T[:256]), (4, W_cl2.T[256:])], b_cl2)  # task_cl2
    col = put(col, 2, [(0, W_dis.T)], b_dis)                      # discr(f_shared)
    col = put(col, 2, [(1, W_dis.T)], b_dis)                      # discr(s_shared)
    col = put(col, nc, [(0, W_cl3.T)], b_cl3)                     # task_cl3(f_shared)
    col = put(col, nc, [(1, W_cl3.T)], b_cl3)                     # task_cl3(s_shared)
    col = put(col, nc, [(2, W_cl3.T)], b_cl3)                     # task_cl3(f_dd)
    col = put(col, nc, [(4, W_cl3.T)], b_cl3)                     # task_cl3(s_dd)
    assert col == ncols
    return dict(WH=WH, BH=BH)


def init_discomkd_params(seed, c_first, c_second, num_classes, batch):
    rng = np.random.RandomState(seed)
    f_inv, f_spec = _lenet_raw(rng, c_first), _lenet_raw(rng, c_first)
    s_inv, s_spec = _lenet_raw(rng, c_second), _lenet_raw(rng, c_second)
    params = dict(
        f_enc=_pack_dual_encoder(f_inv, f_spec, c_first),
        s_enc=_pack_dual_encoder(s_inv, s_spec, c_second),
        sel=_pool_selectors(batch),
        projF=_pack_proj(rng),
        projS=_pack_proj(rng),
        heads=_pack_heads(rng, num_classes),
    )
    return jax.tree_util.tree_map(jnp.asarray, params)


# ----------------------------------------------------------------------------
# Forward pass
# ----------------------------------------------------------------------------
def _prep_input(x_nchw):
    """NCHW -> padded 2-D row grid: rows=(b, ypad), lanes=(xpad, channel)."""
    B, C, H, W = x_nchw.shape
    x = jnp.transpose(x_nchw, (0, 2, 3, 1))                   # NHWC
    x = jnp.pad(x, ((0, 0), (2, 2), (2, 2), (0, 0)))          # conv1 padding=2
    x = x.reshape(B * (H + 4), (W + 4) * C)
    return jnp.pad(x, ((0, 4), (0, 0)))                       # slack rows for ky-shifts


def discomkd_forward(params, f_x, s_x, lambda_val=1.0, *, num_classes=10):
    B = f_x.shape[0]
    femb = _encoder_call(_prep_input(f_x), params["f_enc"], params["sel"], B)
    semb = _encoder_call(_prep_input(s_x), params["s_enc"], params["sel"], B)
    # femb/semb: (B, 1024) = [inv embedding (512) | spec embedding (512)]

    f_sh, s_sh, hd = _heads_call(femb, semb, params["projF"], params["projS"],
                                 params["heads"], B)

    nc = num_classes
    f_dd, f_du = femb[:, 512:768], femb[:, 768:1024]
    s_dd, s_du = semb[:, 512:768], semb[:, 768:1024]

    pred_f_dom = jnp.concatenate([hd[:, 0:2], hd[:, 2:4]], axis=0)
    pred_s_dom = jnp.concatenate([hd[:, 4:6], hd[:, 6:8]], axis=0)
    c = 8
    cl_f = hd[:, c:c + nc]; c += nc
    cl2_s = hd[:, c:c + nc]; c += nc
    # grad_reverse is identity in the forward pass (alpha only affects backward)
    dis_f = hd[:, c:c + 2]; c += 2
    dis_s = hd[:, c:c + 2]; c += 2
    cl3_fsh = hd[:, c:c + nc]; c += nc
    cl3_ssh = hd[:, c:c + nc]; c += nc
    cl3_fdd = hd[:, c:c + nc]; c += nc
    cl3_sdd = hd[:, c:c + nc]; c += nc

    return (f_sh, s_sh, f_dd, f_du, s_dd, s_du, pred_f_dom, pred_s_dom,
            cl_f, cl2_s, dis_f, dis_s, cl3_fsh, cl3_ssh, cl3_fdd, cl3_sdd)


# ----------------------------------------------------------------------------
if __name__ == "__main__":
    B, C_FIRST, C_SECOND, HW = 4, 4, 2, 16
    NUM_CLASSES = 10

    params = init_discomkd_params(0, C_FIRST, C_SECOND, NUM_CLASSES, B)

    key = jax.random.PRNGKey(0)
    k_fx, k_sx = jax.random.split(key)
    f_x = jax.random.normal(k_fx, (B, C_FIRST, HW, HW), jnp.float32)   # NCHW
    s_x = jax.random.normal(k_sx, (B, C_SECOND, HW, HW), jnp.float32)  # NCHW

    fwd = jax.jit(partial(discomkd_forward, num_classes=NUM_CLASSES))
    outs = jax.block_until_ready(fwd(params, f_x, s_x))

    expected = ([(B, 256)] * 6 + [(2 * B, 2)] * 2 + [(B, NUM_CLASSES)] * 2
                + [(B, 2)] * 2 + [(B, NUM_CLASSES)] * 4)
    assert len(outs) == 16
    for o, s in zip(outs, expected):
        assert o.shape == s, (o.shape, s)
        assert bool(jnp.all(jnp.isfinite(o)))
    print("KERNEL_OK")
</pallas_src>

<mosaic_0001>
module attributes {stable_mosaic.version = 11 : i64} {
  func.func @_dual_lenet_kernel(%arg0: i32, %arg1: memref<84x80xf32, #tpu.memory_space<vmem>>, %arg2: memref<5x80x192xf32, #tpu.memory_space<vmem>>, %arg3: memref<1x192xf32, #tpu.memory_space<vmem>>, %arg4: memref<36x80xf32, #tpu.memory_space<vmem>>, %arg5: memref<36x80xf32, #tpu.memory_space<vmem>>, %arg6: memref<192x96xf32, #tpu.memory_space<vmem>>, %arg7: memref<192x96xf32, #tpu.memory_space<vmem>>, %arg8: memref<5x96x128xf32, #tpu.memory_space<vmem>>, %arg9: memref<1x128xf32, #tpu.memory_space<vmem>>, %arg10: memref<8x32xf32, #tpu.memory_space<vmem>>, %arg11: memref<8x32xf32, #tpu.memory_space<vmem>>, %arg12: memref<128x64xf32, #tpu.memory_space<vmem>>, %arg13: memref<128x64xf32, #tpu.memory_space<vmem>>, %arg14: memref<4x8xf32, #tpu.memory_space<vmem>>, %arg15: memref<4x8xf32, #tpu.memory_space<vmem>>, %arg16: memref<2x64x1024xf32, #tpu.memory_space<vmem>>, %arg17: memref<1x1024xf32, #tpu.memory_space<vmem>>, %arg18: memref<4x1024xf32, #tpu.memory_space<vmem>>, %arg19: memref<36x96xf32, #tpu.memory_space<vmem>>) attributes {dimension_semantics = [#tpu.dimension_semantics<arbitrary>], iteration_bounds = array<i64: 1>, scalar_prefetch = 0 : i64, scratch_operands = 1 : i64, tpu.core_type = #tpu.core_type<tc>, window_params = [{pipeline_mode = #tpu.pipeline_mode<synchronous>, transform_indices = @transform_0, window_bounds = array<i64: 84, 80>}, {pipeline_mode = #tpu.pipeline_mode<synchronous>, transform_indices = @transform_1, window_bounds = array<i64: 5, 80, 192>}, {pipeline_mode = #tpu.pipeline_mode<synchronous>, transform_indices = @transform_2, window_bounds = array<i64: 1, 192>}, {pipeline_mode = #tpu.pipeline_mode<synchronous>, transform_indices = @transform_3, window_bounds = array<i64: 36, 80>}, {pipeline_mode = #tpu.pipeline_mode<synchronous>, transform_indices = @transform_4, window_bounds = array<i64: 36, 80>}, {pipeline_mode = #tpu.pipeline_mode<synchronous>, transform_indices = @transform_5, window_bounds = array<i64: 192, 96>}, {pipeline_mode = #tpu.pipeline_mode<synchronous>, transform_indices = @transform_6, window_bounds = array<i64: 192, 96>}, {pipeline_mode = #tpu.pipeline_mode<synchronous>, transform_indices = @transform_7, window_bounds = array<i64: 5, 96, 128>}, {pipeline_mode = #tpu.pipeline_mode<synchronous>, transform_indices = @transform_8, window_bounds = array<i64: 1, 128>}, {pipeline_mode = #tpu.pipeline_mode<synchronous>, transform_indices = @transform_9, window_bounds = array<i64: 8, 32>}, {pipeline_mode = #tpu.pipeline_mode<synchronous>, transform_indices = @transform_10, window_bounds = array<i64: 8, 32>}, {pipeline_mode = #tpu.pipeline_mode<synchronous>, transform_indices = @transform_11, window_bounds = array<i64: 128, 64>}, {pipeline_mode = #tpu.pipeline_mode<synchronous>, transform_indices = @transform_12, window_bounds = array<i64: 128, 64>}, {pipeline_mode = #tpu.pipeline_mode<synchronous>, transform_indices = @transform_13, window_bounds = array<i64: 4, 8>}, {pipeline_mode = #tpu.pipeline_mode<synchronous>, transform_indices = @transform_14, window_bounds = array<i64: 4, 8>}, {pipeline_mode = #tpu.pipeline_mode<synchronous>, transform_indices = @transform_15, window_bounds = array<i64: 2, 64, 1024>}, {pipeline_mode = #tpu.pipeline_mode<synchronous>, transform_indices = @transform_16, window_bounds = array<i64: 1, 1024>}, {pipeline_mode = #tpu.pipeline_mode<synchronous>, transform_indices = @transform_17, window_bounds = array<i64: 4, 1024>}]} {
    %c0 = arith.constant 0 : index
    %c0_0 = arith.constant 0 : index
    %0 = vector.load %arg1[%c0, %c0_0] : memref<84x80xf32, #tpu.memory_space<vmem>>, vector<80x80xf32>
    %c0_1 = arith.constant 0 : index
    %c0_2 = arith.constant 0 : index
    %c0_3 = arith.constant 0 : index
    %1 = vector.load %arg2[%c0_1, %c0_2, %c0_3] : memref<5x80x192xf32, #tpu.memory_space<vmem>>, vector<1x80x192xf32>
    %2 = vector.shape_cast %1 : vector<1x80x192xf32> to vector<80x192xf32>
    %cst = arith.constant dense<0.000000e+00> : vector<80x192xf32>
    %3 = tpu.matmul %0, %2, %cst {dimension_numbers = #tpu.dot_dimension_numbers<[1], [0], [0], [1], [0, 0, 1, 1], [], []>} : vector<80x80xf32>, vector<80x192xf32>, vector<80x192xf32> -> vector<80x192xf32>
    %c1 = arith.constant 1 : index
    %c0_4 = arith.constant 0 : index
    %4 = vector.load %arg1[%c1, %c0_4] : memref<84x80xf32, #tpu.memory_space<vmem>>, vector<80x80xf32>
    %c1_5 = arith.constant 1 : index
    %c0_6 = arith.constant 0 : index
    %c0_7 = arith.constant 0 : index
    %5 = vector.load %arg2[%c1_5, %c0_6, %c0_7] : memref<5x80x192xf32, #tpu.memory_space<vmem>>, vector<1x80x192xf32>
    %6 = vector.shape_cast %5 : vector<1x80x192xf32> to vector<80x192xf32>
    %cst_8 = arith.constant dense<0.000000e+00> : vector<80x192xf32>
    %7 = tpu.matmul %4, %6, %cst_8 {dimension_numbers = #tpu.dot_dimension_numbers<[1], [0], [0], [1], [0, 0, 1, 1], [], []>} : vector<80x80xf32>, vector<80x192xf32>, vector<80x192xf32> -> vector<80x192xf32>
    %8 = arith.addf %3, %7 : vector<80x192xf32>
    %c2 = arith.constant 2 : index
    %c0_9 = arith.constant 0 : index
    %9 = vector.load %arg1[%c2, %c0_9] : memref<84x80xf32, #tpu.memory_space<vmem>>, vector<80x80xf32>
    %c2_10 = arith.constant 2 : index
    %c0_11 = arith.constant 0 : index
    %c0_12 = arith.constant 0 : index
    %10 = vector.load %arg2[%c2_10, %c0_11, %c0_12] : memref<5x80x192xf32, #tpu.memory_space<vmem>>, vector<1x80x192xf32>
    %11 = vector.shape_cast %10 : vector<1x80x192xf32> to vector<80x192xf32>
    %cst_13 = arith.constant dense<0.000000e+00> : vector<80x192xf32>
    %12 = tpu.matmul %9, %11, %cst_13 {dimension_numbers = #tpu.dot_dimension_numbers<[1], [0], [0], [1], [0, 0, 1, 1], [], []>} : vector<80x80xf32>, vector<80x192xf32>, vector<80x192xf32> -> vector<80x192xf32>
    %13 = arith.addf %8, %12 : vector<80x192xf32>
    %c3 = arith.constant 3 : index
    %c0_14 = arith.constant 0 : index
    %14 = vector.load %arg1[%c3, %c0_14] : memref<84x80xf32, #tpu.memory_space<vmem>>, vector<80x80xf32>
    %c3_15 = arith.constant 3 : index
    %c0_16 = arith.constant 0 : index
    %c0_17 = arith.constant 0 : index
    %15 = vector.load %arg2[%c3_15, %c0_16, %c0_17] : memref<5x80x192xf32, #tpu.memory_space<vmem>>, vector<1x80x192xf32>
    %16 = vector.shape_cast %15 : vector<1x80x192xf32> to vector<80x192xf32>
    %cst_18 = arith.constant dense<0.000000e+00> : vector<80x192xf32>
    %17 = tpu.matmul %14, %16, %cst_18 {dimension_numbers = #tpu.dot_dimension_numbers<[1], [0], [0], [1], [0, 0, 1, 1], [], []>} : vector<80x80xf32>, vector<80x192xf32>, vector<80x192xf32> -> vector<80x192xf32>
    %18 = arith.addf %13, %17 : vector<80x192xf32>
    %c4 = arith.constant 4 : index
    %c0_19 = arith.constant 0 : index
    %19 = vector.load %arg1[%c4, %c0_19] : memref<84x80xf32, #tpu.memory_space<vmem>>, vector<80x80xf32>
    %c4_20 = arith.constant 4 : index
    %c0_21 = arith.constant 0 : index
    %c0_22 = arith.constant 0 : index
    %20 = vector.load %arg2[%c4_20, %c0_21, %c0_22] : memref<5x80x192xf32, #tpu.memory_space<vmem>>, vector<1x80x192xf32>
    %21 = vector.shape_cast %20 : vector<1x80x192xf32> to vector<80x192xf32>
    %cst_23 = arith.constant dense<0.000000e+00> : vector<80x192xf32>
    %22 = tpu.matmul %19, %21, %cst_23 {dimension_numbers = #tpu.dot_dimension_numbers<[1], [0], [0], [1], [0, 0, 1, 1], [], []>} : vector<80x80xf32>, vector<80x192xf32>, vector<80x192xf32> -> vector<80x192xf32>
    %23 = arith.addf %18, %22 : vector<80x192xf32>
    %c0_24 = arith.constant 0 : index
    %c0_25 = arith.constant 0 : index
    %24 = vector.load %arg3[%c0_24, %c0_25] : memref<1x192xf32, #tpu.memory_space<vmem>>, vector<1x192xf32>
    %25 = vector.broadcast %24 : vector<1x192xf32> to vector<80x192xf32>
    %26 = arith.addf %23, %25 : vector<80x192xf32>
    %cst_26 = arith.constant 0.000000e+00 : f32
    %27 = vector.broadcast %cst_26 : f32 to vector<80x192xf32>
    %28 = arith.maximumf %26, %27 : vector<80x192xf32>
    %c0_27 = arith.constant 0 : index
    %c0_28 = arith.constant 0 : index
    %29 = vector.load %arg4[%c0_27, %c0_28] : memref<36x80xf32, #tpu.memory_space<vmem>>, vector<36x80xf32>
    %cst_29 = arith.constant dense<0.000000e+00> : vector<36x192xf32>
    %30 = tpu.matmul %29, %28, %cst_29 {dimension_numbers = #tpu.dot_dimension_numbers<[1], [0], [0], [1], [0, 0, 1, 1], [], []>} : vector<36x80xf32>, vector<80x192xf32>, vector<36x192xf32> -> vector<36x192xf32>
    %c0_30 = arith.constant 0 : index
    %c0_31 = arith.constant 0 : index
    %31 = vector.load %arg5[%c0_30, %c0_31] : memref<36x80xf32, #tpu.memory_space<vmem>>, vector<36x80xf32>
    %cst_32 = arith.constant dense<0.000000e+00> : vector<36x192xf32>
    %32 = tpu.matmul %31, %28, %cst_32 {dimension_numbers = #tpu.dot_dimension_numbers<[1], [0], [0], [1], [0, 0, 1, 1], [], []>} : vector<36x80xf32>, vector<80x192xf32>, vector<36x192xf32> -> vector<36x192xf32>
    %33 = arith.maximumf %30, %32 : vector<36x192xf32>
    %c0_33 = arith.constant 0 : index
    %c0_34 = arith.constant 0 : index
    %34 = vector.load %arg6[%c0_33, %c0_34] : memref<192x96xf32, #tpu.memory_space<vmem>>, vector<192x96xf32>
    %cst_35 = arith.constant dense<0.000000e+00> : vector<36x96xf32>
    %35 = tpu.matmul %33, %34, %cst_35 {dimension_numbers = #tpu.dot_dimension_numbers<[1], [0], [0], [1], [0, 0, 1, 1], [], []>} : vector<36x192xf32>, vector<192x96xf32>, vector<36x96xf32> -> vector<36x96xf32>
    %c0_36 = arith.constant 0 : index
    %c0_37 = arith.constant 0 : index
    %36 = vector.load %arg7[%c0_36, %c0_37] : memref<192x96xf32, #tpu.memory_space<vmem>>, vector<192x96xf32>
    %cst_38 = arith.constant dense<0.000000e+00> : vector<36x96xf32>
    %37 = tpu.matmul %33, %36, %cst_38 {dimension_numbers = #tpu.dot_dimension_numbers<[1], [0], [0], [1], [0, 0, 1, 1], [], []>} : vector<36x192xf32>, vector<192x96xf32>, vector<36x96xf32> -> vector<36x96xf32>
    %38 = arith.maximumf %35, %37 : vector<36x96xf32>
    %c0_39 = arith.constant 0 : index
    %c0_40 = arith.constant 0 : index
    %39 = vector.load %arg19[%c0_39, %c0_40] : memref<36x96xf32, #tpu.memory_space<vmem>>, vector<36x96xf32>
    tpu.vector_store %arg19[%c0_39, %c0_40], %38 {strides = array<i32>} : memref<36x96xf32, #tpu.memory_space<vmem>>, vector<36x96xf32>,
    %c0_41 = arith.constant 0 : index
    %c0_42 = arith.constant 0 : index
    %40 = vector.load %arg19[%c0_41, %c0_42] : memref<36x96xf32, #tpu.memory_space<vmem>>, vector<32x96xf32>
    %c0_43 = arith.constant 0 : index
    %c0_44 = arith.constant 0 : index
    %c0_45 = arith.constant 0 : index
    %41 = vector.load %arg8[%c0_43, %c0_44, %c0_45] : memref<5x96x128xf32, #tpu.memory_space<vmem>>, vector<1x96x128xf32>
    %42 = vector.shape_cast %41 : vector<1x96x128xf32> to vector<96x128xf32>
    %cst_46 = arith.constant dense<0.000000e+00> : vector<32x128xf32>
    %43 = tpu.matmul %40, %42, %cst_46 {dimension_numbers = #tpu.dot_dimension_numbers<[1], [0], [0], [1], [0, 0, 1, 1], [], []>} : vector<32x96xf32>, vector<96x128xf32>, vector<32x128xf32> -> vector<32x128xf32>
    %c1_47 = arith.constant 1 : index
    %c0_48 = arith.constant 0 : index
    %44 = vector.load %arg19[%c1_47, %c0_48] : memref<36x96xf32, #tpu.memory_space<vmem>>, vector<32x96xf32>
    %c1_49 = arith.constant 1 : index
    %c0_50 = arith.constant 0 : index
    %c0_51 = arith.constant 0 : index
    %45 = vector.load %arg8[%c1_49, %c0_50, %c0_51] : memref<5x96x128xf32, #tpu.memory_space<vmem>>, vector<1x96x128xf32>
    %46 = vector.shape_cast %45 : vector<1x96x128xf32> to vector<96x128xf32>
    %cst_52 = arith.constant dense<0.000000e+00> : vector<32x128xf32>
    %47 = tpu.matmul %44, %46, %cst_52 {dimension_numbers = #tpu.dot_dimension_numbers<[1], [0], [0], [1], [0, 0, 1, 1], [], []>} : vector<32x96xf32>, vector<96x128xf32>, vector<32x128xf32> -> vector<32x128xf32>
    %48 = arith.addf %43, %47 : vector<32x128xf32>
    %c2_53 = arith.constant 2 : index
    %c0_54 = arith.constant 0 : index
    %49 = vector.load %arg19[%c2_53, %c0_54] : memref<36x96xf32, #tpu.memory_space<vmem>>, vector<32x96xf32>
    %c2_55 = arith.constant 2 : index
    %c0_56 = arith.constant 0 : index
    %c0_57 = arith.constant 0 : index
    %50 = vector.load %arg8[%c2_55, %c0_56, %c0_57] : memref<5x96x128xf32, #tpu.memory_space<vmem>>, vector<1x96x128xf32>
    %51 = vector.shape_cast %50 : vector<1x96x128xf32> to vector<96x128xf32>
    %cst_58 = arith.constant dense<0.000000e+00> : vector<32x128xf32>
    %52 = tpu.matmul %49, %51, %cst_58 {dimension_numbers = #tpu.dot_dimension_numbers<[1], [0], [0], [1], [0, 0, 1, 1], [], []>} : vector<32x96xf32>, vector<96x128xf32>, vector<32x128xf32> -> vector<32x128xf32>
    %53 = arith.addf %48, %52 : vector<32x128xf32>
    %c3_59 = arith.constant 3 : index
    %c0_60 = arith.constant 0 : index
    %54 = vector.load %arg19[%c3_59, %c0_60] : memref<36x96xf32, #tpu.memory_space<vmem>>, vector<32x96xf32>
    %c3_61 = arith.constant 3 : index
    %c0_62 = arith.constant 0 : index
    %c0_63 = arith.constant 0 : index
    %55 = vector.load %arg8[%c3_61, %c0_62, %c0_63] : memref<5x96x128xf32, #tpu.memory_space<vmem>>, vector<1x96x128xf32>
    %56 = vector.shape_cast %55 : vector<1x96x128xf32> to vector<96x128xf32>
    %cst_64 = arith.constant dense<0.000000e+00> : vector<32x128xf32>
    %57 = tpu.matmul %54, %56, %cst_64 {dimension_numbers = #tpu.dot_dimension_numbers<[1], [0], [0], [1], [0, 0, 1, 1], [], []>} : vector<32x96xf32>, vector<96x128xf32>, vector<32x128xf32> -> vector<32x128xf32>
    %58 = arith.addf %53, %57 : vector<32x128xf32>
    %c4_65 = arith.constant 4 : index
    %c0_66 = arith.constant 0 : index
    %59 = vector.load %arg19[%c4_65, %c0_66] : memref<36x96xf32, #tpu.memory_space<vmem>>, vector<32x96xf32>
    %c4_67 = arith.constant 4 : index
    %c0_68 = arith.constant 0 : index
    %c0_69 = arith.constant 0 : index
    %60 = vector.load %arg8[%c4_67, %c0_68, %c0_69] : memref<5x96x128xf32, #tpu.memory_space<vmem>>, vector<1x96x128xf32>
    %61 = vector.shape_cast %60 : vector<1x96x128xf32> to vector<96x128xf32>
    %cst_70 = arith.constant dense<0.000000e+00> : vector<32x128xf32>
    %62 = tpu.matmul %59, %61, %cst_70 {dimension_numbers = #tpu.dot_dimension_numbers<[1], [0], [0], [1], [0, 0, 1, 1], [], []>} : vector<32x96xf32>, vector<96x128xf32>, vector<32x128xf32> -> vector<32x128xf32>
    %63 = arith.addf %58, %62 : vector<32x128xf32>
    %c0_71 = arith.constant 0 : index
    %c0_72 = arith.constant 0 : index
    %64 = vector.load %arg9[%c0_71, %c0_72] : memref<1x128xf32, #tpu.memory_space<vmem>>, vector<1x128xf32>
    %65 = vector.broadcast %64 : vector<1x128xf32> to vector<32x128xf32>
    %66 = arith.addf %63, %65 : vector<32x128xf32>
    %cst_73 = arith.constant 0.000000e+00 : f32
    %67 = vector.broadcast %cst_73 : f32 to vector<32x128xf32>
    %68 = arith.maximumf %66, %67 : vector<32x128xf32>
    %c0_74 = arith.constant 0 : index
    %c0_75 = arith.constant 0 : index
    %69 = vector.load %arg10[%c0_74, %c0_75] : memref<8x32xf32, #tpu.memory_space<vmem>>, vector<8x32xf32>
    %cst_76 = arith.constant dense<0.000000e+00> : vector<8x128xf32>
    %70 = tpu.matmul %69, %68, %cst_76 {dimension_numbers = #tpu.dot_dimension_numbers<[1], [0], [0], [1], [0, 0, 1, 1], [], []>} : vector<8x32xf32>, vector<32x128xf32>, vector<8x128xf32> -> vector<8x128xf32>
    %c0_77 = arith.constant 0 : index
    %c0_78 = arith.constant 0 : index
    %71 = vector.load %arg11[%c0_77, %c0_78] : memref<8x32xf32, #tpu.memory_space<vmem>>, vector<8x32xf32>
    %cst_79 = arith.constant dense<0.000000e+00> : vector<8x128xf32>
    %72 = tpu.matmul %71, %68, %cst_79 {dimension_numbers = #tpu.dot_dimension_numbers<[1], [0], [0], [1], [0, 0, 1, 1], [], []>} : vector<8x32xf32>, vector<32x128xf32>, vector<8x128xf32> -> vector<8x128xf32>
    %73 = arith.maximumf %70, %72 : vector<8x128xf32>
    %c0_80 = arith.constant 0 : index
    %c0_81 = arith.constant 0 : index
    %74 = vector.load %arg12[%c0_80, %c0_81] : memref<128x64xf32, #tpu.memory_space<vmem>>, vector<128x64xf32>
    %cst_82 = arith.constant dense<0.000000e+00> : vector<8x64xf32>
    %75 = tpu.matmul %73, %74, %cst_82 {dimension_numbers = #tpu.dot_dimension_numbers<[1], [0], [0], [1], [0, 0, 1, 1], [], []>} : vector<8x128xf32>, vector<128x64xf32>, vector<8x64xf32> -> vector<8x64xf32>
    %c0_83 = arith.constant 0 : index
    %c0_84 = arith.constant 0 : index
    %76 = vector.load %arg13[%c0_83, %c0_84] : memref<128x64xf32, #tpu.memory_space<vmem>>, vector<128x64xf32>
    %cst_85 = arith.constant dense<0.000000e+00> : vector<8x64xf32>
    %77 = tpu.matmul %73, %76, %cst_85 {dimension_numbers = #tpu.dot_dimension_numbers<[1], [0], [0], [1], [0, 0, 1, 1], [], []>} : vector<8x128xf32>, vector<128x64xf32>, vector<8x64xf32> -> vector<8x64xf32>
    %78 = arith.maximumf %75, %77 : vector<8x64xf32>
    %c0_86 = arith.constant 0 : index
    %c0_87 = arith.constant 0 : index
    %79 = vector.load %arg14[%c0_86, %c0_87] : memref<4x8xf32, #tpu.memory_space<vmem>>, vector<4x8xf32>
    %cst_88 = arith.constant dense<0.000000e+00> : vector<4x64xf32>
    %80 = tpu.matmul %79, %78, %cst_88 {dimension_numbers = #tpu.dot_dimension_numbers<[1], [0], [0], [1], [0, 0, 1, 1], [], []>} : vector<4x8xf32>, vector<8x64xf32>, vector<4x64xf32> -> vector<4x64xf32>
    %c0_89 = arith.constant 0 : index
    %c0_90 = arith.constant 0 : index
    %81 = vector.load %arg15[%c0_89, %c0_90] : memref<4x8xf32, #tpu.memory_space<vmem>>, vector<4x8xf32>
    %cst_91 = arith.constant dense<0.000000e+00> : vector<4x64xf32>
    %82 = tpu.matmul %81, %78, %cst_91 {dimension_numbers = #tpu.dot_dimension_numbers<[1], [0], [0], [1], [0, 0, 1, 1], [], []>} : vector<4x8xf32>, vector<8x64xf32>, vector<4x64xf32> -> vector<4x64xf32>
    %c0_92 = arith.constant 0 : index
    %c0_93 = arith.constant 0 : index
    %c0_94 = arith.constant 0 : index
    %83 = vector.load %arg16[%c0_92, %c0_93, %c0_94] : memref<2x64x1024xf32, #tpu.memory_space<vmem>>, vector<1x64x1024xf32>
    %84 = vector.shape_cast %83 : vector<1x64x1024xf32> to vector<64x1024xf32>
    %cst_95 = arith.constant dense<0.000000e+00> : vector<4x1024xf32>
    %85 = tpu.matmul %80, %84, %cst_95 {dimension_numbers = #tpu.dot_dimension_numbers<[1], [0], [0], [1], [0, 0, 1, 1], [], []>} : vector<4x64xf32>, vector<64x1024xf32>, vector<4x1024xf32> -> vector<4x1024xf32>
    %c1_96 = arith.constant 1 : index
    %c0_97 = arith.constant 0 : index
    %c0_98 = arith.constant 0 : index
    %86 = vector.load %arg16[%c1_96, %c0_97, %c0_98] : memref<2x64x1024xf32, #tpu.memory_space<vmem>>, vector<1x64x1024xf32>
    %87 = vector.shape_cast %86 : vector<1x64x1024xf32> to vector<64x1024xf32>
    %cst_99 = arith.constant dense<0.000000e+00> : vector<4x1024xf32>
    %88 = tpu.matmul %82, %87, %cst_99 {dimension_numbers = #tpu.dot_dimension_numbers<[1], [0], [0], [1], [0, 0, 1, 1], [], []>} : vector<4x64xf32>, vector<64x1024xf32>, vector<4x1024xf32> -> vector<4x1024xf32>
    %89 = arith.addf %85, %88 : vector<4x1024xf32>
    %c0_100 = arith.constant 0 : index
    %c0_101 = arith.constant 0 : index
    %90 = vector.load %arg17[%c0_100, %c0_101] : memref<1x1024xf32, #tpu.memory_space<vmem>>, vector<1x1024xf32>
    %91 = vector.broadcast %90 : vector<1x1024xf32> to vector<4x1024xf32>
    %92 = arith.addf %89, %91 : vector<4x1024xf32>
    %cst_102 = arith.constant 0.000000e+00 : f32
    %93 = vector.broadcast %cst_102 : f32 to vector<4x1024xf32>
    %94 = arith.maximumf %92, %93 : vector<4x1024xf32>
    %c0_103 = arith.constant 0 : index
    %c0_104 = arith.constant 0 : index
    %95 = vector.load %arg18[%c0_103, %c0_104] : memref<4x1024xf32, #tpu.memory_space<vmem>>, vector<4x1024xf32>
    tpu.vector_store %arg18[%c0_103, %c0_104], %94 {strides = array<i32>} : memref<4x1024xf32, #tpu.memory_space<vmem>>, vector<4x1024xf32>,
    return
  }
  func.func @transform_0(%arg0: i32) -> (i32, i32) {
    %c0_i32 = arith.constant 0 : i32
    %c0_i32_0 = arith.constant 0 : i32
    %c0_i32_1 = arith.constant 0 : i32
    return %c0_i32, %c0_i32_0 : i32, i32
  }
  func.func @transform_1(%arg0: i32) -> (i32, i32, i32) {
    %c0_i32 = arith.constant 0 : i32
    %c0_i32_0 = arith.constant 0 : i32
    %c0_i32_1 = arith.constant 0 : i32
    %c0_i32_2 = arith.constant 0 : i32
    return %c0_i32, %c0_i32_0, %c0_i32_1 : i32, i32, i32
  }
  func.func @transform_2(%arg0: i32) -> (i32, i32) {
    %c0_i32 = arith.constant 0 : i32
    %c0_i32_0 = arith.constant 0 : i32
    %c0_i32_1 = arith.constant 0 : i32
    return %c0_i32, %c0_i32_0 : i32, i32
  }
  func.func @transform_3(%arg0: i32) -> (i32, i32) {
    %c0_i32 = arith.constant 0 : i32
    %c0_i32_0 = arith.constant 0 : i32
    %c0_i32_1 = arith.constant 0 : i32
    return %c0_i32, %c0_i32_0 : i32, i32
  }
  func.func @transform_4(%arg0: i32) -> (i32, i32) {
    %c0_i32 = arith.constant 0 : i32
    %c0_i32_0 = arith.constant 0 : i32
    %c0_i32_1 = arith.constant 0 : i32
    return %c0_i32, %c0_i32_0 : i32, i32
  }
  func.func @transform_5(%arg0: i32) -> (i32, i32) {
    %c0_i32 = arith.constant 0 : i32
    %c0_i32_0 = arith.constant 0 : i32
    %c0_i32_1 = arith.constant 0 : i32
    return %c0_i32, %c0_i32_0 : i32, i32
  }
  func.func @transform_6(%arg0: i32) -> (i32, i32) {
    %c0_i32 = arith.constant 0 : i32
    %c0_i32_0 = arith.constant 0 : i32
    %c0_i32_1 = arith.constant 0 : i32
    return %c0_i32, %c0_i32_0 : i32, i32
  }
  func.func @transform_7(%arg0: i32) -> (i32, i32, i32) {
    %c0_i32 = arith.constant 0 : i32
    %c0_i32_0 = arith.constant 0 : i32
    %c0_i32_1 = arith.constant 0 : i32
    %c0_i32_2 = arith.constant 0 : i32
    return %c0_i32, %c0_i32_0, %c0_i32_1 : i32, i32, i32
  }
  func.func @transform_8(%arg0: i32) -> (i32, i32) {
    %c0_i32 = arith.constant 0 : i32
    %c0_i32_0 = arith.constant 0 : i32
    %c0_i32_1 = arith.constant 0 : i32
    return %c0_i32, %c0_i32_0 : i32, i32
  }
  func.func @transform_9(%arg0: i32) -> (i32, i32) {
    %c0_i32 = arith.constant 0 : i32
    %c0_i32_0 = arith.constant 0 : i32
    %c0_i32_1 = arith.constant 0 : i32
    return %c0_i32, %c0_i32_0 : i32, i32
  }
  func.func @transform_10(%arg0: i32) -> (i32, i32) {
    %c0_i32 = arith.constant 0 : i32
    %c0_i32_0 = arith.constant 0 : i32
    %c0_i32_1 = arith.constant 0 : i32
    return %c0_i32, %c0_i32_0 : i32, i32
  }
  func.func @transform_11(%arg0: i32) -> (i32, i32) {
    %c0_i32 = arith.constant 0 : i32
    %c0_i32_0 = arith.constant 0 : i32
    %c0_i32_1 = arith.constant 0 : i32
    return %c0_i32, %c0_i32_0 : i32, i32
  }
  func.func @transform_12(%arg0: i32) -> (i32, i32) {
    %c0_i32 = arith.constant 0 : i32
    %c0_i32_0 = arith.constant 0 : i32
    %c0_i32_1 = arith.constant 0 : i32
    return %c0_i32, %c0_i32_0 : i32, i32
  }
  func.func @transform_13(%arg0: i32) -> (i32, i32) {
    %c0_i32 = arith.constant 0 : i32
    %c0_i32_0 = arith.constant 0 : i32
    %c0_i32_1 = arith.constant 0 : i32
    return %c0_i32, %c0_i32_0 : i32, i32
  }
  func.func @transform_14(%arg0: i32) -> (i32, i32) {
    %c0_i32 = arith.constant 0 : i32
    %c0_i32_0 = arith.constant 0 : i32
    %c0_i32_1 = arith.constant 0 : i32
    return %c0_i32, %c0_i32_0 : i32, i32
  }
  func.func @transform_15(%arg0: i32) -> (i32, i32, i32) {
    %c0_i32 = arith.constant 0 : i32
    %c0_i32_0 = arith.constant 0 : i32
    %c0_i32_1 = arith.constant 0 : i32
    %c0_i32_2 = arith.constant 0 : i32
    return %c0_i32, %c0_i32_0, %c0_i32_1 : i32, i32, i32
  }
  func.func @transform_16(%arg0: i32) -> (i32, i32) {
    %c0_i32 = arith.constant 0 : i32
    %c0_i32_0 = arith.constant 0 : i32
    %c0_i32_1 = arith.constant 0 : i32
    return %c0_i32, %c0_i32_0 : i32, i32
  }
  func.func @transform_17(%arg0: i32) -> (i32, i32) {
    %c0_i32 = arith.constant 0 : i32
    %c0_i32_0 = arith.constant 0 : i32
    %c0_i32_1 = arith.constant 0 : i32
    return %c0_i32, %c0_i32_0 : i32, i32
  }
}

module attributes {stable_mosaic.version = 11 : i64} {
  func.func @_heads_kernel(%arg0: i32, %arg1: memref<4x1024xf32, #tpu.memory_space<vmem>>, %arg2: memref<4x1024xf32, #tpu.memory_space<vmem>>, %arg3: memref<512x256xf32, #tpu.memory_space<vmem>>, %arg4: memref<1x256xf32, #tpu.memory_space<vmem>>, %arg5: memref<1x256xf32, #tpu.memory_space<vmem>>, %arg6: memref<1x256xf32, #tpu.memory_space<vmem>>, %arg7: memref<512x256xf32, #tpu.memory_space<vmem>>, %arg8: memref<1x256xf32, #tpu.memory_space<vmem>>, %arg9: memref<1x256xf32, #tpu.memory_space<vmem>>, %arg10: memref<1x256xf32, #tpu.memory_space<vmem>>, %arg11: memref<1536x128xf32, #tpu.memory_space<vmem>>, %arg12: memref<1x128xf32, #tpu.memory_space<vmem>>, %arg13: memref<4x256xf32, #tpu.memory_space<vmem>>, %arg14: memref<4x256xf32, #tpu.memory_space<vmem>>, %arg15: memref<4x128xf32, #tpu.memory_space<vmem>>) attributes {dimension_semantics = [#tpu.dimension_semantics<arbitrary>], iteration_bounds = array<i64: 1>, scalar_prefetch = 0 : i64, scratch_operands = 0 : i64, tpu.core_type = #tpu.core_type<tc>, window_params = [{pipeline_mode = #tpu.pipeline_mode<synchronous>, transform_indices = @transform_0, window_bounds = array<i64: 4, 1024>}, {pipeline_mode = #tpu.pipeline_mode<synchronous>, transform_indices = @transform_1, window_bounds = array<i64: 4, 1024>}, {pipeline_mode = #tpu.pipeline_mode<synchronous>, transform_indices = @transform_2, window_bounds = array<i64: 512, 256>}, {pipeline_mode = #tpu.pipeline_mode<synchronous>, transform_indices = @transform_3, window_bounds = array<i64: 1, 256>}, {pipeline_mode = #tpu.pipeline_mode<synchronous>, transform_indices = @transform_4, window_bounds = array<i64: 1, 256>}, {pipeline_mode = #tpu.pipeline_mode<synchronous>, transform_indices = @transform_5, window_bounds = array<i64: 1, 256>}, {pipeline_mode = #tpu.pipeline_mode<synchronous>, transform_indices = @transform_6, window_bounds = array<i64: 512, 256>}, {pipeline_mode = #tpu.pipeline_mode<synchronous>, transform_indices = @transform_7, window_bounds = array<i64: 1, 256>}, {pipeline_mode = #tpu.pipeline_mode<synchronous>, transform_indices = @transform_8, window_bounds = array<i64: 1, 256>}, {pipeline_mode = #tpu.pipeline_mode<synchronous>, transform_indices = @transform_9, window_bounds = array<i64: 1, 256>}, {pipeline_mode = #tpu.pipeline_mode<synchronous>, transform_indices = @transform_10, window_bounds = array<i64: 1536, 128>}, {pipeline_mode = #tpu.pipeline_mode<synchronous>, transform_indices = @transform_11, window_bounds = array<i64: 1, 128>}, {pipeline_mode = #tpu.pipeline_mode<synchronous>, transform_indices = @transform_12, window_bounds = array<i64: 4, 256>}, {pipeline_mode = #tpu.pipeline_mode<synchronous>, transform_indices = @transform_13, window_bounds = array<i64: 4, 256>}, {pipeline_mode = #tpu.pipeline_mode<synchronous>, transform_indices = @transform_14, window_bounds = array<i64: 4, 128>}]} {
    %c0 = arith.constant 0 : index
    %c0_0 = arith.constant 0 : index
    %0 = vector.load %arg1[%c0, %c0_0] : memref<4x1024xf32, #tpu.memory_space<vmem>>, vector<4x1024xf32>
    %c0_1 = arith.constant 0 : index
    %c0_2 = arith.constant 0 : index
    %1 = vector.load %arg2[%c0_1, %c0_2] : memref<4x1024xf32, #tpu.memory_space<vmem>>, vector<4x1024xf32>
    %2 = vector.extract_strided_slice %0 {offsets = [0, 0], sizes = [4, 512], strides = [1, 1]} : vector<4x1024xf32> to vector<4x512xf32>
    %c0_3 = arith.constant 0 : index
    %c0_4 = arith.constant 0 : index
    %3 = vector.load %arg3[%c0_3, %c0_4] : memref<512x256xf32, #tpu.memory_space<vmem>>, vector<512x256xf32>
    %c0_5 = arith.constant 0 : index
    %c0_6 = arith.constant 0 : index
    %4 = vector.load %arg4[%c0_5, %c0_6] : memref<1x256xf32, #tpu.memory_space<vmem>>, vector<1x256xf32>
    %c0_7 = arith.constant 0 : index
    %c0_8 = arith.constant 0 : index
    %5 = vector.load %arg5[%c0_7, %c0_8] : memref<1x256xf32, #tpu.memory_space<vmem>>, vector<1x256xf32>
    %c0_9 = arith.constant 0 : index
    %c0_10 = arith.constant 0 : index
    %6 = vector.load %arg6[%c0_9, %c0_10] : memref<1x256xf32, #tpu.memory_space<vmem>>, vector<1x256xf32>
    %cst = arith.constant dense<0.000000e+00> : vector<4x256xf32>
    %7 = tpu.matmul %2, %3, %cst {dimension_numbers = #tpu.dot_dimension_numbers<[1], [0], [0], [1], [0, 0, 1, 1], [], []>} : vector<4x512xf32>, vector<512x256xf32>, vector<4x256xf32> -> vector<4x256xf32>
    %8 = vector.broadcast %4 : vector<1x256xf32> to vector<4x256xf32>
    %9 = arith.addf %7, %8 : vector<4x256xf32>
    %cst_11 = arith.constant dense<0.000000e+00> : vector<256xf32>
    %10 = vector.multi_reduction <add>, %9, %cst_11 [0] : vector<4x256xf32> to vector<256xf32>
    %11 = vector.shape_cast %10 : vector<256xf32> to vector<1x256xf32>
    %cst_12 = arith.constant 4.000000e+00 : f32
    %12 = vector.broadcast %cst_12 : f32 to vector<1x256xf32>
    %13 = arith.divf %11, %12 : vector<1x256xf32>
    %14 = vector.broadcast %13 : vector<1x256xf32> to vector<4x256xf32>
    %15 = arith.subf %9, %14 : vector<4x256xf32>
    %16 = arith.mulf %15, %15 : vector<4x256xf32>
    %cst_13 = arith.constant dense<0.000000e+00> : vector<256xf32>
    %17 = vector.multi_reduction <add>, %16, %cst_13 [0] : vector<4x256xf32> to vector<256xf32>
    %18 = vector.shape_cast %17 : vector<256xf32> to vector<1x256xf32>
    %cst_14 = arith.constant 4.000000e+00 : f32
    %19 = vector.broadcast %cst_14 : f32 to vector<1x256xf32>
    %20 = arith.divf %18, %19 : vector<1x256xf32>
    %21 = vector.broadcast %13 : vector<1x256xf32> to vector<4x256xf32>
    %22 = arith.subf %9, %21 : vector<4x256xf32>
    %cst_15 = arith.constant 9.99999974E-6 : f32
    %23 = vector.broadcast %cst_15 : f32 to vector<1x256xf32>
    %24 = arith.addf %20, %23 : vector<1x256xf32>
    %25 = math.rsqrt %24 : vector<1x256xf32>
    %26 = vector.broadcast %25 : vector<1x256xf32> to vector<4x256xf32>
    %27 = arith.mulf %22, %26 : vector<4x256xf32>
    %28 = vector.broadcast %5 : vector<1x256xf32> to vector<4x256xf32>
    %29 = arith.mulf %27, %28 : vector<4x256xf32>
    %30 = vector.broadcast %6 : vector<1x256xf32> to vector<4x256xf32>
    %31 = arith.addf %29, %30 : vector<4x256xf32>
    %cst_16 = arith.constant 0.000000e+00 : f32
    %32 = vector.broadcast %cst_16 : f32 to vector<4x256xf32>
    %33 = arith.maximumf %31, %32 : vector<4x256xf32>
    %34 = vector.extract_strided_slice %1 {offsets = [0, 0], sizes = [4, 512], strides = [1, 1]} : vector<4x1024xf32> to vector<4x512xf32>
    %c0_17 = arith.constant 0 : index
    %c0_18 = arith.constant 0 : index
    %35 = vector.load %arg7[%c0_17, %c0_18] : memref<512x256xf32, #tpu.memory_space<vmem>>, vector<512x256xf32>
    %c0_19 = arith.constant 0 : index
    %c0_20 = arith.constant 0 : index
    %36 = vector.load %arg8[%c0_19, %c0_20] : memref<1x256xf32, #tpu.memory_space<vmem>>, vector<1x256xf32>
    %c0_21 = arith.constant 0 : index
    %c0_22 = arith.constant 0 : index
    %37 = vector.load %arg9[%c0_21, %c0_22] : memref<1x256xf32, #tpu.memory_space<vmem>>, vector<1x256xf32>
    %c0_23 = arith.constant 0 : index
    %c0_24 = arith.constant 0 : index
    %38 = vector.load %arg10[%c0_23, %c0_24] : memref<1x256xf32, #tpu.memory_space<vmem>>, vector<1x256xf32>
    %cst_25 = arith.constant dense<0.000000e+00> : vector<4x256xf32>
    %39 = tpu.matmul %34, %35, %cst_25 {dimension_numbers = #tpu.dot_dimension_numbers<[1], [0], [0], [1], [0, 0, 1, 1], [], []>} : vector<4x512xf32>, vector<512x256xf32>, vector<4x256xf32> -> vector<4x256xf32>
    %40 = vector.broadcast %36 : vector<1x256xf32> to vector<4x256xf32>
    %41 = arith.addf %39, %40 : vector<4x256xf32>
    %cst_26 = arith.constant dense<0.000000e+00> : vector<256xf32>
    %42 = vector.multi_reduction <add>, %41, %cst_26 [0] : vector<4x256xf32> to vector<256xf32>
    %43 = vector.shape_cast %42 : vector<256xf32> to vector<1x256xf32>
    %cst_27 = arith.constant 4.000000e+00 : f32
    %44 = vector.broadcast %cst_27 : f32 to vector<1x256xf32>
    %45 = arith.divf %43, %44 : vector<1x256xf32>
    %46 = vector.broadcast %45 : vector<1x256xf32> to vector<4x256xf32>
    %47 = arith.subf %41, %46 : vector<4x256xf32>
    %48 = arith.mulf %47, %47 : vector<4x256xf32>
    %cst_28 = arith.constant dense<0.000000e+00> : vector<256xf32>
    %49 = vector.multi_reduction <add>, %48, %cst_28 [0] : vector<4x256xf32> to vector<256xf32>
    %50 = vector.shape_cast %49 : vector<256xf32> to vector<1x256xf32>
    %cst_29 = arith.constant 4.000000e+00 : f32
    %51 = vector.broadcast %cst_29 : f32 to vector<1x256xf32>
    %52 = arith.divf %50, %51 : vector<1x256xf32>
    %53 = vector.broadcast %45 : vector<1x256xf32> to vector<4x256xf32>
    %54 = arith.subf %41, %53 : vector<4x256xf32>
    %cst_30 = arith.constant 9.99999974E-6 : f32
    %55 = vector.broadcast %cst_30 : f32 to vector<1x256xf32>
    %56 = arith.addf %52, %55 : vector<1x256xf32>
    %57 = math.rsqrt %56 : vector<1x256xf32>
    %58 = vector.broadcast %57 : vector<1x256xf32> to vector<4x256xf32>
    %59 = arith.mulf %54, %58 : vector<4x256xf32>
    %60 = vector.broadcast %37 : vector<1x256xf32> to vector<4x256xf32>
    %61 = arith.mulf %59, %60 : vector<4x256xf32>
    %62 = vector.broadcast %38 : vector<1x256xf32> to vector<4x256xf32>
    %63 = arith.addf %61, %62 : vector<4x256xf32>
    %cst_31 = arith.constant 0.000000e+00 : f32
    %64 = vector.broadcast %cst_31 : f32 to vector<4x256xf32>
    %65 = arith.maximumf %63, %64 : vector<4x256xf32>
    %66 = vector.extract_strided_slice %0 {offsets = [0, 512], sizes = [4, 256], strides = [1, 1]} : vector<4x1024xf32> to vector<4x256xf32>
    %67 = vector.extract_strided_slice %0 {offsets = [0, 768], sizes = [4, 256], strides = [1, 1]} : vector<4x1024xf32> to vector<4x256xf32>
    %68 = vector.extract_strided_slice %1 {offsets = [0, 512], sizes = [4, 256], strides = [1, 1]} : vector<4x1024xf32> to vector<4x256xf32>
    %69 = vector.extract_strided_slice %1 {offsets = [0, 768], sizes = [4, 256], strides = [1, 1]} : vector<4x1024xf32> to vector<4x256xf32>
    %c0_32 = arith.constant 0 : index
    %c0_33 = arith.constant 0 : index
    %70 = vector.load %arg11[%c0_32, %c0_33] : memref<1536x128xf32, #tpu.memory_space<vmem>>, vector<256x128xf32>
    %cst_34 = arith.constant dense<0.000000e+00> : vector<4x128xf32>
    %71 = tpu.matmul %33, %70, %cst_34 {dimension_numbers = #tpu.dot_dimension_numbers<[1], [0], [0], [1], [0, 0, 1, 1], [], []>} : vector<4x256xf32>, vector<256x128xf32>, vector<4x128xf32> -> vector<4x128xf32>
    %c256 = arith.constant 256 : index
    %c0_35 = arith.constant 0 : index
    %72 = vector.load %arg11[%c256, %c0_35] : memref<1536x128xf32, #tpu.memory_space<vmem>>, vector<256x128xf32>
    %cst_36 = arith.constant dense<0.000000e+00> : vector<4x128xf32>
    %73 = tpu.matmul %65, %72, %cst_36 {dimension_numbers = #tpu.dot_dimension_numbers<[1], [0], [0], [1], [0, 0, 1, 1], [], []>} : vector<4x256xf32>, vector<256x128xf32>, vector<4x128xf32> -> vector<4x128xf32>
    %74 = arith.addf %71, %73 : vector<4x128xf32>
    %c512 = arith.constant 512 : index
    %c0_37 = arith.constant 0 : index
    %75 = vector.load %arg11[%c512, %c0_37] : memref<1536x128xf32, #tpu.memory_space<vmem>>, vector<256x128xf32>
    %cst_38 = arith.constant dense<0.000000e+00> : vector<4x128xf32>
    %76 = tpu.matmul %66, %75, %cst_38 {dimension_numbers = #tpu.dot_dimension_numbers<[1], [0], [0], [1], [0, 0, 1, 1], [], []>} : vector<4x256xf32>, vector<256x128xf32>, vector<4x128xf32> -> vector<4x128xf32>
    %77 = arith.addf %74, %76 : vector<4x128xf32>
    %c768 = arith.constant 768 : index
    %c0_39 = arith.constant 0 : index
    %78 = vector.load %arg11[%c768, %c0_39] : memref<1536x128xf32, #tpu.memory_space<vmem>>, vector<256x128xf32>
    %cst_40 = arith.constant dense<0.000000e+00> : vector<4x128xf32>
    %79 = tpu.matmul %67, %78, %cst_40 {dimension_numbers = #tpu.dot_dimension_numbers<[1], [0], [0], [1], [0, 0, 1, 1], [], []>} : vector<4x256xf32>, vector<256x128xf32>, vector<4x128xf32> -> vector<4x128xf32>
    %80 = arith.addf %77, %79 : vector<4x128xf32>
    %c1024 = arith.constant 1024 : index
    %c0_41 = arith.constant 0 : index
    %81 = vector.load %arg11[%c1024, %c0_41] : memref<1536x128xf32, #tpu.memory_space<vmem>>, vector<256x128xf32>
    %cst_42 = arith.constant dense<0.000000e+00> : vector<4x128xf32>
    %82 = tpu.matmul %68, %81, %cst_42 {dimension_numbers = #tpu.dot_dimension_numbers<[1], [0], [0], [1], [0, 0, 1, 1], [], []>} : vector<4x256xf32>, vector<256x128xf32>, vector<4x128xf32> -> vector<4x128xf32>
    %83 = arith.addf %80, %82 : vector<4x128xf32>
    %c1280 = arith.constant 1280 : index
    %c0_43 = arith.constant 0 : index
    %84 = vector.load %arg11[%c1280, %c0_43] : memref<1536x128xf32, #tpu.memory_space<vmem>>, vector<256x128xf32>
    %cst_44 = arith.constant dense<0.000000e+00> : vector<4x128xf32>
    %85 = tpu.matmul %69, %84, %cst_44 {dimension_numbers = #tpu.dot_dimension_numbers<[1], [0], [0], [1], [0, 0, 1, 1], [], []>} : vector<4x256xf32>, vector<256x128xf32>, vector<4x128xf32> -> vector<4x128xf32>
    %86 = arith.addf %83, %85 : vector<4x128xf32>
    %c0_45 = arith.constant 0 : index
    %c0_46 = arith.constant 0 : index
    %87 = vector.load %arg13[%c0_45, %c0_46] : memref<4x256xf32, #tpu.memory_space<vmem>>, vector<4x256xf32>
    tpu.vector_store %arg13[%c0_45, %c0_46], %33 {strides = array<i32>} : memref<4x256xf32, #tpu.memory_space<vmem>>, vector<4x256xf32>,
    %c0_47 = arith.constant 0 : index
    %c0_48 = arith.constant 0 : index
    %88 = vector.load %arg14[%c0_47, %c0_48] : memref<4x256xf32, #tpu.memory_space<vmem>>, vector<4x256xf32>
    tpu.vector_store %arg14[%c0_47, %c0_48], %65 {strides = array<i32>} : memref<4x256xf32, #tpu.memory_space<vmem>>, vector<4x256xf32>,
    %c0_49 = arith.constant 0 : index
    %c0_50 = arith.constant 0 : index
    %89 = vector.load %arg12[%c0_49, %c0_50] : memref<1x128xf32, #tpu.memory_space<vmem>>, vector<1x128xf32>
    %90 = vector.broadcast %89 : vector<1x128xf32> to vector<4x128xf32>
    %91 = arith.addf %86, %90 : vector<4x128xf32>
    %c0_51 = arith.constant 0 : index
    %c0_52 = arith.constant 0 : index
    %92 = vector.load %arg15[%c0_51, %c0_52] : memref<4x128xf32, #tpu.memory_space<vmem>>, vector<4x128xf32>
    tpu.vector_store %arg15[%c0_51, %c0_52], %91 {strides = array<i32>} : memref<4x128xf32, #tpu.memory_space<vmem>>, vector<4x128xf32>,
    return
  }
  func.func @transform_0(%arg0: i32) -> (i32, i32) {
    %c0_i32 = arith.constant 0 : i32
    %c0_i32_0 = arith.constant 0 : i32
    %c0_i32_1 = arith.constant 0 : i32
    return %c0_i32, %c0_i32_0 : i32, i32
  }
  func.func @transform_1(%arg0: i32) -> (i32, i32) {
    %c0_i32 = arith.constant 0 : i32
    %c0_i32_0 = arith.constant 0 : i32
    %c0_i32_1 = arith.constant 0 : i32
    return %c0_i32, %c0_i32_0 : i32, i32
  }
  func.func @transform_2(%arg0: i32) -> (i32, i32) {
    %c0_i32 = arith.constant 0 : i32
    %c0_i32_0 = arith.constant 0 : i32
    %c0_i32_1 = arith.constant 0 : i32
    return %c0_i32, %c0_i32_0 : i32, i32
  }
  func.func @transform_3(%arg0: i32) -> (i32, i32) {
    %c0_i32 = arith.constant 0 : i32
    %c0_i32_0 = arith.constant 0 : i32
    %c0_i32_1 = arith.constant 0 : i32
    return %c0_i32, %c0_i32_0 : i32, i32
  }
  func.func @transform_4(%arg0: i32) -> (i32, i32) {
    %c0_i32 = arith.constant 0 : i32
    %c0_i32_0 = arith.constant 0 : i32
    %c0_i32_1 = arith.constant 0 : i32
    return %c0_i32, %c0_i32_0 : i32, i32
  }
  func.func @transform_5(%arg0: i32) -> (i32, i32) {
    %c0_i32 = arith.constant 0 : i32
    %c0_i32_0 = arith.constant 0 : i32
    %c0_i32_1 = arith.constant 0 : i32
    return %c0_i32, %c0_i32_0 : i32, i32
  }
  func.func @transform_6(%arg0: i32) -> (i32, i32) {
    %c0_i32 = arith.constant 0 : i32
    %c0_i32_0 = arith.constant 0 : i32
    %c0_i32_1 = arith.constant 0 : i32
    return %c0_i32, %c0_i32_0 : i32, i32
  }
  func.func @transform_7(%arg0: i32) -> (i32, i32) {
    %c0_i32 = arith.constant 0 : i32
    %c0_i32_0 = arith.constant 0 : i32
    %c0_i32_1 = arith.constant 0 : i32
    return %c0_i32, %c0_i32_0 : i32, i32
  }
  func.func @transform_8(%arg0: i32) -> (i32, i32) {
    %c0_i32 = arith.constant 0 : i32
    %c0_i32_0 = arith.constant 0 : i32
    %c0_i32_1 = arith.constant 0 : i32
    return %c0_i32, %c0_i32_0 : i32, i32
  }
  func.func @transform_9(%arg0: i32) -> (i32, i32) {
    %c0_i32 = arith.constant 0 : i32
    %c0_i32_0 = arith.constant 0 : i32
    %c0_i32_1 = arith.constant 0 : i32
    return %c0_i32, %c0_i32_0 : i32, i32
  }
  func.func @transform_10(%arg0: i32) -> (i32, i32) {
    %c0_i32 = arith.constant 0 : i32
    %c0_i32_0 = arith.constant 0 : i32
    %c0_i32_1 = arith.constant 0 : i32
    return %c0_i32, %c0_i32_0 : i32, i32
  }
  func.func @transform_11(%arg0: i32) -> (i32, i32) {
    %c0_i32 = arith.constant 0 : i32
    %c0_i32_0 = arith.constant 0 : i32
    %c0_i32_1 = arith.constant 0 : i32
    return %c0_i32, %c0_i32_0 : i32, i32
  }
  func.func @transform_12(%arg0: i32) -> (i32, i32) {
    %c0_i32 = arith.constant 0 : i32
    %c0_i32_0 = arith.constant 0 : i32
    %c0_i32_1 = arith.constant 0 : i32
    return %c0_i32, %c0_i32_0 : i32, i32
  }
  func.func @transform_13(%arg0: i32) -> (i32, i32) {
    %c0_i32 = arith.constant 0 : i32
    %c0_i32_0 = arith.constant 0 : i32
    %c0_i32_1 = arith.constant 0 : i32
    return %c0_i32, %c0_i32_0 : i32, i32
  }
  func.func @transform_14(%arg0: i32) -> (i32, i32) {
    %c0_i32 = arith.constant 0 : i32
    %c0_i32_0 = arith.constant 0 : i32
    %c0_i32_1 = arith.constant 0 : i32
    return %c0_i32, %c0_i32_0 : i32, i32
  }
}

module attributes {stable_mosaic.version = 11 : i64} {
  func.func @_dual_lenet_kernel(%arg0: i32, %arg1: memref<84x40xf32, #tpu.memory_space<vmem>>, %arg2: memref<5x40x192xf32, #tpu.memory_space<vmem>>, %arg3: memref<1x192xf32, #tpu.memory_space<vmem>>, %arg4: memref<36x80xf32, #tpu.memory_space<vmem>>, %arg5: memref<36x80xf32, #tpu.memory_space<vmem>>, %arg6: memref<192x96xf32, #tpu.memory_space<vmem>>, %arg7: memref<192x96xf32, #tpu.memory_space<vmem>>, %arg8: memref<5x96x128xf32, #tpu.memory_space<vmem>>, %arg9: memref<1x128xf32, #tpu.memory_space<vmem>>, %arg10: memref<8x32xf32, #tpu.memory_space<vmem>>, %arg11: memref<8x32xf32, #tpu.memory_space<vmem>>, %arg12: memref<128x64xf32, #tpu.memory_space<vmem>>, %arg13: memref<128x64xf32, #tpu.memory_space<vmem>>, %arg14: memref<4x8xf32, #tpu.memory_space<vmem>>, %arg15: memref<4x8xf32, #tpu.memory_space<vmem>>, %arg16: memref<2x64x1024xf32, #tpu.memory_space<vmem>>, %arg17: memref<1x1024xf32, #tpu.memory_space<vmem>>, %arg18: memref<4x1024xf32, #tpu.memory_space<vmem>>, %arg19: memref<36x96xf32, #tpu.memory_space<vmem>>) attributes {dimension_semantics = [#tpu.dimension_semantics<arbitrary>], iteration_bounds = array<i64: 1>, scalar_prefetch = 0 : i64, scratch_operands = 1 : i64, tpu.core_type = #tpu.core_type<tc>, window_params = [{pipeline_mode = #tpu.pipeline_mode<synchronous>, transform_indices = @transform_0, window_bounds = array<i64: 84, 40>}, {pipeline_mode = #tpu.pipeline_mode<synchronous>, transform_indices = @transform_1, window_bounds = array<i64: 5, 40, 192>}, {pipeline_mode = #tpu.pipeline_mode<synchronous>, transform_indices = @transform_2, window_bounds = array<i64: 1, 192>}, {pipeline_mode = #tpu.pipeline_mode<synchronous>, transform_indices = @transform_3, window_bounds = array<i64: 36, 80>}, {pipeline_mode = #tpu.pipeline_mode<synchronous>, transform_indices = @transform_4, window_bounds = array<i64: 36, 80>}, {pipeline_mode = #tpu.pipeline_mode<synchronous>, transform_indices = @transform_5, window_bounds = array<i64: 192, 96>}, {pipeline_mode = #tpu.pipeline_mode<synchronous>, transform_indices = @transform_6, window_bounds = array<i64: 192, 96>}, {pipeline_mode = #tpu.pipeline_mode<synchronous>, transform_indices = @transform_7, window_bounds = array<i64: 5, 96, 128>}, {pipeline_mode = #tpu.pipeline_mode<synchronous>, transform_indices = @transform_8, window_bounds = array<i64: 1, 128>}, {pipeline_mode = #tpu.pipeline_mode<synchronous>, transform_indices = @transform_9, window_bounds = array<i64: 8, 32>}, {pipeline_mode = #tpu.pipeline_mode<synchronous>, transform_indices = @transform_10, window_bounds = array<i64: 8, 32>}, {pipeline_mode = #tpu.pipeline_mode<synchronous>, transform_indices = @transform_11, window_bounds = array<i64: 128, 64>}, {pipeline_mode = #tpu.pipeline_mode<synchronous>, transform_indices = @transform_12, window_bounds = array<i64: 128, 64>}, {pipeline_mode = #tpu.pipeline_mode<synchronous>, transform_indices = @transform_13, window_bounds = array<i64: 4, 8>}, {pipeline_mode = #tpu.pipeline_mode<synchronous>, transform_indices = @transform_14, window_bounds = array<i64: 4, 8>}, {pipeline_mode = #tpu.pipeline_mode<synchronous>, transform_indices = @transform_15, window_bounds = array<i64: 2, 64, 1024>}, {pipeline_mode = #tpu.pipeline_mode<synchronous>, transform_indices = @transform_16, window_bounds = array<i64: 1, 1024>}, {pipeline_mode = #tpu.pipeline_mode<synchronous>, transform_indices = @transform_17, window_bounds = array<i64: 4, 1024>}]} {
    %c0 = arith.constant 0 : index
    %c0_0 = arith.constant 0 : index
    %0 = vector.load %arg1[%c0, %c0_0] : memref<84x40xf32, #tpu.memory_space<vmem>>, vector<80x40xf32>
    %c0_1 = arith.constant 0 : index
    %c0_2 = arith.constant 0 : index
    %c0_3 = arith.constant 0 : index
    %1 = vector.load %arg2[%c0_1, %c0_2, %c0_3] : memref<5x40x192xf32, #tpu.memory_space<vmem>>, vector<1x40x192xf32>
    %2 = vector.shape_cast %1 : vector<1x40x192xf32> to vector<40x192xf32>
    %cst = arith.constant dense<0.000000e+00> : vector<80x192xf32>
    %3 = tpu.matmul %0, %2, %cst {dimension_numbers = #tpu.dot_dimension_numbers<[1], [0], [0], [1], [0, 0, 1, 1], [], []>} : vector<80x40xf32>, vector<40x192xf32>, vector<80x192xf32> -> vector<80x192xf32>
    %c1 = arith.constant 1 : index
    %c0_4 = arith.constant 0 : index
    %4 = vector.load %arg1[%c1, %c0_4] : memref<84x40xf32, #tpu.memory_space<vmem>>, vector<80x40xf32>
    %c1_5 = arith.constant 1 : index
    %c0_6 = arith.constant 0 : index
    %c0_7 = arith.constant 0 : index
    %5 = vector.load %arg2[%c1_5, %c0_6, %c0_7] : memref<5x40x192xf32, #tpu.memory_space<vmem>>, vector<1x40x192xf32>
    %6 = vector.shape_cast %5 : vector<1x40x192xf32> to vector<40x192xf32>
    %cst_8 = arith.constant dense<0.000000e+00> : vector<80x192xf32>
    %7 = tpu.matmul %4, %6, %cst_8 {dimension_numbers = #tpu.dot_dimension_numbers<[1], [0], [0], [1], [0, 0, 1, 1], [], []>} : vector<80x40xf32>, vector<40x192xf32>, vector<80x192xf32> -> vector<80x192xf32>
    %8 = arith.addf %3, %7 : vector<80x192xf32>
    %c2 = arith.constant 2 : index
    %c0_9 = arith.constant 0 : index
    %9 = vector.load %arg1[%c2, %c0_9] : memref<84x40xf32, #tpu.memory_space<vmem>>, vector<80x40xf32>
    %c2_10 = arith.constant 2 : index
    %c0_11 = arith.constant 0 : index
    %c0_12 = arith.constant 0 : index
    %10 = vector.load %arg2[%c2_10, %c0_11, %c0_12] : memref<5x40x192xf32, #tpu.memory_space<vmem>>, vector<1x40x192xf32>
    %11 = vector.shape_cast %10 : vector<1x40x192xf32> to vector<40x192xf32>
    %cst_13 = arith.constant dense<0.000000e+00> : vector<80x192xf32>
    %12 = tpu.matmul %9, %11, %cst_13 {dimension_numbers = #tpu.dot_dimension_numbers<[1], [0], [0], [1], [0, 0, 1, 1], [], []>} : vector<80x40xf32>, vector<40x192xf32>, vector<80x192xf32> -> vector<80x192xf32>
    %13 = arith.addf %8, %12 : vector<80x192xf32>
    %c3 = arith.constant 3 : index
    %c0_14 = arith.constant 0 : index
    %14 = vector.load %arg1[%c3, %c0_14] : memref<84x40xf32, #tpu.memory_space<vmem>>, vector<80x40xf32>
    %c3_15 = arith.constant 3 : index
    %c0_16 = arith.constant 0 : index
    %c0_17 = arith.constant 0 : index
    %15 = vector.load %arg2[%c3_15, %c0_16, %c0_17] : memref<5x40x192xf32, #tpu.memory_space<vmem>>, vector<1x40x192xf32>
    %16 = vector.shape_cast %15 : vector<1x40x192xf32> to vector<40x192xf32>
    %cst_18 = arith.constant dense<0.000000e+00> : vector<80x192xf32>
    %17 = tpu.matmul %14, %16, %cst_18 {dimension_numbers = #tpu.dot_dimension_numbers<[1], [0], [0], [1], [0, 0, 1, 1], [], []>} : vector<80x40xf32>, vector<40x192xf32>, vector<80x192xf32> -> vector<80x192xf32>
    %18 = arith.addf %13, %17 : vector<80x192xf32>
    %c4 = arith.constant 4 : index
    %c0_19 = arith.constant 0 : index
    %19 = vector.load %arg1[%c4, %c0_19] : memref<84x40xf32, #tpu.memory_space<vmem>>, vector<80x40xf32>
    %c4_20 = arith.constant 4 : index
    %c0_21 = arith.constant 0 : index
    %c0_22 = arith.constant 0 : index
    %20 = vector.load %arg2[%c4_20, %c0_21, %c0_22] : memref<5x40x192xf32, #tpu.memory_space<vmem>>, vector<1x40x192xf32>
    %21 = vector.shape_cast %20 : vector<1x40x192xf32> to vector<40x192xf32>
    %cst_23 = arith.constant dense<0.000000e+00> : vector<80x192xf32>
    %22 = tpu.matmul %19, %21, %cst_23 {dimension_numbers = #tpu.dot_dimension_numbers<[1], [0], [0], [1], [0, 0, 1, 1], [], []>} : vector<80x40xf32>, vector<40x192xf32>, vector<80x192xf32> -> vector<80x192xf32>
    %23 = arith.addf %18, %22 : vector<80x192xf32>
    %c0_24 = arith.constant 0 : index
    %c0_25 = arith.constant 0 : index
    %24 = vector.load %arg3[%c0_24, %c0_25] : memref<1x192xf32, #tpu.memory_space<vmem>>, vector<1x192xf32>
    %25 = vector.broadcast %24 : vector<1x192xf32> to vector<80x192xf32>
    %26 = arith.addf %23, %25 : vector<80x192xf32>
    %cst_26 = arith.constant 0.000000e+00 : f32
    %27 = vector.broadcast %cst_26 : f32 to vector<80x192xf32>
    %28 = arith.maximumf %26, %27 : vector<80x192xf32>
    %c0_27 = arith.constant 0 : index
    %c0_28 = arith.constant 0 : index
    %29 = vector.load %arg4[%c0_27, %c0_28] : memref<36x80xf32, #tpu.memory_space<vmem>>, vector<36x80xf32>
    %cst_29 = arith.constant dense<0.000000e+00> : vector<36x192xf32>
    %30 = tpu.matmul %29, %28, %cst_29 {dimension_numbers = #tpu.dot_dimension_numbers<[1], [0], [0], [1], [0, 0, 1, 1], [], []>} : vector<36x80xf32>, vector<80x192xf32>, vector<36x192xf32> -> vector<36x192xf32>
    %c0_30 = arith.constant 0 : index
    %c0_31 = arith.constant 0 : index
    %31 = vector.load %arg5[%c0_30, %c0_31] : memref<36x80xf32, #tpu.memory_space<vmem>>, vector<36x80xf32>
    %cst_32 = arith.constant dense<0.000000e+00> : vector<36x192xf32>
    %32 = tpu.matmul %31, %28, %cst_32 {dimension_numbers = #tpu.dot_dimension_numbers<[1], [0], [0], [1], [0, 0, 1, 1], [], []>} : vector<36x80xf32>, vector<80x192xf32>, vector<36x192xf32> -> vector<36x192xf32>
    %33 = arith.maximumf %30, %32 : vector<36x192xf32>
    %c0_33 = arith.constant 0 : index
    %c0_34 = arith.constant 0 : index
    %34 = vector.load %arg6[%c0_33, %c0_34] : memref<192x96xf32, #tpu.memory_space<vmem>>, vector<192x96xf32>
    %cst_35 = arith.constant dense<0.000000e+00> : vector<36x96xf32>
    %35 = tpu.matmul %33, %34, %cst_35 {dimension_numbers = #tpu.dot_dimension_numbers<[1], [0], [0], [1], [0, 0, 1, 1], [], []>} : vector<36x192xf32>, vector<192x96xf32>, vector<36x96xf32> -> vector<36x96xf32>
    %c0_36 = arith.constant 0 : index
    %c0_37 = arith.constant 0 : index
    %36 = vector.load %arg7[%c0_36, %c0_37] : memref<192x96xf32, #tpu.memory_space<vmem>>, vector<192x96xf32>
    %cst_38 = arith.constant dense<0.000000e+00> : vector<36x96xf32>
    %37 = tpu.matmul %33, %36, %cst_38 {dimension_numbers = #tpu.dot_dimension_numbers<[1], [0], [0], [1], [0, 0, 1, 1], [], []>} : vector<36x192xf32>, vector<192x96xf32>, vector<36x96xf32> -> vector<36x96xf32>
    %38 = arith.maximumf %35, %37 : vector<36x96xf32>
    %c0_39 = arith.constant 0 : index
    %c0_40 = arith.constant 0 : index
    %39 = vector.load %arg19[%c0_39, %c0_40] : memref<36x96xf32, #tpu.memory_space<vmem>>, vector<36x96xf32>
    tpu.vector_store %arg19[%c0_39, %c0_40], %38 {strides = array<i32>} : memref<36x96xf32, #tpu.memory_space<vmem>>, vector<36x96xf32>,
    %c0_41 = arith.constant 0 : index
    %c0_42 = arith.constant 0 : index
    %40 = vector.load %arg19[%c0_41, %c0_42] : memref<36x96xf32, #tpu.memory_space<vmem>>, vector<32x96xf32>
    %c0_43 = arith.constant 0 : index
    %c0_44 = arith.constant 0 : index
    %c0_45 = arith.constant 0 : index
    %41 = vector.load %arg8[%c0_43, %c0_44, %c0_45] : memref<5x96x128xf32, #tpu.memory_space<vmem>>, vector<1x96x128xf32>
    %42 = vector.shape_cast %41 : vector<1x96x128xf32> to vector<96x128xf32>
    %cst_46 = arith.constant dense<0.000000e+00> : vector<32x128xf32>
    %43 = tpu.matmul %40, %42, %cst_46 {dimension_numbers = #tpu.dot_dimension_numbers<[1], [0], [0], [1], [0, 0, 1, 1], [], []>} : vector<32x96xf32>, vector<96x128xf32>, vector<32x128xf32> -> vector<32x128xf32>
    %c1_47 = arith.constant 1 : index
    %c0_48 = arith.constant 0 : index
    %44 = vector.load %arg19[%c1_47, %c0_48] : memref<36x96xf32, #tpu.memory_space<vmem>>, vector<32x96xf32>
    %c1_49 = arith.constant 1 : index
    %c0_50 = arith.constant 0 : index
    %c0_51 = arith.constant 0 : index
    %45 = vector.load %arg8[%c1_49, %c0_50, %c0_51] : memref<5x96x128xf32, #tpu.memory_space<vmem>>, vector<1x96x128xf32>
    %46 = vector.shape_cast %45 : vector<1x96x128xf32> to vector<96x128xf32>
    %cst_52 = arith.constant dense<0.000000e+00> : vector<32x128xf32>
    %47 = tpu.matmul %44, %46, %cst_52 {dimension_numbers = #tpu.dot_dimension_numbers<[1], [0], [0], [1], [0, 0, 1, 1], [], []>} : vector<32x96xf32>, vector<96x128xf32>, vector<32x128xf32> -> vector<32x128xf32>
    %48 = arith.addf %43, %47 : vector<32x128xf32>
    %c2_53 = arith.constant 2 : index
    %c0_54 = arith.constant 0 : index
    %49 = vector.load %arg19[%c2_53, %c0_54] : memref<36x96xf32, #tpu.memory_space<vmem>>, vector<32x96xf32>
    %c2_55 = arith.constant 2 : index
    %c0_56 = arith.constant 0 : index
    %c0_57 = arith.constant 0 : index
    %50 = vector.load %arg8[%c2_55, %c0_56, %c0_57] : memref<5x96x128xf32, #tpu.memory_space<vmem>>, vector<1x96x128xf32>
    %51 = vector.shape_cast %50 : vector<1x96x128xf32> to vector<96x128xf32>
    %cst_58 = arith.constant dense<0.000000e+00> : vector<32x128xf32>
    %52 = tpu.matmul %49, %51, %cst_58 {dimension_numbers = #tpu.dot_dimension_numbers<[1], [0], [0], [1], [0, 0, 1, 1], [], []>} : vector<32x96xf32>, vector<96x128xf32>, vector<32x128xf32> -> vector<32x128xf32>
    %53 = arith.addf %48, %52 : vector<32x128xf32>
    %c3_59 = arith.constant 3 : index
    %c0_60 = arith.constant 0 : index
    %54 = vector.load %arg19[%c3_59, %c0_60] : memref<36x96xf32, #tpu.memory_space<vmem>>, vector<32x96xf32>
    %c3_61 = arith.constant 3 : index
    %c0_62 = arith.constant 0 : index
    %c0_63 = arith.constant 0 : index
    %55 = vector.load %arg8[%c3_61, %c0_62, %c0_63] : memref<5x96x128xf32, #tpu.memory_space<vmem>>, vector<1x96x128xf32>
    %56 = vector.shape_cast %55 : vector<1x96x128xf32> to vector<96x128xf32>
    %cst_64 = arith.constant dense<0.000000e+00> : vector<32x128xf32>
    %57 = tpu.matmul %54, %56, %cst_64 {dimension_numbers = #tpu.dot_dimension_numbers<[1], [0], [0], [1], [0, 0, 1, 1], [], []>} : vector<32x96xf32>, vector<96x128xf32>, vector<32x128xf32> -> vector<32x128xf32>
    %58 = arith.addf %53, %57 : vector<32x128xf32>
    %c4_65 = arith.constant 4 : index
    %c0_66 = arith.constant 0 : index
    %59 = vector.load %arg19[%c4_65, %c0_66] : memref<36x96xf32, #tpu.memory_space<vmem>>, vector<32x96xf32>
    %c4_67 = arith.constant 4 : index
    %c0_68 = arith.constant 0 : index
    %c0_69 = arith.constant 0 : index
    %60 = vector.load %arg8[%c4_67, %c0_68, %c0_69] : memref<5x96x128xf32, #tpu.memory_space<vmem>>, vector<1x96x128xf32>
    %61 = vector.shape_cast %60 : vector<1x96x128xf32> to vector<96x128xf32>
    %cst_70 = arith.constant dense<0.000000e+00> : vector<32x128xf32>
    %62 = tpu.matmul %59, %61, %cst_70 {dimension_numbers = #tpu.dot_dimension_numbers<[1], [0], [0], [1], [0, 0, 1, 1], [], []>} : vector<32x96xf32>, vector<96x128xf32>, vector<32x128xf32> -> vector<32x128xf32>
    %63 = arith.addf %58, %62 : vector<32x128xf32>
    %c0_71 = arith.constant 0 : index
    %c0_72 = arith.constant 0 : index
    %64 = vector.load %arg9[%c0_71, %c0_72] : memref<1x128xf32, #tpu.memory_space<vmem>>, vector<1x128xf32>
    %65 = vector.broadcast %64 : vector<1x128xf32> to vector<32x128xf32>
    %66 = arith.addf %63, %65 : vector<32x128xf32>
    %cst_73 = arith.constant 0.000000e+00 : f32
    %67 = vector.broadcast %cst_73 : f32 to vector<32x128xf32>
    %68 = arith.maximumf %66, %67 : vector<32x128xf32>
    %c0_74 = arith.constant 0 : index
    %c0_75 = arith.constant 0 : index
    %69 = vector.load %arg10[%c0_74, %c0_75] : memref<8x32xf32, #tpu.memory_space<vmem>>, vector<8x32xf32>
    %cst_76 = arith.constant dense<0.000000e+00> : vector<8x128xf32>
    %70 = tpu.matmul %69, %68, %cst_76 {dimension_numbers = #tpu.dot_dimension_numbers<[1], [0], [0], [1], [0, 0, 1, 1], [], []>} : vector<8x32xf32>, vector<32x128xf32>, vector<8x128xf32> -> vector<8x128xf32>
    %c0_77 = arith.constant 0 : index
    %c0_78 = arith.constant 0 : index
    %71 = vector.load %arg11[%c0_77, %c0_78] : memref<8x32xf32, #tpu.memory_space<vmem>>, vector<8x32xf32>
    %cst_79 = arith.constant dense<0.000000e+00> : vector<8x128xf32>
    %72 = tpu.matmul %71, %68, %cst_79 {dimension_numbers = #tpu.dot_dimension_numbers<[1], [0], [0], [1], [0, 0, 1, 1], [], []>} : vector<8x32xf32>, vector<32x128xf32>, vector<8x128xf32> -> vector<8x128xf32>
    %73 = arith.maximumf %70, %72 : vector<8x128xf32>
    %c0_80 = arith.constant 0 : index
    %c0_81 = arith.constant 0 : index
    %74 = vector.load %arg12[%c0_80, %c0_81] : memref<128x64xf32, #tpu.memory_space<vmem>>, vector<128x64xf32>
    %cst_82 = arith.constant dense<0.000000e+00> : vector<8x64xf32>
    %75 = tpu.matmul %73, %74, %cst_82 {dimension_numbers = #tpu.dot_dimension_numbers<[1], [0], [0], [1], [0, 0, 1, 1], [], []>} : vector<8x128xf32>, vector<128x64xf32>, vector<8x64xf32> -> vector<8x64xf32>
    %c0_83 = arith.constant 0 : index
    %c0_84 = arith.constant 0 : index
    %76 = vector.load %arg13[%c0_83, %c0_84] : memref<128x64xf32, #tpu.memory_space<vmem>>, vector<128x64xf32>
    %cst_85 = arith.constant dense<0.000000e+00> : vector<8x64xf32>
    %77 = tpu.matmul %73, %76, %cst_85 {dimension_numbers = #tpu.dot_dimension_numbers<[1], [0], [0], [1], [0, 0, 1, 1], [], []>} : vector<8x128xf32>, vector<128x64xf32>, vector<8x64xf32> -> vector<8x64xf32>
    %78 = arith.maximumf %75, %77 : vector<8x64xf32>
    %c0_86 = arith.constant 0 : index
    %c0_87 = arith.constant 0 : index
    %79 = vector.load %arg14[%c0_86, %c0_87] : memref<4x8xf32, #tpu.memory_space<vmem>>, vector<4x8xf32>
    %cst_88 = arith.constant dense<0.000000e+00> : vector<4x64xf32>
    %80 = tpu.matmul %79, %78, %cst_88 {dimension_numbers = #tpu.dot_dimension_numbers<[1], [0], [0], [1], [0, 0, 1, 1], [], []>} : vector<4x8xf32>, vector<8x64xf32>, vector<4x64xf32> -> vector<4x64xf32>
    %c0_89 = arith.constant 0 : index
    %c0_90 = arith.constant 0 : index
    %81 = vector.load %arg15[%c0_89, %c0_90] : memref<4x8xf32, #tpu.memory_space<vmem>>, vector<4x8xf32>
    %cst_91 = arith.constant dense<0.000000e+00> : vector<4x64xf32>
    %82 = tpu.matmul %81, %78, %cst_91 {dimension_numbers = #tpu.dot_dimension_numbers<[1], [0], [0], [1], [0, 0, 1, 1], [], []>} : vector<4x8xf32>, vector<8x64xf32>, vector<4x64xf32> -> vector<4x64xf32>
    %c0_92 = arith.constant 0 : index
    %c0_93 = arith.constant 0 : index
    %c0_94 = arith.constant 0 : index
    %83 = vector.load %arg16[%c0_92, %c0_93, %c0_94] : memref<2x64x1024xf32, #tpu.memory_space<vmem>>, vector<1x64x1024xf32>
    %84 = vector.shape_cast %83 : vector<1x64x1024xf32> to vector<64x1024xf32>
    %cst_95 = arith.constant dense<0.000000e+00> : vector<4x1024xf32>
    %85 = tpu.matmul %80, %84, %cst_95 {dimension_numbers = #tpu.dot_dimension_numbers<[1], [0], [0], [1], [0, 0, 1, 1], [], []>} : vector<4x64xf32>, vector<64x1024xf32>, vector<4x1024xf32> -> vector<4x1024xf32>
    %c1_96 = arith.constant 1 : index
    %c0_97 = arith.constant 0 : index
    %c0_98 = arith.constant 0 : index
    %86 = vector.load %arg16[%c1_96, %c0_97, %c0_98] : memref<2x64x1024xf32, #tpu.memory_space<vmem>>, vector<1x64x1024xf32>
    %87 = vector.shape_cast %86 : vector<1x64x1024xf32> to vector<64x1024xf32>
    %cst_99 = arith.constant dense<0.000000e+00> : vector<4x1024xf32>
    %88 = tpu.matmul %82, %87, %cst_99 {dimension_numbers = #tpu.dot_dimension_numbers<[1], [0], [0], [1], [0, 0, 1, 1], [], []>} : vector<4x64xf32>, vector<64x1024xf32>, vector<4x1024xf32> -> vector<4x1024xf32>
    %89 = arith.addf %85, %88 : vector<4x1024xf32>
    %c0_100 = arith.constant 0 : index
    %c0_101 = arith.constant 0 : index
    %90 = vector.load %arg17[%c0_100, %c0_101] : memref<1x1024xf32, #tpu.memory_space<vmem>>, vector<1x1024xf32>
    %91 = vector.broadcast %90 : vector<1x1024xf32> to vector<4x1024xf32>
    %92 = arith.addf %89, %91 : vector<4x1024xf32>
    %cst_102 = arith.constant 0.000000e+00 : f32
    %93 = vector.broadcast %cst_102 : f32 to vector<4x1024xf32>
    %94 = arith.maximumf %92, %93 : vector<4x1024xf32>
    %c0_103 = arith.constant 0 : index
    %c0_104 = arith.constant 0 : index
    %95 = vector.load %arg18[%c0_103, %c0_104] : memref<4x1024xf32, #tpu.memory_space<vmem>>, vector<4x1024xf32>
    tpu.vector_store %arg18[%c0_103, %c0_104], %94 {strides = array<i32>} : memref<4x1024xf32, #tpu.memory_space<vmem>>, vector<4x1024xf32>,
    return
  }
  func.func @transform_0(%arg0: i32) -> (i32, i32) {
    %c0_i32 = arith.constant 0 : i32
    %c0_i32_0 = arith.constant 0 : i32
    %c0_i32_1 = arith.constant 0 : i32
    return %c0_i32, %c0_i32_0 : i32, i32
  }
  func.func @transform_1(%arg0: i32) -> (i32, i32, i32) {
    %c0_i32 = arith.constant 0 : i32
    %c0_i32_0 = arith.constant 0 : i32
    %c0_i32_1 = arith.constant 0 : i32
    %c0_i32_2 = arith.constant 0 : i32
    return %c0_i32, %c0_i32_0, %c0_i32_1 : i32, i32, i32
  }
  func.func @transform_2(%arg0: i32) -> (i32, i32) {
    %c0_i32 = arith.constant 0 : i32
    %c0_i32_0 = arith.constant 0 : i32
    %c0_i32_1 = arith.constant 0 : i32
    return %c0_i32, %c0_i32_0 : i32, i32
  }
  func.func @transform_3(%arg0: i32) -> (i32, i32) {
    %c0_i32 = arith.constant 0 : i32
    %c0_i32_0 = arith.constant 0 : i32
    %c0_i32_1 = arith.constant 0 : i32
    return %c0_i32, %c0_i32_0 : i32, i32
  }
  func.func @transform_4(%arg0: i32) -> (i32, i32) {
    %c0_i32 = arith.constant 0 : i32
    %c0_i32_0 = arith.constant 0 : i32
    %c0_i32_1 = arith.constant 0 : i32
    return %c0_i32, %c0_i32_0 : i32, i32
  }
  func.func @transform_5(%arg0: i32) -> (i32, i32) {
    %c0_i32 = arith.constant 0 : i32
    %c0_i32_0 = arith.constant 0 : i32
    %c0_i32_1 = arith.constant 0 : i32
    return %c0_i32, %c0_i32_0 : i32, i32
  }
  func.func @transform_6(%arg0: i32) -> (i32, i32) {
    %c0_i32 = arith.constant 0 : i32
    %c0_i32_0 = arith.constant 0 : i32
    %c0_i32_1 = arith.constant 0 : i32
    return %c0_i32, %c0_i32_0 : i32, i32
  }
  func.func @transform_7(%arg0: i32) -> (i32, i32, i32) {
    %c0_i32 = arith.constant 0 : i32
    %c0_i32_0 = arith.constant 0 : i32
    %c0_i32_1 = arith.constant 0 : i32
    %c0_i32_2 = arith.constant 0 : i32
    return %c0_i32, %c0_i32_0, %c0_i32_1 : i32, i32, i32
  }
  func.func @transform_8(%arg0: i32) -> (i32, i32) {
    %c0_i32 = arith.constant 0 : i32
    %c0_i32_0 = arith.constant 0 : i32
    %c0_i32_1 = arith.constant 0 : i32
    return %c0_i32, %c0_i32_0 : i32, i32
  }
  func.func @transform_9(%arg0: i32) -> (i32, i32) {
    %c0_i32 = arith.constant 0 : i32
    %c0_i32_0 = arith.constant 0 : i32
    %c0_i32_1 = arith.constant 0 : i32
    return %c0_i32, %c0_i32_0 : i32, i32
  }
  func.func @transform_10(%arg0: i32) -> (i32, i32) {
    %c0_i32 = arith.constant 0 : i32
    %c0_i32_0 = arith.constant 0 : i32
    %c0_i32_1 = arith.constant 0 : i32
    return %c0_i32, %c0_i32_0 : i32, i32
  }
  func.func @transform_11(%arg0: i32) -> (i32, i32) {
    %c0_i32 = arith.constant 0 : i32
    %c0_i32_0 = arith.constant 0 : i32
    %c0_i32_1 = arith.constant 0 : i32
    return %c0_i32, %c0_i32_0 : i32, i32
  }
  func.func @transform_12(%arg0: i32) -> (i32, i32) {
    %c0_i32 = arith.constant 0 : i32
    %c0_i32_0 = arith.constant 0 : i32
    %c0_i32_1 = arith.constant 0 : i32
    return %c0_i32, %c0_i32_0 : i32, i32
  }
  func.func @transform_13(%arg0: i32) -> (i32, i32) {
    %c0_i32 = arith.constant 0 : i32
    %c0_i32_0 = arith.constant 0 : i32
    %c0_i32_1 = arith.constant 0 : i32
    return %c0_i32, %c0_i32_0 : i32, i32
  }
  func.func @transform_14(%arg0: i32) -> (i32, i32) {
    %c0_i32 = arith.constant 0 : i32
    %c0_i32_0 = arith.constant 0 : i32
    %c0_i32_1 = arith.constant 0 : i32
    return %c0_i32, %c0_i32_0 : i32, i32
  }
  func.func @transform_15(%arg0: i32) -> (i32, i32, i32) {
    %c0_i32 = arith.constant 0 : i32
    %c0_i32_0 = arith.constant 0 : i32
    %c0_i32_1 = arith.constant 0 : i32
    %c0_i32_2 = arith.constant 0 : i32
    return %c0_i32, %c0_i32_0, %c0_i32_1 : i32, i32, i32
  }
  func.func @transform_16(%arg0: i32) -> (i32, i32) {
    %c0_i32 = arith.constant 0 : i32
    %c0_i32_0 = arith.constant 0 : i32
    %c0_i32_1 = arith.constant 0 : i32
    return %c0_i32, %c0_i32_0 : i32, i32
  }
  func.func @transform_17(%arg0: i32) -> (i32, i32) {
    %c0_i32 = arith.constant 0 : i32
    %c0_i32_0 = arith.constant 0 : i32
    %c0_i32_1 = arith.constant 0 : i32
    return %c0_i32, %c0_i32_0 : i32, i32
  }
}

</mosaic_0001>

<bundles_post_ra>
// kernel: discomkd_forward.5
= control target key start
LH: loop header
LB: loop body
LE: loop exit
PB: predicated region body
PF: predicated region fallthrough
CT: control target
= control target key end

     0   :  { %20 = vsyncpa [#allocation3], 0  ;;  %s3257_s0 = inlined_call_operand.vmem [shape: f32[4,1024], index: 0, kind: input, shape index: {}]   ;;  %s3258_s1 = inlined_call_operand.vmem [shape: f32[4,1024], index: 1, kind: input, shape index: {}]   ;;  %s3259_s2 = inlined_call_operand.vmem [shape: f32[512,256], index: 2, kind: input, shape index: {}]   ;;  %s3260_s3 = inlined_call_operand.vmem [shape: f32[1,256], index: 3, kind: input, shape index: {}]   ;;  %s3261_s4 = inlined_call_operand.vmem [shape: f32[1,256], index: 4, kind: input, shape index: {}]   ;;  %s3262_s5 = inlined_call_operand.vmem [shape: f32[1,256], index: 5, kind: input, shape index: {}]   ;;  %s3263_s6 = inlined_call_operand.vmem [shape: f32[512,256], index: 6, kind: input, shape index: {}]   ;;  %s3264_s7 = inlined_call_operand.vmem [shape: f32[1,256], index: 7, kind: input, shape index: {}]   ;;  %s3265_s8 = inlined_call_operand.vmem [shape: f32[1,256], index: 8, kind: input, shape index: {}]   ;;  %s3266_s9 = inlined_call_operand.vmem [shape: f32[1,256], index: 9, kind: input, shape index: {}]   ;;  %s3267_s10 = inlined_call_operand.vmem [shape: f32[1536,128], index: 10, kind: input, shape index: {}]   ;;  %s3268_s11 = inlined_call_operand.vmem [shape: f32[1,128], index: 11, kind: input, shape index: {}]   ;;  %s3269_s12 = inlined_call_operand.hbm [shape: f32[4,256], index: 12, kind: output, shape index: {0}]   ;;  %s3270_s13 = inlined_call_operand.hbm [shape: f32[4,256], index: 13, kind: output, shape index: {1}]   ;;  %s3271_s14 = inlined_call_operand.vmem [shape: f32[4,128], index: 14, kind: output, shape index: {2}]  }
   0x1   :  { %v85_v0 = vld [vmem:[%s3259_s2 + $0xf8] sm:$0xff]  ;;  %v84_v2 = vld [vmem:[%s3259_s2 + $0xf0] sm:$0xff]  ;;  %v83_v4 = vld [vmem:[%s3259_s2 + $0xe8] sm:$0xff] }
   0x2   :  { %v149_v1 = vld [vmem:[%s3259_s2 + $0x2f8] sm:$0xff]  ;;  %202 = vmatprep.subr.mxu0 %v85_v0  ;;  %v148_v3 = vld [vmem:[%s3259_s2 + $0x2f0] sm:$0xff]  ;;  %v147_v5 = vld [vmem:[%s3259_s2 + $0x2e8] sm:$0xff] }
   0x3   :  { %273 = vmatprep.subr.mxu1 %v149_v1  ;;  %203 = vmatpush1.msra.mxu0 %v84_v2  ;;  %v82_v6 = vld [vmem:[%s3259_s2 + $0xe0] sm:$0xff]  ;;  %v81_v8 = vld [vmem:[%s3259_s2 + $0xd8] sm:$0xff]  ;;  %v80_v10 = vld [vmem:[%s3259_s2 + $0xd0] sm:$0xff] }
   0x4   :  { %274 = vmatpush1.msra.mxu1 %v148_v3  ;;  %v146_v7 = vld [vmem:[%s3259_s2 + $0x2e0] sm:$0xff]  ;;  %204 = vmatprep.subr.mxu0 %v83_v4  ;;  %v145_v9 = vld [vmem:[%s3259_s2 + $0x2d8] sm:$0xff]  ;;  %v144_v11 = vld [vmem:[%s3259_s2 + $0x2d0] sm:$0xff] }
   0x5   :  { %275 = vmatprep.subr.mxu1 %v147_v5  ;;  %205 = vmatpush1.msra.mxu0 %v82_v6  ;;  %v79_v12 = vld [vmem:[%s3259_s2 + $0xc8] sm:$0xff]  ;;  %v78_v14 = vld [vmem:[%s3259_s2 + $0xc0] sm:$0xff]  ;;  %v77_v16 = vld [vmem:[%s3259_s2 + $0xb8] sm:$0xff] }
   0x6   :  { %276 = vmatpush1.msra.mxu1 %v146_v7  ;;  %v143_v13 = vld [vmem:[%s3259_s2 + $0x2c8] sm:$0xff]  ;;  %206 = vmatprep.subr.mxu0 %v81_v8  ;;  %v142_v15 = vld [vmem:[%s3259_s2 + $0x2c0] sm:$0xff]  ;;  %v141_v17 = vld [vmem:[%s3259_s2 + $0x2b8] sm:$0xff] }
   0x7   :  { %277 = vmatprep.subr.mxu1 %v145_v9  ;;  %207 = vmatpush1.msra.mxu0 %v80_v10  ;;  %v76_v18 = vld [vmem:[%s3259_s2 + $0xb0] sm:$0xff]  ;;  %v75_v20 = vld [vmem:[%s3259_s2 + $0xa8] sm:$0xff]  ;;  %v74_v22 = vld [vmem:[%s3259_s2 + $0xa0] sm:$0xff] }
   0x8   :  { %278 = vmatpush1.msra.mxu1 %v144_v11  ;;  %208 = vmatprep.subr.mxu0 %v79_v12  ;;  %v140_v19 = vld [vmem:[%s3259_s2 + $0x2b0] sm:$0xff]  ;;  %v139_v21 = vld [vmem:[%s3259_s2 + $0x2a8] sm:$0xff]  ;;  %v138_v23 = vld [vmem:[%s3259_s2 + $0x2a0] sm:$0xff] }
   0x9   :  { %279 = vmatprep.subr.mxu1 %v143_v13  ;;  %209 = vmatpush1.msra.mxu0 %v78_v14  ;;  %v73_v24 = vld [vmem:[%s3259_s2 + $0x98] sm:$0xff]  ;;  %v72_v26 = vld [vmem:[%s3259_s2 + $0x90] sm:$0xff]  ;;  %v71_v28 = vld [vmem:[%s3259_s2 + $0x88] sm:$0xff] }
   0xa   :  { %280 = vmatpush1.msra.mxu1 %v142_v15  ;;  %210 = vmatprep.subr.mxu0 %v77_v16  ;;  %v137_v25 = vld [vmem:[%s3259_s2 + $0x298] sm:$0xff]  ;;  %v136_v27 = vld [vmem:[%s3259_s2 + $0x290] sm:$0xff]  ;;  %v135_v29 = vld [vmem:[%s3259_s2 + $0x288] sm:$0xff] }
   0xb   :  { %281 = vmatprep.subr.mxu1 %v141_v17  ;;  %211 = vmatpush1.msra.mxu0 %v76_v18  ;;  %v70_v30 = vld [vmem:[%s3259_s2 + $0x80] sm:$0xff]  ;;  %v69_v32 = vld [vmem:[%s3259_s2 + $0x78] sm:$0xff]  ;;  %v68_v34 = vld [vmem:[%s3259_s2 + $0x70] sm:$0xff] }
   0xc   :  { %282 = vmatpush1.msra.mxu1 %v140_v19  ;;  %212 = vmatprep.subr.mxu0 %v75_v20  ;;  %v134_v31 = vld [vmem:[%s3259_s2 + $0x280] sm:$0xff]  ;;  %v133_v33 = vld [vmem:[%s3259_s2 + $0x278] sm:$0xff]  ;;  %v132_v35 = vld [vmem:[%s3259_s2 + $0x270] sm:$0xff] }
   0xd   :  { %283 = vmatprep.subr.mxu1 %v139_v21  ;;  %213 = vmatpush1.msra.mxu0 %v74_v22  ;;  %v67_v36 = vld [vmem:[%s3259_s2 + $0x68] sm:$0xff]  ;;  %v66_v38 = vld [vmem:[%s3259_s2 + $0x60] sm:$0xff]  ;;  %v65_v40 = vld [vmem:[%s3259_s2 + $0x58] sm:$0xff] }
   0xe   :  { %284 = vmatpush1.msra.mxu1 %v138_v23  ;;  %214 = vmatprep.subr.mxu0 %v73_v24  ;;  %v131_v37 = vld [vmem:[%s3259_s2 + $0x268] sm:$0xff]  ;;  %v130_v39 = vld [vmem:[%s3259_s2 + $0x260] sm:$0xff]  ;;  %v129_v41 = vld [vmem:[%s3259_s2 + $0x258] sm:$0xff] }
   0xf   :  { %285 = vmatprep.subr.mxu1 %v137_v25  ;;  %215 = vmatpush1.msra.mxu0 %v72_v26  ;;  %v64_v42 = vld [vmem:[%s3259_s2 + $0x50] sm:$0xff]  ;;  %v63_v44 = vld [vmem:[%s3259_s2 + $0x48] sm:$0xff]  ;;  %v62_v46 = vld [vmem:[%s3259_s2 + $0x40] sm:$0xff] }
  0x10   :  { %286 = vmatpush1.msra.mxu1 %v136_v27  ;;  %216 = vmatprep.subr.mxu0 %v71_v28  ;;  %v128_v43 = vld [vmem:[%s3259_s2 + $0x250] sm:$0xff]  ;;  %v127_v45 = vld [vmem:[%s3259_s2 + $0x248] sm:$0xff]  ;;  %v126_v47 = vld [vmem:[%s3259_s2 + $0x240] sm:$0xff] }
  0x11   :  { %287 = vmatprep.subr.mxu1 %v135_v29  ;;  %217 = vmatpush1.msra.mxu0 %v70_v30  ;;  %v61_v48 = vld [vmem:[%s3259_s2 + $0x38] sm:$0xff]  ;;  %v60_v50 = vld [vmem:[%s3259_s2 + $0x30] sm:$0xff]  ;;  %v59_v52 = vld [vmem:[%s3259_s2 + $0x28] sm:$0xff] }
  0x12   :  { %288 = vmatpush1.msra.mxu1 %v134_v31  ;;  %218 = vmatprep.subr.mxu0 %v69_v32  ;;  %v125_v49 = vld [vmem:[%s3259_s2 + $0x238] sm:$0xff]  ;;  %v124_v51 = vld [vmem:[%s3259_s2 + $0x230] sm:$0xff]  ;;  %v123_v53 = vld [vmem:[%s3259_s2 + $0x228] sm:$0xff] }
  0x13   :  { %289 = vmatprep.subr.mxu1 %v133_v33  ;;  %219 = vmatpush1.msra.mxu0 %v68_v34  ;;  %v58_v54 = vld [vmem:[%s3259_s2 + $0x20] sm:$0xff]  ;;  %v57_v56 = vld [vmem:[%s3259_s2 + $0x18] sm:$0xff]  ;;  %v56_v58 = vld [vmem:[%s3259_s2 + $0x10] sm:$0xff] }
  0x14   :  { %290 = vmatpush1.msra.mxu1 %v132_v35  ;;  %220 = vmatprep.subr.mxu0 %v67_v36  ;;  %v122_v55 = vld [vmem:[%s3259_s2 + $0x220] sm:$0xff]  ;;  %v121_v57 = vld [vmem:[%s3259_s2 + $0x218] sm:$0xff]  ;;  %v120_v59 = vld [vmem:[%s3259_s2 + $0x210] sm:$0xff] }
  0x15   :  { %291 = vmatprep.subr.mxu1 %v131_v37  ;;  %221 = vmatpush1.msra.mxu0 %v66_v38  ;;  %v55_v60 = vld [vmem:[%s3259_s2 + $0x8] sm:$0xff]  ;;  %v54_v62 = vld [vmem:[%s3259_s2] sm:$0xff]  ;;  %v117_v0 = vld [vmem:[%s3259_s2 + $0x1f8] sm:$0xff] }
  0x16   :  { %292 = vmatpush1.msra.mxu1 %v130_v39  ;;  %222 = vmatprep.subr.mxu0 %v65_v40  ;;  %v119_v61 = vld [vmem:[%s3259_s2 + $0x208] sm:$0xff]  ;;  %v118_v63 = vld [vmem:[%s3259_s2 + $0x200] sm:$0xff]  ;;  %v181_v1 = vld [vmem:[%s3259_s2 + $0x3f8] sm:$0xff] }
  0x17   :  { %293 = vmatprep.subr.mxu1 %v129_v41  ;;  %223 = vmatpush1.msra.mxu0 %v64_v42  ;;  %v116_v2 = vld [vmem:[%s3259_s2 + $0x1f0] sm:$0xff]  ;;  %v115_v4 = vld [vmem:[%s3259_s2 + $0x1e8] sm:$0xff]  ;;  %v114_v6 = vld [vmem:[%s3259_s2 + $0x1e0] sm:$0xff] }
  0x18   :  { %294 = vmatpush1.msra.mxu1 %v128_v43  ;;  %224 = vmatprep.subr.mxu0 %v63_v44  ;;  %v180_v3 = vld [vmem:[%s3259_s2 + $0x3f0] sm:$0xff]  ;;  %v179_v5 = vld [vmem:[%s3259_s2 + $0x3e8] sm:$0xff]  ;;  %v178_v7 = vld [vmem:[%s3259_s2 + $0x3e0] sm:$0xff] }
  0x19   :  { %295 = vmatprep.subr.mxu1 %v127_v45  ;;  %225 = vmatpush1.msra.mxu0 %v62_v46  ;;  %v113_v8 = vld [vmem:[%s3259_s2 + $0x1d8] sm:$0xff]  ;;  %v112_v10 = vld [vmem:[%s3259_s2 + $0x1d0] sm:$0xff]  ;;  %v111_v12 = vld [vmem:[%s3259_s2 + $0x1c8] sm:$0xff] }
  0x1a   :  { %296 = vmatpush1.msra.mxu1 %v126_v47  ;;  %226 = vmatprep.subr.mxu0 %v61_v48  ;;  %v177_v9 = vld [vmem:[%s3259_s2 + $0x3d8] sm:$0xff]  ;;  %v176_v11 = vld [vmem:[%s3259_s2 + $0x3d0] sm:$0xff]  ;;  %v175_v13 = vld [vmem:[%s3259_s2 + $0x3c8] sm:$0xff] }
  0x1b   :  { %297 = vmatprep.subr.mxu1 %v125_v49  ;;  %227 = vmatpush1.msra.mxu0 %v60_v50  ;;  %v110_v14 = vld [vmem:[%s3259_s2 + $0x1c0] sm:$0xff]  ;;  %v109_v16 = vld [vmem:[%s3259_s2 + $0x1b8] sm:$0xff]  ;;  %v108_v18 = vld [vmem:[%s3259_s2 + $0x1b0] sm:$0xff] }
  0x1c   :  { %298 = vmatpush1.msra.mxu1 %v124_v51  ;;  %228 = vmatprep.subr.mxu0 %v59_v52  ;;  %v174_v15 = vld [vmem:[%s3259_s2 + $0x3c0] sm:$0xff]  ;;  %v173_v17 = vld [vmem:[%s3259_s2 + $0x3b8] sm:$0xff]  ;;  %v172_v19 = vld [vmem:[%s3259_s2 + $0x3b0] sm:$0xff] }
  0x1d   :  { %299 = vmatprep.subr.mxu1 %v123_v53  ;;  %229 = vmatpush1.msra.mxu0 %v58_v54  ;;  %v107_v20 = vld [vmem:[%s3259_s2 + $0x1a8] sm:$0xff]  ;;  %v106_v22 = vld [vmem:[%s3259_s2 + $0x1a0] sm:$0xff]  ;;  %v105_v24 = vld [vmem:[%s3259_s2 + $0x198] sm:$0xff] }
  0x1e   :  { %300 = vmatpush1.msra.mxu1 %v122_v55  ;;  %230 = vmatprep.subr.mxu0 %v57_v56  ;;  %v171_v21 = vld [vmem:[%s3259_s2 + $0x3a8] sm:$0xff]  ;;  %v170_v23 = vld [vmem:[%s3259_s2 + $0x3a0] sm:$0xff]  ;;  %v169_v25 = vld [vmem:[%s3259_s2 + $0x398] sm:$0xff] }
  0x1f   :  { %301 = vmatprep.subr.mxu1 %v121_v57  ;;  %231 = vmatpush1.msra.mxu0 %v56_v58  ;;  %v104_v26 = vld [vmem:[%s3259_s2 + $0x190] sm:$0xff]  ;;  %v103_v28 = vld [vmem:[%s3259_s2 + $0x188] sm:$0xff]  ;;  %v102_v30 = vld [vmem:[%s3259_s2 + $0x180] sm:$0xff] }
  0x20   :  { %302 = vmatpush1.msra.mxu1 %v120_v59  ;;  %232 = vmatprep.subr.mxu0 %v55_v60  ;;  %v168_v27 = vld [vmem:[%s3259_s2 + $0x390] sm:$0xff]  ;;  %v167_v29 = vld [vmem:[%s3259_s2 + $0x388] sm:$0xff]  ;;  %v166_v31 = vld [vmem:[%s3259_s2 + $0x380] sm:$0xff] }
  0x21   :  { %303 = vmatprep.subr.mxu1 %v119_v61  ;;  %233 = vmatpush1.msra.mxu0 %v54_v62  ;;  %v101_v32 = vld [vmem:[%s3259_s2 + $0x178] sm:$0xff]  ;;  %v100_v34 = vld [vmem:[%s3259_s2 + $0x170] sm:$0xff]  ;;  %v99_v36 = vld [vmem:[%s3259_s2 + $0x168] sm:$0xff] }
  0x22   :  { %304 = vmatpush1.msra.mxu1 %v118_v63  ;;  %234 = vmatprep.subr.mxu0 %v117_v0  ;;  %v165_v33 = vld [vmem:[%s3259_s2 + $0x378] sm:$0xff]  ;;  %v164_v35 = vld [vmem:[%s3259_s2 + $0x370] sm:$0xff]  ;;  %v163_v37 = vld [vmem:[%s3259_s2 + $0x368] sm:$0xff] }
  0x23   :  { %305 = vmatprep.subr.mxu1 %v181_v1  ;;  %235 = vmatpush2.msra.mxu0 %v116_v2  ;;  %v98_v38 = vld [vmem:[%s3259_s2 + $0x160] sm:$0xff]  ;;  %v97_v40 = vld [vmem:[%s3259_s2 + $0x158] sm:$0xff]  ;;  %v96_v42 = vld [vmem:[%s3259_s2 + $0x150] sm:$0xff] }
  0x24   :  { %306 = vmatpush2.msra.mxu1 %v180_v3  ;;  %236 = vmatprep.subr.mxu0 %v115_v4  ;;  %v162_v39 = vld [vmem:[%s3259_s2 + $0x360] sm:$0xff]  ;;  %v161_v41 = vld [vmem:[%s3259_s2 + $0x358] sm:$0xff]  ;;  %v160_v43 = vld [vmem:[%s3259_s2 + $0x350] sm:$0xff] }
  0x25   :  { %307 = vmatprep.subr.mxu1 %v179_v5  ;;  %237 = vmatpush2.msra.mxu0 %v114_v6  ;;  %v95_v44 = vld [vmem:[%s3259_s2 + $0x148] sm:$0xff]  ;;  %v94_v46 = vld [vmem:[%s3259_s2 + $0x140] sm:$0xff]  ;;  %v93_v48 = vld [vmem:[%s3259_s2 + $0x138] sm:$0xff] }
  0x26   :  { %308 = vmatpush2.msra.mxu1 %v178_v7  ;;  %238 = vmatprep.subr.mxu0 %v113_v8  ;;  %v159_v45 = vld [vmem:[%s3259_s2 + $0x348] sm:$0xff]  ;;  %v158_v47 = vld [vmem:[%s3259_s2 + $0x340] sm:$0xff]  ;;  %v157_v49 = vld [vmem:[%s3259_s2 + $0x338] sm:$0xff] }
  0x27   :  { %309 = vmatprep.subr.mxu1 %v177_v9  ;;  %239 = vmatpush2.msra.mxu0 %v112_v10  ;;  %v92_v50 = vld [vmem:[%s3259_s2 + $0x130] sm:$0xff]  ;;  %v91_v52 = vld [vmem:[%s3259_s2 + $0x128] sm:$0xff]  ;;  %v90_v54 = vld [vmem:[%s3259_s2 + $0x120] sm:$0xff] }
  0x28   :  { %310 = vmatpush2.msra.mxu1 %v176_v11  ;;  %240 = vmatprep.subr.mxu0 %v111_v12  ;;  %v156_v51 = vld [vmem:[%s3259_s2 + $0x330] sm:$0xff]  ;;  %v155_v53 = vld [vmem:[%s3259_s2 + $0x328] sm:$0xff]  ;;  %v154_v55 = vld [vmem:[%s3259_s2 + $0x320] sm:$0xff] }
  0x29   :  { %311 = vmatprep.subr.mxu1 %v175_v13  ;;  %241 = vmatpush2.msra.mxu0 %v110_v14  ;;  %v46_v56 = vld [vmem:[%s3257_s0] sm:$0xff]  ;;  %v89_v57 = vld [vmem:[%s3259_s2 + $0x118] sm:$0xff]  ;;  %v88_v59 = vld [vmem:[%s3259_s2 + $0x110] sm:$0xff] }
  0x2a   :  { %312 = vmatpush2.msra.mxu1 %v174_v15  ;;  %242 = vmatprep.subr.mxu0 %v109_v16  ;;  %v153_v58 = vld [vmem:[%s3259_s2 + $0x318] sm:$0xff]  ;;  %v152_v60 = vld [vmem:[%s3259_s2 + $0x310] sm:$0xff]  ;;  %v47_v61 = vld [vmem:[%s3257_s0 + $0x8] sm:$0xff]  ;;  %v198_v0 = vcombine.high %v46_v56, %v46_v56 }
  0x2b   :  { %313 = vmatprep.subr.mxu1 %v173_v17  ;;  %243 = vmatpush2.msra.mxu0 %v108_v18  ;;  %v87_v62 = vld [vmem:[%s3259_s2 + $0x108] sm:$0xff]  ;;  %v86_v1 = vld [vmem:[%s3259_s2 + $0x100] sm:$0xff]  ;;  %v199_v3 = vcombine.high %v47_v61, %v47_v61  ;;  %v447_v4 = vld [vmem:[%s3263_s6 + $0xf8] sm:$0xff] }
  0x2c   :  { %314 = vmatpush2.msra.mxu1 %v172_v19  ;;  %244 = vmatprep.subr.mxu0 %v107_v20  ;;  %v151_v63 = vld [vmem:[%s3259_s2 + $0x308] sm:$0xff]  ;;  %v150_v2 = vld [vmem:[%s3259_s2 + $0x300] sm:$0xff]  ;;  %v511_v5 = vld [vmem:[%s3263_s6 + $0x2f8] sm:$0xff] }
  0x2d   :  { %315 = vmatprep.subr.mxu1 %v171_v21  ;;  %245 = vmatpush2.msra.mxu0 %v106_v22  ;;  %v446_v6 = vld [vmem:[%s3263_s6 + $0xf0] sm:$0xff]  ;;  %v445_v8 = vld [vmem:[%s3263_s6 + $0xe8] sm:$0xff]  ;;  %v444_v10 = vld [vmem:[%s3263_s6 + $0xe0] sm:$0xff] }
  0x2e   :  { %316 = vmatpush2.msra.mxu1 %v170_v23  ;;  %246 = vmatprep.subr.mxu0 %v105_v24  ;;  %v510_v7 = vld [vmem:[%s3263_s6 + $0x2f0] sm:$0xff]  ;;  %v509_v9 = vld [vmem:[%s3263_s6 + $0x2e8] sm:$0xff]  ;;  %v508_v11 = vld [vmem:[%s3263_s6 + $0x2e0] sm:$0xff] }
  0x2f   :  { %317 = vmatprep.subr.mxu1 %v169_v25  ;;  %247 = vmatpush2.msra.mxu0 %v104_v26  ;;  %v443_v12 = vld [vmem:[%s3263_s6 + $0xd8] sm:$0xff]  ;;  %v442_v14 = vld [vmem:[%s3263_s6 + $0xd0] sm:$0xff]  ;;  %v441_v16 = vld [vmem:[%s3263_s6 + $0xc8] sm:$0xff] }
  0x30   :  { %318 = vmatpush2.msra.mxu1 %v168_v27  ;;  %248 = vmatprep.subr.mxu0 %v103_v28  ;;  %v507_v13 = vld [vmem:[%s3263_s6 + $0x2d8] sm:$0xff]  ;;  %v506_v15 = vld [vmem:[%s3263_s6 + $0x2d0] sm:$0xff]  ;;  %v505_v17 = vld [vmem:[%s3263_s6 + $0x2c8] sm:$0xff] }
  0x31   :  { %319 = vmatprep.subr.mxu1 %v167_v29  ;;  %249 = vmatpush2.msra.mxu0 %v102_v30  ;;  %v440_v18 = vld [vmem:[%s3263_s6 + $0xc0] sm:$0xff]  ;;  %v439_v20 = vld [vmem:[%s3263_s6 + $0xb8] sm:$0xff]  ;;  %v438_v22 = vld [vmem:[%s3263_s6 + $0xb0] sm:$0xff] }
  0x32   :  { %320 = vmatpush2.msra.mxu1 %v166_v31  ;;  %250 = vmatprep.subr.mxu0 %v101_v32  ;;  %v504_v19 = vld [vmem:[%s3263_s6 + $0x2c0] sm:$0xff]  ;;  %v503_v21 = vld [vmem:[%s3263_s6 + $0x2b8] sm:$0xff]  ;;  %v502_v23 = vld [vmem:[%s3263_s6 + $0x2b0] sm:$0xff] }
  0x33   :  { %321 = vmatprep.subr.mxu1 %v165_v33  ;;  %251 = vmatpush2.msra.mxu0 %v100_v34  ;;  %v437_v24 = vld [vmem:[%s3263_s6 + $0xa8] sm:$0xff]  ;;  %v436_v26 = vld [vmem:[%s3263_s6 + $0xa0] sm:$0xff]  ;;  %v435_v28 = vld [vmem:[%s3263_s6 + $0x98] sm:$0xff] }
  0x34   :  { %322 = vmatpush2.msra.mxu1 %v164_v35  ;;  %252 = vmatprep.subr.mxu0 %v99_v36  ;;  %v501_v25 = vld [vmem:[%s3263_s6 + $0x2a8] sm:$0xff]  ;;  %v500_v27 = vld [vmem:[%s3263_s6 + $0x2a0] sm:$0xff]  ;;  %v499_v29 = vld [vmem:[%s3263_s6 + $0x298] sm:$0xff] }
  0x35   :  { %323 = vmatprep.subr.mxu1 %v163_v37  ;;  %253 = vmatpush2.msra.mxu0 %v98_v38  ;;  %v434_v30 = vld [vmem:[%s3263_s6 + $0x90] sm:$0xff]  ;;  %v433_v32 = vld [vmem:[%s3263_s6 + $0x88] sm:$0xff]  ;;  %v432_v34 = vld [vmem:[%s3263_s6 + $0x80] sm:$0xff] }
  0x36   :  { %324 = vmatpush2.msra.mxu1 %v162_v39  ;;  %254 = vmatprep.subr.mxu0 %v97_v40  ;;  %v498_v31 = vld [vmem:[%s3263_s6 + $0x290] sm:$0xff]  ;;  %v497_v33 = vld [vmem:[%s3263_s6 + $0x288] sm:$0xff]  ;;  %v496_v35 = vld [vmem:[%s3263_s6 + $0x280] sm:$0xff] }
  0x37   :  { %325 = vmatprep.subr.mxu1 %v161_v41  ;;  %255 = vmatpush2.msra.mxu0 %v96_v42  ;;  %v431_v36 = vld [vmem:[%s3263_s6 + $0x78] sm:$0xff]  ;;  %v430_v38 = vld [vmem:[%s3263_s6 + $0x70] sm:$0xff]  ;;  %v429_v40 = vld [vmem:[%s3263_s6 + $0x68] sm:$0xff] }
  0x38   :  { %326 = vmatpush2.msra.mxu1 %v160_v43  ;;  %256 = vmatprep.subr.mxu0 %v95_v44  ;;  %v495_v37 = vld [vmem:[%s3263_s6 + $0x278] sm:$0xff]  ;;  %v494_v39 = vld [vmem:[%s3263_s6 + $0x270] sm:$0xff]  ;;  %v493_v41 = vld [vmem:[%s3263_s6 + $0x268] sm:$0xff] }
  0x39   :  { %327 = vmatprep.subr.mxu1 %v159_v45  ;;  %257 = vmatpush2.msra.mxu0 %v94_v46  ;;  %v428_v42 = vld [vmem:[%s3263_s6 + $0x60] sm:$0xff]  ;;  %v427_v44 = vld [vmem:[%s3263_s6 + $0x58] sm:$0xff]  ;;  %v426_v46 = vld [vmem:[%s3263_s6 + $0x50] sm:$0xff] }
  0x3a   :  { %328 = vmatpush2.msra.mxu1 %v158_v47  ;;  %258 = vmatprep.subr.mxu0 %v93_v48  ;;  %v492_v43 = vld [vmem:[%s3263_s6 + $0x260] sm:$0xff]  ;;  %v491_v45 = vld [vmem:[%s3263_s6 + $0x258] sm:$0xff]  ;;  %v490_v47 = vld [vmem:[%s3263_s6 + $0x250] sm:$0xff] }
  0x3b   :  { %329 = vmatprep.subr.mxu1 %v157_v49  ;;  %259 = vmatpush2.msra.mxu0 %v92_v50  ;;  %v425_v48 = vld [vmem:[%s3263_s6 + $0x48] sm:$0xff]  ;;  %v424_v50 = vld [vmem:[%s3263_s6 + $0x40] sm:$0xff] }
  0x3c   :  { %330 = vmatpush2.msra.mxu1 %v156_v51  ;;  %260 = vmatprep.subr.mxu0 %v91_v52  ;;  %v489_v49 = vld [vmem:[%s3263_s6 + $0x248] sm:$0xff]  ;;  %v488_v51 = vld [vmem:[%s3263_s6 + $0x240] sm:$0xff] }
  0x3d   :  { %331 = vmatprep.subr.mxu1 %v155_v53  ;;  %261 = vmatpush2.msra.mxu0 %v90_v54 }
  0x3e   :  { %332 = vmatpush2.msra.mxu1 %v154_v55  ;;  %262 = vmatprep.subr.mxu0 %v89_v57 }
  0x3f   :  { %333 = vmatprep.subr.mxu1 %v153_v58  ;;  %263 = vmatpush2.msra.mxu0 %v88_v59 }
  0x40   :  { %334 = vmatpush2.msra.mxu1 %v152_v60  ;;  %264 = vmatprep.subr.mxu0 %v87_v62 }
  0x41   :  { %335 = vmatprep.subr.mxu1 %v151_v63  ;;  %265 = vmatpush2.msra.mxu0 %v86_v1 }
  0x42   :  { %266 = vmatprep.mubr.f32.mxu0 %v198_v0  ;;  %336 = vmatpush2.msra.mxu1 %v150_v2 }
  0x43   :  { %267 = vmatmul.mubr.f32.vlgmr.msra.gmra.mxu0 %v46_v56  ;;  %337 = vmatprep.mubr.f32.mxu1 %v199_v3 }
  0x44   :  { %564 = vmatprep.subr.mxu0 %v447_v4  ;;  %635 = vmatprep.subr.mxu1 %v511_v5 }
  0x45   :  { %338 = vmatmul.mubr.f32.vlgmr.msra.gmra.mxu1 %v47_v61  ;;  %565 = vmatpush1.msra.mxu0 %v446_v6 }
  0x46   :  { %636 = vmatpush1.msra.mxu1 %v510_v7  ;;  %566 = vmatprep.subr.mxu0 %v445_v8 }
  0x47   :  { %637 = vmatprep.subr.mxu1 %v509_v9  ;;  %567 = vmatpush1.msra.mxu0 %v444_v10 }
  0x48   :  { %638 = vmatpush1.msra.mxu1 %v508_v11  ;;  %568 = vmatprep.subr.mxu0 %v443_v12 }
  0x49   :  { %639 = vmatprep.subr.mxu1 %v507_v13  ;;  %569 = vmatpush1.msra.mxu0 %v442_v14 }
  0x4a   :  { %640 = vmatpush1.msra.mxu1 %v506_v15  ;;  %570 = vmatprep.subr.mxu0 %v441_v16 }
  0x4b   :  { %641 = vmatprep.subr.mxu1 %v505_v17  ;;  %571 = vmatpush1.msra.mxu0 %v440_v18 }
  0x4c   :  { %642 = vmatpush1.msra.mxu1 %v504_v19  ;;  %572 = vmatprep.subr.mxu0 %v439_v20 }
  0x4d   :  { %643 = vmatprep.subr.mxu1 %v503_v21  ;;  %573 = vmatpush1.msra.mxu0 %v438_v22 }
  0x4e   :  { %644 = vmatpush1.msra.mxu1 %v502_v23  ;;  %574 = vmatprep.subr.mxu0 %v437_v24 }
  0x4f   :  { %645 = vmatprep.subr.mxu1 %v501_v25  ;;  %575 = vmatpush1.msra.mxu0 %v436_v26 }
  0x50   :  { %646 = vmatpush1.msra.mxu1 %v500_v27  ;;  %576 = vmatprep.subr.mxu0 %v435_v28 }
  0x51   :  { %647 = vmatprep.subr.mxu1 %v499_v29  ;;  %577 = vmatpush1.msra.mxu0 %v434_v30 }
  0x52   :  { %648 = vmatpush1.msra.mxu1 %v498_v31  ;;  %578 = vmatprep.subr.mxu0 %v433_v32 }
  0x53   :  { %649 = vmatprep.subr.mxu1 %v497_v33  ;;  %579 = vmatpush1.msra.mxu0 %v432_v34 }
  0x54   :  { %650 = vmatpush1.msra.mxu1 %v496_v35  ;;  %580 = vmatprep.subr.mxu0 %v431_v36 }
  0x55   :  { %651 = vmatprep.subr.mxu1 %v495_v37  ;;  %581 = vmatpush1.msra.mxu0 %v430_v38 }
  0x56   :  { %652 = vmatpush1.msra.mxu1 %v494_v39  ;;  %582 = vmatprep.subr.mxu0 %v429_v40 }
  0x57   :  { %653 = vmatprep.subr.mxu1 %v493_v41  ;;  %583 = vmatpush1.msra.mxu0 %v428_v42 }
  0x58   :  { %654 = vmatpush1.msra.mxu1 %v492_v43  ;;  %584 = vmatprep.subr.mxu0 %v427_v44 }
  0x59   :  { %655 = vmatprep.subr.mxu1 %v491_v45 }
  0x5a   :  { %21 = vsyncpa [#allocation5], 0  ;;  %585 = vmatpush1.msra.mxu0 %v426_v46  ;;  %656 = vmatpush1.msra.mxu1 %v490_v47  ;;  %v423_v52 = vld [vmem:[%s3263_s6 + $0x38] sm:$0xff]  ;;  %v422_v54 = vld [vmem:[%s3263_s6 + $0x30] sm:$0xff]  ;;  %vm344_vm0 = vcmask 1043456   ;;  %s1728_s16 = smov [#allocation2]  }
  0x5b   :  { %v487_v53 = vld [vmem:[%s3263_s6 + $0x238] sm:$0xff]  ;;  %586 = vmatprep.subr.mxu0 %v425_v48  ;;  %657 = vmatprep.subr.mxu1 %v489_v49  ;;  %v486_v55 = vld [vmem:[%s3263_s6 + $0x230] sm:$0xff]  ;;  %v421_v56 = vld [vmem:[%s3263_s6 + $0x28] sm:$0xff]  ;;  %s1429_s17 = sshll.u32 %s1728_s16, 4  ;;  %s1729_s18 = smov [#allocation4]   ;;  %s1430_s17 = int_to_ptr.vmem [resolvable:$true] %s1429_s17 }
  0x5c   :  { %587 = vmatpush1.msra.mxu0 %v424_v50  ;;  %658 = vmatpush1.msra.mxu1 %v488_v51  ;;  %v485_v57 = vld [vmem:[%s3263_s6 + $0x228] sm:$0xff]  ;;  %v420_v58 = vld [vmem:[%s3263_s6 + $0x20] sm:$0xff]  ;;  %v419_v60 = vld [vmem:[%s3263_s6 + $0x18] sm:$0xff]  ;;  %s1439_s19 = sshll.u32 %s1729_s18, 4  ;;  %p1689_p1 = scmp.lt.s32.totalorder %s1430_s17, %s1430_s17  ;;  %s1440_s19 = int_to_ptr.vmem [resolvable:$true] %s1439_s19 }
  0x5d   :  { %588 = vmatprep.subr.mxu0 %v423_v52  ;;  %659 = vmatprep.subr.mxu1 %v487_v53  ;;  %v484_v59 = vld [vmem:[%s3263_s6 + $0x220] sm:$0xff]  ;;  %v483_v61 = vld [vmem:[%s3263_s6 + $0x218] sm:$0xff]  ;;  %v418_v62 = vld [vmem:[%s3263_s6 + $0x10] sm:$0xff] }
  0x5e   :  { %589 = vmatpush1.msra.mxu0 %v422_v54  ;;  %660 = vmatpush1.msra.mxu1 %v486_v55  ;;  %v482_v63 = vld [vmem:[%s3263_s6 + $0x210] sm:$0xff]  ;;  %v417_v0 = vld [vmem:[%s3263_s6 + $0x8] sm:$0xff]  ;;  %v416_v2 = vld [vmem:[%s3263_s6] sm:$0xff] }
  0x5f   :  { %590 = vmatprep.subr.mxu0 %v421_v56  ;;  %661 = vmatprep.subr.mxu1 %v485_v57  ;;  %v481_v1 = vld [vmem:[%s3263_s6 + $0x208] sm:$0xff]  ;;  %v480_v3 = vld [vmem:[%s3263_s6 + $0x200] sm:$0xff]  ;;  %v479_v4 = vld [vmem:[%s3263_s6 + $0x1f8] sm:$0xff] }
  0x60   :  { %591 = vmatpush1.msra.mxu0 %v420_v58  ;;  %662 = vmatpush1.msra.mxu1 %v484_v59  ;;  %v543_v5 = vld [vmem:[%s3263_s6 + $0x3f8] sm:$0xff]  ;;  %v478_v6 = vld [vmem:[%s3263_s6 + $0x1f0] sm:$0xff]  ;;  %v477_v8 = vld [vmem:[%s3263_s6 + $0x1e8] sm:$0xff] }
  0x61   :  { %592 = vmatprep.subr.mxu0 %v419_v60  ;;  %663 = vmatprep.subr.mxu1 %v483_v61  ;;  %v542_v7 = vld [vmem:[%s3263_s6 + $0x3f0] sm:$0xff]  ;;  %v541_v9 = vld [vmem:[%s3263_s6 + $0x3e8] sm:$0xff]  ;;  %v476_v10 = vld [vmem:[%s3263_s6 + $0x1e0] sm:$0xff] }
  0x62   :  { %593 = vmatpush1.msra.mxu0 %v418_v62  ;;  %664 = vmatpush1.msra.mxu1 %v482_v63  ;;  %v540_v11 = vld [vmem:[%s3263_s6 + $0x3e0] sm:$0xff]  ;;  %v475_v12 = vld [vmem:[%s3263_s6 + $0x1d8] sm:$0xff]  ;;  %v474_v14 = vld [vmem:[%s3263_s6 + $0x1d0] sm:$0xff] }
  0x63   :  { %594 = vmatprep.subr.mxu0 %v417_v0  ;;  %665 = vmatprep.subr.mxu1 %v481_v1  ;;  %v539_v13 = vld [vmem:[%s3263_s6 + $0x3d8] sm:$0xff]  ;;  %v538_v15 = vld [vmem:[%s3263_s6 + $0x3d0] sm:$0xff]  ;;  %v473_v16 = vld [vmem:[%s3263_s6 + $0x1c8] sm:$0xff] }
  0x64   :  { %595 = vmatpush1.msra.mxu0 %v416_v2  ;;  %666 = vmatpush1.msra.mxu1 %v480_v3  ;;  %v537_v17 = vld [vmem:[%s3263_s6 + $0x3c8] sm:$0xff]  ;;  %v472_v18 = vld [vmem:[%s3263_s6 + $0x1c0] sm:$0xff]  ;;  %v471_v20 = vld [vmem:[%s3263_s6 + $0x1b8] sm:$0xff] }
  0x65   :  { %596 = vmatprep.subr.mxu0 %v479_v4  ;;  %667 = vmatprep.subr.mxu1 %v543_v5  ;;  %v536_v19 = vld [vmem:[%s3263_s6 + $0x3c0] sm:$0xff]  ;;  %v535_v21 = vld [vmem:[%s3263_s6 + $0x3b8] sm:$0xff]  ;;  %v470_v22 = vld [vmem:[%s3263_s6 + $0x1b0] sm:$0xff] }
  0x66   :  { %597 = vmatpush2.msra.mxu0 %v478_v6  ;;  %668 = vmatpush2.msra.mxu1 %v542_v7  ;;  %v534_v23 = vld [vmem:[%s3263_s6 + $0x3b0] sm:$0xff]  ;;  %v469_v24 = vld [vmem:[%s3263_s6 + $0x1a8] sm:$0xff]  ;;  %v468_v26 = vld [vmem:[%s3263_s6 + $0x1a0] sm:$0xff] }
  0x67   :  { %598 = vmatprep.subr.mxu0 %v477_v8  ;;  %669 = vmatprep.subr.mxu1 %v541_v9  ;;  %v533_v25 = vld [vmem:[%s3263_s6 + $0x3a8] sm:$0xff]  ;;  %v532_v27 = vld [vmem:[%s3263_s6 + $0x3a0] sm:$0xff]  ;;  %v467_v28 = vld [vmem:[%s3263_s6 + $0x198] sm:$0xff] }
  0x68   :  { %599 = vmatpush2.msra.mxu0 %v476_v10  ;;  %670 = vmatpush2.msra.mxu1 %v540_v11  ;;  %v531_v29 = vld [vmem:[%s3263_s6 + $0x398] sm:$0xff]  ;;  %v466_v30 = vld [vmem:[%s3263_s6 + $0x190] sm:$0xff]  ;;  %v465_v32 = vld [vmem:[%s3263_s6 + $0x188] sm:$0xff] }
  0x69   :  { %600 = vmatprep.subr.mxu0 %v475_v12  ;;  %671 = vmatprep.subr.mxu1 %v539_v13  ;;  %v530_v31 = vld [vmem:[%s3263_s6 + $0x390] sm:$0xff]  ;;  %v529_v33 = vld [vmem:[%s3263_s6 + $0x388] sm:$0xff]  ;;  %v464_v34 = vld [vmem:[%s3263_s6 + $0x180] sm:$0xff] }
  0x6a   :  { %601 = vmatpush2.msra.mxu0 %v474_v14  ;;  %672 = vmatpush2.msra.mxu1 %v538_v15  ;;  %v528_v35 = vld [vmem:[%s3263_s6 + $0x380] sm:$0xff]  ;;  %v463_v36 = vld [vmem:[%s3263_s6 + $0x178] sm:$0xff]  ;;  %v462_v38 = vld [vmem:[%s3263_s6 + $0x170] sm:$0xff] }
  0x6b   :  { %602 = vmatprep.subr.mxu0 %v473_v16  ;;  %673 = vmatprep.subr.mxu1 %v537_v17  ;;  %v527_v37 = vld [vmem:[%s3263_s6 + $0x378] sm:$0xff]  ;;  %v526_v39 = vld [vmem:[%s3263_s6 + $0x370] sm:$0xff]  ;;  %v461_v40 = vld [vmem:[%s3263_s6 + $0x168] sm:$0xff] }
  0x6c   :  { %603 = vmatpush2.msra.mxu0 %v472_v18  ;;  %674 = vmatpush2.msra.mxu1 %v536_v19  ;;  %v525_v41 = vld [vmem:[%s3263_s6 + $0x368] sm:$0xff]  ;;  %v460_v42 = vld [vmem:[%s3263_s6 + $0x160] sm:$0xff]  ;;  %v459_v44 = vld [vmem:[%s3263_s6 + $0x158] sm:$0xff] }
  0x6d   :  { %604 = vmatprep.subr.mxu0 %v471_v20  ;;  %675 = vmatprep.subr.mxu1 %v535_v21  ;;  %v524_v43 = vld [vmem:[%s3263_s6 + $0x360] sm:$0xff]  ;;  %v523_v45 = vld [vmem:[%s3263_s6 + $0x358] sm:$0xff]  ;;  %v458_v46 = vld [vmem:[%s3263_s6 + $0x150] sm:$0xff] }
  0x6e   :  { %605 = vmatpush2.msra.mxu0 %v470_v22  ;;  %676 = vmatpush2.msra.mxu1 %v534_v23  ;;  %v522_v47 = vld [vmem:[%s3263_s6 + $0x350] sm:$0xff]  ;;  %v457_v48 = vld [vmem:[%s3263_s6 + $0x148] sm:$0xff]  ;;  %v456_v50 = vld [vmem:[%s3263_s6 + $0x140] sm:$0xff] }
  0x6f   :  { %606 = vmatprep.subr.mxu0 %v469_v24  ;;  %677 = vmatprep.subr.mxu1 %v533_v25  ;;  %v521_v49 = vld [vmem:[%s3263_s6 + $0x348] sm:$0xff]  ;;  %v520_v51 = vld [vmem:[%s3263_s6 + $0x340] sm:$0xff]  ;;  %v455_v52 = vld [vmem:[%s3263_s6 + $0x138] sm:$0xff] }
  0x70   :  { %607 = vmatpush2.msra.mxu0 %v468_v26  ;;  %678 = vmatpush2.msra.mxu1 %v532_v27  ;;  %v519_v53 = vld [vmem:[%s3263_s6 + $0x338] sm:$0xff]  ;;  %v454_v54 = vld [vmem:[%s3263_s6 + $0x130] sm:$0xff]  ;;  %v453_v56 = vld [vmem:[%s3263_s6 + $0x128] sm:$0xff] }
  0x71   :  { %608 = vmatprep.subr.mxu0 %v467_v28  ;;  %679 = vmatprep.subr.mxu1 %v531_v29  ;;  %v518_v55 = vld [vmem:[%s3263_s6 + $0x330] sm:$0xff]  ;;  %v517_v57 = vld [vmem:[%s3263_s6 + $0x328] sm:$0xff]  ;;  %v452_v58 = vld [vmem:[%s3263_s6 + $0x120] sm:$0xff] }
  0x72   :  { %609 = vmatpush2.msra.mxu0 %v466_v30  ;;  %680 = vmatpush2.msra.mxu1 %v530_v31  ;;  %v516_v59 = vld [vmem:[%s3263_s6 + $0x320] sm:$0xff]  ;;  %v451_v61 = vld [vmem:[%s3263_s6 + $0x118] sm:$0xff]  ;;  %v51_v63 = vld [vmem:[%s3258_s1 + $0x8] sm:$0xff] }
  0x73   :  { %610 = vmatprep.subr.mxu0 %v465_v32  ;;  %681 = vmatprep.subr.mxu1 %v529_v33  ;;  %v50_v60 = vld [vmem:[%s3258_s1] sm:$0xff]  ;;  %v515_v62 = vld [vmem:[%s3263_s6 + $0x318] sm:$0xff]  ;;  %v450_v0 = vld [vmem:[%s3263_s6 + $0x110] sm:$0xff]  ;;  %v561_v6 = vcombine.high %v51_v63, %v51_v63 }
  0x74   :  { %611 = vmatpush2.msra.mxu0 %v464_v34  ;;  %682 = vmatpush2.msra.mxu1 %v528_v35  ;;  %v514_v1 = vld [vmem:[%s3263_s6 + $0x310] sm:$0xff]  ;;  %v449_v2 = vld [vmem:[%s3263_s6 + $0x108] sm:$0xff]  ;;  %v560_v4 = vcombine.high %v50_v60, %v50_v60  ;;  %v448_v5 = vld [vmem:[%s3263_s6 + $0x100] sm:$0xff] }
  0x75   :  { %612 = vmatprep.subr.mxu0 %v463_v36  ;;  %683 = vmatprep.subr.mxu1 %v527_v37  ;;  %v513_v3 = vld [vmem:[%s3263_s6 + $0x308] sm:$0xff]  ;;  %v512_v7 = vld [vmem:[%s3263_s6 + $0x300] sm:$0xff]  ;;  %v807_v8 = vld [vmem:[%s3267_s10 + $0xf8] sm:$0xff] }
  0x76   :  { %613 = vmatpush2.msra.mxu0 %v462_v38  ;;  %684 = vmatpush2.msra.mxu1 %v526_v39  ;;  %v791_v9 = vld [vmem:[%s3267_s10 + $0x78] sm:$0xff]  ;;  %v806_v10 = vld [vmem:[%s3267_s10 + $0xf0] sm:$0xff]  ;;  %v805_v12 = vld [vmem:[%s3267_s10 + $0xe8] sm:$0xff] }
  0x77   :  { %614 = vmatprep.subr.mxu0 %v461_v40  ;;  %685 = vmatprep.subr.mxu1 %v525_v41  ;;  %v790_v11 = vld [vmem:[%s3267_s10 + $0x70] sm:$0xff]  ;;  %v789_v13 = vld [vmem:[%s3267_s10 + $0x68] sm:$0xff]  ;;  %v804_v14 = vld [vmem:[%s3267_s10 + $0xe0] sm:$0xff] }
  0x78   :  { %615 = vmatpush2.msra.mxu0 %v460_v42  ;;  %686 = vmatpush2.msra.mxu1 %v524_v43  ;;  %v788_v15 = vld [vmem:[%s3267_s10 + $0x60] sm:$0xff]  ;;  %v803_v16 = vld [vmem:[%s3267_s10 + $0xd8] sm:$0xff]  ;;  %v802_v18 = vld [vmem:[%s3267_s10 + $0xd0] sm:$0xff] }
  0x79   :  { %616 = vmatprep.subr.mxu0 %v459_v44  ;;  %687 = vmatprep.subr.mxu1 %v523_v45  ;;  %v787_v17 = vld [vmem:[%s3267_s10 + $0x58] sm:$0xff]  ;;  %v786_v19 = vld [vmem:[%s3267_s10 + $0x50] sm:$0xff]  ;;  %v801_v20 = vld [vmem:[%s3267_s10 + $0xc8] sm:$0xff] }
  0x7a   :  { %617 = vmatpush2.msra.mxu0 %v458_v46  ;;  %688 = vmatpush2.msra.mxu1 %v522_v47  ;;  %v785_v21 = vld [vmem:[%s3267_s10 + $0x48] sm:$0xff]  ;;  %v800_v22 = vld [vmem:[%s3267_s10 + $0xc0] sm:$0xff]  ;;  %v799_v24 = vld [vmem:[%s3267_s10 + $0xb8] sm:$0xff] }
  0x7b   :  { %618 = vmatprep.subr.mxu0 %v457_v48  ;;  %689 = vmatprep.subr.mxu1 %v521_v49  ;;  %v784_v23 = vld [vmem:[%s3267_s10 + $0x40] sm:$0xff]  ;;  %v783_v25 = vld [vmem:[%s3267_s10 + $0x38] sm:$0xff]  ;;  %v798_v26 = vld [vmem:[%s3267_s10 + $0xb0] sm:$0xff] }
  0x7c   :  { %619 = vmatpush2.msra.mxu0 %v456_v50  ;;  %690 = vmatpush2.msra.mxu1 %v520_v51  ;;  %v782_v27 = vld [vmem:[%s3267_s10 + $0x30] sm:$0xff]  ;;  %v797_v28 = vld [vmem:[%s3267_s10 + $0xa8] sm:$0xff]  ;;  %v796_v30 = vld [vmem:[%s3267_s10 + $0xa0] sm:$0xff] }
  0x7d   :  { %620 = vmatprep.subr.mxu0 %v455_v52  ;;  %691 = vmatprep.subr.mxu1 %v519_v53  ;;  %v781_v29 = vld [vmem:[%s3267_s10 + $0x28] sm:$0xff]  ;;  %v780_v31 = vld [vmem:[%s3267_s10 + $0x20] sm:$0xff]  ;;  %v795_v32 = vld [vmem:[%s3267_s10 + $0x98] sm:$0xff] }
  0x7e   :  { %621 = vmatpush2.msra.mxu0 %v454_v54  ;;  %692 = vmatpush2.msra.mxu1 %v518_v55  ;;  %v779_v33 = vld [vmem:[%s3267_s10 + $0x18] sm:$0xff]  ;;  %v794_v34 = vld [vmem:[%s3267_s10 + $0x90] sm:$0xff]  ;;  %v793_v36 = vld [vmem:[%s3267_s10 + $0x88] sm:$0xff]  ;;  %v186_v54 = vlaneseq }
  0x7f   :  { %622 = vmatprep.subr.mxu0 %v453_v56  ;;  %693 = vmatprep.subr.mxu1 %v517_v57  ;;  %v778_v35 = vld [vmem:[%s3267_s10 + $0x10] sm:$0xff]  ;;  %v777_v37 = vld [vmem:[%s3267_s10 + $0x8] sm:$0xff]  ;;  %v792_v38 = vld [vmem:[%s3267_s10 + $0x80] sm:$0xff] }
  0x80   :  { %623 = vmatpush2.msra.mxu0 %v452_v58  ;;  %694 = vmatpush2.msra.mxu1 %v516_v59  ;;  %v776_v39 = vld [vmem:[%s3267_s10] sm:$0xff]  ;;  %v839_v40 = vld [vmem:[%s3267_s10 + $0x1f8] sm:$0xff]  ;;  %v838_v42 = vld [vmem:[%s3267_s10 + $0x1f0] sm:$0xff]  ;;  %v187_v59 = vshrl.u32 %v186_v54, 7 }
  0x81   :  { %624 = vmatprep.subr.mxu0 %v451_v61  ;;  %695 = vmatprep.subr.mxu1 %v515_v62  ;;  %v823_v41 = vld [vmem:[%s3267_s10 + $0x178] sm:$0xff]  ;;  %v822_v43 = vld [vmem:[%s3267_s10 + $0x170] sm:$0xff]  ;;  %v837_v44 = vld [vmem:[%s3267_s10 + $0x1e8] sm:$0xff] }
  0x82   :  { %625 = vmatpush2.msra.mxu0 %v450_v0  ;;  %696 = vmatpush2.msra.mxu1 %v514_v1  ;;  %v821_v45 = vld [vmem:[%s3267_s10 + $0x168] sm:$0xff]  ;;  %v836_v46 = vld [vmem:[%s3267_s10 + $0x1e0] sm:$0xff]  ;;  %v835_v48 = vld [vmem:[%s3267_s10 + $0x1d8] sm:$0xff]  ;;  %v2747_v0 = vsub.s32 0, %v187_v59 }
  0x83   :  { %626 = vmatprep.subr.mxu0 %v449_v2  ;;  %697 = vmatprep.subr.mxu1 %v513_v3  ;;  %v820_v47 = vld [vmem:[%s3267_s10 + $0x160] sm:$0xff]  ;;  %v819_v49 = vld [vmem:[%s3267_s10 + $0x158] sm:$0xff]  ;;  %v834_v50 = vld [vmem:[%s3267_s10 + $0x1d0] sm:$0xff] }
  0x84   :  { %627 = vmatpush2.msra.mxu0 %v448_v5  ;;  %628 = vmatprep.mubr.f32.mxu0 %v560_v4  ;;  %v818_v51 = vld [vmem:[%s3267_s10 + $0x150] sm:$0xff]  ;;  %v833_v52 = vld [vmem:[%s3267_s10 + $0x1c8] sm:$0xff]  ;;  %v832_v55 = vld [vmem:[%s3267_s10 + $0x1c0] sm:$0xff]  ;;  %v2758_v4 = vsub.s32 1, %v187_v59 }
  0x85   :  { %698 = vmatpush2.msra.mxu1 %v512_v7  ;;  %699 = vmatprep.mubr.f32.mxu1 %v561_v6  ;;  %v817_v53 = vld [vmem:[%s3267_s10 + $0x148] sm:$0xff]  ;;  %v816_v56 = vld [vmem:[%s3267_s10 + $0x140] sm:$0xff]  ;;  %v831_v57 = vld [vmem:[%s3267_s10 + $0x1b8] sm:$0xff] }
  0x86   :  { %629 = vmatmul.mubr.f32.vlgmr.msra.gmra.mxu0 %v50_v60  ;;  %700 = vmatmul.mubr.f32.vlgmr.msra.gmra.mxu1 %v51_v63  ;;  %v815_v58 = vld [vmem:[%s3267_s10 + $0x138] sm:$0xff]  ;;  %v830_v60 = vld [vmem:[%s3267_s10 + $0x1b0] sm:$0xff]  ;;  %v829_v62 = vld [vmem:[%s3267_s10 + $0x1a8] sm:$0xff] }
  0x87   :  { %1491 = vmatprep.subr.mxu1 %v807_v8  ;;  %1456 = vmatprep.subr.mxu0 %v839_v40  ;;  %v814_v61 = vld [vmem:[%s3267_s10 + $0x130] sm:$0xff]  ;;  %v813_v63 = vld [vmem:[%s3267_s10 + $0x128] sm:$0xff]  ;;  %v828_v1 = vld [vmem:[%s3267_s10 + $0x1a0] sm:$0xff] }
  0x88   :  { %1492 = vmatpush3.msra.mxu1 %v791_v9  ;;  %1457 = vmatpush3.msra.mxu0 %v823_v41  ;;  %v182_v2 = vld [vmem:[%s3260_s3] sm:$0x3]  ;;  %v827_v5 = vld [vmem:[%s3267_s10 + $0x198] sm:$0xff]  ;;  %v826_v7 = vld [vmem:[%s3267_s10 + $0x190] sm:$0xff] }
  0x89   :  { %1493 = vmatprep.subr.mxu1 %v806_v10  ;;  %1458 = vmatprep.subr.mxu0 %v838_v42  ;;  %v812_v3 = vld [vmem:[%s3267_s10 + $0x120] sm:$0xff]  ;;  %v811_v6 = vld [vmem:[%s3267_s10 + $0x118] sm:$0xff]  ;;  %v810_v8 = vld [vmem:[%s3267_s10 + $0x110] sm:$0xff]  ;;  %v189_v9 = vrot.slane %v182_v2, %v2747_v0 }
  0x8a   :  { %1494 = vmatpush3.msra.mxu1 %v790_v11  ;;  %1459 = vmatpush3.msra.mxu0 %v822_v43  ;;  %v825_v10 = vld [vmem:[%s3267_s10 + $0x188] sm:$0xff] }
  0x8b   :  { %1495 = vmatprep.subr.mxu1 %v805_v12  ;;  %1460 = vmatprep.subr.mxu0 %v837_v44  ;;  %v809_v11 = vld [vmem:[%s3267_s10 + $0x108] sm:$0xff]  ;;  %v193_v12 = vrot.slane %v182_v2, %v2758_v4 }
  0x8c   :  { %1496 = vmatpush3.msra.mxu1 %v789_v13  ;;  %1461 = vmatpush3.msra.mxu0 %v821_v45  ;;  %v824_v13 = vld [vmem:[%s3267_s10 + $0x180] sm:$0xff] }
  0x8d   :  { %1497 = vmatprep.subr.mxu1 %v804_v14  ;;  %1462 = vmatprep.subr.mxu0 %v836_v46 }
  0x8e   :  { %1498 = vmatpush3.msra.mxu1 %v788_v15  ;;  %1463 = vmatpush3.msra.mxu0 %v820_v47  ;;  %v808_v15 = vld [vmem:[%s3267_s10 + $0x100] sm:$0xff] }
  0x8f   :  { %1499 = vmatprep.subr.mxu1 %v803_v16  ;;  %1464 = vmatprep.subr.mxu0 %v835_v48 }
  0x90   :  { %1500 = vmatpush3.msra.mxu1 %v787_v17  ;;  %1465 = vmatpush3.msra.mxu0 %v819_v49 }
  0x91   :  { %1501 = vmatprep.subr.mxu1 %v802_v18  ;;  %1466 = vmatprep.subr.mxu0 %v834_v50 }
  0x92   :  { %1502 = vmatpush3.msra.mxu1 %v786_v19  ;;  %1467 = vmatpush3.msra.mxu0 %v818_v51 }
  0x93   :  { %1503 = vmatprep.subr.mxu1 %v801_v20  ;;  %1468 = vmatprep.subr.mxu0 %v833_v52 }
  0x94   :  { %1504 = vmatpush3.msra.mxu1 %v785_v21  ;;  %1469 = vmatpush3.msra.mxu0 %v817_v53  ;;  %v1011_v21 = vld [vmem:[%s3267_s10 + $0x2f8] sm:$0xff] }
  0x95   :  { %1505 = vmatprep.subr.mxu1 %v800_v22  ;;  %1470 = vmatprep.subr.mxu0 %v832_v55  ;;  %v1117_v22 = vld [vmem:[%s3267_s10 + $0x3f8] sm:$0xff] }
  0x96   :  { %1506 = vmatpush3.msra.mxu1 %v784_v23  ;;  %1471 = vmatpush3.msra.mxu0 %v816_v56 }
  0x97   :  { %1507 = vmatprep.subr.mxu1 %v799_v24  ;;  %1472 = vmatprep.subr.mxu0 %v831_v57 }
  0x98   :  { %1508 = vmatpush3.msra.mxu1 %v783_v25  ;;  %1473 = vmatpush3.msra.mxu0 %v815_v58 }
  0x99   :  { %1509 = vmatprep.subr.mxu1 %v798_v26  ;;  %1474 = vmatprep.subr.mxu0 %v830_v60 }
  0x9a   :  { %1510 = vmatpush3.msra.mxu1 %v782_v27  ;;  %1475 = vmatpush3.msra.mxu0 %v814_v61 }
  0x9b   :  { %1511 = vmatprep.subr.mxu1 %v797_v28  ;;  %1476 = vmatprep.subr.mxu0 %v829_v62 }
  0x9c   :  { %1512 = vmatpush3.msra.mxu1 %v781_v29  ;;  %1477 = vmatpush3.msra.mxu0 %v813_v63  ;;  %v183_v63 = vld [vmem:[%s3261_s4] sm:$0x3] }
  0x9d   :  { %1513 = vmatprep.subr.mxu1 %v796_v30  ;;  %1478 = vmatprep.subr.mxu0 %v828_v1  ;;  %v184_v1 = vld [vmem:[%s3262_s5] sm:$0x3]  ;;  %v392_v2 = vrot.slane %v183_v63, %v2747_v0 }
  0x9e   :  { %1514 = vmatpush3.msra.mxu1 %v780_v31  ;;  %1479 = vmatpush3.msra.mxu0 %v812_v3 }
  0x9f   :  { %1515 = vmatprep.subr.mxu1 %v795_v32  ;;  %1480 = vmatprep.subr.mxu0 %v827_v5 }
  0xa0   :  { %1516 = vmatpush3.msra.mxu1 %v779_v33  ;;  %1481 = vmatpush3.msra.mxu0 %v811_v6  ;;  %v396_v6 = vrot.slane %v183_v63, %v2758_v4  ;;  %v1107_v63 = vld [vmem:[%s3267_s10 + $0x3a8] sm:$0xff] }
  0xa1   :  { %1517 = vmatprep.subr.mxu1 %v794_v34  ;;  %1482 = vmatprep.subr.mxu0 %v826_v7  ;;  %v405_v7 = vrot.slane %v184_v1, %v2747_v0 }
  0xa2   :  { %1518 = vmatpush3.msra.mxu1 %v778_v35  ;;  %1483 = vmatpush3.msra.mxu0 %v810_v8 }
  0xa3   :  { %1519 = vmatprep.subr.mxu1 %v793_v36  ;;  %1484 = vmatprep.subr.mxu0 %v825_v10 }
  0xa4   :  { %1520 = vmatpush3.msra.mxu1 %v777_v37  ;;  %1485 = vmatpush3.msra.mxu0 %v809_v11  ;;  %v409_v11 = vrot.slane %v184_v1, %v2758_v4  ;;  %v1091_v1 = vld [vmem:[%s3267_s10 + $0x328] sm:$0xff] }
  0xa5   :  { %1521 = vmatprep.subr.mxu1 %v792_v38  ;;  %1486 = vmatprep.subr.mxu0 %v824_v13 }
  0xa6   :  { %1522 = vmatpush3.msra.mxu1 %v776_v39  ;;  %1487 = vmatpush3.msra.mxu0 %v808_v15  ;;  %v544_v15 = vld [vmem:[%s3264_s7] sm:$0x3] }
  0xa7   :  { %1526 = vmatprep.subr.mxu0 %v1011_v21  ;;  %1561 = vmatprep.subr.mxu1 %v1117_v22  ;;  %v1101_v21 = vld [vmem:[%s3267_s10 + $0x378] sm:$0xff]  ;;  %v1116_v22 = vld [vmem:[%s3267_s10 + $0x3f0] sm:$0xff] }
 0x103   :  { %v268_v14 = vpop.f32.mrf.mxu0 }
 0x104   :  { %v269_v16 = vadd.f32 %v268_v14, %v189_v9  ;;  %v2809_v14 = vld [vmem:[%s3257_s0 + $0x18] sm:$0xff] }
 0x105   :  { %v339_v17 = vpop.f32.mrf.mxu1  ;;  %v270_v18 = vpop.f32.mrf.mxu0 }
 0x106   :  { %v340_v19 = vadd.f32 %v339_v17, %v269_v16  ;;  %v271_v20 = vadd.f32 %v270_v18, %v193_v12 }
 0x107   :  { %v341_v23 = vpop.f32.mrf.mxu1 }
 0x108   :  { %v345_v24 = vsel %vm344_vm0, %v340_v19, 0.0  ;;  %v342_v25 = vadd.f32 %v341_v23, %v271_v20  ;;  %v551_v20 = vrot.slane %v544_v15, %v2747_v0 }
 0x109   :  { %v346_v26 = vrot.slane %v345_v24, 4 }
 0x10a   :  { %v352_v27 = vsel %vm344_vm0, %v342_v25, 0.0 }
 0x10b   :  { %v347_v28 = vadd.f32 %v346_v26, %v345_v24  ;;  %v353_v29 = vrot.slane %v352_v27, 4  ;;  %v555_v24 = vrot.slane %v544_v15, %v2758_v4  ;;  %v1088_v15 = vld [vmem:[%s3267_s10 + $0x310] sm:$0xff] }
 0x10d   :  { %v348_v30 = vrot.slane %v347_v28, 2  ;;  %v354_v31 = vadd.f32 %v353_v29, %v352_v27 }
 0x10f   :  { %v349_v32 = vadd.f32 %v348_v30, %v347_v28  ;;  %v355_v33 = vrot.slane %v354_v31, 2  ;;  %v1115_v28 = vld [vmem:[%s3267_s10 + $0x3e8] sm:$0xff] }
 0x110   :  { %v1099_v30 = vld [vmem:[%s3267_s10 + $0x368] sm:$0xff] }
 0x111   :  { %v350_v34 = vrot.slane %v349_v32, 1  ;;  %v356_v35 = vadd.f32 %v355_v33, %v354_v31 }
 0x113   :  { %v351_v36 = vadd.f32 %v350_v34, %v349_v32  ;;  %v357_v37 = vrot.slane %v356_v35, 1  ;;  %v1114_v32 = vld [vmem:[%s3267_s10 + $0x3e0] sm:$0xff] }
 0x115   :  { %v360_v38 = vmul.f32 0.25, %v351_v36  ;;  %v358_v39 = vadd.f32 %v357_v37, %v356_v35  ;;  %v1098_v35 = vld [vmem:[%s3267_s10 + $0x360] sm:$0xff]  ;;  %v1113_v37 = vld [vmem:[%s3267_s10 + $0x3d8] sm:$0xff] }
 0x117   :  { %v362_v40 = vsub.f32 %v340_v19, %v360_v38  ;;  %v361_v41 = vmul.f32 0.25, %v358_v39  ;;  %v1119_v19 = vcombine.high %v2809_v14, %v2809_v14 }
 0x119   :  { %v364_v42 = vmul.f32 %v362_v40, %v362_v40  ;;  %v363_v43 = vsub.f32 %v342_v25, %v361_v41  ;;  %v1100_v25 = vld [vmem:[%s3267_s10 + $0x370] sm:$0xff] }
 0x11b   :  { %v366_v44 = vsel %vm344_vm0, %v364_v42, 0.0  ;;  %v365_v45 = vmul.f32 %v363_v43, %v363_v43  ;;  %v1112_v42 = vld [vmem:[%s3267_s10 + $0x3d0] sm:$0xff] }
 0x11c   :  { %v367_v46 = vrot.slane %v366_v44, 4 }
 0x11d   :  { %v373_v47 = vsel %vm344_vm0, %v365_v45, 0.0 }
 0x11e   :  { %v368_v48 = vadd.f32 %v367_v46, %v366_v44  ;;  %v374_v49 = vrot.slane %v373_v47, 4  ;;  %v1096_v44 = vld [vmem:[%s3267_s10 + $0x350] sm:$0xff] }
 0x120   :  { %v369_v50 = vrot.slane %v368_v48, 2  ;;  %v375_v51 = vadd.f32 %v374_v49, %v373_v47  ;;  %v1111_v47 = vld [vmem:[%s3267_s10 + $0x3c8] sm:$0xff] }
 0x122   :  { %v370_v52 = vadd.f32 %v369_v50, %v368_v48  ;;  %v376_v53 = vrot.slane %v375_v51, 2  ;;  %v1095_v48 = vld [vmem:[%s3267_s10 + $0x348] sm:$0xff] }
 0x124   :  { %v371_v54 = vrot.slane %v370_v52, 1  ;;  %v377_v55 = vadd.f32 %v376_v53, %v375_v51  ;;  %v1110_v51 = vld [vmem:[%s3267_s10 + $0x3c0] sm:$0xff] }
 0x126   :  { %v372_v56 = vadd.f32 %v371_v54, %v370_v52  ;;  %v378_v57 = vrot.slane %v377_v55, 1  ;;  %v1094_v52 = vld [vmem:[%s3267_s10 + $0x340] sm:$0xff] }
 0x128   :  { %v380_v58 = vmul.f32 0.25, %v372_v56  ;;  %v379_v59 = vadd.f32 %v378_v57, %v377_v55  ;;  %v1109_v55 = vld [vmem:[%s3267_s10 + $0x3b8] sm:$0xff] }
 0x129   :  { %v1093_v56 = vld [vmem:[%s3267_s10 + $0x338] sm:$0xff] }
 0x12a   :  { %v382_v60 = vadd.f32 1e-05, %v380_v58  ;;  %v381_v61 = vmul.f32 0.25, %v379_v59  ;;  %v1108_v59 = vld [vmem:[%s3267_s10 + $0x3b0] sm:$0xff] }
 0x12c   :  { %1676 = vrsqrt.f32 %v382_v60  ;;  %v383_v62 = vadd.f32 1e-05, %v381_v61  ;;  %v1092_v60 = vld [vmem:[%s3267_s10 + $0x330] sm:$0xff] }
 0x12e   :  { %1678 = vrsqrt.f32 %v383_v62 }
 0x139   :  { %v1677_v3 = vpop.eup %1676 }
 0x13a   :  { %v386_v5 = vmul.f32 %v1677_v3, %v362_v40  ;;  %v1097_v40 = vld [vmem:[%s3267_s10 + $0x358] sm:$0xff] }
 0x13b   :  { %v1679_v8 = vpop.eup %1678 }
 0x13c   :  { %v399_v9 = vmul.f32 %v392_v2, %v386_v5  ;;  %v387_v10 = vmul.f32 %v1679_v8, %v363_v43  ;;  %v1106_v5 = vld [vmem:[%s3267_s10 + $0x3a0] sm:$0xff] }
 0x13e   :  { %v400_v12 = vmul.f32 %v396_v6, %v387_v10  ;;  %v412_v13 = vadd.f32 %v405_v7, %v399_v9  ;;  %v1090_v6 = vld [vmem:[%s3267_s10 + $0x320] sm:$0xff]  ;;  %v1105_v9 = vld [vmem:[%s3267_s10 + $0x398] sm:$0xff] }
 0x13f   :  { %v1089_v10 = vld [vmem:[%s3267_s10 + $0x318] sm:$0xff] }
 0x140   :  { %v413_v16 = vadd.f32 %v409_v11, %v400_v12  ;;  %v414_v18 = vmax.f32 %v412_v13, 0.0  ;;  %v1104_v13 = vld [vmem:[%s3267_s10 + $0x390] sm:$0xff] }
 0x142   :  { %v415_v17 = vmax.f32 %v413_v16, 0.0 }
 0x144   :  { %974 = vmatprep.mubr.f32.mxu1 %v415_v17  ;;  %v1406_v23 = vcombine.low %v414_v18, %v415_v17 }
 0x145   :  { %975 = vmatmul.mubr.f32.vlgmr.msra.gmra.mxu1 %v414_v18  ;;  %v1103_v18 = vld [vmem:[%s3267_s10 + $0x388] sm:$0xff] }
 0x146   :  { %v630_v26 = vpop.f32.mrf.mxu0  ;;  %v701_v27 = vpop.f32.mrf.mxu1  ;;  %1562 = vmatpush3.msra.mxu1 %v1101_v21  ;;  %1185 = vmatprep.mubr.f32.mxu1 %v1119_v19  ;;  %1408 = vst [vmem:[#allocation2] sm:$0xff] %v1406_v23  ;;  %v2919_v21 = vld [vmem:[%s3258_s1 + $0x18] sm:$0xff]  ;;  %v1102_v23 = vld [vmem:[%s3267_s10 + $0x380] sm:$0xff] }
 0x147   :  { %v631_v29 = vadd.f32 %v630_v26, %v551_v20  ;;  %1563 = vmatprep.subr.mxu1 %v1116_v22  ;;  %v1087_v20 = vld [vmem:[%s3267_s10 + $0x308] sm:$0xff]  ;;  %v1086_v26 = vld [vmem:[%s3267_s10 + $0x300] sm:$0xff] }
 0x148   :  { %v632_v31 = vpop.f32.mrf.mxu0  ;;  %1564 = vmatpush3.msra.mxu1 %v1100_v25  ;;  %v703_v36 = vpop.f32.mrf.mxu1 }
 0x149   :  { %v702_v33 = vadd.f32 %v701_v27, %v631_v29  ;;  %v633_v34 = vadd.f32 %v632_v31, %v555_v24  ;;  %1565 = vmatprep.subr.mxu1 %v1115_v28  ;;  %v1329_v27 = vld [vmem:[%s3267_s10 + $0x5f8] sm:$0xff]  ;;  %v1331_v28 = vcombine.high %v2919_v21, %v2919_v21 }
 0x14a   :  { %1566 = vmatpush3.msra.mxu1 %v1099_v30  ;;  %v1313_v31 = vld [vmem:[%s3267_s10 + $0x578] sm:$0xff] }
 0x14b   :  { %v706_v38 = vsel %vm344_vm0, %v702_v33, 0.0  ;;  %v704_v39 = vadd.f32 %v703_v36, %v633_v34  ;;  %1567 = vmatprep.subr.mxu1 %v1114_v32  ;;  %v1328_v32 = vld [vmem:[%s3267_s10 + $0x5f0] sm:$0xff]  ;;  %v1327_v36 = vld [vmem:[%s3267_s10 + $0x5e8] sm:$0xff] }
 0x14c   :  { %v707_v41 = vrot.slane %v706_v38, 4  ;;  %1568 = vmatpush3.msra.mxu1 %v1098_v35  ;;  %v1312_v35 = vld [vmem:[%s3267_s10 + $0x570] sm:$0xff] }
 0x14d   :  { %v713_v43 = vsel %vm344_vm0, %v704_v39, 0.0  ;;  %1569 = vmatprep.subr.mxu1 %v1113_v37 }
 0x14e   :  { %v708_v45 = vadd.f32 %v707_v41, %v706_v38  ;;  %v714_v46 = vrot.slane %v713_v43, 4  ;;  %1570 = vmatpush3.msra.mxu1 %v1097_v40 }
 0x14f   :  { %1571 = vmatprep.subr.mxu1 %v1112_v42  ;;  %v1310_v42 = vld [vmem:[%s3267_s10 + $0x560] sm:$0xff] }
 0x150   :  { %v709_v49 = vrot.slane %v708_v45, 2  ;;  %v715_v50 = vadd.f32 %v714_v46, %v713_v43  ;;  %1572 = vmatpush3.msra.mxu1 %v1096_v44  ;;  %v1325_v43 = vld [vmem:[%s3267_s10 + $0x5d8] sm:$0xff] }
 0x151   :  { %1573 = vmatprep.subr.mxu1 %v1111_v47  ;;  %v1309_v46 = vld [vmem:[%s3267_s10 + $0x558] sm:$0xff]  ;;  %v1324_v47 = vld [vmem:[%s3267_s10 + $0x5d0] sm:$0xff] }
 0x152   :  { %v710_v53 = vadd.f32 %v709_v49, %v708_v45  ;;  %v716_v54 = vrot.slane %v715_v50, 2  ;;  %1574 = vmatpush3.msra.mxu1 %v1095_v48 }
 0x153   :  { %1575 = vmatprep.subr.mxu1 %v1110_v51  ;;  %v1323_v51 = vld [vmem:[%s3267_s10 + $0x5c8] sm:$0xff] }
 0x154   :  { %v711_v57 = vrot.slane %v710_v53, 1  ;;  %v717_v58 = vadd.f32 %v716_v54, %v715_v50  ;;  %1576 = vmatpush3.msra.mxu1 %v1094_v52  ;;  %v1308_v50 = vld [vmem:[%s3267_s10 + $0x550] sm:$0xff]  ;;  %v1322_v54 = vld [vmem:[%s3267_s10 + $0x5c0] sm:$0xff] }
 0x155   :  { %1577 = vmatprep.subr.mxu1 %v1109_v55  ;;  %v1306_v55 = vld [vmem:[%s3267_s10 + $0x540] sm:$0xff] }
 0x156   :  { %v712_v61 = vadd.f32 %v711_v57, %v710_v53  ;;  %v718_v62 = vrot.slane %v717_v58, 1  ;;  %1578 = vmatpush3.msra.mxu1 %v1093_v56  ;;  %v1307_v53 = vld [vmem:[%s3267_s10 + $0x548] sm:$0xff]  ;;  %v1321_v56 = vld [vmem:[%s3267_s10 + $0x5b8] sm:$0xff] }
 0x157   :  { %1579 = vmatprep.subr.mxu1 %v1108_v59  ;;  %v1305_v57 = vld [vmem:[%s3267_s10 + $0x538] sm:$0xff]  ;;  %v1304_v59 = vld [vmem:[%s3267_s10 + $0x530] sm:$0xff] }
 0x158   :  { %v720_v2 = vmul.f32 0.25, %v712_v61  ;;  %v719_v3 = vadd.f32 %v718_v62, %v717_v58  ;;  %1580 = vmatpush3.msra.mxu1 %v1092_v60  ;;  %v1320_v58 = vld [vmem:[%s3267_s10 + $0x5b0] sm:$0xff]  ;;  %v1319_v60 = vld [vmem:[%s3267_s10 + $0x5a8] sm:$0xff]  ;;  %v545_v62 = vld [vmem:[%s3265_s8] sm:$0x3] }
 0x159   :  { %1581 = vmatprep.subr.mxu1 %v1107_v63  ;;  %v1303_v61 = vld [vmem:[%s3267_s10 + $0x528] sm:$0xff]  ;;  %v1318_v63 = vld [vmem:[%s3267_s10 + $0x5a0] sm:$0xff] }
 0x15a   :  { %v2889_v7 = vsub.f32 %v702_v33, %v720_v2  ;;  %v721_v8 = vmul.f32 0.25, %v719_v3  ;;  %1582 = vmatpush3.msra.mxu1 %v1091_v1  ;;  %v1302_v1 = vld [vmem:[%s3267_s10 + $0x520] sm:$0xff]  ;;  %v1317_v3 = vld [vmem:[%s3267_s10 + $0x598] sm:$0xff] }
 0x15b   :  { %1583 = vmatprep.subr.mxu1 %v1106_v5  ;;  %v546_v2 = vld [vmem:[%s3266_s9] sm:$0x3]  ;;  %v752_v5 = vrot.slane %v545_v62, %v2747_v0 }
 0x15c   :  { %v724_v11 = vmul.f32 %v2889_v7, %v2889_v7  ;;  %v2899_v12 = vsub.f32 %v704_v39, %v721_v8  ;;  %1584 = vmatpush3.msra.mxu1 %v1090_v6  ;;  %v1311_v39 = vld [vmem:[%s3267_s10 + $0x568] sm:$0xff]  ;;  %v1301_v6 = vld [vmem:[%s3267_s10 + $0x518] sm:$0xff] }
 0x15d   :  { %1585 = vmatprep.subr.mxu1 %v1105_v9  ;;  %v1316_v9 = vld [vmem:[%s3267_s10 + $0x590] sm:$0xff] }
 0x15e   :  { %v726_v16 = vsel %vm344_vm0, %v724_v11, 0.0  ;;  %v725_v17 = vmul.f32 %v2899_v12, %v2899_v12  ;;  %1586 = vmatpush3.msra.mxu1 %v1089_v10  ;;  %v756_v11 = vrot.slane %v545_v62, %v2758_v4  ;;  %v1222_v62 = vld [vmem:[%s3267_s10 + $0x4f0] sm:$0xff] }
 0x15f   :  { %v727_v19 = vrot.slane %v726_v16, 4  ;;  %1587 = vmatprep.subr.mxu1 %v1104_v13  ;;  %v765_v13 = vrot.slane %v546_v2, %v2747_v0  ;;  %v1299_v0 = vld [vmem:[%s3267_s10 + $0x508] sm:$0xff] }
 0x160   :  { %v733_v22 = vsel %vm344_vm0, %v725_v17, 0.0  ;;  %1588 = vmatpush3.msra.mxu1 %v1088_v15  ;;  %v1300_v15 = vld [vmem:[%s3267_s10 + $0x510] sm:$0xff]  ;;  %v1315_v17 = vld [vmem:[%s3267_s10 + $0x588] sm:$0xff] }
 0x161   :  { %v728_v24 = vadd.f32 %v727_v19, %v726_v16  ;;  %v734_v25 = vrot.slane %v733_v22, 4  ;;  %1589 = vmatprep.subr.mxu1 %v1103_v18 }
 0x162   :  { %1590 = vmatpush3.msra.mxu1 %v1087_v20  ;;  %v1314_v20 = vld [vmem:[%s3267_s10 + $0x580] sm:$0xff] }
 0x163   :  { %v729_v29 = vrot.slane %v728_v24, 2  ;;  %v735_v30 = vadd.f32 %v734_v25, %v733_v22  ;;  %1591 = vmatprep.subr.mxu1 %v1102_v23 }
 0x164   :  { %1592 = vmatpush3.msra.mxu1 %v1086_v26 }
 0x165   :  { %v730_v33 = vadd.f32 %v729_v29, %v728_v24  ;;  %v736_v34 = vrot.slane %v735_v30, 2  ;;  %1631 = vmatprep.subr.mxu1 %v1329_v27  ;;  %1186 = vmatmul.mubr.f32.vlgmr.msra.gmra.mxu1 %v2809_v14  ;;  %v1326_v14 = vld [vmem:[%s3267_s10 + $0x5e0] sm:$0xff]  ;;  %v1010_v29 = vld [vmem:[%s3267_s10 + $0x2f0] sm:$0xff] }
 0x166   :  { %1632 = vmatpush3.msra.mxu1 %v1313_v31  ;;  %1397 = vmatprep.mubr.f32.mxu1 %v1331_v28  ;;  %v1298_v24 = vld [vmem:[%s3267_s10 + $0x500] sm:$0xff]  ;;  %v995_v28 = vld [vmem:[%s3267_s10 + $0x278] sm:$0xff]  ;;  %v994_v31 = vld [vmem:[%s3267_s10 + $0x270] sm:$0xff] }
 0x167   :  { %v731_v37 = vrot.slane %v730_v33, 1  ;;  %v737_v38 = vadd.f32 %v736_v34, %v735_v30  ;;  %1633 = vmatprep.subr.mxu1 %v1328_v32  ;;  %v993_v32 = vld [vmem:[%s3267_s10 + $0x268] sm:$0xff]  ;;  %v992_v34 = vld [vmem:[%s3267_s10 + $0x260] sm:$0xff] }
 0x168   :  { %1634 = vmatpush3.msra.mxu1 %v1312_v35  ;;  %v1007_v35 = vld [vmem:[%s3267_s10 + $0x2d8] sm:$0xff] }
 0x169   :  { %v732_v40 = vadd.f32 %v731_v37, %v730_v33  ;;  %v738_v41 = vrot.slane %v737_v38, 1  ;;  %1635 = vmatprep.subr.mxu1 %v1327_v36  ;;  %v1008_v33 = vld [vmem:[%s3267_s10 + $0x2e0] sm:$0xff]  ;;  %v991_v36 = vld [vmem:[%s3267_s10 + $0x258] sm:$0xff]  ;;  %v1006_v37 = vld [vmem:[%s3267_s10 + $0x2d0] sm:$0xff] }
 0x16a   :  { %1636 = vmatpush3.msra.mxu1 %v1311_v39  ;;  %v1005_v39 = vld [vmem:[%s3267_s10 + $0x2c8] sm:$0xff] }
 0x16b   :  { %v740_v44 = vmul.f32 0.25, %v732_v40  ;;  %v739_v45 = vadd.f32 %v738_v41, %v737_v38  ;;  %1637 = vmatprep.subr.mxu1 %v1326_v14  ;;  %v990_v38 = vld [vmem:[%s3267_s10 + $0x250] sm:$0xff]  ;;  %v989_v14 = vld [vmem:[%s3267_s10 + $0x248] sm:$0xff]  ;;  %v1004_v40 = vld [vmem:[%s3267_s10 + $0x2c0] sm:$0xff] }
 0x16c   :  { %1638 = vmatpush3.msra.mxu1 %v1310_v42  ;;  %v988_v41 = vld [vmem:[%s3267_s10 + $0x240] sm:$0xff]  ;;  %v1003_v42 = vld [vmem:[%s3267_s10 + $0x2b8] sm:$0xff] }
 0x16d   :  { %v742_v48 = vadd.f32 1e-05, %v740_v44  ;;  %v741_v49 = vmul.f32 0.25, %v739_v45  ;;  %1639 = vmatprep.subr.mxu1 %v1325_v43  ;;  %v987_v43 = vld [vmem:[%s3267_s10 + $0x238] sm:$0xff]  ;;  %v1002_v44 = vld [vmem:[%s3267_s10 + $0x2b0] sm:$0xff] }
 0x16e   :  { %1640 = vmatpush3.msra.mxu1 %v1309_v46  ;;  %v986_v45 = vld [vmem:[%s3267_s10 + $0x230] sm:$0xff]  ;;  %v1001_v46 = vld [vmem:[%s3267_s10 + $0x2a8] sm:$0xff] }
 0x16f   :  { %1680 = vrsqrt.f32 %v742_v48  ;;  %v743_v52 = vadd.f32 1e-05, %v741_v49  ;;  %1641 = vmatprep.subr.mxu1 %v1324_v47  ;;  %v985_v47 = vld [vmem:[%s3267_s10 + $0x228] sm:$0xff]  ;;  %v1000_v48 = vld [vmem:[%s3267_s10 + $0x2a0] sm:$0xff] }
 0x170   :  { %1642 = vmatpush3.msra.mxu1 %v1308_v50  ;;  %v984_v49 = vld [vmem:[%s3267_s10 + $0x220] sm:$0xff]  ;;  %v999_v50 = vld [vmem:[%s3267_s10 + $0x298] sm:$0xff] }
 0x171   :  { %1682 = vrsqrt.f32 %v743_v52  ;;  %1643 = vmatprep.subr.mxu1 %v1323_v51  ;;  %v983_v51 = vld [vmem:[%s3267_s10 + $0x218] sm:$0xff]  ;;  %v998_v52 = vld [vmem:[%s3267_s10 + $0x290] sm:$0xff] }
 0x172   :  { %1644 = vmatpush3.msra.mxu1 %v1307_v53  ;;  %v982_v53 = vld [vmem:[%s3267_s10 + $0x210] sm:$0xff] }
 0x173   :  { %1645 = vmatprep.subr.mxu1 %v1322_v54  ;;  %v997_v54 = vld [vmem:[%s3267_s10 + $0x288] sm:$0xff] }
 0x174   :  { %1646 = vmatpush3.msra.mxu1 %v1306_v55  ;;  %v981_v55 = vld [vmem:[%s3267_s10 + $0x208] sm:$0xff] }
 0x175   :  { %1647 = vmatprep.subr.mxu1 %v1321_v56  ;;  %v3137_v56 = vld [vmem:[%s3258_s1 + $0x10] sm:$0xff] }
 0x176   :  { %1648 = vmatpush3.msra.mxu1 %v1305_v57  ;;  %v996_v57 = vld [vmem:[%s3267_s10 + $0x280] sm:$0xff] }
 0x177   :  { %1649 = vmatprep.subr.mxu1 %v1320_v58  ;;  %v980_v58 = vld [vmem:[%s3267_s10 + $0x200] sm:$0xff] }
 0x178   :  { %1650 = vmatpush3.msra.mxu1 %v1304_v59  ;;  %v1223_v59 = vld [vmem:[%s3267_s10 + $0x4f8] sm:$0xff] }
 0x179   :  { %1651 = vmatprep.subr.mxu1 %v1319_v60  ;;  %v1225_v60 = vcombine.high %v3137_v56, %v3137_v56 }
 0x17a   :  { %1652 = vmatpush3.msra.mxu1 %v1303_v61  ;;  %v1207_v61 = vld [vmem:[%s3267_s10 + $0x478] sm:$0xff] }
 0x17b   :  { %1653 = vmatprep.subr.mxu1 %v1318_v63  ;;  %v1206_v63 = vld [vmem:[%s3267_s10 + $0x470] sm:$0xff] }
 0x17c   :  { %v1681_v8 = vpop.eup %1680  ;;  %1654 = vmatpush3.msra.mxu1 %v1302_v1  ;;  %v1221_v1 = vld [vmem:[%s3267_s10 + $0x4e8] sm:$0xff] }
 0x17d   :  { %v746_v10 = vmul.f32 %v1681_v8, %v2889_v7  ;;  %1655 = vmatprep.subr.mxu1 %v1317_v3  ;;  %v769_v7 = vrot.slane %v546_v2, %v2758_v4  ;;  %v3042_v4 = vld [vmem:[%s3257_s0 + $0x10] sm:$0xff]  ;;  %v1205_v2 = vld [vmem:[%s3267_s10 + $0x468] sm:$0xff]  ;;  %v1220_v3 = vld [vmem:[%s3267_s10 + $0x4e0] sm:$0xff]  ;;  %s1684_s0 = scalar_lea.vmem %s1430_s17, 128 }
 0x17e   :  { %v1683_v16 = vpop.eup %1682  ;;  %1656 = vmatpush3.msra.mxu1 %v1301_v6  ;;  %v1013_v27 = vcombine.high %v3042_v4, %v3042_v4  ;;  %v1219_v6 = vld [vmem:[%s3267_s10 + $0x4d8] sm:$0xff]  ;;  %p1685_p0 = scmp.ne.s32.totalorder %s1430_s17, %s1684_s0  ;;  %p1690_p2 = scmp.lt.s32.totalorder %s1684_s0, %s1684_s0 }
 0x17f   :  { %v759_v18 = vmul.f32 %v752_v5, %v746_v10  ;;  %v747_v19 = vmul.f32 %v1683_v16, %v2899_v12  ;;  %1657 = vmatprep.subr.mxu1 %v1316_v9  ;;  %v1204_v5 = vld [vmem:[%s3267_s10 + $0x460] sm:$0xff]  ;;  %v1203_v8 = vld [vmem:[%s3267_s10 + $0x458] sm:$0xff]  ;;  %v1218_v9 = vld [vmem:[%s3267_s10 + $0x4d0] sm:$0xff] }
 0x180   :  { %1658 = vmatpush3.msra.mxu1 %v1300_v15  ;;  %v1202_v10 = vld [vmem:[%s3267_s10 + $0x450] sm:$0xff]  ;;  %v1216_v15 = vld [vmem:[%s3267_s10 + $0x4c0] sm:$0xff]  ;;  %p1691_p3 = por %p1690_p2, %p1689_p1 }
 0x181   :  { %v760_v22 = vmul.f32 %v756_v11, %v747_v19  ;;  %v772_v23 = vadd.f32 %v765_v13, %v759_v18  ;;  %1659 = vmatprep.subr.mxu1 %v1315_v17  ;;  %v1217_v11 = vld [vmem:[%s3267_s10 + $0x4c8] sm:$0xff]  ;;  %v1200_v16 = vld [vmem:[%s3267_s10 + $0x440] sm:$0xff]  ;;  %v1215_v17 = vld [vmem:[%s3267_s10 + $0x4b8] sm:$0xff] }
 0x182   :  { %1660 = vmatpush3.msra.mxu1 %v1299_v0  ;;  %v1201_v13 = vld [vmem:[%s3267_s10 + $0x448] sm:$0xff]  ;;  %v1199_v18 = vld [vmem:[%s3267_s10 + $0x438] sm:$0xff]  ;;  %v1214_v19 = vld [vmem:[%s3267_s10 + $0x4b0] sm:$0xff]  ;;  %p1692_p4 = pnand %p1691_p3, %p1685_p0 }
 0x183   :  { %v773_v12 = vadd.f32 %v769_v7, %v760_v22  ;;  %1661 = vmatprep.subr.mxu1 %v1314_v20  ;;  %v774_v26 = vmax.f32 %v772_v23, 0.0  ;;  %v1198_v7 = vld [vmem:[%s3267_s10 + $0x430] sm:$0xff]  ;;  %v1213_v0 = vld [vmem:[%s3267_s10 + $0x4a8] sm:$0xff]  ;;  %v1212_v22 = vld [vmem:[%s3267_s10 + $0x4a0] sm:$0xff] }
 0x184   :  { %1662 = vmatpush3.msra.mxu1 %v1298_v24  ;;  %v1197_v20 = vld [vmem:[%s3267_s10 + $0x428] sm:$0xff]  ;;  %v1196_v23 = vld [vmem:[%s3267_s10 + $0x420] sm:$0xff]  ;;  %v1211_v24 = vld [vmem:[%s3267_s10 + $0x498] sm:$0xff] }
 0x185   :  { %v775_v25 = vmax.f32 %v773_v12, 0.0  ;;  %1398 = vmatmul.mubr.f32.vlgmr.msra.gmra.mxu1 %v2919_v21  ;;  %v1009_v21 = vld [vmem:[%s3267_s10 + $0x2e8] sm:$0xff]  ;;  %v1210_v12 = vld [vmem:[%s3267_s10 + $0x490] sm:$0xff] }
 0x187   :  { %904 = vmatprep.mubr.f32.mxu0 %v775_v25  ;;  %v1411_v30 = vcombine.low %v774_v26, %v775_v25  ;;  %v1194_v25 = vld [vmem:[%s3267_s10 + $0x410] sm:$0xff] }
 0x188   :  { %905 = vmatmul.mubr.f32.vlgmr.msra.gmra.mxu0 %v774_v26  ;;  %v1209_v26 = vld [vmem:[%s3267_s10 + $0x488] sm:$0xff] }
 0x189   :  { %1527 = vmatpush3.msra.mxu0 %v995_v28  ;;  %1079 = vmatprep.mubr.f32.mxu0 %v1013_v27  ;;  %1413 = vst [vmem:[#allocation4] sm:$0xff] %v1411_v30  ;;  %v1193_v27 = vld [vmem:[%s3267_s10 + $0x408] sm:$0xff]  ;;  %v1208_v28 = vld [vmem:[%s3267_s10 + $0x480] sm:$0xff] }
 0x18a   :  { %1528 = vmatprep.subr.mxu0 %v1010_v29  ;;  %v1192_v29 = vld [vmem:[%s3267_s10 + $0x400] sm:$0xff] }
 0x18b   :  { %1529 = vmatpush3.msra.mxu0 %v994_v31 }
 0x18c   :  { %1530 = vmatprep.subr.mxu0 %v1009_v21 }
 0x18d   :  { %1531 = vmatpush3.msra.mxu0 %v993_v32 }
 0x18e   :  { %1532 = vmatprep.subr.mxu0 %v1008_v33 }
 0x18f   :  { %1533 = vmatpush3.msra.mxu0 %v992_v34 }
 0x190   :  { %1534 = vmatprep.subr.mxu0 %v1007_v35 }
 0x191   :  { %1535 = vmatpush3.msra.mxu0 %v991_v36 }
 0x192   :  { %1536 = vmatprep.subr.mxu0 %v1006_v37 }
 0x193   :  { %1537 = vmatpush3.msra.mxu0 %v990_v38 }
 0x194   :  { %1538 = vmatprep.subr.mxu0 %v1005_v39 }
 0x195   :  { %1539 = vmatpush3.msra.mxu0 %v989_v14 }
 0x196   :  { %1540 = vmatprep.subr.mxu0 %v1004_v40 }
 0x197   :  { %1541 = vmatpush3.msra.mxu0 %v988_v41 }
 0x198   :  { %1542 = vmatprep.subr.mxu0 %v1003_v42 }
 0x199   :  { %1543 = vmatpush3.msra.mxu0 %v987_v43 }
 0x19a   :  { %1544 = vmatprep.subr.mxu0 %v1002_v44 }
 0x19b   :  { %1545 = vmatpush3.msra.mxu0 %v986_v45 }
 0x19c   :  { %1546 = vmatprep.subr.mxu0 %v1001_v46 }
 0x19d   :  { %1547 = vmatpush3.msra.mxu0 %v985_v47 }
 0x19e   :  { %1548 = vmatprep.subr.mxu0 %v1000_v48 }
 0x19f   :  { %1549 = vmatpush3.msra.mxu0 %v984_v49 }
 0x1a0   :  { %1550 = vmatprep.subr.mxu0 %v999_v50 }
 0x1a1   :  { %1551 = vmatpush3.msra.mxu0 %v983_v51 }
 0x1a2   :  { %1552 = vmatprep.subr.mxu0 %v998_v52 }
 0x1a3   :  { %1553 = vmatpush3.msra.mxu0 %v982_v53 }
 0x1a4   :  { %1554 = vmatprep.subr.mxu0 %v997_v54 }
 0x1a5   :  { %1555 = vmatpush3.msra.mxu0 %v981_v55 }
 0x1a6   :  { %1556 = vmatprep.subr.mxu0 %v996_v57 }
 0x1a7   :  { %1557 = vmatpush3.msra.mxu0 %v980_v58 }
 0x1a8   :  { %1080 = vmatmul.mubr.f32.vlgmr.msra.gmra.mxu0 %v3042_v4  ;;  %1596 = vmatprep.subr.mxu0 %v1223_v59  ;;  %v1195_v4 = vld [vmem:[%s3267_s10 + $0x418] sm:$0xff] }
 0x1a9   :  { %1597 = vmatpush3.msra.mxu0 %v1207_v61  ;;  %1291 = vmatprep.mubr.f32.mxu0 %v1225_v60 }
 0x1aa   :  { %1598 = vmatprep.subr.mxu0 %v1222_v62 }
 0x1ab   :  { %1599 = vmatpush3.msra.mxu0 %v1206_v63 }
 0x1ac   :  { %1600 = vmatprep.subr.mxu0 %v1221_v1 }
 0x1ad   :  { %1601 = vmatpush3.msra.mxu0 %v1205_v2 }
 0x1ae   :  { %1602 = vmatprep.subr.mxu0 %v1220_v3 }
 0x1af   :  { %1603 = vmatpush3.msra.mxu0 %v1204_v5 }
 0x1b0   :  { %1604 = vmatprep.subr.mxu0 %v1219_v6 }
 0x1b1   :  { %1605 = vmatpush3.msra.mxu0 %v1203_v8 }
 0x1b2   :  { %1606 = vmatprep.subr.mxu0 %v1218_v9 }
 0x1b3   :  { %1607 = vmatpush3.msra.mxu0 %v1202_v10 }
 0x1b4   :  { %1608 = vmatprep.subr.mxu0 %v1217_v11 }
 0x1b5   :  { %1609 = vmatpush3.msra.mxu0 %v1201_v13 }
 0x1b6   :  { %1610 = vmatprep.subr.mxu0 %v1216_v15 }
 0x1b7   :  { %1611 = vmatpush3.msra.mxu0 %v1200_v16 }
 0x1b8   :  { %1612 = vmatprep.subr.mxu0 %v1215_v17 }
 0x1b9   :  { %1613 = vmatpush3.msra.mxu0 %v1199_v18 }
 0x1ba   :  { %1614 = vmatprep.subr.mxu0 %v1214_v19 }
 0x1bb   :  { %1615 = vmatpush3.msra.mxu0 %v1198_v7 }
 0x1bc   :  { %1616 = vmatprep.subr.mxu0 %v1213_v0 }
 0x1bd   :  { %1617 = vmatpush3.msra.mxu0 %v1197_v20 }
 0x1be   :  { %1618 = vmatprep.subr.mxu0 %v1212_v22 }
 0x1bf   :  { %1619 = vmatpush3.msra.mxu0 %v1196_v23 }
 0x1c0   :  { %1620 = vmatprep.subr.mxu0 %v1211_v24 }
 0x1c1   :  { %1621 = vmatpush3.msra.mxu0 %v1195_v4 }
 0x1c2   :  { %1622 = vmatprep.subr.mxu0 %v1210_v12 }
 0x1c3   :  { %1623 = vmatpush3.msra.mxu0 %v1194_v25 }
 0x1c4   :  { %1624 = vmatprep.subr.mxu0 %v1209_v26 }
 0x1c5   :  { %1625 = vmatpush3.msra.mxu0 %v1193_v27 }
 0x1c6   :  { %1626 = vmatprep.subr.mxu0 %v1208_v28 }
 0x1c7   :  { %1627 = vmatpush3.msra.mxu0 %v1192_v29 }
 0x1c8   :  { %1292 = vmatmul.mubr.f32.vlgmr.msra.gmra.mxu0 %v3137_v56 }
 0x1c9   :  { %1695 = shalt.err (!%p1692_p4)
}
 0x1ca   :  { %1432 = dma.vmem_to_hbm [thread:$0]  %s1430_s17, 128, %s3269_s12, [#allocation3]  }
 0x1cb   :  { %s1704_s20 = scalar_lea.vmem %s1440_s19, 128  ;;  %p1709_p6 = scmp.lt.s32.totalorder %s1440_s19, %s1440_s19 }
 0x1cc   :  { %p1705_p5 = scmp.ne.s32.totalorder %s1440_s19, %s1704_s20  ;;  %p1710_p7 = scmp.lt.s32.totalorder %s1704_s20, %s1704_s20 }
 0x1ce   :  { %p1711_p8 = por %p1710_p7, %p1709_p6 }
 0x1d0   :  { %p1712_p9 = pnand %p1711_p8, %p1705_p5 }
 0x1d2   :  { %1715 = shalt.err (!%p1712_p9)
}
 0x1d3   :  { %1442 = dma.vmem_to_hbm [thread:$0]  %s1440_s19, 128, %s3270_s13, [#allocation5]   ;;  %v1455_v50 = vld [vmem:[%s3268_s11] ss:$0 sm:$0xff] }
 0x205   :  { %v1523_v31 = vpop.f32.mrf.mxu1 }
 0x207   :  { %v1524_v33 = vpop.f32.mrf.mxu1 }
 0x208   :  { %v1525_v37 = vadd.f32 %v1524_v33, %v1523_v31 }
 0x225   :  { %v1593_v34 = vpop.f32.mrf.mxu1 }
 0x227   :  { %v1594_v39 = vpop.f32.mrf.mxu1 }
 0x228   :  { %v1595_v42 = vadd.f32 %v1594_v39, %v1593_v34 }
 0x245   :  { %v1663_v40 = vpop.f32.mrf.mxu1 }
 0x247   :  { %v1664_v45 = vpop.f32.mrf.mxu1 }
 0x248   :  { %v1488_v30 = vpop.f32.mrf.mxu0  ;;  %v1665_v49 = vadd.f32 %v1664_v45, %v1663_v40 }
 0x24a   :  { %v1489_v21 = vpop.f32.mrf.mxu0 }
 0x24b   :  { %v1490_v36 = vadd.f32 %v1489_v21, %v1488_v30 }
 0x24d   :  { %v977_v14 = vadd.f32 %v1525_v37, %v1490_v36 }
 0x268   :  { %v1558_v32 = vpop.f32.mrf.mxu0 }
 0x26a   :  { %v1559_v35 = vpop.f32.mrf.mxu0 }
 0x26b   :  { %v1560_v38 = vadd.f32 %v1559_v35, %v1558_v32 }
 0x26d   :  { %v1085_v41 = vadd.f32 %v1560_v38, %v977_v14 }
 0x26f   :  { %v1191_v46 = vadd.f32 %v1595_v42, %v1085_v41 }
 0x288   :  { %v1628_v43 = vpop.f32.mrf.mxu0 }
 0x28a   :  { %v1629_v44 = vpop.f32.mrf.mxu0 }
 0x28b   :  { %v1630_v47 = vadd.f32 %v1629_v44, %v1628_v43 }
 0x28d   :  { %v1297_v48 = vadd.f32 %v1630_v47, %v1191_v46 }
 0x28f   :  { %v1403_v51 = vadd.f32 %v1665_v49, %v1297_v48 }
 0x291   :  { %v1421_v52 = vadd.f32 %v1455_v50, %v1403_v51 }
 0x293   :  { %1422 = vst [vmem:[%s3271_s14] sm:$0xf] %v1421_v52 }
 0x294   :  { %1724 = dma.done.wait [#allocation3], 128  }
 0x295   :  { %1725 = vsyncadd [#allocation3], 4294967168 }
 0x296   :  { %1726 = dma.done.wait [#allocation5], 128  }
 0x297   :  { %1727 = vsyncadd [#allocation5], 4294967168 }
 0x298   :  { %1453 = vsyncpa [#allocation3], 1 }
 0x299   :  { %1454 = vsyncpa [#allocation5], 1 }

// kernel: discomkd_forward.4
= control target key start
LH: loop header
LB: loop body
LE: loop exit
PB: predicated region body
PF: predicated region fallthrough
CT: control target
= control target key end

     0   :  { %v5883_v3 = vmov 0.0   ;;  %vm97_vm0 = vcmask 326656   ;;  %vm1053_vm1 = vcmask 654336   ;;  %vm1313_vm2 = vcmask 523264   ;;  %s5863_s1 = inlined_call_operand.vmem [shape: f32[5,40,192], index: 1, kind: input, shape index: {}]   ;;  %s5864_s0 = inlined_call_operand.vmem [shape: f32[84,40], index: 0, kind: input, shape index: {}]   ;;  %s5865_s5 = inlined_call_operand.vmem [shape: f32[192,96], index: 5, kind: input, shape index: {}]   ;;  %s5866_s2 = inlined_call_operand.vmem [shape: f32[1,192], index: 2, kind: input, shape index: {}]   ;;  %s5867_s3 = inlined_call_operand.vmem [shape: f32[36,80], index: 3, kind: input, shape index: {}]   ;;  %s5868_s4 = inlined_call_operand.vmem [shape: f32[36,80], index: 4, kind: input, shape index: {}]   ;;  %s5869_s6 = inlined_call_operand.vmem [shape: f32[192,96], index: 6, kind: input, shape index: {}]   ;;  %s5870_s7 = inlined_call_operand.vmem [shape: f32[5,96,128], index: 7, kind: input, shape index: {}]   ;;  %s5871_s8 = inlined_call_operand.vmem [shape: f32[1,128], index: 8, kind: input, shape index: {}]   ;;  %s5872_s9 = inlined_call_operand.vmem [shape: f32[8,32], index: 9, kind: input, shape index: {}]   ;;  %s5873_s10 = inlined_call_operand.vmem [shape: f32[8,32], index: 10, kind: input, shape index: {}]   ;;  %s5874_s11 = inlined_call_operand.vmem [shape: f32[128,64], index: 11, kind: input, shape index: {}]   ;;  %s5875_s12 = inlined_call_operand.vmem [shape: f32[128,64], index: 12, kind: input, shape index: {}]   ;;  %s5876_s14 = inlined_call_operand.vmem [shape: f32[4,8], index: 14, kind: input, shape index: {}]   ;;  %s5877_s13 = inlined_call_operand.vmem [shape: f32[4,8], index: 13, kind: input, shape index: {}]   ;;  %s5878_s15 = inlined_call_operand.vmem [shape: f32[2,64,1024], index: 15, kind: input, shape index: {}]   ;;  %s5879_s16 = inlined_call_operand.vmem [shape: f32[1,1024], index: 16, kind: input, shape index: {}]   ;;  %s5880_s17 = inlined_call_operand.vmem [shape: f32[4,1024], index: 17, kind: output, shape index: {}]  }
   0x1   :  { %5885 = sst [smem:[#allocation23_spill]] %s5863_s1  ;;  %192 = vmatprep.mubr.f32.mxu0 %v5883_v3  ;;  %347 = vmatprep.mubr.f32.mxu1 %v5883_v3  ;;  %vm1538_vm3 = vcmask 785408   ;;  %vm1543_vm4 = vcmask 781312   ;;  %vm4036_vm5 = vmmov 0   ;;  %vm2142_vm6 = vcmask 261120  }
   0x2   :  { %5886 = sst [smem:[#allocation24_spill]] %s5864_s0  ;;  %vm2465_vm7 = vcmask 64512  }
   0x3   :  { %s5887_s26 = sld [smem:[#allocation23_spill]] }
   0x4   :  { %s5888_s24 = sld [smem:[#allocation24_spill]] }
   0x9   :  { %v3407_v0 = vld [vmem:[%s5887_s26 + $0x98] sm:$0xff]  ;;  %v75_v1 = vld [vmem:[%s5887_s26 + $0x48] sm:$0xff]  ;;  %v3406_v2 = vld [vmem:[%s5887_s26 + $0x90] sm:$0xff] }
   0xa   :  { %150 = vmatprep.subr.mxu0 %v3407_v0  ;;  %305 = vmatprep.subr.mxu1 %v75_v1  ;;  %v74_v4 = vld [vmem:[%s5887_s26 + $0x40] sm:$0xff]  ;;  %v3405_v5 = vld [vmem:[%s5887_s26 + $0x88] sm:$0xff]  ;;  %v73_v6 = vld [vmem:[%s5887_s26 + $0x38] sm:$0xff] }
   0xb   :  { %151 = vmatpush1.msra.mxu0 %v3406_v2  ;;  %306 = vmatpush1.msra.mxu1 %v74_v4  ;;  %v3404_v7 = vld [vmem:[%s5887_s26 + $0x80] sm:$0xff]  ;;  %v72_v8 = vld [vmem:[%s5887_s26 + $0x30] sm:$0xff]  ;;  %v3403_v9 = vld [vmem:[%s5887_s26 + $0x78] sm:$0xff] }
   0xc   :  { %152 = vmatprep.subr.mxu0 %v3405_v5  ;;  %307 = vmatprep.subr.mxu1 %v73_v6  ;;  %v71_v10 = vld [vmem:[%s5887_s26 + $0x28] sm:$0xff]  ;;  %v3402_v11 = vld [vmem:[%s5887_s26 + $0x70] sm:$0xff]  ;;  %v70_v12 = vld [vmem:[%s5887_s26 + $0x20] sm:$0xff] }
   0xd   :  { %153 = vmatpush1.msra.mxu0 %v3404_v7  ;;  %308 = vmatpush1.msra.mxu1 %v72_v8  ;;  %v3401_v13 = vld [vmem:[%s5887_s26 + $0x68] sm:$0xff]  ;;  %v69_v14 = vld [vmem:[%s5887_s26 + $0x18] sm:$0xff]  ;;  %v3400_v15 = vld [vmem:[%s5887_s26 + $0x60] sm:$0xff] }
   0xe   :  { %154 = vmatprep.subr.mxu0 %v3403_v9  ;;  %309 = vmatprep.subr.mxu1 %v71_v10  ;;  %v68_v16 = vld [vmem:[%s5887_s26 + $0x10] sm:$0xff]  ;;  %v3399_v17 = vld [vmem:[%s5887_s26 + $0x58] sm:$0xff]  ;;  %v67_v18 = vld [vmem:[%s5887_s26 + $0x8] sm:$0xff] }
   0xf   :  { %155 = vmatpush1.msra.mxu0 %v3402_v11  ;;  %310 = vmatpush1.msra.mxu1 %v70_v12  ;;  %v3398_v19 = vld [vmem:[%s5887_s26 + $0x50] sm:$0xff]  ;;  %v66_v20 = vld [vmem:[%s5887_s26] sm:$0xff]  ;;  %v3437_v23 = vld [vmem:[%s5887_s26 + $0xe8] sm:$0xff] }
  0x10   :  { %156 = vmatprep.subr.mxu0 %v3401_v13  ;;  %311 = vmatprep.subr.mxu1 %v69_v14  ;;  %v76_v21 = vld [vmem:[%s5888_s24 + $0x1] sm:$0xff]  ;;  %v77_v25 = vld [vmem:[%s5888_s24 + $0x9] sm:$0xff]  ;;  %v3435_v27 = vld [vmem:[%s5887_s26 + $0xd8] sm:$0xff] }
  0x11   :  { %157 = vmatpush1.msra.mxu0 %v3400_v15  ;;  %312 = vmatpush1.msra.mxu1 %v68_v16  ;;  %v56_v22 = vld [vmem:[%s5888_s24] sm:$0xff]  ;;  %v57_v26 = vld [vmem:[%s5888_s24 + $0x8] sm:$0xff]  ;;  %v3457_v28 = vld [vmem:[%s5887_s26 + $0x138] sm:$0xff] }
  0x12   :  { %158 = vmatprep.subr.mxu0 %v3399_v17  ;;  %313 = vmatprep.subr.mxu1 %v67_v18  ;;  %v3436_v24 = vld [vmem:[%s5887_s26 + $0xe0] sm:$0xff]  ;;  %v3434_v29 = vld [vmem:[%s5887_s26 + $0xd0] sm:$0xff]  ;;  %v3433_v33 = vld [vmem:[%s5887_s26 + $0xc8] sm:$0xff] }
  0x13   :  { %159 = vmatpush1.msra.mxu0 %v3398_v19  ;;  %314 = vmatpush1.msra.mxu1 %v66_v20  ;;  %v3456_v30 = vld [vmem:[%s5887_s26 + $0x130] sm:$0xff]  ;;  %v3455_v34 = vld [vmem:[%s5887_s26 + $0x128] sm:$0xff]  ;;  %v3432_v35 = vld [vmem:[%s5887_s26 + $0xc0] sm:$0xff] }
  0x14   :  { %3408 = vmatmul.mubr.msk.f32.vlgmr.msra.gmra.mxu0 %vm97_vm0, %v76_v21  ;;  %3418 = vmatmul.mubr.msk.f32.vlgmr.msra.gmra.mxu1 %vm97_vm0, %v56_v22  ;;  %v78_v31 = vld [vmem:[%s5888_s24 + $0x11] sm:$0xff]  ;;  %v3454_v36 = vld [vmem:[%s5887_s26 + $0x120] sm:$0xff]  ;;  %v3429_v45 = vld [vmem:[%s5887_s26 + $0xa8] sm:$0xff] }
  0x15   :  { %198 = vmatprep.mubr.f32.mxu0 %v5883_v3  ;;  %353 = vmatprep.mubr.f32.mxu1 %v5883_v3  ;;  %v58_v32 = vld [vmem:[%s5888_s24 + $0x10] sm:$0xff]  ;;  %v79_v37 = vld [vmem:[%s5888_s24 + $0x19] sm:$0xff]  ;;  %v80_v43 = vld [vmem:[%s5888_s24 + $0x21] sm:$0xff] }
  0x16   :  { %481 = vmatprep.subr.mxu0 %v3437_v23  ;;  %677 = vmatprep.subr.mxu1 %v3457_v28  ;;  %v59_v38 = vld [vmem:[%s5888_s24 + $0x18] sm:$0xff]  ;;  %v3430_v41 = vld [vmem:[%s5887_s26 + $0xb0] sm:$0xff]  ;;  %v60_v44 = vld [vmem:[%s5888_s24 + $0x20] sm:$0xff] }
  0x17   :  { %482 = vmatpush1.msra.mxu0 %v3436_v24  ;;  %678 = vmatpush1.msra.mxu1 %v3456_v30  ;;  %v3431_v39 = vld [vmem:[%s5887_s26 + $0xb8] sm:$0xff]  ;;  %v3452_v42 = vld [vmem:[%s5887_s26 + $0x110] sm:$0xff]  ;;  %v3451_v46 = vld [vmem:[%s5887_s26 + $0x108] sm:$0xff] }
  0x18   :  { %3409 = vmatmul.mubr.msk.f32.gmra.mxu0 %vm97_vm0, %v77_v25  ;;  %3419 = vmatmul.mubr.msk.f32.gmra.mxu1 %vm97_vm0, %v57_v26  ;;  %v3453_v40 = vld [vmem:[%s5887_s26 + $0x118] sm:$0xff]  ;;  %v3428_v47 = vld [vmem:[%s5887_s26 + $0xa0] sm:$0xff]  ;;  %v81_v49 = vld [vmem:[%s5888_s24 + $0x29] sm:$0xff] }
  0x19   :  { %204 = vmatprep.mubr.f32.mxu0 %v5883_v3  ;;  %359 = vmatprep.mubr.f32.mxu1 %v5883_v3  ;;  %v3450_v48 = vld [vmem:[%s5887_s26 + $0x100] sm:$0xff]  ;;  %v61_v50 = vld [vmem:[%s5888_s24 + $0x28] sm:$0xff]  ;;  %v3449_v51 = vld [vmem:[%s5887_s26 + $0xf8] sm:$0xff] }
  0x1a   :  { %483 = vmatprep.subr.mxu0 %v3435_v27  ;;  %679 = vmatprep.subr.mxu1 %v3455_v34  ;;  %v3477_v52 = vld [vmem:[%s5887_s26 + $0x188] sm:$0xff]  ;;  %v3448_v53 = vld [vmem:[%s5887_s26 + $0xf0] sm:$0xff]  ;;  %v83_v56 = vld [vmem:[%s5888_s24 + $0x39] sm:$0xff] }
  0x1b   :  { %484 = vmatpush1.msra.mxu0 %v3434_v29  ;;  %680 = vmatpush1.msra.mxu1 %v3454_v36  ;;  %v82_v54 = vld [vmem:[%s5888_s24 + $0x31] sm:$0xff]  ;;  %v84_v58 = vld [vmem:[%s5888_s24 + $0x41] sm:$0xff]  ;;  %v85_v60 = vld [vmem:[%s5888_s24 + $0x49] sm:$0xff] }
  0x1c   :  { %3410 = vmatmul.mubr.msk.f32.gmra.mxu0 %vm97_vm0, %v78_v31  ;;  %3420 = vmatmul.mubr.msk.f32.gmra.mxu1 %vm97_vm0, %v58_v32  ;;  %v62_v55 = vld [vmem:[%s5888_s24 + $0x30] sm:$0xff]  ;;  %v63_v57 = vld [vmem:[%s5888_s24 + $0x38] sm:$0xff]  ;;  %v64_v59 = vld [vmem:[%s5888_s24 + $0x40] sm:$0xff] }
  0x1d   :  { %210 = vmatprep.mubr.f32.mxu0 %v5883_v3  ;;  %365 = vmatprep.mubr.f32.mxu1 %v5883_v3  ;;  %v65_v61 = vld [vmem:[%s5888_s24 + $0x48] sm:$0xff]  ;;  %v3476_v0 = vld [vmem:[%s5887_s26 + $0x180] sm:$0xff]  ;;  %v3475_v1 = vld [vmem:[%s5887_s26 + $0x178] sm:$0xff] }
  0x1e   :  { %485 = vmatprep.subr.mxu0 %v3433_v33  ;;  %681 = vmatprep.subr.mxu1 %v3453_v40  ;;  %v408_v62 = vld [vmem:[%s5888_s24 + $0x2] sm:$0xff]  ;;  %v409_v2 = vld [vmem:[%s5888_s24 + $0xa] sm:$0xff]  ;;  %v410_v7 = vld [vmem:[%s5888_s24 + $0x12] sm:$0xff] }
  0x1f   :  { %486 = vmatpush1.msra.mxu0 %v3432_v35  ;;  %682 = vmatpush1.msra.mxu1 %v3452_v42  ;;  %v604_v63 = vld [vmem:[%s5888_s24 + $0x3] sm:$0xff]  ;;  %v605_v4 = vld [vmem:[%s5888_s24 + $0xb] sm:$0xff]  ;;  %v606_v8 = vld [vmem:[%s5888_s24 + $0x13] sm:$0xff] }
  0x20   :  { %3411 = vmatmul.mubr.msk.f32.gmra.mxu0 %vm97_vm0, %v79_v37  ;;  %3421 = vmatmul.mubr.msk.f32.gmra.mxu1 %vm97_vm0, %v59_v38  ;;  %v3474_v5 = vld [vmem:[%s5887_s26 + $0x170] sm:$0xff]  ;;  %v3473_v6 = vld [vmem:[%s5887_s26 + $0x168] sm:$0xff]  ;;  %v3472_v9 = vld [vmem:[%s5887_s26 + $0x160] sm:$0xff] }
  0x21   :  { %216 = vmatprep.mubr.f32.mxu0 %v5883_v3  ;;  %371 = vmatprep.mubr.f32.mxu1 %v5883_v3  ;;  %v3471_v10 = vld [vmem:[%s5887_s26 + $0x158] sm:$0xff]  ;;  %v3470_v13 = vld [vmem:[%s5887_s26 + $0x150] sm:$0xff]  ;;  %v3469_v14 = vld [vmem:[%s5887_s26 + $0x148] sm:$0xff] }
  0x22   :  { %487 = vmatprep.subr.mxu0 %v3431_v39  ;;  %683 = vmatprep.subr.mxu1 %v3451_v46  ;;  %v411_v11 = vld [vmem:[%s5888_s24 + $0x1a] sm:$0xff]  ;;  %v412_v15 = vld [vmem:[%s5888_s24 + $0x22] sm:$0xff]  ;;  %v413_v18 = vld [vmem:[%s5888_s24 + $0x2a] sm:$0xff] }
  0x23   :  { %488 = vmatpush1.msra.mxu0 %v3430_v41  ;;  %684 = vmatpush1.msra.mxu1 %v3450_v48  ;;  %v607_v12 = vld [vmem:[%s5888_s24 + $0x1b] sm:$0xff]  ;;  %v608_v16 = vld [vmem:[%s5888_s24 + $0x23] sm:$0xff]  ;;  %v609_v19 = vld [vmem:[%s5888_s24 + $0x2b] sm:$0xff] }
  0x24   :  { %3412 = vmatmul.mubr.msk.f32.gmra.mxu0 %vm97_vm0, %v80_v43  ;;  %3422 = vmatmul.mubr.msk.f32.gmra.mxu1 %vm97_vm0, %v60_v44  ;;  %v3468_v17 = vld [vmem:[%s5887_s26 + $0x140] sm:$0xff]  ;;  %v414_v20 = vld [vmem:[%s5888_s24 + $0x32] sm:$0xff]  ;;  %v417_v26 = vld [vmem:[%s5888_s24 + $0x4a] sm:$0xff] }
  0x25   :  { %222 = vmatprep.mubr.f32.mxu0 %v5883_v3  ;;  %377 = vmatprep.mubr.f32.mxu1 %v5883_v3  ;;  %v610_v21 = vld [vmem:[%s5888_s24 + $0x33] sm:$0xff]  ;;  %v611_v23 = vld [vmem:[%s5888_s24 + $0x3b] sm:$0xff]  ;;  %v612_v25 = vld [vmem:[%s5888_s24 + $0x43] sm:$0xff] }
  0x26   :  { %489 = vmatprep.subr.mxu0 %v3429_v45  ;;  %685 = vmatprep.subr.mxu1 %v3449_v51  ;;  %v415_v22 = vld [vmem:[%s5888_s24 + $0x3a] sm:$0xff]  ;;  %v416_v24 = vld [vmem:[%s5888_s24 + $0x42] sm:$0xff]  ;;  %v613_v27 = vld [vmem:[%s5888_s24 + $0x4b] sm:$0xff] }
  0x27   :  { %490 = vmatpush1.msra.mxu0 %v3428_v47  ;;  %686 = vmatpush1.msra.mxu1 %v3448_v53  ;;  %v800_v28 = vld [vmem:[%s5888_s24 + $0x4] sm:$0xff]  ;;  %v801_v29 = vld [vmem:[%s5888_s24 + $0xc] sm:$0xff]  ;;  %v802_v30 = vld [vmem:[%s5888_s24 + $0x14] sm:$0xff] }
  0x28   :  { %3413 = vmatmul.mubr.msk.f32.gmra.mxu0 %vm97_vm0, %v81_v49  ;;  %3423 = vmatmul.mubr.msk.f32.gmra.mxu1 %vm97_vm0, %v61_v50  ;;  %v803_v31 = vld [vmem:[%s5888_s24 + $0x1c] sm:$0xff]  ;;  %v804_v32 = vld [vmem:[%s5888_s24 + $0x24] sm:$0xff]  ;;  %v805_v33 = vld [vmem:[%s5888_s24 + $0x2c] sm:$0xff] }
  0x29   :  { %228 = vmatprep.mubr.f32.mxu0 %v5883_v3  ;;  %383 = vmatprep.mubr.f32.mxu1 %v5883_v3  ;;  %v806_v34 = vld [vmem:[%s5888_s24 + $0x34] sm:$0xff]  ;;  %v807_v35 = vld [vmem:[%s5888_s24 + $0x3c] sm:$0xff]  ;;  %v808_v36 = vld [vmem:[%s5888_s24 + $0x44] sm:$0xff] }
  0x2a   :  { %873 = vmatprep.subr.mxu0 %v3477_v52  ;;  %v809_v37 = vld [vmem:[%s5888_s24 + $0x4c] sm:$0xff] }
  0x2c   :  { %3414 = vmatmul.mubr.msk.f32.gmra.mxu0 %vm97_vm0, %v82_v54  ;;  %3424 = vmatmul.mubr.msk.f32.gmra.mxu1 %vm97_vm0, %v62_v55 }
  0x2d   :  { %234 = vmatprep.mubr.f32.mxu0 %v5883_v3  ;;  %389 = vmatprep.mubr.f32.mxu1 %v5883_v3 }
  0x30   :  { %3415 = vmatmul.mubr.msk.f32.gmra.mxu0 %vm97_vm0, %v83_v56  ;;  %3425 = vmatmul.mubr.msk.f32.gmra.mxu1 %vm97_vm0, %v63_v57 }
  0x31   :  { %240 = vmatprep.mubr.f32.mxu0 %v5883_v3  ;;  %395 = vmatprep.mubr.f32.mxu1 %v5883_v3 }
  0x34   :  { %3416 = vmatmul.mubr.msk.f32.gmra.mxu0 %vm97_vm0, %v84_v58  ;;  %3426 = vmatmul.mubr.msk.f32.gmra.mxu1 %vm97_vm0, %v64_v59 }
  0x35   :  { %246 = vmatprep.mubr.f32.mxu0 %v5883_v3  ;;  %401 = vmatprep.mubr.f32.mxu1 %v5883_v3 }
  0x38   :  { %3417 = vmatmul.mubr.msk.f32.gmra.mxu0 %vm97_vm0, %v85_v60  ;;  %3427 = vmatmul.mubr.msk.f32.gmra.mxu1 %vm97_vm0, %v65_v61 }
  0x39   :  { %523 = vmatprep.mubr.f32.mxu0 %v5883_v3  ;;  %719 = vmatprep.mubr.f32.mxu1 %v5883_v3 }
  0x3c   :  { %3438 = vmatmul.mubr.msk.f32.vlgmr.msra.gmra.mxu0 %vm97_vm0, %v408_v62  ;;  %3458 = vmatmul.mubr.msk.f32.vlgmr.msra.gmra.mxu1 %vm97_vm0, %v604_v63 }
  0x3d   :  { %529 = vmatprep.mubr.f32.mxu0 %v5883_v3  ;;  %725 = vmatprep.mubr.f32.mxu1 %v5883_v3 }
  0x3e   :  { %874 = vmatpush1.msra.mxu0 %v3476_v0 }
  0x3f   :  { %875 = vmatprep.subr.mxu0 %v3475_v1 }
  0x40   :  { %3439 = vmatmul.mubr.msk.f32.gmra.mxu0 %vm97_vm0, %v409_v2  ;;  %3459 = vmatmul.mubr.msk.f32.gmra.mxu1 %vm97_vm0, %v605_v4 }
  0x41   :  { %535 = vmatprep.mubr.f32.mxu0 %v5883_v3  ;;  %731 = vmatprep.mubr.f32.mxu1 %v5883_v3 }
  0x42   :  { %876 = vmatpush1.msra.mxu0 %v3474_v5 }
  0x43   :  { %877 = vmatprep.subr.mxu0 %v3473_v6 }
  0x44   :  { %3440 = vmatmul.mubr.msk.f32.gmra.mxu0 %vm97_vm0, %v410_v7  ;;  %3460 = vmatmul.mubr.msk.f32.gmra.mxu1 %vm97_vm0, %v606_v8 }
  0x45   :  { %541 = vmatprep.mubr.f32.mxu0 %v5883_v3  ;;  %737 = vmatprep.mubr.f32.mxu1 %v5883_v3 }
  0x46   :  { %878 = vmatpush1.msra.mxu0 %v3472_v9 }
  0x47   :  { %879 = vmatprep.subr.mxu0 %v3471_v10 }
  0x48   :  { %3441 = vmatmul.mubr.msk.f32.gmra.mxu0 %vm97_vm0, %v411_v11  ;;  %3461 = vmatmul.mubr.msk.f32.gmra.mxu1 %vm97_vm0, %v607_v12 }
  0x49   :  { %547 = vmatprep.mubr.f32.mxu0 %v5883_v3  ;;  %743 = vmatprep.mubr.f32.mxu1 %v5883_v3 }
  0x4a   :  { %880 = vmatpush1.msra.mxu0 %v3470_v13 }
  0x4b   :  { %881 = vmatprep.subr.mxu0 %v3469_v14 }
  0x4c   :  { %3442 = vmatmul.mubr.msk.f32.gmra.mxu0 %vm97_vm0, %v412_v15  ;;  %3462 = vmatmul.mubr.msk.f32.gmra.mxu1 %vm97_vm0, %v608_v16 }
  0x4d   :  { %553 = vmatprep.mubr.f32.mxu0 %v5883_v3  ;;  %749 = vmatprep.mubr.f32.mxu1 %v5883_v3 }
  0x4e   :  { %882 = vmatpush1.msra.mxu0 %v3468_v17 }
  0x4f   :  { %1329 = vmatprep.subr.mxu0 %v5883_v3 }
  0x50   :  { %3443 = vmatmul.mubr.msk.f32.gmra.mxu0 %vm97_vm0, %v413_v18  ;;  %3463 = vmatmul.mubr.msk.f32.gmra.mxu1 %vm97_vm0, %v609_v19 }
  0x51   :  { %559 = vmatprep.mubr.f32.mxu0 %v5883_v3  ;;  %755 = vmatprep.mubr.f32.mxu1 %v5883_v3 }
  0x54   :  { %3444 = vmatmul.mubr.msk.f32.gmra.mxu0 %vm97_vm0, %v414_v20  ;;  %3464 = vmatmul.mubr.msk.f32.gmra.mxu1 %vm97_vm0, %v610_v21 }
  0x55   :  { %565 = vmatprep.mubr.f32.mxu0 %v5883_v3  ;;  %761 = vmatprep.mubr.f32.mxu1 %v5883_v3 }
  0x58   :  { %3445 = vmatmul.mubr.msk.f32.gmra.mxu0 %vm97_vm0, %v415_v22  ;;  %3465 = vmatmul.mubr.msk.f32.gmra.mxu1 %vm97_vm0, %v611_v23 }
  0x59   :  { %571 = vmatprep.mubr.f32.mxu0 %v5883_v3  ;;  %767 = vmatprep.mubr.f32.mxu1 %v5883_v3 }
  0x5c   :  { %3446 = vmatmul.mubr.msk.f32.gmra.mxu0 %vm97_vm0, %v416_v24  ;;  %3466 = vmatmul.mubr.msk.f32.gmra.mxu1 %vm97_vm0, %v612_v25 }
  0x5d   :  { %577 = vmatprep.mubr.f32.mxu0 %v5883_v3  ;;  %773 = vmatprep.mubr.f32.mxu1 %v5883_v3 }
  0x60   :  { %3447 = vmatmul.mubr.msk.f32.gmra.mxu0 %vm97_vm0, %v417_v26  ;;  %3467 = vmatmul.mubr.msk.f32.gmra.mxu1 %vm97_vm0, %v613_v27 }
  0x61   :  { %915 = vmatprep.mubr.f32.mxu0 %v5883_v3  ;;  %1133 = vmatprep.mubr.f32.mxu1 %v5883_v3 }
  0x64   :  { %3478 = vmatmul.mubr.msk.f32.vlgmr.msra.gmra.mxu0 %vm97_vm0, %v800_v28 }
  0x65   :  { %921 = vmatprep.mubr.f32.mxu0 %v5883_v3 }
  0x68   :  { %3479 = vmatmul.mubr.msk.f32.gmra.mxu0 %vm97_vm0, %v801_v29 }
  0x69   :  { %927 = vmatprep.mubr.f32.mxu0 %v5883_v3 }
  0x6c   :  { %3480 = vmatmul.mubr.msk.f32.gmra.mxu0 %vm97_vm0, %v802_v30 }
  0x6d   :  { %933 = vmatprep.mubr.f32.mxu0 %v5883_v3 }
  0x70   :  { %3481 = vmatmul.mubr.msk.f32.gmra.mxu0 %vm97_vm0, %v803_v31 }
  0x71   :  { %939 = vmatprep.mubr.f32.mxu0 %v5883_v3 }
  0x74   :  { %3482 = vmatmul.mubr.msk.f32.gmra.mxu0 %vm97_vm0, %v804_v32 }
  0x75   :  { %945 = vmatprep.mubr.f32.mxu0 %v5883_v3 }
  0x78   :  { %3483 = vmatmul.mubr.msk.f32.gmra.mxu0 %vm97_vm0, %v805_v33 }
  0x79   :  { %951 = vmatprep.mubr.f32.mxu0 %v5883_v3 }
  0x7c   :  { %3484 = vmatmul.mubr.msk.f32.gmra.mxu0 %vm97_vm0, %v806_v34 }
  0x7d   :  { %957 = vmatprep.mubr.f32.mxu0 %v5883_v3 }
  0x80   :  { %3485 = vmatmul.mubr.msk.f32.gmra.mxu0 %vm97_vm0, %v807_v35 }
  0x81   :  { %963 = vmatprep.mubr.f32.mxu0 %v5883_v3 }
  0x84   :  { %3486 = vmatmul.mubr.msk.f32.gmra.mxu0 %vm97_vm0, %v808_v36 }
  0x85   :  { %969 = vmatprep.mubr.f32.mxu0 %v5883_v3 }
  0x88   :  { %3487 = vmatmul.mubr.msk.f32.gmra.mxu0 %vm97_vm0, %v809_v37 }
  0xd4   :  { %v194_v38 = vpop.f32.mrf.mxu0  ;;  %v349_v39 = vpop.f32.mrf.mxu1 }
  0xd5   :  { %v350_v40 = vadd.f32 %v349_v39, %v194_v38 }
  0xd6   :  { %v196_v41 = vpop.f32.mrf.mxu0  ;;  %v351_v42 = vpop.f32.mrf.mxu1 }
  0xd7   :  { %v352_v43 = vadd.f32 %v351_v42, %v196_v41 }
  0xd8   :  { %v200_v44 = vpop.f32.mrf.mxu0  ;;  %v355_v45 = vpop.f32.mrf.mxu1 }
  0xd9   :  { %v356_v46 = vadd.f32 %v355_v45, %v200_v44  ;;  %v1304_v45 = vld [vmem:[%s5865_s5 + $0x78] sm:$0xff] }
  0xda   :  { %v202_v47 = vpop.f32.mrf.mxu0  ;;  %v357_v48 = vpop.f32.mrf.mxu1  ;;  %1330 = vmatpush1.msra.mxu0 %v1304_v45 }
  0xdb   :  { %v358_v49 = vadd.f32 %v357_v48, %v202_v47  ;;  %1331 = vmatprep.subr.mxu0 %v5883_v3 }
  0xdc   :  { %v206_v50 = vpop.f32.mrf.mxu0  ;;  %v361_v51 = vpop.f32.mrf.mxu1 }
  0xdd   :  { %v362_v52 = vadd.f32 %v361_v51, %v206_v50 }
  0xde   :  { %v208_v53 = vpop.f32.mrf.mxu0  ;;  %v363_v54 = vpop.f32.mrf.mxu1 }
  0xdf   :  { %v364_v55 = vadd.f32 %v363_v54, %v208_v53  ;;  %v1301_v53 = vld [vmem:[%s5865_s5 + $0x60] sm:$0xff] }
  0xe0   :  { %v212_v56 = vpop.f32.mrf.mxu0  ;;  %v367_v57 = vpop.f32.mrf.mxu1 }
  0xe1   :  { %v368_v58 = vadd.f32 %v367_v57, %v212_v56  ;;  %v1300_v56 = vld [vmem:[%s5865_s5 + $0x58] sm:$0xff] }
  0xe2   :  { %v214_v59 = vpop.f32.mrf.mxu0  ;;  %v369_v60 = vpop.f32.mrf.mxu1 }
  0xe3   :  { %v370_v61 = vadd.f32 %v369_v60, %v214_v59  ;;  %v1299_v59 = vld [vmem:[%s5865_s5 + $0x50] sm:$0xff] }
  0xe4   :  { %v218_v62 = vpop.f32.mrf.mxu0  ;;  %v373_v63 = vpop.f32.mrf.mxu1 }
  0xe5   :  { %v374_v0 = vadd.f32 %v373_v63, %v218_v62 }
  0xe6   :  { %v220_v1 = vpop.f32.mrf.mxu0  ;;  %v375_v2 = vpop.f32.mrf.mxu1 }
  0xe7   :  { %v376_v4 = vadd.f32 %v375_v2, %v220_v1  ;;  %v1296_v2 = vld [vmem:[%s5865_s5 + $0x38] sm:$0xff] }
  0xe8   :  { %v4529_v5 = vpop.f32.mrf.mxu0  ;;  %v4531_v6 = vpop.f32.mrf.mxu1 }
  0xea   :  { %v4533_v7 = vpop.f32.mrf.mxu0  ;;  %v4535_v8 = vpop.f32.mrf.mxu1 }
  0xec   :  { %v4537_v9 = vpop.f32.mrf.mxu0  ;;  %v4539_v10 = vpop.f32.mrf.mxu1 }
  0xee   :  { %v4541_v11 = vpop.f32.mrf.mxu0  ;;  %v4543_v12 = vpop.f32.mrf.mxu1 }
  0xf0   :  { %v4545_v13 = vpop.f32.mrf.mxu0  ;;  %v4547_v14 = vpop.f32.mrf.mxu1 }
  0xf2   :  { %v4549_v15 = vpop.f32.mrf.mxu0  ;;  %v4551_v16 = vpop.f32.mrf.mxu1 }
  0xf4   :  { %v4553_v17 = vpop.f32.mrf.mxu0  ;;  %v4555_v18 = vpop.f32.mrf.mxu1 }
  0xf6   :  { %v4557_v19 = vpop.f32.mrf.mxu0  ;;  %v4559_v20 = vpop.f32.mrf.mxu1 }
  0xf8   :  { %v4561_v21 = vpop.f32.mrf.mxu0  ;;  %v4563_v22 = vpop.f32.mrf.mxu1 }
  0xfa   :  { %v4565_v23 = vpop.f32.mrf.mxu0  ;;  %v4567_v24 = vpop.f32.mrf.mxu1 }
  0xfc   :  { %v525_v25 = vpop.f32.mrf.mxu0  ;;  %v4569_v26 = vpop.f32.mrf.mxu1 }
  0xfd   :  { %5889 = vst [vmem:[#allocation3_spill] sm:$0xff] %v4569_v26  ;;  %v4571_v27 = vadd.f32 %v525_v25, %v350_v40 }
  0xfe   :  { %v527_v28 = vpop.f32.mrf.mxu0  ;;  %v4573_v29 = vpop.f32.mrf.mxu1 }
  0xff   :  { %5890 = vst [vmem:[#allocation4_spill] sm:$0xff] %v4571_v27  ;;  %5891 = vst [vmem:[#allocation5_spill] sm:$0xff] %v4573_v29  ;;  %v4575_v30 = vadd.f32 %v527_v28, %v352_v43  ;;  %v1295_v28 = vld [vmem:[%s5865_s5 + $0x30] sm:$0xff] }
 0x100   :  { %v531_v31 = vpop.f32.mrf.mxu0  ;;  %v4579_v34 = vpop.f32.mrf.mxu1 }
 0x101   :  { %5892 = vst [vmem:[#allocation6_spill] sm:$0xff] %v4575_v30  ;;  %v4577_v32 = vadd.f32 %v531_v31, %v356_v46  ;;  %5894 = vst [vmem:[#allocation8_spill] sm:$0xff] %v4579_v34  ;;  %v1303_v46 = vld [vmem:[%s5865_s5 + $0x70] sm:$0xff]  ;;  %v998_v30 = vlaneseq }
 0x102   :  { %v533_v33 = vpop.f32.mrf.mxu0  ;;  %v4585_v38 = vpop.f32.mrf.mxu1  ;;  %1332 = vmatpush1.msra.mxu0 %v1303_v46 }
 0x103   :  { %5893 = vst [vmem:[#allocation7_spill] sm:$0xff] %v4577_v32  ;;  %v4581_v35 = vadd.f32 %v533_v33, %v358_v49  ;;  %5897 = vst [vmem:[#allocation11_spill] sm:$0xff] %v4585_v38  ;;  %v1302_v49 = vld [vmem:[%s5865_s5 + $0x68] sm:$0xff]  ;;  %1333 = vmatprep.subr.mxu0 %v5883_v3  ;;  %v400_v32 = vadd.f32 %v4559_v20, %v4557_v19  ;;  %v398_v38 = vadd.f32 %v4555_v18, %v4553_v17 }
 0x104   :  { %v537_v36 = vpop.f32.mrf.mxu0  ;;  %v4591_v43 = vpop.f32.mrf.mxu1  ;;  %1334 = vmatpush1.msra.mxu0 %v1302_v49  ;;  %v1294_v33 = vld [vmem:[%s5865_s5 + $0x28] sm:$0xff]  ;;  %v392_v19 = vadd.f32 %v4547_v14, %v4545_v13  ;;  %v388_v17 = vadd.f32 %v4543_v12, %v4541_v11  ;;  %v996_v11 = vld [vmem:[%s5866_s2] sm:$0x3] }
 0x105   :  { %5895 = vst [vmem:[#allocation9_spill] sm:$0xff] %v4581_v35  ;;  %v4583_v37 = vadd.f32 %v537_v36, %v362_v52  ;;  %5899 = vst [vmem:[#allocation13_spill] sm:$0xff] %v4591_v43  ;;  %1335 = vmatprep.subr.mxu0 %v5883_v3 }
 0x106   :  { %v539_v39 = vpop.f32.mrf.mxu0  ;;  %v4607_v51 = vpop.f32.mrf.mxu1  ;;  %1336 = vmatpush1.msra.mxu0 %v1301_v53 }
 0x107   :  { %5896 = vst [vmem:[#allocation10_spill] sm:$0xff] %v4583_v37  ;;  %v4587_v40 = vadd.f32 %v539_v39, %v364_v55  ;;  %5900 = vst [vmem:[#allocation14_spill] sm:$0xff] %v4607_v51  ;;  %1337 = vmatprep.subr.mxu0 %v5883_v3  ;;  %v394_v37 = vadd.f32 %v4551_v16, %v4549_v15  ;;  %v386_v15 = vadd.f32 %v4539_v10, %v4537_v9 }
 0x108   :  { %v543_v41 = vpop.f32.mrf.mxu0  ;;  %v4621_v57 = vpop.f32.mrf.mxu1  ;;  %1338 = vmatpush1.msra.mxu0 %v1300_v56 }
 0x109   :  { %5898 = vst [vmem:[#allocation12_spill] sm:$0xff] %v4587_v40  ;;  %v4589_v42 = vadd.f32 %v543_v41, %v368_v58  ;;  %1339 = vmatprep.subr.mxu0 %v5883_v3 }
 0x10a   :  { %v545_v44 = vpop.f32.mrf.mxu0  ;;  %1340 = vmatpush1.msra.mxu0 %v1299_v59  ;;  %v4635_v62 = vpop.f32.mrf.mxu1 }
 0x10b   :  { %v4599_v47 = vadd.f32 %v545_v44, %v370_v61  ;;  %v1298_v61 = vld [vmem:[%s5865_s5 + $0x48] sm:$0xff]  ;;  %1341 = vmatprep.subr.mxu0 %v5883_v3 }
 0x10c   :  { %v549_v48 = vpop.f32.mrf.mxu0  ;;  %1342 = vmatpush1.msra.mxu0 %v1298_v61 }
 0x10d   :  { %v4605_v50 = vadd.f32 %v549_v48, %v374_v0  ;;  %v1297_v0 = vld [vmem:[%s5865_s5 + $0x40] sm:$0xff]  ;;  %1343 = vmatprep.subr.mxu0 %v5883_v3 }
 0x10e   :  { %v551_v52 = vpop.f32.mrf.mxu0  ;;  %1344 = vmatpush1.msra.mxu0 %v1297_v0 }
 0x10f   :  { %v4613_v54 = vadd.f32 %v551_v52, %v376_v4  ;;  %v4649_v4 = vpop.f32.mrf.mxu1  ;;  %1345 = vmatprep.subr.mxu0 %v5883_v3 }
 0x110   :  { %v4615_v55 = vpop.f32.mrf.mxu0  ;;  %1346 = vmatpush1.msra.mxu0 %v1296_v2 }
 0x111   :  { %1347 = vmatprep.subr.mxu0 %v5883_v3  ;;  %v4659_v36 = vpop.f32.mrf.mxu1 }
 0x112   :  { %v4623_v58 = vpop.f32.mrf.mxu0  ;;  %1348 = vmatpush1.msra.mxu0 %v1295_v28 }
 0x113   :  { %1349 = vmatprep.subr.mxu0 %v5883_v3  ;;  %v4663_v44 = vpop.f32.mrf.mxu1 }
 0x114   :  { %v4629_v60 = vpop.f32.mrf.mxu0  ;;  %1350 = vmatpush1.msra.mxu0 %v1294_v33 }
 0x115   :  { %1351 = vmatprep.subr.mxu0 %v5883_v3  ;;  %v4667_v48 = vpop.f32.mrf.mxu1  ;;  %v596_v9 = vadd.f32 %v4629_v60, %v386_v15 }
 0x116   :  { %v4637_v63 = vpop.f32.mrf.mxu0 }
 0x117   :  { %v4673_v53 = vpop.f32.mrf.mxu1  ;;  %v597_v13 = vadd.f32 %v4637_v63, %v388_v17 }
 0x118   :  { %v4643_v1 = vpop.f32.mrf.mxu0  ;;  %v792_v60 = vadd.f32 %v4673_v53, %v596_v9 }
 0x119   :  { %v759_v61 = vpop.f32.mrf.mxu1  ;;  %v598_v16 = vadd.f32 %v4643_v1, %v392_v19  ;;  %v788_v19 = vadd.f32 %v4649_v4, %v4605_v50  ;;  %v786_v50 = vadd.f32 %v4621_v57, %v4589_v42  ;;  %v5913_v57 = vld [vmem:[#allocation13_spill] sm:$0xff] }
 0x11a   :  { %v569_v25 = vpop.f32.mrf.mxu0 }
 0x11b   :  { %v763_v28 = vpop.f32.mrf.mxu1  ;;  %v599_v18 = vadd.f32 %v569_v25, %v394_v37 }
 0x11c   :  { %v573_v31 = vpop.f32.mrf.mxu0 }
 0x11d   :  { %v600_v20 = vadd.f32 %v573_v31, %v398_v38 }
 0x11e   :  { %v575_v39 = vpop.f32.mrf.mxu0 }
 0x11f   :  { %v601_v51 = vadd.f32 %v575_v39, %v400_v32 }
 0x120   :  { %v579_v41 = vpop.f32.mrf.mxu0 }
 0x122   :  { %v581_v45 = vpop.f32.mrf.mxu0 }
 0x124   :  { %v4665_v46 = vpop.f32.mrf.mxu0 }
 0x125   :  { %5901 = vst [vmem:[#allocation15_spill] sm:$0xff] %v4665_v46  ;;  %v765_v46 = vpop.f32.mrf.mxu1 }
 0x126   :  { %v4669_v49 = vpop.f32.mrf.mxu0  ;;  %v795_v1 = vadd.f32 %v765_v46, %v599_v18 }
 0x127   :  { %5902 = vst [vmem:[#allocation16_spill] sm:$0xff] %v4669_v49  ;;  %v769_v26 = vpop.f32.mrf.mxu1 }
 0x128   :  { %v4671_v52 = vpop.f32.mrf.mxu0  ;;  %v796_v10 = vadd.f32 %v769_v26, %v600_v20 }
 0x129   :  { %5903 = vst [vmem:[#allocation17_spill] sm:$0xff] %v4671_v52  ;;  %v771_v29 = vpop.f32.mrf.mxu1 }
 0x12a   :  { %v4675_v56 = vpop.f32.mrf.mxu0  ;;  %v797_v14 = vadd.f32 %v771_v29, %v601_v51 }
 0x12b   :  { %5904 = vst [vmem:[#allocation18_spill] sm:$0xff] %v4675_v56  ;;  %v775_v35 = vpop.f32.mrf.mxu1 }
 0x12c   :  { %v4677_v59 = vpop.f32.mrf.mxu0 }
 0x12d   :  { %5905 = vst [vmem:[#allocation19_spill] sm:$0xff] %v4677_v59 }
 0x12e   :  { %v4679_v0 = vpop.f32.mrf.mxu0 }
 0x12f   :  { %5906 = vst [vmem:[#allocation20_spill] sm:$0xff] %v4679_v0  ;;  %v404_v0 = vadd.f32 %v4563_v22, %v4561_v21 }
 0x130   :  { %v4681_v2 = vpop.f32.mrf.mxu0 }
 0x131   :  { %5907 = vst [vmem:[#allocation21_spill] sm:$0xff] %v4681_v2  ;;  %v4699_v2 = vshrl.u32 %v998_v30, 7  ;;  %v602_v40 = vadd.f32 %v579_v41, %v404_v0  ;;  %v382_v30 = vadd.f32 %v4535_v8, %v4533_v7  ;;  %v380_v7 = vadd.f32 %v4531_v6, %v4529_v5 }
 0x132   :  { %v4683_v33 = vpop.f32.mrf.mxu0  ;;  %v793_v5 = vadd.f32 %v759_v61, %v597_v13 }
 0x133   :  { %5908 = vst [vmem:[#allocation22_spill] sm:$0xff] %v4683_v33  ;;  %v406_v33 = vadd.f32 %v4567_v24, %v4565_v23  ;;  %v777_v23 = vpop.f32.mrf.mxu1  ;;  %v1000_v24 = vsub.s32 0, %v4699_v2  ;;  %v798_v38 = vadd.f32 %v775_v35, %v602_v40  ;;  %v1004_v12 = vsub.s32 1, %v4699_v2 }
 0x134   :  { %v4685_v3 = vpop.f32.mrf.mxu0  ;;  %v595_v8 = vadd.f32 %v4623_v58, %v382_v30  ;;  %v594_v35 = vadd.f32 %v4615_v55, %v380_v7  ;;  %v794_v40 = vadd.f32 %v763_v28, %v598_v16 }
 0x135   :  { %v603_v22 = vadd.f32 %v581_v45, %v406_v33  ;;  %v4727_v51 = vrot.slane %v996_v11, %v1000_v24  ;;  %v4731_v6 = vrot.slane %v996_v11, %v1004_v12  ;;  %v984_v4 = vadd.f32 %v4685_v3, %v788_v19  ;;  %v5912_v3 = vld [vmem:[#allocation10_spill] sm:$0xff] }
 0x136   :  { %v4687_v49 = vpop.f32.mrf.mxu0  ;;  %v791_v55 = vadd.f32 %v4667_v48, %v595_v8  ;;  %v790_v28 = vadd.f32 %v4663_v44, %v594_v35  ;;  %v784_v15 = vadd.f32 %v5913_v57, %v5912_v3  ;;  %v5917_v7 = vld [vmem:[#allocation20_spill] sm:$0xff] }
 0x137   :  { %v799_v25 = vadd.f32 %v777_v23, %v603_v22  ;;  %v4811_v35 = vadd.f32 %v4727_v51, %v984_v4 }
 0x138   :  { %v4689_v52 = vpop.f32.mrf.mxu0  ;;  %v5914_v16 = vld [vmem:[#allocation21_spill] sm:$0xff] }
 0x139   :  { %v986_v20 = vadd.f32 %v4689_v52, %v790_v28  ;;  %v982_v23 = vadd.f32 %v5914_v16, %v786_v50  ;;  %v5928_v50 = vld [vmem:[#allocation15_spill] sm:$0xff] }
 0x13a   :  { %v4691_v27 = vpop.f32.mrf.mxu0  ;;  %v5911_v18 = vld [vmem:[#allocation22_spill] sm:$0xff] }
 0x13b   :  { %v987_v53 = vadd.f32 %v4691_v27, %v791_v55  ;;  %v5924_v55 = vld [vmem:[#allocation4_spill] sm:$0xff] }
 0x13c   :  { %v953_v56 = vpop.f32.mrf.mxu0 }
 0x13d   :  { %v988_v33 = vadd.f32 %v953_v56, %v792_v60  ;;  %v4784_v30 = vadd.f32 %v4731_v6, %v987_v53  ;;  %v1014_v53 = vadd.f32 %v4727_v51, %v982_v23 }
 0x13e   :  { %v955_v59 = vpop.f32.mrf.mxu0 }
 0x13f   :  { %v989_v46 = vadd.f32 %v955_v59, %v793_v5  ;;  %v4775_v52 = vadd.f32 %v4727_v51, %v988_v33  ;;  %v5926_v33 = vld [vmem:[#allocation17_spill] sm:$0xff] }
 0x140   :  { %v959_v34 = vpop.f32.mrf.mxu0 }
 0x141   :  { %v990_v41 = vadd.f32 %v959_v34, %v794_v40  ;;  %v789_v34 = vadd.f32 %v4659_v36, %v4613_v54  ;;  %v787_v54 = vadd.f32 %v4635_v62, %v4599_v47  ;;  %v4766_v36 = vadd.f32 %v4731_v6, %v989_v46  ;;  %v5909_v62 = vld [vmem:[#allocation12_spill] sm:$0xff]  ;;  %v5925_v46 = vld [vmem:[#allocation3_spill] sm:$0xff] }
 0x142   :  { %v961_v43 = vpop.f32.mrf.mxu0  ;;  %v1040_v40 = vmax.f32 %v4775_v52, 0.0  ;;  %v780_v28 = vadd.f32 %v5925_v46, %v5924_v55  ;;  %v1311_v55 = vld [vmem:[%s5865_s5 + $0xb0] sm:$0xff] }
 0x143   :  { %v991_v26 = vadd.f32 %v961_v43, %v795_v1  ;;  %v4759_v44 = vadd.f32 %v4727_v51, %v990_v41  ;;  %v985_v27 = vadd.f32 %v4687_v49, %v789_v34  ;;  %v5910_v49 = vld [vmem:[#allocation14_spill] sm:$0xff]  ;;  %v983_v22 = vadd.f32 %v5911_v18, %v787_v54  ;;  %v5919_v1 = vld [vmem:[#allocation8_spill] sm:$0xff] }
 0x144   :  { %v965_v21 = vpop.f32.mrf.mxu0  ;;  %v785_v17 = vadd.f32 %v5910_v49, %v5909_v62  ;;  %v1039_v41 = vmax.f32 %v4784_v30, 0.0  ;;  %v976_v4 = vadd.f32 %v5928_v50, %v780_v28  ;;  %v1036_v62 = vmax.f32 %v4811_v35, 0.0  ;;  %v1422_v35 = vld [vmem:[%s5869_s6 + $0x18] sm:$0xff]  ;;  %v1441_v46 = vld [vmem:[%s5869_s6 + $0xb0] sm:$0xff]  ;;  %v1310_v28 = vld [vmem:[%s5865_s5 + $0xa8] sm:$0xff] }
 0x145   :  { %v992_v31 = vadd.f32 %v965_v21, %v796_v10  ;;  %v4752_v48 = vadd.f32 %v4731_v6, %v991_v26  ;;  %v1042_v13 = vmax.f32 %v4759_v44, 0.0  ;;  %v4802_v9 = vadd.f32 %v4731_v6, %v985_v27  ;;  %v5923_v26 = vld [vmem:[#allocation18_spill] sm:$0xff]  ;;  %v1165_v44 = vld [vmem:[%s5868_s4 + $0x8] sm:$0xff] }
 0x146   :  { %v967_v32 = vpop.f32.mrf.mxu0  ;;  %v981_v8 = vadd.f32 %v5917_v7, %v785_v17  ;;  %v1041_v10 = vmax.f32 %v4766_v36, 0.0  ;;  %v4820_v60 = vadd.f32 %v4731_v6, %v983_v22  ;;  %v1034_v22 = vmax.f32 %v1014_v53, 0.0  ;;  %v1428_v7 = vld [vmem:[%s5869_s6 + $0x48] sm:$0xff]  ;;  %v1439_v53 = vld [vmem:[%s5869_s6 + $0xa0] sm:$0xff] }
 0x147   :  { %v993_v63 = vadd.f32 %v967_v32, %v797_v14  ;;  %v4746_v43 = vadd.f32 %v4727_v51, %v992_v31  ;;  %v1043_v42 = vmax.f32 %v4752_v48, 0.0  ;;  %v4793_v32 = vadd.f32 %v4727_v51, %v986_v20  ;;  %v5915_v14 = vld [vmem:[#allocation9_spill] sm:$0xff]  ;;  %v5921_v31 = vld [vmem:[#allocation6_spill] sm:$0xff]  ;;  %v5927_v20 = vld [vmem:[#allocation16_spill] sm:$0xff] }
 0x148   :  { %v971_v37 = vpop.f32.mrf.mxu0  ;;  %v1013_v27 = vadd.f32 %v4731_v6, %v981_v8  ;;  %v1037_v36 = vmax.f32 %v4802_v9, 0.0  ;;  %v1035_v17 = vmax.f32 %v4820_v60, 0.0  ;;  %v1008_v57 = vadd.f32 %v4727_v51, %v976_v4  ;;  %v1434_v48 = vld [vmem:[%s5869_s6 + $0x78] sm:$0xff]  ;;  %v1427_v8 = vld [vmem:[%s5869_s6 + $0x40] sm:$0xff]  ;;  %v1436_v50 = vld [vmem:[%s5869_s6 + $0x88] sm:$0xff] }
 0x149   :  { %v994_v29 = vadd.f32 %v971_v37, %v798_v38  ;;  %v4739_v0 = vadd.f32 %v4731_v6, %v993_v63  ;;  %v1044_v47 = vmax.f32 %v4746_v43, 0.0  ;;  %v5916_v38 = vld [vmem:[#allocation11_spill] sm:$0xff]  ;;  %v1038_v19 = vmax.f32 %v4793_v32, 0.0  ;;  %v1164_v43 = vld [vmem:[%s5868_s4] sm:$0xff]  ;;  %v1312_v60 = vld [vmem:[%s5865_s5 + $0xb8] sm:$0xff] }
 0x14a   :  { %v973_v39 = vpop.f32.mrf.mxu0  ;;  %v783_v11 = vadd.f32 %v5916_v38, %v5915_v14  ;;  %v5918_v37 = vld [vmem:[#allocation7_spill] sm:$0xff]  ;;  %v1033_v3 = vmax.f32 %v1013_v27, 0.0  ;;  %v1028_v14 = vmax.f32 %v1008_v57, 0.0  ;;  %v1048_v38 = vld [vmem:[%s5867_s3] sm:$0xff]  ;;  %v1437_v27 = vld [vmem:[%s5869_s6 + $0x90] sm:$0xff] }
 0x14b   :  { %v995_v58 = vadd.f32 %v973_v39, %v799_v25  ;;  %v4735_v45 = vadd.f32 %v4727_v51, %v994_v29  ;;  %v1045_v21 = vmax.f32 %v4739_v0, 0.0  ;;  %v782_v25 = vadd.f32 %v5919_v1, %v5918_v37  ;;  %v5920_v63 = vld [vmem:[#allocation19_spill] sm:$0xff]  ;;  %v5922_v39 = vld [vmem:[#allocation5_spill] sm:$0xff]  ;;  %v1168_v9 = vld [vmem:[%s5868_s4 + $0x20] sm:$0xf] }
 0x14c   :  { %v980_v29 = vadd.f32 %v5920_v63, %v784_v15  ;;  %v781_v5 = vadd.f32 %v5922_v39, %v5921_v31  ;;  %v1051_v0 = vld [vmem:[%s5867_s3 + $0x18] sm:$0xff]  ;;  %v1425_v37 = vld [vmem:[%s5869_s6 + $0x30] sm:$0xff]  ;;  %v1424_v1 = vld [vmem:[%s5869_s6 + $0x28] sm:$0xff] }
 0x14d   :  { %v4742_v61 = vadd.f32 %v4731_v6, %v995_v58  ;;  %v1046_v56 = vmax.f32 %v4735_v45, 0.0  ;;  %v979_v58 = vadd.f32 %v5923_v26, %v783_v11  ;;  %v978_v34 = vadd.f32 %v5926_v33, %v782_v25  ;;  %v1050_v45 = vld [vmem:[%s5867_s3 + $0x10] sm:$0xff]  ;;  %v1167_v11 = vld [vmem:[%s5868_s4 + $0x18] sm:$0xff]  ;;  %v1293_v25 = vld [vmem:[%s5865_s5 + $0x20] sm:$0xff] }
 0x14e   :  { %v977_v54 = vadd.f32 %v5927_v20, %v781_v5  ;;  %v1012_v52 = vadd.f32 %v4727_v51, %v980_v29  ;;  %v1423_v63 = vld [vmem:[%s5869_s6 + $0x20] sm:$0xff]  ;;  %1352 = vmatpush1.msra.mxu0 %v1293_v25  ;;  %v1292_v29 = vld [vmem:[%s5865_s5 + $0x18] sm:$0xff]  ;;  %v1421_v31 = vld [vmem:[%s5869_s6 + $0x10] sm:$0xff] }
 0x14f   :  { %v1047_v59 = vmax.f32 %v4742_v61, 0.0  ;;  %v1011_v49 = vadd.f32 %v4731_v6, %v979_v58  ;;  %v1010_v18 = vadd.f32 %v4727_v51, %v978_v34  ;;  %v5929_v51 = vmov 0.0   ;;  %v1052_v61 = vld [vmem:[%s5867_s3 + $0x20] sm:$0xf]  ;;  %v1290_v39 = vld [vmem:[%s5865_s5 + $0x8] sm:$0xff]  ;;  %v1438_v20 = vld [vmem:[%s5869_s6 + $0x98] sm:$0xff] }
 0x150   :  { %v1009_v30 = vadd.f32 %v4731_v6, %v977_v54  ;;  %v1032_v15 = vmax.f32 %v1012_v52, 0.0  ;;  %v1049_v6 = vld [vmem:[%s5867_s3 + $0x8] sm:$0xff]  ;;  %1353 = vmatprep.subr.mxu0 %v5929_v51  ;;  %v1289_v26 = vld [vmem:[%s5865_s5] sm:$0xff]  ;;  %v1307_v54 = vld [vmem:[%s5865_s5 + $0x90] sm:$0xff] }
 0x151   :  { %1081 = vmatprep.subr.mxu1 %v1047_v59  ;;  %v1031_v16 = vmax.f32 %v1011_v49, 0.0  ;;  %v1030_v23 = vmax.f32 %v1010_v18, 0.0  ;;  %1354 = vmatpush1.msra.mxu0 %v1292_v29  ;;  %v1420_v5 = vld [vmem:[%s5869_s6 + $0x8] sm:$0xff]  ;;  %v1419_v58 = vld [vmem:[%s5869_s6] sm:$0xff]  ;;  %v3519_v49 = vld [vmem:[%s5870_s7 + $0xb8] sm:$0xff] }
 0x152   :  { %1082 = vmatpush1.msra.mxu1 %v1046_v56  ;;  %v1029_v32 = vmax.f32 %v1009_v30, 0.0  ;;  %1355 = vmatprep.subr.mxu0 %v5929_v51  ;;  %v1440_v33 = vld [vmem:[%s5869_s6 + $0xa8] sm:$0xff]  ;;  %v1309_v34 = vld [vmem:[%s5865_s5 + $0xa0] sm:$0xff]  ;;  %v1556_v25 = vld [vmem:[%s5870_s7 + $0x38] sm:$0xff] }
 0x153   :  { %1083 = vmatprep.subr.mxu1 %v1045_v21  ;;  %v1305_v4 = vld [vmem:[%s5865_s5 + $0x80] sm:$0xff] }
 0x154   :  { %1084 = vmatpush1.msra.mxu1 %v1044_v47  ;;  %v1435_v52 = vld [vmem:[%s5869_s6 + $0x80] sm:$0xff] }
 0x155   :  { %1085 = vmatprep.subr.mxu1 %v1043_v42 }
 0x156   :  { %1086 = vmatpush1.msra.mxu1 %v1042_v13 }
 0x157   :  { %1087 = vmatprep.subr.mxu1 %v1041_v10 }
 0x158   :  { %1088 = vmatpush1.msra.mxu1 %v1040_v40 }
 0x159   :  { %1089 = vmatprep.subr.mxu1 %v1039_v41 }
 0x15a   :  { %1090 = vmatpush1.msra.mxu1 %v1038_v19 }
 0x15b   :  { %1091 = vmatprep.subr.mxu1 %v1037_v36 }
 0x15c   :  { %1092 = vmatpush1.msra.mxu1 %v1036_v62 }
 0x15d   :  { %1093 = vmatprep.subr.mxu1 %v1035_v17 }
 0x15e   :  { %1094 = vmatpush1.msra.mxu1 %v1034_v22 }
 0x15f   :  { %1095 = vmatprep.subr.mxu1 %v1033_v3 }
 0x160   :  { %1096 = vmatpush1.msra.mxu1 %v1032_v15 }
 0x161   :  { %1097 = vmatprep.subr.mxu1 %v1031_v16 }
 0x162   :  { %1098 = vmatpush1.msra.mxu1 %v1030_v23 }
 0x163   :  { %1099 = vmatprep.subr.mxu1 %v1029_v32 }
 0x164   :  { %1100 = vmatpush1.msra.mxu1 %v1028_v14 }
 0x165   :  { %3488 = vmatmul.mubr.msk.f32.vlgmr.msra.gmra.mxu1 %vm1053_vm1, %v1048_v38  ;;  %1196 = vmatprep.subr.mxu1 %v1047_v59  ;;  %v1433_v59 = vld [vmem:[%s5869_s6 + $0x70] sm:$0xff] }
 0x166   :  { %1197 = vmatpush1.msra.mxu1 %v1046_v56  ;;  %1139 = vmatprep.mubr.f32.mxu1 %v5929_v51  ;;  %v1432_v56 = vld [vmem:[%s5869_s6 + $0x68] sm:$0xff] }
 0x167   :  { %1198 = vmatprep.subr.mxu1 %v1045_v21  ;;  %v1431_v21 = vld [vmem:[%s5869_s6 + $0x60] sm:$0xff] }
 0x168   :  { %1199 = vmatpush1.msra.mxu1 %v1044_v47  ;;  %v1166_v47 = vld [vmem:[%s5868_s4 + $0x10] sm:$0xff] }
 0x169   :  { %3489 = vmatmul.mubr.msk.f32.gmra.mxu1 %vm1053_vm1, %v1049_v6  ;;  %1200 = vmatprep.subr.mxu1 %v1043_v42  ;;  %v1430_v42 = vld [vmem:[%s5869_s6 + $0x58] sm:$0xff] }
 0x16a   :  { %1201 = vmatpush1.msra.mxu1 %v1042_v13  ;;  %1145 = vmatprep.mubr.f32.mxu1 %v5929_v51  ;;  %v1429_v13 = vld [vmem:[%s5869_s6 + $0x50] sm:$0xff] }
 0x16b   :  { %1202 = vmatprep.subr.mxu1 %v1041_v10  ;;  %v1426_v10 = vld [vmem:[%s5869_s6 + $0x38] sm:$0xff] }
 0x16c   :  { %1203 = vmatpush1.msra.mxu1 %v1040_v40  ;;  %v1291_v40 = vld [vmem:[%s5865_s5 + $0x10] sm:$0xff] }
 0x16d   :  { %3490 = vmatmul.mubr.msk.f32.gmra.mxu1 %vm1053_vm1, %v1050_v45  ;;  %1204 = vmatprep.subr.mxu1 %v1039_v41  ;;  %v1442_v41 = vld [vmem:[%s5869_s6 + $0xb8] sm:$0xff] }
 0x16e   :  { %1205 = vmatpush1.msra.mxu1 %v1038_v19  ;;  %1151 = vmatprep.mubr.f32.mxu1 %v5929_v51  ;;  %v1308_v19 = vld [vmem:[%s5865_s5 + $0x98] sm:$0xff] }
 0x16f   :  { %1206 = vmatprep.subr.mxu1 %v1037_v36  ;;  %1356 = vmatpush1.msra.mxu0 %v1291_v40  ;;  %v1306_v36 = vld [vmem:[%s5865_s5 + $0x88] sm:$0xff]  ;;  %v3516_v40 = vld [vmem:[%s5870_s7 + $0xa0] sm:$0xff] }
 0x170   :  { %1207 = vmatpush1.msra.mxu1 %v1036_v62  ;;  %1357 = vmatprep.subr.mxu0 %v5929_v51  ;;  %v1560_v62 = vld [vmem:[%s5870_s7 + $0x58] sm:$0xff] }
 0x171   :  { %3491 = vmatmul.mubr.msk.f32.gmra.mxu1 %vm1053_vm1, %v1051_v0  ;;  %1208 = vmatprep.subr.mxu1 %v1035_v17 }
 0x172   :  { %1209 = vmatpush1.msra.mxu1 %v1034_v22  ;;  %1157 = vmatprep.mubr.f32.mxu1 %v5929_v51 }
 0x173   :  { %1210 = vmatprep.subr.mxu1 %v1033_v3  ;;  %1358 = vmatpush1.msra.mxu0 %v1290_v39  ;;  %v3515_v39 = vld [vmem:[%s5870_s7 + $0x98] sm:$0xff] }
 0x174   :  { %1211 = vmatpush1.msra.mxu1 %v1032_v15  ;;  %1359 = vmatprep.subr.mxu0 %v5929_v51 }
 0x175   :  { %3492 = vmatmul.mubr.msk.f32.gmra.mxu1 %vm1053_vm1, %v1052_v61  ;;  %1212 = vmatprep.subr.mxu1 %v1031_v16  ;;  %v1559_v61 = vld [vmem:[%s5870_s7 + $0x50] sm:$0xff] }
 0x176   :  { %1213 = vmatpush1.msra.mxu1 %v1030_v23  ;;  %1248 = vmatprep.mubr.f32.mxu1 %v5929_v51 }
 0x177   :  { %1214 = vmatprep.subr.mxu1 %v1029_v32  ;;  %1360 = vmatpush1.msra.mxu0 %v1289_v26  ;;  %v3514_v26 = vld [vmem:[%s5870_s7 + $0x90] sm:$0xff] }
 0x178   :  { %1215 = vmatpush1.msra.mxu1 %v1028_v14  ;;  %1377 = vmatprep.subr.mxu0 %v5929_v51 }
 0x179   :  { %3493 = vmatmul.mubr.msk.f32.vlgmr.msra.gmra.mxu1 %vm1053_vm1, %v1164_v43  ;;  %1443 = vmatprep.subr.mxu1 %v5929_v51  ;;  %v3518_v43 = vld [vmem:[%s5870_s7 + $0xb0] sm:$0xff] }
 0x17a   :  { %1254 = vmatprep.mubr.f32.mxu1 %v5929_v51  ;;  %1444 = vmatpush1.msra.mxu1 %v1434_v48 }
 0x17b   :  { %1445 = vmatprep.subr.mxu1 %v5929_v51  ;;  %1378 = vmatpush2.msra.mxu0 %v1312_v60  ;;  %v3513_v60 = vld [vmem:[%s5870_s7 + $0x88] sm:$0xff] }
 0x17c   :  { %1446 = vmatpush1.msra.mxu1 %v1433_v59  ;;  %1379 = vmatprep.subr.mxu0 %v5929_v51 }
 0x17d   :  { %3494 = vmatmul.mubr.msk.f32.gmra.mxu1 %vm1053_vm1, %v1165_v44  ;;  %1447 = vmatprep.subr.mxu1 %v5929_v51 }
 0x17e   :  { %1260 = vmatprep.mubr.f32.mxu1 %v5929_v51  ;;  %1448 = vmatpush1.msra.mxu1 %v1432_v56 }
 0x17f   :  { %1449 = vmatprep.subr.mxu1 %v5929_v51  ;;  %1380 = vmatpush2.msra.mxu0 %v1311_v55  ;;  %v3512_v55 = vld [vmem:[%s5870_s7 + $0x80] sm:$0xff] }
 0x180   :  { %1450 = vmatpush1.msra.mxu1 %v1431_v21  ;;  %1381 = vmatprep.subr.mxu0 %v5929_v51  ;;  %v1558_v21 = vld [vmem:[%s5870_s7 + $0x48] sm:$0xff] }
 0x181   :  { %3495 = vmatmul.mubr.msk.f32.gmra.mxu1 %vm1053_vm1, %v1166_v47  ;;  %1451 = vmatprep.subr.mxu1 %v5929_v51  ;;  %v3517_v47 = vld [vmem:[%s5870_s7 + $0xa8] sm:$0xff] }
 0x182   :  { %1266 = vmatprep.mubr.f32.mxu1 %v5929_v51  ;;  %1452 = vmatpush1.msra.mxu1 %v1430_v42 }
 0x183   :  { %1453 = vmatprep.subr.mxu1 %v5929_v51  ;;  %1382 = vmatpush2.msra.mxu0 %v1310_v28  ;;  %v3511_v28 = vld [vmem:[%s5870_s7 + $0x78] sm:$0xff] }
 0x184   :  { %1454 = vmatpush1.msra.mxu1 %v1429_v13  ;;  %1383 = vmatprep.subr.mxu0 %v5929_v51 }
 0x185   :  { %3496 = vmatmul.mubr.msk.f32.gmra.mxu1 %vm1053_vm1, %v1167_v11  ;;  %1455 = vmatprep.subr.mxu1 %v5929_v51 }
 0x186   :  { %1272 = vmatprep.mubr.f32.mxu1 %v5929_v51  ;;  %1456 = vmatpush1.msra.mxu1 %v1428_v7 }
 0x187   :  { %1457 = vmatprep.subr.mxu1 %v5929_v51  ;;  %1384 = vmatpush2.msra.mxu0 %v1309_v34  ;;  %v3510_v34 = vld [vmem:[%s5870_s7 + $0x70] sm:$0xff] }
 0x188   :  { %1458 = vmatpush1.msra.mxu1 %v1427_v8  ;;  %1385 = vmatprep.subr.mxu0 %v5929_v51  ;;  %v1557_v8 = vld [vmem:[%s5870_s7 + $0x40] sm:$0xff] }
 0x189   :  { %3497 = vmatmul.mubr.msk.f32.gmra.mxu1 %vm1053_vm1, %v1168_v9  ;;  %1459 = vmatprep.subr.mxu1 %v5929_v51 }
 0x18a   :  { %1460 = vmatpush1.msra.mxu1 %v1426_v10  ;;  %1386 = vmatpush2.msra.mxu0 %v1308_v19  ;;  %v3509_v19 = vld [vmem:[%s5870_s7 + $0x68] sm:$0xff] }
 0x18b   :  { %1461 = vmatprep.subr.mxu1 %v5929_v51  ;;  %1387 = vmatprep.subr.mxu0 %v5929_v51 }
 0x18c   :  { %1462 = vmatpush1.msra.mxu1 %v1425_v37  ;;  %1388 = vmatpush2.msra.mxu0 %v1307_v54  ;;  %v3508_v54 = vld [vmem:[%s5870_s7 + $0x60] sm:$0xff] }
 0x18d   :  { %1463 = vmatprep.subr.mxu1 %v5929_v51  ;;  %1389 = vmatprep.subr.mxu0 %v5929_v51 }
 0x18e   :  { %1464 = vmatpush1.msra.mxu1 %v1424_v1  ;;  %1390 = vmatpush2.msra.mxu0 %v1306_v36 }
 0x18f   :  { %1465 = vmatprep.subr.mxu1 %v5929_v51  ;;  %1391 = vmatprep.subr.mxu0 %v5929_v51 }
 0x190   :  { %1466 = vmatpush1.msra.mxu1 %v1423_v63  ;;  %1392 = vmatpush2.msra.mxu0 %v1305_v4 }
 0x191   :  { %1467 = vmatprep.subr.mxu1 %v5929_v51  ;;  %3781 = vmatprep.subr.mxu0 %v3519_v49 }
 0x192   :  { %1468 = vmatpush1.msra.mxu1 %v1422_v35 }
 0x193   :  { %1469 = vmatprep.subr.mxu1 %v5929_v51 }
 0x194   :  { %1470 = vmatpush1.msra.mxu1 %v1421_v31  ;;  %v1555_v31 = vld [vmem:[%s5870_s7 + $0x30] sm:$0xff] }
 0x195   :  { %1471 = vmatprep.subr.mxu1 %v5929_v51 }
 0x196   :  { %1472 = vmatpush1.msra.mxu1 %v1420_v5  ;;  %v1554_v5 = vld [vmem:[%s5870_s7 + $0x28] sm:$0xff] }
 0x197   :  { %1473 = vmatprep.subr.mxu1 %v5929_v51 }
 0x198   :  { %1474 = vmatpush1.msra.mxu1 %v1419_v58  ;;  %v1553_v58 = vld [vmem:[%s5870_s7 + $0x20] sm:$0xff] }
 0x199   :  { %1491 = vmatprep.subr.mxu1 %v5929_v51 }
 0x19a   :  { %1492 = vmatpush2.msra.mxu1 %v1442_v41  ;;  %v1552_v41 = vld [vmem:[%s5870_s7 + $0x18] sm:$0xff] }
 0x19b   :  { %1493 = vmatprep.subr.mxu1 %v5929_v51 }
 0x19c   :  { %1494 = vmatpush2.msra.mxu1 %v1441_v46  ;;  %v1551_v46 = vld [vmem:[%s5870_s7 + $0x10] sm:$0xff] }
 0x19d   :  { %1495 = vmatprep.subr.mxu1 %v5929_v51 }
 0x19e   :  { %1496 = vmatpush2.msra.mxu1 %v1440_v33  ;;  %v1550_v33 = vld [vmem:[%s5870_s7 + $0x8] sm:$0xff] }
 0x19f   :  { %1497 = vmatprep.subr.mxu1 %v5929_v51 }
 0x1a0   :  { %1498 = vmatpush2.msra.mxu1 %v1439_v53  ;;  %v1549_v53 = vld [vmem:[%s5870_s7] sm:$0xff] }
 0x1a1   :  { %1499 = vmatprep.subr.mxu1 %v5929_v51 }
 0x1a2   :  { %1500 = vmatpush2.msra.mxu1 %v1438_v20  ;;  %v3555_v20 = vld [vmem:[%s5870_s7 + $0x178] sm:$0xff] }
 0x1a3   :  { %1501 = vmatprep.subr.mxu1 %v5929_v51 }
 0x1a4   :  { %1502 = vmatpush2.msra.mxu1 %v1437_v27  ;;  %v3539_v27 = vld [vmem:[%s5870_s7 + $0x118] sm:$0xff] }
 0x1a5   :  { %1503 = vmatprep.subr.mxu1 %v5929_v51 }
 0x1a6   :  { %1504 = vmatpush2.msra.mxu1 %v1436_v50 }
 0x1a7   :  { %1505 = vmatprep.subr.mxu1 %v5929_v51 }
 0x1a8   :  { %1506 = vmatpush2.msra.mxu1 %v1435_v52 }
 0x1a9   :  { %3811 = vmatprep.subr.mxu1 %v1560_v62 }
 0x225   :  { %v1135_v17 = vpop.f32.mrf.mxu1 }
 0x227   :  { %v1137_v18 = vpop.f32.mrf.mxu1 }
 0x229   :  { %v1141_v22 = vpop.f32.mrf.mxu1 }
 0x22b   :  { %v1143_v30 = vpop.f32.mrf.mxu1 }
 0x22d   :  { %v1147_v3 = vpop.f32.mrf.mxu1 }
 0x22f   :  { %v1149_v57 = vpop.f32.mrf.mxu1 }
 0x231   :  { %v1153_v15 = vpop.f32.mrf.mxu1 }
 0x233   :  { %v1155_v16 = vpop.f32.mrf.mxu1 }
 0x235   :  { %v1159_v23 = vpop.f32.mrf.mxu1 }
 0x237   :  { %v1161_v32 = vpop.f32.mrf.mxu1 }
 0x239   :  { %v1250_v14 = vpop.f32.mrf.mxu1 }
 0x23a   :  { %v1279_v45 = vmax.f32 %v1135_v17, %v1250_v14 }
 0x23b   :  { %v1252_v38 = vpop.f32.mrf.mxu1 }
 0x23c   :  { %v1280_v6 = vmax.f32 %v1137_v18, %v1252_v38 }
 0x23d   :  { %v1256_v0 = vpop.f32.mrf.mxu1 }
 0x23e   :  { %3498 = vmatprep.mubr.msk.f32.mxu0 %vm1313_vm2, %v1280_v6  ;;  %3503 = vmatprep.mubr.msk.f32.mxu1 %vm1313_vm2, %v1280_v6  ;;  %v1281_v44 = vmax.f32 %v1141_v22, %v1256_v0 }
 0x23f   :  { %v1258_v48 = vpop.f32.mrf.mxu1  ;;  %1394 = vmatmul.mubr.f32.vlgmr.msra.gmra.mxu0 %v1279_v45  ;;  %1508 = vmatmul.mubr.f32.vlgmr.msra.gmra.mxu1 %v1279_v45 }
 0x240   :  { %v1282_v59 = vmax.f32 %v1143_v30, %v1258_v48  ;;  %3812 = vmatpush3.msra.mxu1 %v1560_v62  ;;  %3782 = vmatpush3.msra.mxu0 %v3519_v49  ;;  %v3554_v48 = vld [vmem:[%s5870_s7 + $0x170] sm:$0xff] }
 0x241   :  { %v1262_v56 = vpop.f32.mrf.mxu1  ;;  %3813 = vmatprep.subr.mxu1 %v1559_v61  ;;  %3783 = vmatprep.subr.mxu0 %v3518_v43 }
 0x242   :  { %3499 = vmatprep.mubr.msk.f32.mxu0 %vm1313_vm2, %v1282_v59  ;;  %3504 = vmatprep.mubr.msk.f32.mxu1 %vm1313_vm2, %v1282_v59  ;;  %v1283_v11 = vmax.f32 %v1147_v3, %v1262_v56  ;;  %v3553_v56 = vld [vmem:[%s5870_s7 + $0x168] sm:$0xff] }
 0x243   :  { %v1264_v42 = vpop.f32.mrf.mxu1  ;;  %1399 = vmatmul.mubr.f32.gmra.mxu0 %v1281_v44  ;;  %1513 = vmatmul.mubr.f32.gmra.mxu1 %v1281_v44 }
 0x244   :  { %v1284_v13 = vmax.f32 %v1149_v57, %v1264_v42  ;;  %3814 = vmatpush3.msra.mxu1 %v1559_v61  ;;  %3784 = vmatpush3.msra.mxu0 %v3518_v43 }
 0x245   :  { %v1268_v7 = vpop.f32.mrf.mxu1  ;;  %3815 = vmatprep.subr.mxu1 %v1558_v21  ;;  %3785 = vmatprep.subr.mxu0 %v3517_v47 }
 0x246   :  { %3500 = vmatprep.mubr.msk.f32.mxu0 %vm1313_vm2, %v1284_v13  ;;  %3505 = vmatprep.mubr.msk.f32.mxu1 %vm1313_vm2, %v1284_v13  ;;  %v1285_v37 = vmax.f32 %v1153_v15, %v1268_v7  ;;  %v3538_v7 = vld [vmem:[%s5870_s7 + $0x110] sm:$0xff] }
 0x247   :  { %v1270_v9 = vpop.f32.mrf.mxu1  ;;  %1404 = vmatmul.mubr.f32.gmra.mxu0 %v1283_v11  ;;  %1518 = vmatmul.mubr.f32.gmra.mxu1 %v1283_v11 }
 0x248   :  { %v1286_v10 = vmax.f32 %v1155_v16, %v1270_v9  ;;  %3816 = vmatpush3.msra.mxu1 %v1558_v21  ;;  %3786 = vmatpush3.msra.mxu0 %v3517_v47  ;;  %v3537_v9 = vld [vmem:[%s5870_s7 + $0x108] sm:$0xff] }
 0x249   :  { %v1274_v1 = vpop.f32.mrf.mxu1  ;;  %3817 = vmatprep.subr.mxu1 %v1557_v8  ;;  %3787 = vmatprep.subr.mxu0 %v3516_v40 }
 0x24a   :  { %3501 = vmatprep.mubr.msk.f32.mxu0 %vm1313_vm2, %v1286_v10  ;;  %3506 = vmatprep.mubr.msk.f32.mxu1 %vm1313_vm2, %v1286_v10  ;;  %v1287_v35 = vmax.f32 %v1159_v23, %v1274_v1  ;;  %v3551_v10 = vld [vmem:[%s5870_s7 + $0x158] sm:$0xff] }
 0x24b   :  { %v1276_v63 = vpop.f32.mrf.mxu1  ;;  %1409 = vmatmul.mubr.f32.gmra.mxu0 %v1285_v37  ;;  %1523 = vmatmul.mubr.f32.gmra.mxu1 %v1285_v37 }
 0x24c   :  { %v1288_v29 = vmax.f32 %v1161_v32, %v1276_v63  ;;  %3818 = vmatpush3.msra.mxu1 %v1557_v8  ;;  %3788 = vmatpush3.msra.mxu0 %v3516_v40  ;;  %v3552_v8 = vld [vmem:[%s5870_s7 + $0x160] sm:$0xff]  ;;  %v3550_v63 = vld [vmem:[%s5870_s7 + $0x150] sm:$0xff]  ;;  %v3549_v40 = vld [vmem:[%s5870_s7 + $0x148] sm:$0xff] }
 0x24d   :  { %3819 = vmatprep.subr.mxu1 %v1556_v25  ;;  %3789 = vmatprep.subr.mxu0 %v3515_v39 }
 0x24e   :  { %3502 = vmatprep.mubr.msk.f32.mxu0 %vm1313_vm2, %v1288_v29  ;;  %3507 = vmatprep.mubr.msk.f32.mxu1 %vm1313_vm2, %v1288_v29 }
 0x24f   :  { %1414 = vmatmul.mubr.f32.gmra.mxu0 %v1287_v35  ;;  %1528 = vmatmul.mubr.f32.gmra.mxu1 %v1287_v35  ;;  %v3535_v35 = vld [vmem:[%s5870_s7 + $0xf8] sm:$0xff] }
 0x250   :  { %3820 = vmatpush3.msra.mxu1 %v1556_v25  ;;  %3790 = vmatpush3.msra.mxu0 %v3515_v39  ;;  %v3536_v25 = vld [vmem:[%s5870_s7 + $0x100] sm:$0xff]  ;;  %v3534_v39 = vld [vmem:[%s5870_s7 + $0xf0] sm:$0xff] }
 0x251   :  { %3821 = vmatprep.subr.mxu1 %v1555_v31  ;;  %3791 = vmatprep.subr.mxu0 %v3514_v26 }
 0x252   :  { %3822 = vmatpush3.msra.mxu1 %v1555_v31  ;;  %3792 = vmatpush3.msra.mxu0 %v3514_v26 }
 0x253   :  { %3823 = vmatprep.subr.mxu1 %v1554_v5  ;;  %3793 = vmatprep.subr.mxu0 %v3513_v60 }
 0x254   :  { %3824 = vmatpush3.msra.mxu1 %v1554_v5  ;;  %3794 = vmatpush3.msra.mxu0 %v3513_v60  ;;  %v3548_v5 = vld [vmem:[%s5870_s7 + $0x140] sm:$0xff]  ;;  %v3547_v60 = vld [vmem:[%s5870_s7 + $0x138] sm:$0xff] }
 0x255   :  { %3825 = vmatprep.subr.mxu1 %v1553_v58  ;;  %3795 = vmatprep.subr.mxu0 %v3512_v55 }
 0x256   :  { %3826 = vmatpush3.msra.mxu1 %v1553_v58  ;;  %3796 = vmatpush3.msra.mxu0 %v3512_v55  ;;  %v3533_v58 = vld [vmem:[%s5870_s7 + $0xe8] sm:$0xff]  ;;  %v3546_v55 = vld [vmem:[%s5870_s7 + $0x130] sm:$0xff] }
 0x257   :  { %3827 = vmatprep.subr.mxu1 %v1552_v41  ;;  %3797 = vmatprep.subr.mxu0 %v3511_v28 }
 0x258   :  { %3828 = vmatpush3.msra.mxu1 %v1552_v41  ;;  %3798 = vmatpush3.msra.mxu0 %v3511_v28  ;;  %v3532_v41 = vld [vmem:[%s5870_s7 + $0xe0] sm:$0xff]  ;;  %v3545_v28 = vld [vmem:[%s5870_s7 + $0x128] sm:$0xff] }
 0x259   :  { %3829 = vmatprep.subr.mxu1 %v1551_v46  ;;  %3799 = vmatprep.subr.mxu0 %v3510_v34 }
 0x25a   :  { %3830 = vmatpush3.msra.mxu1 %v1551_v46  ;;  %3800 = vmatpush3.msra.mxu0 %v3510_v34  ;;  %v3531_v46 = vld [vmem:[%s5870_s7 + $0xd8] sm:$0xff]  ;;  %v3544_v34 = vld [vmem:[%s5870_s7 + $0x120] sm:$0xff] }
 0x25b   :  { %3831 = vmatprep.subr.mxu1 %v1550_v33  ;;  %3801 = vmatprep.subr.mxu0 %v3509_v19 }
 0x25c   :  { %3832 = vmatpush3.msra.mxu1 %v1550_v33  ;;  %3802 = vmatpush3.msra.mxu0 %v3509_v19  ;;  %v3530_v33 = vld [vmem:[%s5870_s7 + $0xd0] sm:$0xff] }
 0x25d   :  { %3833 = vmatprep.subr.mxu1 %v1549_v53  ;;  %3803 = vmatprep.subr.mxu0 %v3508_v54 }
 0x25e   :  { %3834 = vmatpush3.msra.mxu1 %v1549_v53  ;;  %3804 = vmatpush3.msra.mxu0 %v3508_v54  ;;  %v3529_v53 = vld [vmem:[%s5870_s7 + $0xc8] sm:$0xff] }
 0x25f   :  { %3871 = vmatprep.subr.mxu1 %v3555_v20  ;;  %3841 = vmatprep.subr.mxu0 %v3539_v27 }
 0x2ff   :  { %v1395_v36 = vpop.f32.mrf.mxu0  ;;  %v1509_v50 = vpop.f32.mrf.mxu1 }
 0x300   :  { %v1533_v4 = vmax.f32 %v1395_v36, %v1509_v50 }
 0x301   :  { %v1397_v52 = vpop.f32.mrf.mxu0  ;;  %v1511_v62 = vpop.f32.mrf.mxu1 }
 0x302   :  { %1539 = vst.msk [vmem:[#allocation2] sm:$0xff] %vm1538_vm3, %v1533_v4  ;;  %v3570_v52 = vld [vmem:[%s5870_s7 + $0x1d0] sm:$0xff]  ;;  %v3569_v62 = vld [vmem:[%s5870_s7 + $0x1c8] sm:$0xff] }
 0x303   :  { %v1400_v49 = vpop.f32.mrf.mxu0  ;;  %v1514_v17 = vpop.f32.mrf.mxu1 }
 0x304   :  { %v1534_v18 = vmax.f32 %v1400_v49, %v1514_v17  ;;  %v3568_v17 = vld [vmem:[%s5870_s7 + $0x1c0] sm:$0xff] }
 0x305   :  { %v1402_v22 = vpop.f32.mrf.mxu0  ;;  %v1516_v30 = vpop.f32.mrf.mxu1 }
 0x306   :  { %1540 = vst.msk [vmem:[#allocation2 + $0x8] sm:$0xff] %vm1538_vm3, %v1534_v18  ;;  %v3567_v22 = vld [vmem:[%s5870_s7 + $0x1b8] sm:$0xff]  ;;  %v3566_v30 = vld [vmem:[%s5870_s7 + $0x1b0] sm:$0xff] }
 0x307   :  { %v1405_v3 = vpop.f32.mrf.mxu0  ;;  %v1519_v57 = vpop.f32.mrf.mxu1 }
 0x308   :  { %v1535_v15 = vmax.f32 %v1405_v3, %v1519_v57  ;;  %v3565_v3 = vld [vmem:[%s5870_s7 + $0x1a8] sm:$0xff]  ;;  %v3564_v57 = vld [vmem:[%s5870_s7 + $0x1a0] sm:$0xff] }
 0x309   :  { %v1407_v16 = vpop.f32.mrf.mxu0  ;;  %v1521_v23 = vpop.f32.mrf.mxu1  ;;  %v1545_v32 = vld [vmem:[#allocation2] sm:$0xff] }
 0x30a   :  { %1541 = vst.msk [vmem:[#allocation2 + $0x10] sm:$0xff] %vm1538_vm3, %v1535_v15  ;;  %3835 = vmatprep.mubr.msk.f32.mxu1 %vm1538_vm3, %v1545_v32  ;;  %v3563_v15 = vld [vmem:[%s5870_s7 + $0x198] sm:$0xff]  ;;  %v3562_v16 = vld [vmem:[%s5870_s7 + $0x190] sm:$0xff]  ;;  %v3561_v23 = vld [vmem:[%s5870_s7 + $0x188] sm:$0xff] }
 0x30b   :  { %v1410_v14 = vpop.f32.mrf.mxu0  ;;  %v1524_v38 = vpop.f32.mrf.mxu1  ;;  %v3560_v32 = vld [vmem:[%s5870_s7 + $0x180] sm:$0xff] }
 0x30c   :  { %v1536_v6 = vmax.f32 %v1410_v14, %v1524_v38 }
 0x30d   :  { %v1412_v45 = vpop.f32.mrf.mxu0  ;;  %v1526_v0 = vpop.f32.mrf.mxu1  ;;  %v1561_v61 = vld [vmem:[#allocation2 + $0x1] sm:$0xff] }
 0x30e   :  { %v1546_v43 = vld [vmem:[#allocation2 + $0x8] sm:$0xff]  ;;  %1542 = vst.msk [vmem:[#allocation2 + $0x18] sm:$0xff] %vm1538_vm3, %v1536_v6  ;;  %3805 = vmatprep.mubr.msk.f32.mxu0 %vm1538_vm3, %v1561_v61 }
 0x30f   :  { %3836 = vmatmul.mubr.msk.f32.vlgmr.msra.gmra.mxu1 %vm1538_vm3, %v1546_v43  ;;  %v1415_v59 = vpop.f32.mrf.mxu0  ;;  %v1529_v44 = vpop.f32.mrf.mxu1  ;;  %v1890_v29 = vld [vmem:[#allocation2 + $0x3] sm:$0xff] }
 0x310   :  { %3872 = vmatpush3.msra.mxu1 %v3555_v20  ;;  %v1537_v21 = vmax.f32 %v1415_v59, %v1529_v44  ;;  %v1772_v26 = vld [vmem:[#allocation2 + $0x2] sm:$0xff] }
 0x311   :  { %3873 = vmatprep.subr.mxu1 %v3554_v48  ;;  %v1417_v47 = vpop.f32.mrf.mxu0  ;;  %v1531_v42 = vpop.f32.mrf.mxu1  ;;  %v1562_v13 = vld [vmem:[#allocation2 + $0x9] sm:$0xff]  ;;  %v3528_v20 = vld [vmem:[%s5870_s7 + $0xc0] sm:$0xff] }
 0x312   :  { %3874 = vmatpush3.msra.mxu1 %v3554_v48  ;;  %v1547_v11 = vld [vmem:[#allocation2 + $0x10] sm:$0xff]  ;;  %1544 = vst.msk [vmem:[#allocation2 + $0x20] sm:$0xf] %vm1543_vm4, %v1537_v21  ;;  %3806 = vmatmul.mubr.msk.f32.vlgmr.msra.gmra.mxu0 %vm1538_vm3, %v1562_v13  ;;  %v2008_v18 = vld [vmem:[#allocation2 + $0x4] sm:$0xff] }
 0x313   :  { %3875 = vmatprep.subr.mxu1 %v3553_v56  ;;  %3838 = vmatprep.mubr.msk.f32.mxu1 %vm1538_vm3, %v1547_v11  ;;  %v1891_v19 = vld [vmem:[#allocation2 + $0xb] sm:$0xff] }
 0x314   :  { %3842 = vmatpush3.msra.mxu0 %v3539_v27  ;;  %3876 = vmatpush3.msra.mxu1 %v3553_v56  ;;  %v3571_v27 = vld [vmem:[%s5870_s7 + $0x1d8] sm:$0xff]  ;;  %v1773_v36 = vld [vmem:[#allocation2 + $0xa] sm:$0xff] }
 0x315   :  { %3843 = vmatprep.subr.mxu0 %v3538_v7  ;;  %3877 = vmatprep.subr.mxu1 %v3552_v8  ;;  %v1563_v37 = vld [vmem:[#allocation2 + $0x11] sm:$0xff] }
 0x316   :  { %3844 = vmatpush3.msra.mxu0 %v3538_v7  ;;  %v1548_v1 = vld [vmem:[#allocation2 + $0x18] sm:$0xff]  ;;  %3878 = vmatpush3.msra.mxu1 %v3552_v8  ;;  %v2009_v14 = vld [vmem:[#allocation2 + $0xc] sm:$0xff] }
 0x317   :  { %3845 = vmatprep.subr.mxu0 %v3537_v9  ;;  %3879 = vmatprep.subr.mxu1 %v3551_v10  ;;  %v1892_v54 = vld [vmem:[#allocation2 + $0x13] sm:$0xff] }
 0x318   :  { %3808 = vmatprep.mubr.msk.f32.mxu0 %vm1538_vm3, %v1563_v37  ;;  %3839 = vmatmul.mubr.msk.f32.gmra.mxu1 %vm1538_vm3, %v1548_v1  ;;  %v1774_v4 = vld [vmem:[#allocation2 + $0x12] sm:$0xff] }
 0x319   :  { %3846 = vmatpush3.msra.mxu0 %v3537_v9  ;;  %3880 = vmatpush3.msra.mxu1 %v3551_v10  ;;  %v1564_v31 = vld [vmem:[#allocation2 + $0x19] sm:$0xff] }
 0x31a   :  { %3847 = vmatprep.subr.mxu0 %v3536_v25  ;;  %3881 = vmatprep.subr.mxu1 %v3550_v63  ;;  %v1893_v50 = vld [vmem:[#allocation2 + $0x1b] sm:$0xff] }
 0x31b   :  { %3895 = vmatprep.mubr.msk.f32.mxu1 %vm1538_vm3, %v1890_v29  ;;  %3848 = vmatpush3.msra.mxu0 %v3536_v25  ;;  %v1775_v49 = vld [vmem:[#allocation2 + $0x1a] sm:$0xff] }
 0x31c   :  { %3882 = vmatpush3.msra.mxu1 %v3550_v63  ;;  %3849 = vmatprep.subr.mxu0 %v3535_v35  ;;  %v2010_v38 = vld [vmem:[#allocation2 + $0x14] sm:$0xff]  ;;  %v2011_v6 = vld [vmem:[#allocation2 + $0x1c] sm:$0xff] }
 0x31d   :  { %3883 = vmatprep.subr.mxu1 %v3549_v40  ;;  %3809 = vmatmul.mubr.msk.f32.gmra.mxu0 %vm1538_vm3, %v1564_v31 }
 0x31e   :  { %3884 = vmatpush3.msra.mxu1 %v3549_v40  ;;  %3850 = vmatpush3.msra.mxu0 %v3535_v35 }
 0x31f   :  { %3865 = vmatprep.mubr.msk.f32.mxu0 %vm1538_vm3, %v1772_v26  ;;  %3851 = vmatprep.subr.mxu0 %v3534_v39 }
 0x320   :  { %3885 = vmatprep.subr.mxu1 %v3548_v5  ;;  %3852 = vmatpush3.msra.mxu0 %v3534_v39 }
 0x321   :  { %3886 = vmatpush3.msra.mxu1 %v3548_v5  ;;  %3853 = vmatprep.subr.mxu0 %v3533_v58 }
 0x322   :  { %3887 = vmatprep.subr.mxu1 %v3547_v60  ;;  %3854 = vmatpush3.msra.mxu0 %v3533_v58 }
 0x323   :  { %3888 = vmatpush3.msra.mxu1 %v3547_v60  ;;  %3855 = vmatprep.subr.mxu0 %v3532_v41 }
 0x324   :  { %3889 = vmatprep.subr.mxu1 %v3546_v55  ;;  %3856 = vmatpush3.msra.mxu0 %v3532_v41 }
 0x325   :  { %3890 = vmatpush3.msra.mxu1 %v3546_v55  ;;  %3857 = vmatprep.subr.mxu0 %v3531_v46 }
 0x326   :  { %3891 = vmatprep.subr.mxu1 %v3545_v28  ;;  %3858 = vmatpush3.msra.mxu0 %v3531_v46 }
 0x327   :  { %3892 = vmatpush3.msra.mxu1 %v3545_v28  ;;  %3859 = vmatprep.subr.mxu0 %v3530_v33  ;;  %v3576_v28 = vld [vmem:[%s5871_s8] ss:$0 sm:$0xff] }
 0x328   :  { %3893 = vmatprep.subr.mxu1 %v3544_v34  ;;  %3860 = vmatpush3.msra.mxu0 %v3530_v33 }
 0x329   :  { %3894 = vmatpush3.msra.mxu1 %v3544_v34  ;;  %3861 = vmatprep.subr.mxu0 %v3529_v53 }
 0x32a   :  { %3896 = vmatmul.mubr.msk.f32.vlgmr.msra.gmra.mxu1 %vm1538_vm3, %v1891_v19  ;;  %3862 = vmatpush3.msra.mxu0 %v3529_v53 }
 0x32b   :  { %3898 = vmatprep.mubr.msk.f32.mxu1 %vm1538_vm3, %v1892_v54  ;;  %3863 = vmatprep.subr.mxu0 %v3528_v20 }
 0x32c   :  { %3931 = vmatprep.subr.mxu1 %v5929_v51  ;;  %3864 = vmatpush3.msra.mxu0 %v3528_v20 }
 0x32d   :  { %3866 = vmatmul.mubr.msk.f32.vlgmr.msra.gmra.mxu0 %vm1538_vm3, %v1773_v36  ;;  %3901 = vmatprep.subr.mxu0 %v3571_v27 }
 0x32e   :  { %3899 = vmatmul.mubr.msk.f32.gmra.mxu1 %vm1538_vm3, %v1893_v50  ;;  %3868 = vmatprep.mubr.msk.f32.mxu0 %vm1538_vm3, %v1774_v4 }
 0x32f   :  { %3902 = vmatpush3.msra.mxu0 %v3571_v27  ;;  %3939 = vmatprep.mubr.msk.f32.mxu1 %vm4036_vm5, %v5929_v51 }
 0x330   :  { %3903 = vmatprep.subr.mxu0 %v3570_v52 }
 0x331   :  { %3904 = vmatpush3.msra.mxu0 %v3570_v52 }
 0x332   :  { %3869 = vmatmul.mubr.msk.f32.gmra.mxu0 %vm1538_vm3, %v1775_v49  ;;  %3905 = vmatprep.subr.mxu0 %v3569_v62  ;;  %v2216_v49 = vld [vmem:[%s5873_s10] sm:$0xff] }
 0x333   :  { %3906 = vmatpush3.msra.mxu0 %v3569_v62  ;;  %3925 = vmatprep.mubr.msk.f32.mxu0 %vm1538_vm3, %v2008_v18  ;;  %v2141_v62 = vld [vmem:[%s5872_s9] sm:$0xff]  ;;  %v2392_v18 = vld [vmem:[%s5875_s12 + $0x78] sm:$0xff] }
 0x334   :  { %3907 = vmatprep.subr.mxu0 %v3568_v17 }
 0x335   :  { %3908 = vmatpush3.msra.mxu0 %v3568_v17  ;;  %v2306_v17 = vld [vmem:[%s5874_s11 + $0x78] sm:$0xff] }
 0x336   :  { %3909 = vmatprep.subr.mxu0 %v3567_v22 }
 0x337   :  { %3910 = vmatpush3.msra.mxu0 %v3567_v22  ;;  %v2305_v22 = vld [vmem:[%s5874_s11 + $0x70] sm:$0xff] }
 0x338   :  { %3911 = vmatprep.subr.mxu0 %v3566_v30 }
 0x339   :  { %3912 = vmatpush3.msra.mxu0 %v3566_v30  ;;  %v2391_v30 = vld [vmem:[%s5875_s12 + $0x70] sm:$0xff] }
 0x33a   :  { %3913 = vmatprep.subr.mxu0 %v3565_v3 }
 0x33b   :  { %3914 = vmatpush3.msra.mxu0 %v3565_v3  ;;  %v2304_v3 = vld [vmem:[%s5874_s11 + $0x68] sm:$0xff] }
 0x33c   :  { %3915 = vmatprep.subr.mxu0 %v3564_v57 }
 0x33d   :  { %3916 = vmatpush3.msra.mxu0 %v3564_v57  ;;  %v2390_v57 = vld [vmem:[%s5875_s12 + $0x68] sm:$0xff] }
 0x33e   :  { %3917 = vmatprep.subr.mxu0 %v3563_v15 }
 0x33f   :  { %3918 = vmatpush3.msra.mxu0 %v3563_v15  ;;  %v2303_v15 = vld [vmem:[%s5874_s11 + $0x60] sm:$0xff] }
 0x340   :  { %3919 = vmatprep.subr.mxu0 %v3562_v16 }
 0x341   :  { %3920 = vmatpush3.msra.mxu0 %v3562_v16  ;;  %v2389_v16 = vld [vmem:[%s5875_s12 + $0x60] sm:$0xff] }
 0x342   :  { %3921 = vmatprep.subr.mxu0 %v3561_v23 }
 0x343   :  { %3922 = vmatpush3.msra.mxu0 %v3561_v23  ;;  %v2302_v23 = vld [vmem:[%s5874_s11 + $0x58] sm:$0xff] }
 0x344   :  { %3923 = vmatprep.subr.mxu0 %v3560_v32 }
 0x345   :  { %3924 = vmatpush3.msra.mxu0 %v3560_v32  ;;  %v2388_v32 = vld [vmem:[%s5875_s12 + $0x58] sm:$0xff] }
 0x346   :  { %3926 = vmatmul.mubr.msk.f32.vlgmr.msra.gmra.mxu0 %vm1538_vm3, %v2009_v14  ;;  %3942 = vmatprep.subr.mxu0 %v5929_v51  ;;  %v2301_v14 = vld [vmem:[%s5874_s11 + $0x50] sm:$0xff] }
 0x347   :  { %3928 = vmatprep.mubr.msk.f32.mxu0 %vm1538_vm3, %v2010_v38  ;;  %v2387_v38 = vld [vmem:[%s5875_s12 + $0x50] sm:$0xff] }
 0x34a   :  { %3929 = vmatmul.mubr.msk.f32.gmra.mxu0 %vm1538_vm3, %v2011_v6  ;;  %v2300_v6 = vld [vmem:[%s5874_s11 + $0x48] sm:$0xff] }
 0x34b   :  { %3950 = vmatprep.mubr.msk.f32.mxu0 %vm4036_vm5, %v5929_v51 }
 0x3cf   :  { %v3837_v61 = vpop.f32.mrf.mxu1 }
 0x3d1   :  { %v1753_v48 = vpop.f32.mrf.mxu1 }
 0x3d2   :  { %v3807_v45 = vpop.f32.mrf.mxu0 }
 0x3d3   :  { %v1759_v7 = vadd.f32 %v3837_v61, %v3807_v45  ;;  %v2386_v45 = vld [vmem:[%s5875_s12 + $0x48] sm:$0xff]  ;;  %v2385_v61 = vld [vmem:[%s5875_s12 + $0x40] sm:$0xff] }
 0x3d4   :  { %v1656_v0 = vpop.f32.mrf.mxu0 }
 0x3d5   :  { %v1754_v10 = vadd.f32 %v1753_v48, %v1656_v0  ;;  %v2299_v0 = vld [vmem:[%s5874_s11 + $0x40] sm:$0xff]  ;;  %v2384_v48 = vld [vmem:[%s5875_s12 + $0x38] sm:$0xff] }
 0x3d8   :  { %v3840_v44 = vpop.f32.mrf.mxu1 }
 0x3da   :  { %v1763_v21 = vpop.f32.mrf.mxu1 }
 0x3dd   :  { %v3810_v43 = vpop.f32.mrf.mxu0 }
 0x3de   :  { %v1769_v8 = vadd.f32 %v3840_v44, %v3810_v43  ;;  %v2298_v43 = vld [vmem:[%s5874_s11 + $0x38] sm:$0xff]  ;;  %v2383_v44 = vld [vmem:[%s5875_s12 + $0x30] sm:$0xff] }
 0x3df   :  { %v1666_v59 = vpop.f32.mrf.mxu0 }
 0x3e0   :  { %v1764_v37 = vadd.f32 %v1763_v21, %v1666_v59  ;;  %v2297_v59 = vld [vmem:[%s5874_s11 + $0x30] sm:$0xff]  ;;  %v2382_v21 = vld [vmem:[%s5875_s12 + $0x28] sm:$0xff] }
 0x3ea   :  { %v3897_v42 = vpop.f32.mrf.mxu1 }
 0x3ec   :  { %v1985_v11 = vpop.f32.mrf.mxu1 }
 0x3ed   :  { %v3867_v56 = vpop.f32.mrf.mxu0 }
 0x3ee   :  { %v1887_v1 = vadd.f32 %v3867_v56, %v1759_v7  ;;  %v3900_v63 = vpop.f32.mrf.mxu1  ;;  %v2296_v56 = vld [vmem:[%s5874_s11 + $0x28] sm:$0xff]  ;;  %v2293_v7 = vld [vmem:[%s5874_s11 + $0x10] sm:$0xff] }
 0x3ef   :  { %v1867_v47 = vpop.f32.mrf.mxu0 }
 0x3f0   :  { %v1886_v35 = vadd.f32 %v1867_v47, %v1754_v10  ;;  %v2005_v39 = vadd.f32 %v3897_v42, %v1887_v1  ;;  %v1995_v26 = vpop.f32.mrf.mxu1  ;;  %v2295_v47 = vld [vmem:[%s5874_s11 + $0x20] sm:$0xff]  ;;  %v2378_v10 = vld [vmem:[%s5875_s12 + $0x8] sm:$0xff] }
 0x3f1   :  { %v2381_v42 = vld [vmem:[%s5875_s12 + $0x20] sm:$0xff] }
 0x3f2   :  { %v3870_v13 = vpop.f32.mrf.mxu0  ;;  %v2004_v41 = vadd.f32 %v1985_v11, %v1886_v35  ;;  %v2380_v11 = vld [vmem:[%s5875_s12 + $0x18] sm:$0xff]  ;;  %v2377_v1 = vld [vmem:[%s5875_s12] sm:$0xff] }
 0x3f3   :  { %v1889_v25 = vadd.f32 %v3870_v13, %v1769_v8  ;;  %v2294_v13 = vld [vmem:[%s5874_s11 + $0x18] sm:$0xff]  ;;  %v2379_v8 = vld [vmem:[%s5875_s12 + $0x10] sm:$0xff] }
 0x3f4   :  { %v1877_v9 = vpop.f32.mrf.mxu0 }
 0x3f5   :  { %v1888_v40 = vadd.f32 %v1877_v9, %v1764_v37  ;;  %v2007_v5 = vadd.f32 %v3900_v63, %v1889_v25  ;;  %v2292_v9 = vld [vmem:[%s5874_s11 + $0x8] sm:$0xff]  ;;  %v2291_v37 = vld [vmem:[%s5874_s11] sm:$0xff] }
 0x3f7   :  { %v2006_v46 = vadd.f32 %v1995_v26, %v1888_v40  ;;  %v2539_v26 = vld [vmem:[%s5876_s14] sm:$0xf] }
 0x406   :  { %v3927_v29 = vpop.f32.mrf.mxu0 }
 0x407   :  { %v2123_v60 = vadd.f32 %v3927_v29, %v2005_v39 }
 0x408   :  { %v2103_v31 = vpop.f32.mrf.mxu0 }
 0x409   :  { %v2122_v34 = vadd.f32 %v2103_v31, %v2004_v41  ;;  %v2134_v20 = vadd.f32 %v3576_v28, %v2123_v60 }
 0x40a   :  { %v3930_v58 = vpop.f32.mrf.mxu0 }
 0x40b   :  { %v2125_v55 = vadd.f32 %v3930_v58, %v2007_v5  ;;  %v2133_v36 = vadd.f32 %v3576_v28, %v2122_v34  ;;  %v2138_v4 = vmax.f32 %v2134_v20, 0.0  ;;  %v2464_v58 = vld [vmem:[%s5877_s13] sm:$0xf]  ;;  %v3630_v34 = vld [vmem:[%s5878_s15 + $0x388] sm:$0xff]  ;;  %v3631_v20 = vld [vmem:[%s5878_s15 + $0x390] sm:$0xff] }
 0x40c   :  { %v2113_v33 = vpop.f32.mrf.mxu0 }
 0x40d   :  { %v2136_v53 = vadd.f32 %v3576_v28, %v2125_v55  ;;  %v2124_v19 = vadd.f32 %v2113_v33, %v2006_v46  ;;  %v2137_v52 = vmax.f32 %v2133_v36, 0.0  ;;  %v3638_v55 = vld [vmem:[%s5878_s15 + $0x3c8] sm:$0xff]  ;;  %v3640_v46 = vld [vmem:[%s5878_s15 + $0x3d8] sm:$0xff]  ;;  %v3639_v33 = vld [vmem:[%s5878_s15 + $0x3d0] sm:$0xff] }
 0x40e   :  { %v3621_v36 = vld [vmem:[%s5878_s15 + $0x340] sm:$0xff] }
 0x40f   :  { %v2140_v54 = vmax.f32 %v2136_v53, 0.0  ;;  %v2135_v27 = vadd.f32 %v3576_v28, %v2124_v19  ;;  %v3637_v28 = vld [vmem:[%s5878_s15 + $0x3c0] sm:$0xff]  ;;  %v3632_v53 = vld [vmem:[%s5878_s15 + $0x398] sm:$0xff] }
 0x410   :  { %v3629_v19 = vld [vmem:[%s5878_s15 + $0x380] sm:$0xff] }
 0x411   :  { %v2139_v50 = vmax.f32 %v2135_v27, 0.0  ;;  %3932 = vmatpush3.msra.mxu1 %v2140_v54  ;;  %3943 = vmatpush3.msra.mxu0 %v2140_v54  ;;  %v3622_v54 = vld [vmem:[%s5878_s15 + $0x348] sm:$0xff]  ;;  %v3624_v27 = vld [vmem:[%s5878_s15 + $0x358] sm:$0xff] }
 0x412   :  { %3933 = vmatprep.subr.mxu1 %v5929_v51  ;;  %3944 = vmatprep.subr.mxu0 %v5929_v51 }
 0x413   :  { %3934 = vmatpush3.msra.mxu1 %v2139_v50  ;;  %3945 = vmatpush3.msra.mxu0 %v2139_v50  ;;  %v3623_v50 = vld [vmem:[%s5878_s15 + $0x350] sm:$0xff] }
 0x414   :  { %3935 = vmatprep.subr.mxu1 %v5929_v51  ;;  %3946 = vmatprep.subr.mxu0 %v5929_v51 }
 0x415   :  { %3936 = vmatpush3.msra.mxu1 %v2138_v4  ;;  %3947 = vmatpush3.msra.mxu0 %v2138_v4  ;;  %v3614_v4 = vld [vmem:[%s5878_s15 + $0x308] sm:$0xff] }
 0x416   :  { %3937 = vmatprep.subr.mxu1 %v5929_v51  ;;  %3948 = vmatprep.subr.mxu0 %v5929_v51 }
 0x417   :  { %3938 = vmatpush3.msra.mxu1 %v2137_v52  ;;  %3949 = vmatpush3.msra.mxu0 %v2137_v52  ;;  %v3616_v52 = vld [vmem:[%s5878_s15 + $0x318] sm:$0xff] }
 0x418   :  { %3940 = vmatmul.mubr.msk.f32.vlgmr.msra.gmra.mxu1 %vm2142_vm6, %v2141_v62  ;;  %3951 = vmatmul.mubr.msk.f32.vlgmr.msra.gmra.mxu0 %vm2142_vm6, %v2216_v49  ;;  %v3613_v62 = vld [vmem:[%s5878_s15 + $0x300] sm:$0xff]  ;;  %v3615_v49 = vld [vmem:[%s5878_s15 + $0x310] sm:$0xff] }
 0x419   :  { %3953 = vmatprep.subr.mxu1 %v5929_v51  ;;  %3988 = vmatprep.subr.mxu0 %v5929_v51 }
 0x41a   :  { %3954 = vmatpush3.msra.mxu1 %v2306_v17  ;;  %3989 = vmatpush3.msra.mxu0 %v2392_v18  ;;  %v3606_v17 = vld [vmem:[%s5878_s15 + $0x2c8] sm:$0xff]  ;;  %v3608_v18 = vld [vmem:[%s5878_s15 + $0x2d8] sm:$0xff] }
 0x41b   :  { %3955 = vmatprep.subr.mxu1 %v5929_v51  ;;  %3990 = vmatprep.subr.mxu0 %v5929_v51 }
 0x41c   :  { %3956 = vmatpush3.msra.mxu1 %v2305_v22  ;;  %3991 = vmatpush3.msra.mxu0 %v2391_v30  ;;  %v3605_v22 = vld [vmem:[%s5878_s15 + $0x2c0] sm:$0xff]  ;;  %v3607_v30 = vld [vmem:[%s5878_s15 + $0x2d0] sm:$0xff] }
 0x41d   :  { %3957 = vmatprep.subr.mxu1 %v5929_v51  ;;  %3992 = vmatprep.subr.mxu0 %v5929_v51 }
 0x41e   :  { %3958 = vmatpush3.msra.mxu1 %v2304_v3  ;;  %3993 = vmatpush3.msra.mxu0 %v2390_v57  ;;  %v3598_v3 = vld [vmem:[%s5878_s15 + $0x288] sm:$0xff]  ;;  %v3600_v57 = vld [vmem:[%s5878_s15 + $0x298] sm:$0xff] }
 0x41f   :  { %3959 = vmatprep.subr.mxu1 %v5929_v51  ;;  %3994 = vmatprep.subr.mxu0 %v5929_v51 }
 0x420   :  { %3960 = vmatpush3.msra.mxu1 %v2303_v15  ;;  %3995 = vmatpush3.msra.mxu0 %v2389_v16  ;;  %v3597_v15 = vld [vmem:[%s5878_s15 + $0x280] sm:$0xff]  ;;  %v3599_v16 = vld [vmem:[%s5878_s15 + $0x290] sm:$0xff] }
 0x421   :  { %3961 = vmatprep.subr.mxu1 %v5929_v51  ;;  %3996 = vmatprep.subr.mxu0 %v5929_v51 }
 0x422   :  { %3962 = vmatpush3.msra.mxu1 %v2302_v23  ;;  %3997 = vmatpush3.msra.mxu0 %v2388_v32  ;;  %v3590_v23 = vld [vmem:[%s5878_s15 + $0x248] sm:$0xff]  ;;  %v3592_v32 = vld [vmem:[%s5878_s15 + $0x258] sm:$0xff] }
 0x423   :  { %3963 = vmatprep.subr.mxu1 %v5929_v51  ;;  %3998 = vmatprep.subr.mxu0 %v5929_v51 }
 0x424   :  { %3964 = vmatpush3.msra.mxu1 %v2301_v14  ;;  %3999 = vmatpush3.msra.mxu0 %v2387_v38  ;;  %v3589_v14 = vld [vmem:[%s5878_s15 + $0x240] sm:$0xff]  ;;  %v3591_v38 = vld [vmem:[%s5878_s15 + $0x250] sm:$0xff] }
 0x425   :  { %3965 = vmatprep.subr.mxu1 %v5929_v51  ;;  %4000 = vmatprep.subr.mxu0 %v5929_v51 }
 0x426   :  { %3966 = vmatpush3.msra.mxu1 %v2300_v6  ;;  %4001 = vmatpush3.msra.mxu0 %v2386_v45  ;;  %v3582_v6 = vld [vmem:[%s5878_s15 + $0x208] sm:$0xff]  ;;  %v3584_v45 = vld [vmem:[%s5878_s15 + $0x218] sm:$0xff] }
 0x427   :  { %3967 = vmatprep.subr.mxu1 %v5929_v51  ;;  %4002 = vmatprep.subr.mxu0 %v5929_v51 }
 0x428   :  { %3968 = vmatpush3.msra.mxu1 %v2299_v0  ;;  %4003 = vmatpush3.msra.mxu0 %v2385_v61  ;;  %v3581_v0 = vld [vmem:[%s5878_s15 + $0x200] sm:$0xff]  ;;  %v3583_v61 = vld [vmem:[%s5878_s15 + $0x210] sm:$0xff] }
 0x429   :  { %3969 = vmatprep.subr.mxu1 %v5929_v51  ;;  %4004 = vmatprep.subr.mxu0 %v5929_v51 }
 0x42a   :  { %3970 = vmatpush3.msra.mxu1 %v2298_v43  ;;  %4005 = vmatpush3.msra.mxu0 %v2384_v48  ;;  %v3642_v43 = vld [vmem:[%s5878_s15 + $0x3e8] sm:$0xff]  ;;  %v3644_v48 = vld [vmem:[%s5878_s15 + $0x3f8] sm:$0xff] }
 0x42b   :  { %3971 = vmatprep.subr.mxu1 %v5929_v51  ;;  %4006 = vmatprep.subr.mxu0 %v5929_v51 }
 0x42c   :  { %3972 = vmatpush3.msra.mxu1 %v2297_v59  ;;  %4007 = vmatpush3.msra.mxu0 %v2383_v44  ;;  %v3641_v59 = vld [vmem:[%s5878_s15 + $0x3e0] sm:$0xff]  ;;  %v3643_v44 = vld [vmem:[%s5878_s15 + $0x3f0] sm:$0xff] }
 0x42d   :  { %3973 = vmatprep.subr.mxu1 %v5929_v51  ;;  %4008 = vmatprep.subr.mxu0 %v5929_v51 }
 0x42e   :  { %3974 = vmatpush3.msra.mxu1 %v2296_v56  ;;  %4009 = vmatpush3.msra.mxu0 %v2382_v21  ;;  %v3634_v21 = vld [vmem:[%s5878_s15 + $0x3a8] sm:$0xff] }
 0x42f   :  { %3975 = vmatprep.subr.mxu1 %v5929_v51  ;;  %4010 = vmatprep.subr.mxu0 %v5929_v51 }
 0x430   :  { %3976 = vmatpush3.msra.mxu1 %v2295_v47  ;;  %4011 = vmatpush3.msra.mxu0 %v2381_v42  ;;  %v3636_v47 = vld [vmem:[%s5878_s15 + $0x3b8] sm:$0xff] }
 0x431   :  { %3977 = vmatprep.subr.mxu1 %v5929_v51  ;;  %4012 = vmatprep.subr.mxu0 %v5929_v51 }
 0x432   :  { %3978 = vmatpush3.msra.mxu1 %v2294_v13  ;;  %4013 = vmatpush3.msra.mxu0 %v2380_v11  ;;  %v3633_v13 = vld [vmem:[%s5878_s15 + $0x3a0] sm:$0xff]  ;;  %v3635_v11 = vld [vmem:[%s5878_s15 + $0x3b0] sm:$0xff] }
 0x433   :  { %3979 = vmatprep.subr.mxu1 %v5929_v51  ;;  %4014 = vmatprep.subr.mxu0 %v5929_v51 }
 0x434   :  { %3980 = vmatpush3.msra.mxu1 %v2293_v7  ;;  %4015 = vmatpush3.msra.mxu0 %v2379_v8  ;;  %v3626_v7 = vld [vmem:[%s5878_s15 + $0x368] sm:$0xff]  ;;  %v3628_v8 = vld [vmem:[%s5878_s15 + $0x378] sm:$0xff] }
 0x435   :  { %3981 = vmatprep.subr.mxu1 %v5929_v51  ;;  %4016 = vmatprep.subr.mxu0 %v5929_v51 }
 0x436   :  { %3985 = vmatprep.mubr.msk.f32.mxu1 %vm4036_vm5, %v5929_v51  ;;  %4020 = vmatprep.mubr.msk.f32.mxu0 %vm4036_vm5, %v5929_v51 }
 0x437   :  { %3982 = vmatpush3.msra.mxu1 %v2292_v9  ;;  %4017 = vmatpush3.msra.mxu0 %v2378_v10 }
 0x438   :  { %3983 = vmatprep.subr.mxu1 %v5929_v51  ;;  %4018 = vmatprep.subr.mxu0 %v5929_v51 }
 0x439   :  { %3984 = vmatpush3.msra.mxu1 %v2291_v37  ;;  %4019 = vmatpush3.msra.mxu0 %v2377_v1  ;;  %v3625_v37 = vld [vmem:[%s5878_s15 + $0x360] sm:$0xff]  ;;  %v3627_v1 = vld [vmem:[%s5878_s15 + $0x370] sm:$0xff] }
 0x43a   :  { %4028 = vmatprep.subr.mxu0 %v5929_v51  ;;  %4023 = vmatprep.subr.mxu1 %v5929_v51 }
 0x4d8   :  { %v2212_v25 = vpop.f32.mrf.mxu1  ;;  %v2286_v63 = vpop.f32.mrf.mxu0 }
 0x4d9   :  { %v2290_v29 = vmax.f32 %v2212_v25, %v2286_v63  ;;  %v3618_v25 = vld [vmem:[%s5878_s15 + $0x328] sm:$0xff]  ;;  %v3620_v63 = vld [vmem:[%s5878_s15 + $0x338] sm:$0xff] }
 0x4da   :  { %v3941_v35 = vpop.f32.mrf.mxu1  ;;  %v3952_v40 = vpop.f32.mrf.mxu0 }
 0x4db   :  { %3986 = vmatmul.mubr.f32.vlgmr.msra.gmra.mxu1 %v2290_v29  ;;  %4021 = vmatmul.mubr.f32.vlgmr.msra.gmra.mxu0 %v2290_v29  ;;  %v3617_v29 = vld [vmem:[%s5878_s15 + $0x320] sm:$0xff]  ;;  %v3619_v35 = vld [vmem:[%s5878_s15 + $0x330] sm:$0xff]  ;;  %v3610_v40 = vld [vmem:[%s5878_s15 + $0x2e8] sm:$0xff] }
 0x4dc   :  { %4030 = vmatprep.mubr.msk.f32.mxu0 %vm4036_vm5, %v5929_v51  ;;  %4025 = vmatprep.mubr.msk.f32.mxu1 %vm4036_vm5, %v5929_v51 }
 0x59b   :  { %v2373_v31 = vpop.f32.mrf.mxu1  ;;  %v2459_v39 = vpop.f32.mrf.mxu0 }
 0x59c   :  { %v2463_v5 = vmax.f32 %v2373_v31, %v2459_v39  ;;  %v3612_v31 = vld [vmem:[%s5878_s15 + $0x2f8] sm:$0xff]  ;;  %v3609_v39 = vld [vmem:[%s5878_s15 + $0x2e0] sm:$0xff] }
 0x59d   :  { %v3987_v60 = vpop.f32.mrf.mxu1  ;;  %v4022_v41 = vpop.f32.mrf.mxu0 }
 0x59e   :  { %4029 = vmatpush3.msra.mxu0 %v2463_v5  ;;  %4024 = vmatpush3.msra.mxu1 %v2463_v5  ;;  %v3611_v5 = vld [vmem:[%s5878_s15 + $0x2f0] sm:$0xff]  ;;  %v3601_v60 = vld [vmem:[%s5878_s15 + $0x2a0] sm:$0xff] }
 0x59f   :  { %4031 = vmatmul.mubr.msk.f32.vlgmr.msra.gmra.mxu0 %vm2465_vm7, %v2539_v26  ;;  %4026 = vmatmul.mubr.msk.f32.vlgmr.msra.gmra.mxu1 %vm2465_vm7, %v2464_v58  ;;  %v3602_v26 = vld [vmem:[%s5878_s15 + $0x2a8] sm:$0xff]  ;;  %v3604_v58 = vld [vmem:[%s5878_s15 + $0x2b8] sm:$0xff]  ;;  %v3603_v41 = vld [vmem:[%s5878_s15 + $0x2b0] sm:$0xff] }
 0x5a0   :  { %2761 = vmatprep.subr.mxu1 %v3638_v55  ;;  %2832 = vmatprep.subr.mxu0 %v3640_v46  ;;  %v3594_v55 = vld [vmem:[%s5878_s15 + $0x268] sm:$0xff]  ;;  %v3596_v46 = vld [vmem:[%s5878_s15 + $0x278] sm:$0xff] }
 0x5a1   :  { %2762 = vmatpush1.msra.mxu1 %v3637_v28  ;;  %2833 = vmatpush1.msra.mxu0 %v3639_v33  ;;  %v3593_v28 = vld [vmem:[%s5878_s15 + $0x260] sm:$0xff]  ;;  %v3595_v33 = vld [vmem:[%s5878_s15 + $0x270] sm:$0xff] }
 0x5a2   :  { %2763 = vmatprep.subr.mxu1 %v3630_v34  ;;  %2834 = vmatprep.subr.mxu0 %v3632_v53  ;;  %v3586_v34 = vld [vmem:[%s5878_s15 + $0x228] sm:$0xff]  ;;  %v3588_v53 = vld [vmem:[%s5878_s15 + $0x238] sm:$0xff] }
 0x5a3   :  { %2764 = vmatpush1.msra.mxu1 %v3629_v19  ;;  %2835 = vmatpush1.msra.mxu0 %v3631_v20  ;;  %v3585_v19 = vld [vmem:[%s5878_s15 + $0x220] sm:$0xff]  ;;  %v3587_v20 = vld [vmem:[%s5878_s15 + $0x230] sm:$0xff] }
 0x5a4   :  { %2765 = vmatprep.subr.mxu1 %v3622_v54  ;;  %2836 = vmatprep.subr.mxu0 %v3624_v27  ;;  %v2670_v54 = vld [vmem:[%s5878_s15 + $0x1c8] sm:$0xff]  ;;  %v2672_v27 = vld [vmem:[%s5878_s15 + $0x1d8] sm:$0xff] }
 0x5a5   :  { %2766 = vmatpush1.msra.mxu1 %v3621_v36  ;;  %2837 = vmatpush1.msra.mxu0 %v3623_v50  ;;  %v2669_v36 = vld [vmem:[%s5878_s15 + $0x1c0] sm:$0xff]  ;;  %v2671_v50 = vld [vmem:[%s5878_s15 + $0x1d0] sm:$0xff] }
 0x5a6   :  { %2767 = vmatprep.subr.mxu1 %v3614_v4  ;;  %2838 = vmatprep.subr.mxu0 %v3616_v52  ;;  %v2662_v4 = vld [vmem:[%s5878_s15 + $0x188] sm:$0xff]  ;;  %v2664_v52 = vld [vmem:[%s5878_s15 + $0x198] sm:$0xff] }
 0x5a7   :  { %2768 = vmatpush1.msra.mxu1 %v3613_v62  ;;  %2839 = vmatpush1.msra.mxu0 %v3615_v49  ;;  %v2661_v62 = vld [vmem:[%s5878_s15 + $0x180] sm:$0xff]  ;;  %v2663_v49 = vld [vmem:[%s5878_s15 + $0x190] sm:$0xff] }
 0x5a8   :  { %2769 = vmatprep.subr.mxu1 %v3606_v17  ;;  %2840 = vmatprep.subr.mxu0 %v3608_v18  ;;  %v2654_v17 = vld [vmem:[%s5878_s15 + $0x148] sm:$0xff]  ;;  %v2656_v18 = vld [vmem:[%s5878_s15 + $0x158] sm:$0xff] }
 0x5a9   :  { %2770 = vmatpush1.msra.mxu1 %v3605_v22  ;;  %2841 = vmatpush1.msra.mxu0 %v3607_v30  ;;  %v2653_v22 = vld [vmem:[%s5878_s15 + $0x140] sm:$0xff]  ;;  %v2655_v30 = vld [vmem:[%s5878_s15 + $0x150] sm:$0xff] }
 0x5aa   :  { %2771 = vmatprep.subr.mxu1 %v3598_v3  ;;  %2842 = vmatprep.subr.mxu0 %v3600_v57  ;;  %v2646_v3 = vld [vmem:[%s5878_s15 + $0x108] sm:$0xff]  ;;  %v2648_v57 = vld [vmem:[%s5878_s15 + $0x118] sm:$0xff] }
 0x5ab   :  { %2772 = vmatpush1.msra.mxu1 %v3597_v15  ;;  %2843 = vmatpush1.msra.mxu0 %v3599_v16  ;;  %v2645_v15 = vld [vmem:[%s5878_s15 + $0x100] sm:$0xff]  ;;  %v2647_v16 = vld [vmem:[%s5878_s15 + $0x110] sm:$0xff] }
 0x5ac   :  { %2773 = vmatprep.subr.mxu1 %v3590_v23  ;;  %2844 = vmatprep.subr.mxu0 %v3592_v32  ;;  %v2638_v23 = vld [vmem:[%s5878_s15 + $0xc8] sm:$0xff]  ;;  %v2640_v32 = vld [vmem:[%s5878_s15 + $0xd8] sm:$0xff] }
 0x5ad   :  { %2774 = vmatpush1.msra.mxu1 %v3589_v14  ;;  %2845 = vmatpush1.msra.mxu0 %v3591_v38  ;;  %v2637_v14 = vld [vmem:[%s5878_s15 + $0xc0] sm:$0xff]  ;;  %v2639_v38 = vld [vmem:[%s5878_s15 + $0xd0] sm:$0xff] }
 0x5ae   :  { %2775 = vmatprep.subr.mxu1 %v3582_v6  ;;  %2846 = vmatprep.subr.mxu0 %v3584_v45  ;;  %v2630_v6 = vld [vmem:[%s5878_s15 + $0x88] sm:$0xff]  ;;  %v2632_v45 = vld [vmem:[%s5878_s15 + $0x98] sm:$0xff] }
 0x5af   :  { %2776 = vmatpush1.msra.mxu1 %v3581_v0  ;;  %2847 = vmatpush1.msra.mxu0 %v3583_v61  ;;  %v2629_v0 = vld [vmem:[%s5878_s15 + $0x80] sm:$0xff]  ;;  %v2631_v61 = vld [vmem:[%s5878_s15 + $0x90] sm:$0xff] }
 0x5b0   :  { %2809 = vmatprep.mubr.f32.mxu1 %v5929_v51  ;;  %2880 = vmatprep.mubr.f32.mxu0 %v5929_v51 }
 0x5b1   :  { %2903 = vmatprep.subr.mxu1 %v3642_v43  ;;  %2974 = vmatprep.subr.mxu0 %v3644_v48  ;;  %v2622_v43 = vld [vmem:[%s5878_s15 + $0x48] sm:$0xff]  ;;  %v2624_v48 = vld [vmem:[%s5878_s15 + $0x58] sm:$0xff] }
 0x65f   :  { %v5536_v56 = vpop.f32.mrf.mxu0  ;;  %v5544_v42 = vpop.f32.mrf.mxu1 }
 0x660   :  { %3645 = vmatmul.mubr.msk.f32.vlgmr.msra.gmra.mxu1 %vm1313_vm2, %v5536_v56  ;;  %3646 = vmatmul.mubr.msk.f32.vlgmr.msra.gmra.mxu0 %vm1313_vm2, %v5536_v56 }
 0x661   :  { %2904 = vmatpush1.msra.mxu1 %v3641_v59  ;;  %2975 = vmatpush1.msra.mxu0 %v3643_v44  ;;  %v4032_v9 = vpop.f32.mrf.mxu0  ;;  %v4027_v10 = vpop.f32.mrf.mxu1  ;;  %v2621_v59 = vld [vmem:[%s5878_s15 + $0x40] sm:$0xff]  ;;  %v2623_v44 = vld [vmem:[%s5878_s15 + $0x50] sm:$0xff] }
 0x662   :  { %2905 = vmatprep.subr.mxu1 %v3634_v21  ;;  %2976 = vmatprep.subr.mxu0 %v3636_v47  ;;  %v2616_v21 = vld [vmem:[%s5878_s15 + $0x18] sm:$0xff]  ;;  %v2613_v47 = vld [vmem:[%s5878_s15] sm:$0xff]  ;;  %v2675_v9 = vld [vmem:[%s5878_s15 + $0x1f0] sm:$0xff] }
 0x663   :  { %2906 = vmatpush1.msra.mxu1 %v3633_v13  ;;  %2977 = vmatpush1.msra.mxu0 %v3635_v11  ;;  %v2615_v13 = vld [vmem:[%s5878_s15 + $0x10] sm:$0xff]  ;;  %v2674_v11 = vld [vmem:[%s5878_s15 + $0x1e8] sm:$0xff] }
 0x664   :  { %2907 = vmatprep.subr.mxu1 %v3626_v7  ;;  %2978 = vmatprep.subr.mxu0 %v3628_v8  ;;  %v2676_v7 = vld [vmem:[%s5878_s15 + $0x1f8] sm:$0xff]  ;;  %v2673_v8 = vld [vmem:[%s5878_s15 + $0x1e0] sm:$0xff]  ;;  %v2666_v10 = vld [vmem:[%s5878_s15 + $0x1a8] sm:$0xff] }
 0x665   :  { %2908 = vmatpush1.msra.mxu1 %v3625_v37  ;;  %2979 = vmatpush1.msra.mxu0 %v3627_v1  ;;  %v2668_v37 = vld [vmem:[%s5878_s15 + $0x1b8] sm:$0xff]  ;;  %v2665_v1 = vld [vmem:[%s5878_s15 + $0x1a0] sm:$0xff] }
 0x666   :  { %2909 = vmatprep.subr.mxu1 %v3618_v25  ;;  %2980 = vmatprep.subr.mxu0 %v3620_v63  ;;  %v2667_v25 = vld [vmem:[%s5878_s15 + $0x1b0] sm:$0xff]  ;;  %v2658_v63 = vld [vmem:[%s5878_s15 + $0x168] sm:$0xff] }
 0x667   :  { %2910 = vmatpush1.msra.mxu1 %v3617_v29  ;;  %2981 = vmatpush1.msra.mxu0 %v3619_v35  ;;  %v2660_v29 = vld [vmem:[%s5878_s15 + $0x178] sm:$0xff]  ;;  %v2657_v35 = vld [vmem:[%s5878_s15 + $0x160] sm:$0xff] }
 0x668   :  { %2911 = vmatprep.subr.mxu1 %v3610_v40  ;;  %2982 = vmatprep.subr.mxu0 %v3612_v31  ;;  %v2659_v40 = vld [vmem:[%s5878_s15 + $0x170] sm:$0xff]  ;;  %v2650_v31 = vld [vmem:[%s5878_s15 + $0x128] sm:$0xff] }
 0x669   :  { %2912 = vmatpush1.msra.mxu1 %v3609_v39  ;;  %2983 = vmatpush1.msra.mxu0 %v3611_v5  ;;  %v2652_v39 = vld [vmem:[%s5878_s15 + $0x138] sm:$0xff]  ;;  %v2649_v5 = vld [vmem:[%s5878_s15 + $0x120] sm:$0xff] }
 0x66a   :  { %2913 = vmatprep.subr.mxu1 %v3602_v26  ;;  %2984 = vmatprep.subr.mxu0 %v3604_v58  ;;  %v2651_v26 = vld [vmem:[%s5878_s15 + $0x130] sm:$0xff]  ;;  %v2642_v58 = vld [vmem:[%s5878_s15 + $0xe8] sm:$0xff] }
 0x66b   :  { %2914 = vmatpush1.msra.mxu1 %v3601_v60  ;;  %2985 = vmatpush1.msra.mxu0 %v3603_v41  ;;  %v2644_v60 = vld [vmem:[%s5878_s15 + $0xf8] sm:$0xff]  ;;  %v2641_v41 = vld [vmem:[%s5878_s15 + $0xe0] sm:$0xff] }
 0x66c   :  { %2915 = vmatprep.subr.mxu1 %v3594_v55  ;;  %2986 = vmatprep.subr.mxu0 %v3596_v46  ;;  %v2643_v55 = vld [vmem:[%s5878_s15 + $0xf0] sm:$0xff]  ;;  %v2634_v46 = vld [vmem:[%s5878_s15 + $0xa8] sm:$0xff] }
 0x66d   :  { %2916 = vmatpush1.msra.mxu1 %v3593_v28  ;;  %2987 = vmatpush1.msra.mxu0 %v3595_v33  ;;  %v2636_v28 = vld [vmem:[%s5878_s15 + $0xb8] sm:$0xff]  ;;  %v2633_v33 = vld [vmem:[%s5878_s15 + $0xa0] sm:$0xff] }
 0x66e   :  { %2917 = vmatprep.subr.mxu1 %v3586_v34  ;;  %2988 = vmatprep.subr.mxu0 %v3588_v53  ;;  %v2635_v34 = vld [vmem:[%s5878_s15 + $0xb0] sm:$0xff]  ;;  %v2626_v53 = vld [vmem:[%s5878_s15 + $0x68] sm:$0xff] }
 0x66f   :  { %2918 = vmatpush1.msra.mxu1 %v3585_v19  ;;  %2989 = vmatpush1.msra.mxu0 %v3587_v20  ;;  %v2628_v19 = vld [vmem:[%s5878_s15 + $0x78] sm:$0xff]  ;;  %v2625_v20 = vld [vmem:[%s5878_s15 + $0x60] sm:$0xff] }
 0x670   :  { %2951 = vmatprep.mubr.f32.mxu1 %v5929_v51  ;;  %3022 = vmatprep.mubr.f32.mxu0 %v5929_v51 }
 0x671   :  { %3048 = vmatprep.subr.mxu1 %v2670_v54  ;;  %3119 = vmatprep.subr.mxu0 %v2672_v27  ;;  %v2627_v54 = vld [vmem:[%s5878_s15 + $0x70] sm:$0xff]  ;;  %v2618_v27 = vld [vmem:[%s5878_s15 + $0x28] sm:$0xff] }
 0x672   :  { %3647 = vmatmul.mubr.msk.f32.vlgmr.msra.gmra.mxu1 %vm1313_vm2, %v5536_v56  ;;  %3648 = vmatmul.mubr.msk.f32.vlgmr.msra.gmra.mxu0 %vm1313_vm2, %v5536_v56  ;;  %v2614_v56 = vld [vmem:[%s5878_s15 + $0x8] sm:$0xff] }
 0x673   :  { %3049 = vmatpush1.msra.mxu1 %v2669_v36  ;;  %3120 = vmatpush1.msra.mxu0 %v2671_v50  ;;  %v2620_v36 = vld [vmem:[%s5878_s15 + $0x38] sm:$0xff]  ;;  %v2617_v50 = vld [vmem:[%s5878_s15 + $0x20] sm:$0xff] }
 0x674   :  { %3050 = vmatprep.subr.mxu1 %v2662_v4  ;;  %3121 = vmatprep.subr.mxu0 %v2664_v52  ;;  %v2619_v4 = vld [vmem:[%s5878_s15 + $0x30] sm:$0xff] }
 0x675   :  { %3051 = vmatpush1.msra.mxu1 %v2661_v62  ;;  %3122 = vmatpush1.msra.mxu0 %v2663_v49 }
 0x676   :  { %3052 = vmatprep.subr.mxu1 %v2654_v17  ;;  %3123 = vmatprep.subr.mxu0 %v2656_v18 }
 0x677   :  { %3053 = vmatpush1.msra.mxu1 %v2653_v22  ;;  %3124 = vmatpush1.msra.mxu0 %v2655_v30  ;;  %v3328_v30 = vsub.s32 2, %v4699_v2 }
 0x678   :  { %3054 = vmatprep.subr.mxu1 %v2646_v3  ;;  %3125 = vmatprep.subr.mxu0 %v2648_v57  ;;  %v3316_v3 = vld [vmem:[%s5879_s16] sm:$0xff] }
 0x679   :  { %3055 = vmatpush1.msra.mxu1 %v2645_v15  ;;  %3126 = vmatpush1.msra.mxu0 %v2647_v16  ;;  %v3321_v16 = vrot.slane %v3316_v3, %v1000_v24 }
 0x67a   :  { %3056 = vmatprep.subr.mxu1 %v2638_v23  ;;  %3127 = vmatprep.subr.mxu0 %v2640_v32 }
 0x67b   :  { %3057 = vmatpush1.msra.mxu1 %v2637_v14  ;;  %3128 = vmatpush1.msra.mxu0 %v2639_v38 }
 0x67c   :  { %3058 = vmatprep.subr.mxu1 %v2630_v6  ;;  %3129 = vmatprep.subr.mxu0 %v2632_v45  ;;  %v3325_v6 = vrot.slane %v3316_v3, %v1004_v12  ;;  %v3336_v12 = vsub.s32 4, %v4699_v2 }
 0x67d   :  { %3059 = vmatpush1.msra.mxu1 %v2629_v0  ;;  %3130 = vmatpush1.msra.mxu0 %v2631_v61 }
 0x67e   :  { %3060 = vmatprep.subr.mxu1 %v2622_v43  ;;  %3131 = vmatprep.subr.mxu0 %v2624_v48 }
 0x67f   :  { %3061 = vmatpush1.msra.mxu1 %v2621_v59  ;;  %3132 = vmatpush1.msra.mxu0 %v2623_v44 }
 0x680   :  { %3062 = vmatprep.subr.mxu1 %v2614_v56  ;;  %3133 = vmatprep.subr.mxu0 %v2616_v21 }
 0x681   :  { %3063 = vmatpush1.msra.mxu1 %v2613_v47  ;;  %3096 = vmatprep.mubr.f32.mxu1 %v5929_v51 }
 0x682   :  { %3134 = vmatpush1.msra.mxu0 %v2615_v13  ;;  %3167 = vmatprep.mubr.f32.mxu0 %v5929_v51 }
 0x683   :  { %3649 = vmatmul.mubr.msk.f32.vlgmr.msra.gmra.mxu1 %vm1313_vm2, %v5544_v42  ;;  %3650 = vmatmul.mubr.msk.f32.vlgmr.msra.gmra.mxu0 %vm1313_vm2, %v5544_v42 }
 0x684   :  { %3190 = vmatprep.subr.mxu1 %v2674_v11  ;;  %3261 = vmatprep.subr.mxu0 %v2676_v7 }
 0x685   :  { %3191 = vmatpush1.msra.mxu1 %v2673_v8  ;;  %3262 = vmatpush1.msra.mxu0 %v2675_v9  ;;  %v3344_v9 = vsub.s32 6, %v4699_v2 }
 0x686   :  { %3192 = vmatprep.subr.mxu1 %v2666_v10  ;;  %3263 = vmatprep.subr.mxu0 %v2668_v37  ;;  %v3340_v10 = vsub.s32 5, %v4699_v2  ;;  %v3348_v37 = vsub.s32 7, %v4699_v2 }
 0x687   :  { %3193 = vmatpush1.msra.mxu1 %v2665_v1  ;;  %3264 = vmatpush1.msra.mxu0 %v2667_v25  ;;  %v3337_v1 = vrot.slane %v3316_v3, %v3336_v12  ;;  %v3345_v25 = vrot.slane %v3316_v3, %v3344_v9 }
 0x688   :  { %3194 = vmatprep.subr.mxu1 %v2658_v63  ;;  %3265 = vmatprep.subr.mxu0 %v2660_v29 }
 0x689   :  { %3195 = vmatpush1.msra.mxu1 %v2657_v35  ;;  %3266 = vmatpush1.msra.mxu0 %v2659_v40 }
 0x68a   :  { %3196 = vmatprep.subr.mxu1 %v2650_v31  ;;  %3267 = vmatprep.subr.mxu0 %v2652_v39  ;;  %v3341_v31 = vrot.slane %v3316_v3, %v3340_v10  ;;  %v3349_v39 = vrot.slane %v3316_v3, %v3348_v37 }
 0x68b   :  { %3197 = vmatpush1.msra.mxu1 %v2649_v5  ;;  %3268 = vmatpush1.msra.mxu0 %v2651_v26 }
 0x68c   :  { %3198 = vmatprep.subr.mxu1 %v2642_v58  ;;  %3269 = vmatprep.subr.mxu0 %v2644_v60 }
 0x68d   :  { %3199 = vmatpush1.msra.mxu1 %v2641_v41  ;;  %3270 = vmatpush1.msra.mxu0 %v2643_v55 }
 0x68e   :  { %3200 = vmatprep.subr.mxu1 %v2634_v46  ;;  %3271 = vmatprep.subr.mxu0 %v2636_v28 }
 0x68f   :  { %3201 = vmatpush1.msra.mxu1 %v2633_v33  ;;  %3272 = vmatpush1.msra.mxu0 %v2635_v34 }
 0x690   :  { %3202 = vmatprep.subr.mxu1 %v2626_v53  ;;  %3273 = vmatprep.subr.mxu0 %v2628_v19 }
 0x691   :  { %3203 = vmatpush1.msra.mxu1 %v2625_v20  ;;  %3274 = vmatpush1.msra.mxu0 %v2627_v54 }
 0x692   :  { %3204 = vmatprep.subr.mxu1 %v2618_v27  ;;  %3275 = vmatprep.subr.mxu0 %v2620_v36 }
 0x693   :  { %3205 = vmatpush1.msra.mxu1 %v2617_v50  ;;  %3238 = vmatprep.mubr.f32.mxu1 %v5929_v51 }
 0x694   :  { %3276 = vmatpush1.msra.mxu0 %v2619_v4  ;;  %3309 = vmatprep.mubr.f32.mxu0 %v5929_v51  ;;  %v3332_v51 = vsub.s32 3, %v4699_v2 }
 0x695   :  { %3651 = vmatmul.mubr.msk.f32.vlgmr.msra.gmra.mxu1 %vm1313_vm2, %v5544_v42  ;;  %3652 = vmatmul.mubr.msk.f32.vlgmr.msra.gmra.mxu0 %vm1313_vm2, %v5544_v42  ;;  %v3329_v42 = vrot.slane %v3316_v3, %v3328_v30 }
 0x696   :  { %v3333_v45 = vrot.slane %v3316_v3, %v3332_v51 }
 0x720   :  { %v2811_v52 = vpop.f32.mrf.mxu1  ;;  %v2882_v62 = vpop.f32.mrf.mxu0 }
 0x722   :  { %v2813_v49 = vpop.f32.mrf.mxu1  ;;  %v2884_v17 = vpop.f32.mrf.mxu0 }
 0x732   :  { %v2953_v18 = vpop.f32.mrf.mxu1  ;;  %v3024_v22 = vpop.f32.mrf.mxu0 }
 0x734   :  { %v2955_v57 = vpop.f32.mrf.mxu1  ;;  %v3026_v15 = vpop.f32.mrf.mxu0 }
 0x743   :  { %v3098_v23 = vpop.f32.mrf.mxu1  ;;  %v3169_v32 = vpop.f32.mrf.mxu0 }
 0x744   :  { %v3099_v14 = vadd.f32 %v3098_v23, %v2811_v52  ;;  %v3170_v38 = vadd.f32 %v3169_v32, %v2882_v62 }
 0x745   :  { %v3100_v0 = vpop.f32.mrf.mxu1  ;;  %v3171_v61 = vpop.f32.mrf.mxu0 }
 0x746   :  { %v3358_v43 = vadd.f32 %v3321_v16, %v3099_v14  ;;  %v3360_v48 = vadd.f32 %v3329_v42, %v3170_v38  ;;  %v3101_v59 = vadd.f32 %v3100_v0, %v2813_v49  ;;  %v3172_v44 = vadd.f32 %v3171_v61, %v2884_v17 }
 0x748   :  { %v3359_v56 = vadd.f32 %v3325_v6, %v3101_v59  ;;  %v3361_v21 = vadd.f32 %v3333_v45, %v3172_v44  ;;  %v3366_v47 = vmax.f32 %v3358_v43, 0.0  ;;  %v3368_v13 = vmax.f32 %v3360_v48, 0.0 }
 0x74a   :  { %v3367_v24 = vmax.f32 %v3359_v56, 0.0  ;;  %v3369_v11 = vmax.f32 %v3361_v21, 0.0 }
 0x74c   :  { %v3382_v7 = vcombine.low %v3366_v47, %v3367_v24  ;;  %v3383_v8 = vcombine.low %v3368_v13, %v3369_v11 }
 0x74e   :  { %3390 = vst [vmem:[%s5880_s17] sm:$0xff] %v3382_v7  ;;  %3391 = vst [vmem:[%s5880_s17 + $0x8] sm:$0xff] %v3383_v8 }
 0x755   :  { %v3240_v63 = vpop.f32.mrf.mxu1  ;;  %v3311_v29 = vpop.f32.mrf.mxu0 }
 0x756   :  { %v3241_v35 = vadd.f32 %v3240_v63, %v2953_v18  ;;  %v3312_v40 = vadd.f32 %v3311_v29, %v3024_v22 }
 0x757   :  { %v3242_v5 = vpop.f32.mrf.mxu1  ;;  %v3313_v26 = vpop.f32.mrf.mxu0 }
 0x758   :  { %v3362_v58 = vadd.f32 %v3337_v1, %v3241_v35  ;;  %v3364_v60 = vadd.f32 %v3345_v25, %v3312_v40  ;;  %v3243_v41 = vadd.f32 %v3242_v5, %v2955_v57  ;;  %v3314_v55 = vadd.f32 %v3313_v26, %v3026_v15 }
 0x75a   :  { %v3363_v46 = vadd.f32 %v3341_v31, %v3243_v41  ;;  %v3365_v28 = vadd.f32 %v3349_v39, %v3314_v55  ;;  %v3370_v33 = vmax.f32 %v3362_v58, 0.0  ;;  %v3372_v34 = vmax.f32 %v3364_v60, 0.0 }
 0x75c   :  { %v3371_v53 = vmax.f32 %v3363_v46, 0.0  ;;  %v3373_v2 = vmax.f32 %v3365_v28, 0.0 }
 0x75e   :  { %v3384_v19 = vcombine.low %v3370_v33, %v3371_v53  ;;  %v3385_v20 = vcombine.low %v3372_v34, %v3373_v2 }
 0x760   :  { %3392 = vst [vmem:[%s5880_s17 + $0x10] sm:$0xff] %v3384_v19  ;;  %3393 = vst [vmem:[%s5880_s17 + $0x18] sm:$0xff] %v3385_v20 }

// kernel: discomkd_forward.3
= control target key start
LH: loop header
LB: loop body
LE: loop exit
PB: predicated region body
PF: predicated region fallthrough
CT: control target
= control target key end

     0   :  { %s6150_s0 = inlined_call_operand.vmem [shape: f32[84,80], index: 0, kind: input, shape index: {}]   ;;  %s6151_s1 = inlined_call_operand.vmem [shape: f32[5,80,192], index: 1, kind: input, shape index: {}]   ;;  %s6152_s2 = inlined_call_operand.hbm [shape: f32[1,192], index: 2, kind: input, shape index: {}]   ;;  %s6153_s3 = inlined_call_operand.vmem [shape: f32[36,80], index: 3, kind: input, shape index: {}]   ;;  %s6154_s4 = inlined_call_operand.hbm [shape: f32[36,80], index: 4, kind: input, shape index: {}]   ;;  %s6155_s5 = inlined_call_operand.vmem [shape: f32[192,96], index: 5, kind: input, shape index: {}]   ;;  %s6156_s6 = inlined_call_operand.vmem [shape: f32[192,96], index: 6, kind: input, shape index: {}]   ;;  %s6157_s7 = inlined_call_operand.hbm [shape: f32[5,96,128], index: 7, kind: input, shape index: {}]   ;;  %s6158_s8 = inlined_call_operand.vmem [shape: f32[1,128], index: 8, kind: input, shape index: {}]   ;;  %s6159_s9 = inlined_call_operand.hbm [shape: f32[8,32], index: 9, kind: input, shape index: {}]   ;;  %s6160_s10 = inlined_call_operand.hbm [shape: f32[8,32], index: 10, kind: input, shape index: {}]   ;;  %s6161_s11 = inlined_call_operand.vmem [shape: f32[128,64], index: 11, kind: input, shape index: {}]   ;;  %s6162_s12 = inlined_call_operand.vmem [shape: f32[128,64], index: 12, kind: input, shape index: {}]   ;;  %s6163_s13 = inlined_call_operand.hbm [shape: f32[4,8], index: 13, kind: input, shape index: {}]   ;;  %s6164_s14 = inlined_call_operand.hbm [shape: f32[4,8], index: 14, kind: input, shape index: {}]   ;;  %s6165_s15 = inlined_call_operand.vmem [shape: f32[2,64,1024], index: 15, kind: input, shape index: {}]   ;;  %s6166_s16 = inlined_call_operand.hbm [shape: f32[1,1024], index: 16, kind: input, shape index: {}]   ;;  %s6167_s17 = inlined_call_operand.vmem [shape: f32[4,1024], index: 17, kind: output, shape index: {}]  }
   0x1   :  { %6172 = sst [smem:[#allocation41_spill]] %s6150_s0 }
   0x2   :  { %6173 = sst [smem:[#allocation42_spill]] %s6151_s1 }
   0x3   :  { %22 = vsyncpa [#allocation4], 0 }
   0x4   :  { %23 = vsyncpa [#allocation6], 0 }
   0x5   :  { %24 = vsyncpa [#allocation9], 0 }
   0x6   :  { %25 = vsyncpa [#allocation12], 0 }
   0x7   :  { %26 = vsyncpa [#allocation15], 0  ;;  %s4358_s24 = smov [#allocation5]  }
   0x8   :  { %s48_s25 = sshll.u32 %s4358_s24, 4  ;;  %s49_s25 = int_to_ptr.vmem [resolvable:$true] %s48_s25 }
   0x9   :  { %s4196_s26 = scalar_lea.vmem %s49_s25, 640  ;;  %p4201_p1 = scmp.lt.s32.totalorder %s49_s25, %s49_s25 }
   0xa   :  { %p4197_p0 = scmp.ne.s32.totalorder %s49_s25, %s4196_s26  ;;  %p4202_p2 = scmp.lt.s32.totalorder %s4196_s26, %s4196_s26 }
   0xc   :  { %p4203_p3 = por %p4202_p2, %p4201_p1 }
   0xe   :  { %p4204_p4 = pnand %p4203_p3, %p4197_p0 }
  0x10   :  { %4207 = shalt.err (!%p4204_p4)
}
  0x11   :  { %s4359_s27 = smov 128   ;;  %s4360_s28 = smov 8  }
  0x12   :  { %54 = dma.hbm_to_vmem [thread:$0]  %s6154_s4, 640, %s49_s25, [#allocation6], %s4359_s27, %s4359_s27, %s4360_s28  }
  0x13   :  { %s4361_s30 = smov [#allocation8]   ;;  %s4362_s19 = smov [#allocation11]  }
  0x14   :  { %s79_s18 = sshll.u32 %s4361_s30, 4  ;;  %s103_s1 = sshll.u32 %s4362_s19, 4  ;;  %s80_s18 = int_to_ptr.vmem [resolvable:$true] %s79_s18  ;;  %s104_s1 = int_to_ptr.vmem [resolvable:$true] %s103_s1 }
  0x15   :  { %s4216_s20 = scalar_lea.vmem %s80_s18, 128  ;;  %p4221_p6 = scmp.lt.s32.totalorder %s80_s18, %s80_s18 }
  0x16   :  { %p4217_p5 = scmp.ne.s32.totalorder %s80_s18, %s4216_s20  ;;  %p4222_p7 = scmp.lt.s32.totalorder %s4216_s20, %s4216_s20 }
  0x18   :  { %p4223_p8 = por %p4222_p7, %p4221_p6 }
  0x1a   :  { %p4224_p9 = pnand %p4223_p8, %p4217_p5 }
  0x1c   :  { %4227 = shalt.err (!%p4224_p9)
}
  0x1d   :  { %82 = dma.hbm_to_vmem [thread:$0]  %s6159_s9, 128, %s80_s18, [#allocation9]  }
  0x1e   :  { %s4236_s23 = scalar_lea.vmem %s104_s1, 64  ;;  %p4241_p11 = scmp.lt.s32.totalorder %s104_s1, %s104_s1 }
  0x1f   :  { %p4237_p10 = scmp.ne.s32.totalorder %s104_s1, %s4236_s23  ;;  %p4242_p12 = scmp.lt.s32.totalorder %s4236_s23, %s4236_s23 }
  0x21   :  { %p4243_p13 = por %p4242_p12, %p4241_p11 }
  0x23   :  { %p4244_p0 = pnand %p4243_p13, %p4237_p10 }
  0x25   :  { %4247 = shalt.err (!%p4244_p0)
}
  0x26   :  { %106 = dma.hbm_to_vmem [thread:$0]  %s6163_s13, 64, %s104_s1, [#allocation12]  }
  0x27   :  { %s4363_s25 = smov [#allocation3]   ;;  %s4364_s29 = smov [#allocation7]  }
  0x28   :  { %s37_s26 = sshll.u32 %s4363_s25, 4  ;;  %s64_s0 = sshll.u32 %s4364_s29, 4  ;;  %s38_s26 = int_to_ptr.vmem [resolvable:$true] %s37_s26  ;;  %s65_s0 = int_to_ptr.vmem [resolvable:$true] %s64_s0 }
  0x29   :  { %s4256_s30 = scalar_lea.vmem %s38_s26, 32  ;;  %p4261_p2 = scmp.lt.s32.totalorder %s38_s26, %s38_s26 }
  0x2a   :  { %p4257_p1 = scmp.ne.s32.totalorder %s38_s26, %s4256_s30  ;;  %p4262_p3 = scmp.lt.s32.totalorder %s4256_s30, %s4256_s30 }
  0x2c   :  { %p4263_p4 = por %p4262_p3, %p4261_p2 }
  0x2e   :  { %p4264_p5 = pnand %p4263_p4, %p4257_p1 }
  0x30   :  { %4267 = shalt.err (!%p4264_p5)
}
  0x31   :  { %40 = dma.hbm_to_vmem [thread:$0]  %s6152_s2, 32, %s38_s26, [#allocation4]  }
  0x32   :  { %s4276_s19 = scalar_lea.vmem %s65_s0, 7680  ;;  %p4281_p7 = scmp.lt.s32.totalorder %s65_s0, %s65_s0 }
  0x33   :  { %p4277_p6 = scmp.ne.s32.totalorder %s65_s0, %s4276_s19  ;;  %p4282_p8 = scmp.lt.s32.totalorder %s4276_s19, %s4276_s19 }
  0x35   :  { %p4283_p9 = por %p4282_p8, %p4281_p7 }
  0x37   :  { %p4284_p10 = pnand %p4283_p9, %p4277_p6 }
  0x39   :  { %4287 = shalt.err (!%p4284_p10)
}
  0x3a   :  { %70 = dma.hbm_to_vmem [thread:$0]  %s6157_s7, 7680, %s65_s0, [#allocation6], %s4359_s27, %s4359_s27, %s4360_s28  }
  0x3b   :  { %s4365_s20 = smov [#allocation10]   ;;  %s4366_s22 = smov [#allocation13]  }
  0x3c   :  { %s89_s21 = sshll.u32 %s4365_s20, 4  ;;  %s113_s2 = sshll.u32 %s4366_s22, 4  ;;  %s90_s21 = int_to_ptr.vmem [resolvable:$true] %s89_s21  ;;  %s114_s2 = int_to_ptr.vmem [resolvable:$true] %s113_s2 }
  0x3d   :  { %s4296_s23 = scalar_lea.vmem %s90_s21, 128  ;;  %p4301_p12 = scmp.lt.s32.totalorder %s90_s21, %s90_s21 }
  0x3e   :  { %p4297_p11 = scmp.ne.s32.totalorder %s90_s21, %s4296_s23  ;;  %p4302_p13 = scmp.lt.s32.totalorder %s4296_s23, %s4296_s23 }
  0x40   :  { %p4303_p0 = por %p4302_p13, %p4301_p12 }
  0x42   :  { %p4304_p1 = pnand %p4303_p0, %p4297_p11 }
  0x44   :  { %4307 = shalt.err (!%p4304_p1)
}
  0x45   :  { %92 = dma.hbm_to_vmem [thread:$0]  %s6160_s10, 128, %s90_s21, [#allocation9]  }
  0x46   :  { %s4316_s25 = scalar_lea.vmem %s114_s2, 64  ;;  %p4321_p3 = scmp.lt.s32.totalorder %s114_s2, %s114_s2 }
  0x47   :  { %p4317_p2 = scmp.ne.s32.totalorder %s114_s2, %s4316_s25  ;;  %p4322_p4 = scmp.lt.s32.totalorder %s4316_s25, %s4316_s25 }
  0x49   :  { %p4323_p5 = por %p4322_p4, %p4321_p3 }
  0x4b   :  { %p4324_p6 = pnand %p4323_p5, %p4317_p2 }
  0x4d   :  { %4327 = shalt.err (!%p4324_p6)
}
  0x4e   :  { %116 = dma.hbm_to_vmem [thread:$0]  %s6164_s14, 64, %s114_s2, [#allocation12]  }
  0x4f   :  { %s4367_s28 = smov [#allocation14]  }
  0x50   :  { %s125_s26 = sshll.u32 %s4367_s28, 4  ;;  %s126_s26 = int_to_ptr.vmem [resolvable:$true] %s125_s26 }
  0x51   :  { %s4336_s29 = scalar_lea.vmem %s126_s26, 128  ;;  %p4341_p8 = scmp.lt.s32.totalorder %s126_s26, %s126_s26 }
  0x52   :  { %p4337_p7 = scmp.ne.s32.totalorder %s126_s26, %s4336_s29  ;;  %p4342_p9 = scmp.lt.s32.totalorder %s4336_s29, %s4336_s29 }
  0x54   :  { %p4343_p10 = por %p4342_p9, %p4341_p8 }
  0x56   :  { %p4344_p11 = pnand %p4343_p10, %p4337_p7 }
  0x58   :  { %4347 = shalt.err (!%p4344_p11)
}
  0x59   :  { %128 = dma.hbm_to_vmem [thread:$0]  %s6166_s16, 128, %s126_s26, [#allocation15]  }
  0x5a   :  { %4348 = dma.done.wait [#allocation4], 32  }
  0x5b   :  { %4349 = vsyncadd [#allocation4], 4294967264 }
  0x5c   :  { %4350 = dma.done.wait [#allocation6], 8320  }
  0x5d   :  { %4351 = vsyncadd [#allocation6], 4294958976 }
  0x5e   :  { %4352 = dma.done.wait [#allocation9], 256  }
  0x5f   :  { %4353 = vsyncadd [#allocation9], 4294967040 }
  0x60   :  { %4354 = dma.done.wait [#allocation12], 128  }
  0x61   :  { %4355 = vsyncadd [#allocation12], 4294967168 }
  0x62   :  { %4356 = dma.done.wait [#allocation15], 128  }
  0x63   :  { %4357 = vsyncadd [#allocation15], 4294967168  ;;  %v6170_v0 = vmov 0.0   ;;  %s6174_s9 = sld [smem:[#allocation42_spill]]  ;;  %vm214_vm0 = vcmask 654336   ;;  %vm1459_vm1 = vcmask 523264  }
  0x64   :  { %309 = vmatprep.mubr.f32.mxu0 %v6170_v0  ;;  %464 = vmatprep.mubr.f32.mxu1 %v6170_v0  ;;  %s6175_s27 = sld [smem:[#allocation41_spill]]  ;;  %vm1684_vm2 = vcmask 785408   ;;  %vm1689_vm3 = vcmask 781312   ;;  %vm4369_vm4 = vmmov 0   ;;  %vm2288_vm5 = vcmask 261120  }
  0x65   :  { %vm2611_vm6 = vcmask 64512  }
  0x69   :  { %v3568_v1 = vld [vmem:[%s6174_s9 + $0x138] sm:$0xff]  ;;  %v3567_v3 = vld [vmem:[%s6174_s9 + $0x130] sm:$0xff]  ;;  %v3566_v5 = vld [vmem:[%s6174_s9 + $0x128] sm:$0xff] }
  0x6a   :  { %v182_v2 = vld [vmem:[%s6174_s9 + $0x98] sm:$0xff]  ;;  %257 = vmatprep.subr.mxu0 %v3568_v1  ;;  %v181_v4 = vld [vmem:[%s6174_s9 + $0x90] sm:$0xff]  ;;  %v180_v6 = vld [vmem:[%s6174_s9 + $0x88] sm:$0xff] }
  0x6b   :  { %412 = vmatprep.subr.mxu1 %v182_v2  ;;  %258 = vmatpush1.msra.mxu0 %v3567_v3  ;;  %v3565_v7 = vld [vmem:[%s6174_s9 + $0x120] sm:$0xff]  ;;  %v3564_v9 = vld [vmem:[%s6174_s9 + $0x118] sm:$0xff]  ;;  %v3563_v11 = vld [vmem:[%s6174_s9 + $0x110] sm:$0xff] }
  0x6c   :  { %413 = vmatpush1.msra.mxu1 %v181_v4  ;;  %v179_v8 = vld [vmem:[%s6174_s9 + $0x80] sm:$0xff]  ;;  %259 = vmatprep.subr.mxu0 %v3566_v5  ;;  %v178_v10 = vld [vmem:[%s6174_s9 + $0x78] sm:$0xff]  ;;  %v177_v12 = vld [vmem:[%s6174_s9 + $0x70] sm:$0xff] }
  0x6d   :  { %414 = vmatprep.subr.mxu1 %v180_v6  ;;  %260 = vmatpush1.msra.mxu0 %v3565_v7  ;;  %v3562_v13 = vld [vmem:[%s6174_s9 + $0x108] sm:$0xff]  ;;  %v3561_v15 = vld [vmem:[%s6174_s9 + $0x100] sm:$0xff]  ;;  %v3560_v17 = vld [vmem:[%s6174_s9 + $0xf8] sm:$0xff] }
  0x6e   :  { %415 = vmatpush1.msra.mxu1 %v179_v8  ;;  %v176_v14 = vld [vmem:[%s6174_s9 + $0x68] sm:$0xff]  ;;  %261 = vmatprep.subr.mxu0 %v3564_v9  ;;  %v175_v16 = vld [vmem:[%s6174_s9 + $0x60] sm:$0xff]  ;;  %v174_v18 = vld [vmem:[%s6174_s9 + $0x58] sm:$0xff] }
  0x6f   :  { %416 = vmatprep.subr.mxu1 %v178_v10  ;;  %262 = vmatpush1.msra.mxu0 %v3563_v11  ;;  %v3559_v19 = vld [vmem:[%s6174_s9 + $0xf0] sm:$0xff]  ;;  %v3558_v21 = vld [vmem:[%s6174_s9 + $0xe8] sm:$0xff]  ;;  %v3557_v23 = vld [vmem:[%s6174_s9 + $0xe0] sm:$0xff] }
  0x70   :  { %417 = vmatpush1.msra.mxu1 %v177_v12  ;;  %263 = vmatprep.subr.mxu0 %v3562_v13  ;;  %v173_v20 = vld [vmem:[%s6174_s9 + $0x50] sm:$0xff]  ;;  %v172_v22 = vld [vmem:[%s6174_s9 + $0x48] sm:$0xff]  ;;  %v171_v24 = vld [vmem:[%s6174_s9 + $0x40] sm:$0xff] }
  0x71   :  { %418 = vmatprep.subr.mxu1 %v176_v14  ;;  %264 = vmatpush1.msra.mxu0 %v3561_v15  ;;  %v3556_v25 = vld [vmem:[%s6174_s9 + $0xd8] sm:$0xff]  ;;  %v3555_v27 = vld [vmem:[%s6174_s9 + $0xd0] sm:$0xff]  ;;  %v3554_v29 = vld [vmem:[%s6174_s9 + $0xc8] sm:$0xff] }
  0x72   :  { %419 = vmatpush1.msra.mxu1 %v175_v16  ;;  %265 = vmatprep.subr.mxu0 %v3560_v17  ;;  %v170_v26 = vld [vmem:[%s6174_s9 + $0x38] sm:$0xff]  ;;  %v169_v28 = vld [vmem:[%s6174_s9 + $0x30] sm:$0xff]  ;;  %v168_v30 = vld [vmem:[%s6174_s9 + $0x28] sm:$0xff] }
  0x73   :  { %420 = vmatprep.subr.mxu1 %v174_v18  ;;  %266 = vmatpush1.msra.mxu0 %v3559_v19  ;;  %v3553_v31 = vld [vmem:[%s6174_s9 + $0xc0] sm:$0xff]  ;;  %v3552_v33 = vld [vmem:[%s6174_s9 + $0xb8] sm:$0xff]  ;;  %v3551_v35 = vld [vmem:[%s6174_s9 + $0xb0] sm:$0xff] }
  0x74   :  { %421 = vmatpush1.msra.mxu1 %v173_v20  ;;  %267 = vmatprep.subr.mxu0 %v3558_v21  ;;  %v167_v32 = vld [vmem:[%s6174_s9 + $0x20] sm:$0xff]  ;;  %v166_v34 = vld [vmem:[%s6174_s9 + $0x18] sm:$0xff]  ;;  %v165_v36 = vld [vmem:[%s6174_s9 + $0x10] sm:$0xff] }
  0x75   :  { %422 = vmatprep.subr.mxu1 %v172_v22  ;;  %268 = vmatpush1.msra.mxu0 %v3557_v23  ;;  %v3550_v37 = vld [vmem:[%s6174_s9 + $0xa8] sm:$0xff]  ;;  %v3549_v39 = vld [vmem:[%s6174_s9 + $0xa0] sm:$0xff]  ;;  %v3608_v43 = vld [vmem:[%s6174_s9 + $0x1d8] sm:$0xff] }
  0x76   :  { %423 = vmatpush1.msra.mxu1 %v171_v24  ;;  %269 = vmatprep.subr.mxu0 %v3556_v25  ;;  %v164_v38 = vld [vmem:[%s6174_s9 + $0x8] sm:$0xff]  ;;  %v163_v40 = vld [vmem:[%s6174_s9] sm:$0xff]  ;;  %v3638_v44 = vld [vmem:[%s6174_s9 + $0x278] sm:$0xff] }
  0x77   :  { %424 = vmatprep.subr.mxu1 %v170_v26  ;;  %270 = vmatpush1.msra.mxu0 %v3555_v27  ;;  %v183_v41 = vld [vmem:[%s6175_s27 + $0x1] sm:$0xff]  ;;  %v3607_v45 = vld [vmem:[%s6174_s9 + $0x1d0] sm:$0xff]  ;;  %v3604_v55 = vld [vmem:[%s6174_s9 + $0x1b8] sm:$0xff] }
  0x78   :  { %425 = vmatpush1.msra.mxu1 %v169_v28  ;;  %271 = vmatprep.subr.mxu0 %v3554_v29  ;;  %v153_v42 = vld [vmem:[%s6175_s27] sm:$0xff]  ;;  %v3637_v46 = vld [vmem:[%s6174_s9 + $0x270] sm:$0xff]  ;;  %v154_v48 = vld [vmem:[%s6175_s27 + $0x8] sm:$0xff] }
  0x79   :  { %426 = vmatprep.subr.mxu1 %v168_v30  ;;  %272 = vmatpush1.msra.mxu0 %v3553_v31  ;;  %v184_v47 = vld [vmem:[%s6175_s27 + $0x9] sm:$0xff]  ;;  %v3605_v51 = vld [vmem:[%s6174_s9 + $0x1c0] sm:$0xff]  ;;  %v185_v53 = vld [vmem:[%s6175_s27 + $0x11] sm:$0xff] }
  0x7a   :  { %427 = vmatpush1.msra.mxu1 %v167_v32  ;;  %273 = vmatprep.subr.mxu0 %v3552_v33  ;;  %v3606_v49 = vld [vmem:[%s6174_s9 + $0x1c8] sm:$0xff]  ;;  %v3635_v52 = vld [vmem:[%s6174_s9 + $0x260] sm:$0xff]  ;;  %v155_v54 = vld [vmem:[%s6175_s27 + $0x10] sm:$0xff] }
  0x7b   :  { %428 = vmatprep.subr.mxu1 %v166_v34  ;;  %274 = vmatpush1.msra.mxu0 %v3551_v35  ;;  %v3636_v50 = vld [vmem:[%s6174_s9 + $0x268] sm:$0xff]  ;;  %v3634_v56 = vld [vmem:[%s6174_s9 + $0x258] sm:$0xff]  ;;  %v3603_v57 = vld [vmem:[%s6174_s9 + $0x1b0] sm:$0xff] }
  0x7c   :  { %429 = vmatpush1.msra.mxu1 %v165_v36  ;;  %275 = vmatprep.subr.mxu0 %v3550_v37  ;;  %v3633_v58 = vld [vmem:[%s6174_s9 + $0x250] sm:$0xff]  ;;  %v186_v59 = vld [vmem:[%s6175_s27 + $0x19] sm:$0xff]  ;;  %v3602_v61 = vld [vmem:[%s6174_s9 + $0x1a8] sm:$0xff] }
  0x7d   :  { %430 = vmatprep.subr.mxu1 %v164_v38  ;;  %276 = vmatpush1.msra.mxu0 %v3549_v39  ;;  %v156_v60 = vld [vmem:[%s6175_s27 + $0x18] sm:$0xff]  ;;  %v3632_v62 = vld [vmem:[%s6174_s9 + $0x248] sm:$0xff]  ;;  %v3601_v63 = vld [vmem:[%s6174_s9 + $0x1a0] sm:$0xff] }
  0x7e   :  { %431 = vmatpush1.msra.mxu1 %v163_v40  ;;  %3569 = vmatmul.mubr.msk.f32.vlgmr.msra.gmra.mxu0 %vm214_vm0, %v183_v41  ;;  %v3631_v1 = vld [vmem:[%s6174_s9 + $0x240] sm:$0xff]  ;;  %v3600_v4 = vld [vmem:[%s6174_s9 + $0x198] sm:$0xff]  ;;  %v3599_v6 = vld [vmem:[%s6174_s9 + $0x190] sm:$0xff] }
  0x7f   :  { %3579 = vmatmul.mubr.msk.f32.vlgmr.msra.gmra.mxu1 %vm214_vm0, %v153_v42  ;;  %315 = vmatprep.mubr.f32.mxu0 %v6170_v0  ;;  %v187_v2 = vld [vmem:[%s6175_s27 + $0x21] sm:$0xff]  ;;  %v3630_v5 = vld [vmem:[%s6174_s9 + $0x238] sm:$0xff]  ;;  %v3629_v7 = vld [vmem:[%s6174_s9 + $0x230] sm:$0xff] }
  0x80   :  { %470 = vmatprep.mubr.f32.mxu1 %v6170_v0  ;;  %598 = vmatprep.subr.mxu0 %v3608_v43  ;;  %v157_v3 = vld [vmem:[%s6175_s27 + $0x20] sm:$0xff]  ;;  %v188_v8 = vld [vmem:[%s6175_s27 + $0x29] sm:$0xff]  ;;  %v189_v14 = vld [vmem:[%s6175_s27 + $0x31] sm:$0xff] }
  0x81   :  { %804 = vmatprep.subr.mxu1 %v3638_v44  ;;  %599 = vmatpush1.msra.mxu0 %v3607_v45  ;;  %v158_v9 = vld [vmem:[%s6175_s27 + $0x28] sm:$0xff]  ;;  %v3597_v12 = vld [vmem:[%s6174_s9 + $0x180] sm:$0xff]  ;;  %v159_v15 = vld [vmem:[%s6175_s27 + $0x30] sm:$0xff] }
  0x82   :  { %805 = vmatpush1.msra.mxu1 %v3637_v46  ;;  %3570 = vmatmul.mubr.msk.f32.gmra.mxu0 %vm214_vm0, %v184_v47  ;;  %v3598_v10 = vld [vmem:[%s6174_s9 + $0x188] sm:$0xff]  ;;  %v3627_v13 = vld [vmem:[%s6174_s9 + $0x220] sm:$0xff]  ;;  %v3596_v16 = vld [vmem:[%s6174_s9 + $0x178] sm:$0xff] }
  0x83   :  { %3580 = vmatmul.mubr.msk.f32.gmra.mxu1 %vm214_vm0, %v154_v48  ;;  %321 = vmatprep.mubr.f32.mxu0 %v6170_v0  ;;  %v3628_v11 = vld [vmem:[%s6174_s9 + $0x228] sm:$0xff]  ;;  %v3626_v17 = vld [vmem:[%s6174_s9 + $0x218] sm:$0xff]  ;;  %v3595_v18 = vld [vmem:[%s6174_s9 + $0x170] sm:$0xff] }
  0x84   :  { %476 = vmatprep.mubr.f32.mxu1 %v6170_v0  ;;  %600 = vmatprep.subr.mxu0 %v3606_v49  ;;  %v3625_v19 = vld [vmem:[%s6174_s9 + $0x210] sm:$0xff]  ;;  %v190_v20 = vld [vmem:[%s6175_s27 + $0x39] sm:$0xff]  ;;  %v3594_v22 = vld [vmem:[%s6174_s9 + $0x168] sm:$0xff] }
  0x85   :  { %806 = vmatprep.subr.mxu1 %v3636_v50  ;;  %601 = vmatpush1.msra.mxu0 %v3605_v51  ;;  %v160_v21 = vld [vmem:[%s6175_s27 + $0x38] sm:$0xff]  ;;  %v3624_v23 = vld [vmem:[%s6174_s9 + $0x208] sm:$0xff]  ;;  %v3593_v24 = vld [vmem:[%s6174_s9 + $0x160] sm:$0xff] }
  0x86   :  { %807 = vmatpush1.msra.mxu1 %v3635_v52  ;;  %3571 = vmatmul.mubr.msk.f32.gmra.mxu0 %vm214_vm0, %v185_v53  ;;  %v3623_v25 = vld [vmem:[%s6174_s9 + $0x200] sm:$0xff]  ;;  %v3592_v28 = vld [vmem:[%s6174_s9 + $0x158] sm:$0xff]  ;;  %v3591_v30 = vld [vmem:[%s6174_s9 + $0x150] sm:$0xff] }
  0x87   :  { %3581 = vmatmul.mubr.msk.f32.gmra.mxu1 %vm214_vm0, %v155_v54  ;;  %327 = vmatprep.mubr.f32.mxu0 %v6170_v0  ;;  %v191_v26 = vld [vmem:[%s6175_s27 + $0x41] sm:$0xff]  ;;  %v3622_v29 = vld [vmem:[%s6174_s9 + $0x1f8] sm:$0xff]  ;;  %v3621_v31 = vld [vmem:[%s6174_s9 + $0x1f0] sm:$0xff] }
  0x88   :  { %482 = vmatprep.mubr.f32.mxu1 %v6170_v0  ;;  %602 = vmatprep.subr.mxu0 %v3604_v55  ;;  %v161_v27 = vld [vmem:[%s6175_s27 + $0x40] sm:$0xff]  ;;  %v192_v32 = vld [vmem:[%s6175_s27 + $0x49] sm:$0xff]  ;;  %v3668_v40 = vld [vmem:[%s6174_s9 + $0x318] sm:$0xff] }
  0x89   :  { %808 = vmatprep.subr.mxu1 %v3634_v56  ;;  %603 = vmatpush1.msra.mxu0 %v3603_v57  ;;  %v162_v33 = vld [vmem:[%s6175_s27 + $0x48] sm:$0xff]  ;;  %v3589_v35 = vld [vmem:[%s6174_s9 + $0x140] sm:$0xff]  ;;  %v3667_v41 = vld [vmem:[%s6174_s9 + $0x310] sm:$0xff] }
  0x8a   :  { %809 = vmatpush1.msra.mxu1 %v3633_v58  ;;  %3572 = vmatmul.mubr.msk.f32.gmra.mxu0 %vm214_vm0, %v186_v59  ;;  %v3590_v34 = vld [vmem:[%s6174_s9 + $0x148] sm:$0xff]  ;;  %v3619_v37 = vld [vmem:[%s6174_s9 + $0x1e0] sm:$0xff]  ;;  %v527_v46 = vld [vmem:[%s6175_s27 + $0x12] sm:$0xff] }
  0x8b   :  { %3582 = vmatmul.mubr.msk.f32.gmra.mxu1 %vm214_vm0, %v156_v60  ;;  %333 = vmatprep.mubr.f32.mxu0 %v6170_v0  ;;  %v3620_v36 = vld [vmem:[%s6174_s9 + $0x1e8] sm:$0xff]  ;;  %v3665_v45 = vld [vmem:[%s6174_s9 + $0x300] sm:$0xff]  ;;  %v733_v47 = vld [vmem:[%s6175_s27 + $0x13] sm:$0xff] }
  0x8c   :  { %488 = vmatprep.mubr.f32.mxu1 %v6170_v0  ;;  %604 = vmatprep.subr.mxu0 %v3602_v61  ;;  %v525_v38 = vld [vmem:[%s6175_s27 + $0x2] sm:$0xff]  ;;  %v526_v42 = vld [vmem:[%s6175_s27 + $0xa] sm:$0xff]  ;;  %v3664_v48 = vld [vmem:[%s6174_s9 + $0x2f8] sm:$0xff] }
  0x8d   :  { %810 = vmatprep.subr.mxu1 %v3632_v62  ;;  %605 = vmatpush1.msra.mxu0 %v3601_v63  ;;  %v731_v39 = vld [vmem:[%s6175_s27 + $0x3] sm:$0xff]  ;;  %v732_v43 = vld [vmem:[%s6175_s27 + $0xb] sm:$0xff]  ;;  %v528_v50 = vld [vmem:[%s6175_s27 + $0x1a] sm:$0xff] }
  0x8e   :  { %811 = vmatpush1.msra.mxu1 %v3631_v1  ;;  %3573 = vmatmul.mubr.msk.f32.gmra.mxu0 %vm214_vm0, %v187_v2  ;;  %v3666_v44 = vld [vmem:[%s6174_s9 + $0x308] sm:$0xff]  ;;  %v3663_v49 = vld [vmem:[%s6174_s9 + $0x2f0] sm:$0xff]  ;;  %v734_v51 = vld [vmem:[%s6175_s27 + $0x1b] sm:$0xff] }
  0x8f   :  { %3583 = vmatmul.mubr.msk.f32.gmra.mxu1 %vm214_vm0, %v157_v3  ;;  %339 = vmatprep.mubr.f32.mxu0 %v6170_v0  ;;  %v3662_v52 = vld [vmem:[%s6174_s9 + $0x2e8] sm:$0xff]  ;;  %v3661_v53 = vld [vmem:[%s6174_s9 + $0x2e0] sm:$0xff]  ;;  %v3660_v56 = vld [vmem:[%s6174_s9 + $0x2d8] sm:$0xff] }
  0x90   :  { %494 = vmatprep.mubr.f32.mxu1 %v6170_v0  ;;  %606 = vmatprep.subr.mxu0 %v3600_v4  ;;  %v529_v54 = vld [vmem:[%s6175_s27 + $0x22] sm:$0xff]  ;;  %v3659_v57 = vld [vmem:[%s6174_s9 + $0x2d0] sm:$0xff]  ;;  %v3656_v1 = vld [vmem:[%s6174_s9 + $0x2b8] sm:$0xff] }
  0x91   :  { %812 = vmatprep.subr.mxu1 %v3630_v5  ;;  %607 = vmatpush1.msra.mxu0 %v3599_v6  ;;  %v735_v55 = vld [vmem:[%s6175_s27 + $0x23] sm:$0xff]  ;;  %v736_v59 = vld [vmem:[%s6175_s27 + $0x2b] sm:$0xff]  ;;  %v737_v63 = vld [vmem:[%s6175_s27 + $0x33] sm:$0xff] }
  0x92   :  { %813 = vmatpush1.msra.mxu1 %v3629_v7  ;;  %3574 = vmatmul.mubr.msk.f32.gmra.mxu0 %vm214_vm0, %v188_v8  ;;  %v530_v58 = vld [vmem:[%s6175_s27 + $0x2a] sm:$0xff]  ;;  %v3657_v61 = vld [vmem:[%s6174_s9 + $0x2c0] sm:$0xff]  ;;  %v531_v62 = vld [vmem:[%s6175_s27 + $0x32] sm:$0xff] }
  0x93   :  { %3584 = vmatmul.mubr.msk.f32.gmra.mxu1 %vm214_vm0, %v158_v9  ;;  %345 = vmatprep.mubr.f32.mxu0 %v6170_v0  ;;  %v3658_v60 = vld [vmem:[%s6174_s9 + $0x2c8] sm:$0xff]  ;;  %v3655_v2 = vld [vmem:[%s6174_s9 + $0x2b0] sm:$0xff]  ;;  %v532_v3 = vld [vmem:[%s6175_s27 + $0x3a] sm:$0xff] }
  0x94   :  { %500 = vmatprep.mubr.f32.mxu1 %v6170_v0  ;;  %608 = vmatprep.subr.mxu0 %v3598_v10  ;;  %v738_v4 = vld [vmem:[%s6175_s27 + $0x3b] sm:$0xff]  ;;  %v3654_v5 = vld [vmem:[%s6174_s9 + $0x2a8] sm:$0xff]  ;;  %v3651_v10 = vld [vmem:[%s6174_s9 + $0x290] sm:$0xff] }
  0x95   :  { %814 = vmatprep.subr.mxu1 %v3628_v11  ;;  %609 = vmatpush1.msra.mxu0 %v3597_v12  ;;  %v3653_v6 = vld [vmem:[%s6174_s9 + $0x2a0] sm:$0xff]  ;;  %v3652_v9 = vld [vmem:[%s6174_s9 + $0x298] sm:$0xff]  ;;  %v3650_v11 = vld [vmem:[%s6174_s9 + $0x288] sm:$0xff] }
  0x96   :  { %815 = vmatpush1.msra.mxu1 %v3627_v13  ;;  %3575 = vmatmul.mubr.msk.f32.gmra.mxu0 %vm214_vm0, %v189_v14  ;;  %v533_v7 = vld [vmem:[%s6175_s27 + $0x42] sm:$0xff]  ;;  %v534_v12 = vld [vmem:[%s6175_s27 + $0x4a] sm:$0xff] }
  0x97   :  { %3585 = vmatmul.mubr.msk.f32.gmra.mxu1 %vm214_vm0, %v159_v15  ;;  %351 = vmatprep.mubr.f32.mxu0 %v6170_v0  ;;  %v739_v8 = vld [vmem:[%s6175_s27 + $0x43] sm:$0xff]  ;;  %v740_v13 = vld [vmem:[%s6175_s27 + $0x4b] sm:$0xff] }
  0x98   :  { %506 = vmatprep.mubr.f32.mxu1 %v6170_v0  ;;  %610 = vmatprep.subr.mxu0 %v3596_v16  ;;  %v3649_v14 = vld [vmem:[%s6174_s9 + $0x280] sm:$0xff]  ;;  %v938_v16 = vld [vmem:[%s6175_s27 + $0xc] sm:$0xff] }
  0x99   :  { %816 = vmatprep.subr.mxu1 %v3626_v17  ;;  %611 = vmatpush1.msra.mxu0 %v3595_v18  ;;  %v937_v15 = vld [vmem:[%s6175_s27 + $0x4] sm:$0xff]  ;;  %v939_v17 = vld [vmem:[%s6175_s27 + $0x14] sm:$0xff]  ;;  %v940_v18 = vld [vmem:[%s6175_s27 + $0x1c] sm:$0xff] }
  0x9a   :  { %817 = vmatpush1.msra.mxu1 %v3625_v19  ;;  %3576 = vmatmul.mubr.msk.f32.gmra.mxu0 %vm214_vm0, %v190_v20  ;;  %v941_v19 = vld [vmem:[%s6175_s27 + $0x24] sm:$0xff]  ;;  %v942_v20 = vld [vmem:[%s6175_s27 + $0x2c] sm:$0xff] }
  0x9b   :  { %3586 = vmatmul.mubr.msk.f32.gmra.mxu1 %vm214_vm0, %v160_v21  ;;  %357 = vmatprep.mubr.f32.mxu0 %v6170_v0  ;;  %v943_v21 = vld [vmem:[%s6175_s27 + $0x34] sm:$0xff] }
  0x9c   :  { %512 = vmatprep.mubr.f32.mxu1 %v6170_v0  ;;  %612 = vmatprep.subr.mxu0 %v3594_v22  ;;  %v944_v22 = vld [vmem:[%s6175_s27 + $0x3c] sm:$0xff] }
  0x9d   :  { %818 = vmatprep.subr.mxu1 %v3624_v23  ;;  %613 = vmatpush1.msra.mxu0 %v3593_v24  ;;  %v945_v23 = vld [vmem:[%s6175_s27 + $0x44] sm:$0xff]  ;;  %v946_v24 = vld [vmem:[%s6175_s27 + $0x4c] sm:$0xff] }
  0x9e   :  { %819 = vmatpush1.msra.mxu1 %v3623_v25  ;;  %3577 = vmatmul.mubr.msk.f32.gmra.mxu0 %vm214_vm0, %v191_v26 }
  0x9f   :  { %3587 = vmatmul.mubr.msk.f32.gmra.mxu1 %vm214_vm0, %v161_v27  ;;  %363 = vmatprep.mubr.f32.mxu0 %v6170_v0 }
  0xa0   :  { %518 = vmatprep.mubr.f32.mxu1 %v6170_v0  ;;  %614 = vmatprep.subr.mxu0 %v3592_v28 }
  0xa1   :  { %820 = vmatprep.subr.mxu1 %v3622_v29  ;;  %615 = vmatpush1.msra.mxu0 %v3591_v30 }
  0xa2   :  { %821 = vmatpush1.msra.mxu1 %v3621_v31  ;;  %3578 = vmatmul.mubr.msk.f32.gmra.mxu0 %vm214_vm0, %v192_v32 }
  0xa3   :  { %3588 = vmatmul.mubr.msk.f32.gmra.mxu1 %vm214_vm0, %v162_v33  ;;  %616 = vmatprep.subr.mxu0 %v3590_v34 }
  0xa4   :  { %650 = vmatprep.mubr.f32.mxu0 %v6170_v0  ;;  %617 = vmatpush1.msra.mxu0 %v3589_v35 }
  0xa5   :  { %822 = vmatprep.subr.mxu1 %v3620_v36  ;;  %856 = vmatprep.mubr.f32.mxu1 %v6170_v0 }
  0xa6   :  { %823 = vmatpush1.msra.mxu1 %v3619_v37  ;;  %3609 = vmatmul.mubr.msk.f32.vlgmr.msra.gmra.mxu0 %vm214_vm0, %v525_v38 }
  0xa7   :  { %3639 = vmatmul.mubr.msk.f32.vlgmr.msra.gmra.mxu1 %vm214_vm0, %v731_v39  ;;  %656 = vmatprep.mubr.f32.mxu0 %v6170_v0 }
  0xa8   :  { %862 = vmatprep.mubr.f32.mxu1 %v6170_v0  ;;  %1010 = vmatprep.subr.mxu0 %v3668_v40 }
  0xa9   :  { %1011 = vmatpush1.msra.mxu0 %v3667_v41 }
  0xaa   :  { %3610 = vmatmul.mubr.msk.f32.gmra.mxu0 %vm214_vm0, %v526_v42  ;;  %1012 = vmatprep.subr.mxu0 %v3666_v44 }
  0xab   :  { %3640 = vmatmul.mubr.msk.f32.gmra.mxu1 %vm214_vm0, %v732_v43  ;;  %662 = vmatprep.mubr.f32.mxu0 %v6170_v0 }
  0xac   :  { %868 = vmatprep.mubr.f32.mxu1 %v6170_v0  ;;  %1013 = vmatpush1.msra.mxu0 %v3665_v45 }
  0xad   :  { %1014 = vmatprep.subr.mxu0 %v3664_v48 }
  0xae   :  { %3611 = vmatmul.mubr.msk.f32.gmra.mxu0 %vm214_vm0, %v527_v46 }
  0xaf   :  { %3641 = vmatmul.mubr.msk.f32.gmra.mxu1 %vm214_vm0, %v733_v47  ;;  %668 = vmatprep.mubr.f32.mxu0 %v6170_v0 }
  0xb0   :  { %874 = vmatprep.mubr.f32.mxu1 %v6170_v0  ;;  %1015 = vmatpush1.msra.mxu0 %v3663_v49 }
  0xb1   :  { %1016 = vmatprep.subr.mxu0 %v3662_v52 }
  0xb2   :  { %3612 = vmatmul.mubr.msk.f32.gmra.mxu0 %vm214_vm0, %v528_v50 }
  0xb3   :  { %3642 = vmatmul.mubr.msk.f32.gmra.mxu1 %vm214_vm0, %v734_v51  ;;  %674 = vmatprep.mubr.f32.mxu0 %v6170_v0 }
  0xb4   :  { %880 = vmatprep.mubr.f32.mxu1 %v6170_v0  ;;  %1017 = vmatpush1.msra.mxu0 %v3661_v53 }
  0xb5   :  { %1018 = vmatprep.subr.mxu0 %v3660_v56 }
  0xb6   :  { %3613 = vmatmul.mubr.msk.f32.gmra.mxu0 %vm214_vm0, %v529_v54 }
  0xb7   :  { %3643 = vmatmul.mubr.msk.f32.gmra.mxu1 %vm214_vm0, %v735_v55  ;;  %680 = vmatprep.mubr.f32.mxu0 %v6170_v0 }
  0xb8   :  { %886 = vmatprep.mubr.f32.mxu1 %v6170_v0  ;;  %1019 = vmatpush1.msra.mxu0 %v3659_v57 }
  0xb9   :  { %1020 = vmatprep.subr.mxu0 %v3658_v60 }
  0xba   :  { %3614 = vmatmul.mubr.msk.f32.gmra.mxu0 %vm214_vm0, %v530_v58 }
  0xbb   :  { %3644 = vmatmul.mubr.msk.f32.gmra.mxu1 %vm214_vm0, %v736_v59  ;;  %686 = vmatprep.mubr.f32.mxu0 %v6170_v0 }
  0xbc   :  { %892 = vmatprep.mubr.f32.mxu1 %v6170_v0  ;;  %1021 = vmatpush1.msra.mxu0 %v3657_v61 }
  0xbd   :  { %1022 = vmatprep.subr.mxu0 %v3656_v1 }
  0xbe   :  { %3615 = vmatmul.mubr.msk.f32.gmra.mxu0 %vm214_vm0, %v531_v62 }
  0xbf   :  { %3645 = vmatmul.mubr.msk.f32.gmra.mxu1 %vm214_vm0, %v737_v63  ;;  %692 = vmatprep.mubr.f32.mxu0 %v6170_v0 }
  0xc0   :  { %898 = vmatprep.mubr.f32.mxu1 %v6170_v0  ;;  %1023 = vmatpush1.msra.mxu0 %v3655_v2 }
  0xc1   :  { %1024 = vmatprep.subr.mxu0 %v3654_v5 }
  0xc2   :  { %3616 = vmatmul.mubr.msk.f32.gmra.mxu0 %vm214_vm0, %v532_v3 }
  0xc3   :  { %3646 = vmatmul.mubr.msk.f32.gmra.mxu1 %vm214_vm0, %v738_v4  ;;  %698 = vmatprep.mubr.f32.mxu0 %v6170_v0 }
  0xc4   :  { %904 = vmatprep.mubr.f32.mxu1 %v6170_v0  ;;  %1025 = vmatpush1.msra.mxu0 %v3653_v6 }
  0xc5   :  { %1026 = vmatprep.subr.mxu0 %v3652_v9 }
  0xc6   :  { %3617 = vmatmul.mubr.msk.f32.gmra.mxu0 %vm214_vm0, %v533_v7 }
  0xc7   :  { %3647 = vmatmul.mubr.msk.f32.gmra.mxu1 %vm214_vm0, %v739_v8  ;;  %704 = vmatprep.mubr.f32.mxu0 %v6170_v0 }
  0xc8   :  { %910 = vmatprep.mubr.f32.mxu1 %v6170_v0  ;;  %1027 = vmatpush1.msra.mxu0 %v3651_v10 }
  0xc9   :  { %1028 = vmatprep.subr.mxu0 %v3650_v11 }
  0xca   :  { %3618 = vmatmul.mubr.msk.f32.gmra.mxu0 %vm214_vm0, %v534_v12 }
  0xcb   :  { %3648 = vmatmul.mubr.msk.f32.gmra.mxu1 %vm214_vm0, %v740_v13  ;;  %1029 = vmatpush1.msra.mxu0 %v3649_v14 }
  0xcc   :  { %1062 = vmatprep.mubr.f32.mxu0 %v6170_v0  ;;  %1279 = vmatprep.mubr.f32.mxu1 %v6170_v0 }
  0xcd   :  { %1475 = vmatprep.subr.mxu0 %v6170_v0 }
  0xce   :  { %3669 = vmatmul.mubr.msk.f32.vlgmr.msra.gmra.mxu0 %vm214_vm0, %v937_v15 }
  0xcf   :  { %1068 = vmatprep.mubr.f32.mxu0 %v6170_v0 }
  0xd2   :  { %3670 = vmatmul.mubr.msk.f32.gmra.mxu0 %vm214_vm0, %v938_v16 }
  0xd3   :  { %1074 = vmatprep.mubr.f32.mxu0 %v6170_v0 }
  0xd6   :  { %3671 = vmatmul.mubr.msk.f32.gmra.mxu0 %vm214_vm0, %v939_v17 }
  0xd7   :  { %1080 = vmatprep.mubr.f32.mxu0 %v6170_v0 }
  0xda   :  { %3672 = vmatmul.mubr.msk.f32.gmra.mxu0 %vm214_vm0, %v940_v18 }
  0xdb   :  { %1086 = vmatprep.mubr.f32.mxu0 %v6170_v0 }
  0xde   :  { %3673 = vmatmul.mubr.msk.f32.gmra.mxu0 %vm214_vm0, %v941_v19 }
  0xdf   :  { %1092 = vmatprep.mubr.f32.mxu0 %v6170_v0 }
  0xe2   :  { %3674 = vmatmul.mubr.msk.f32.gmra.mxu0 %vm214_vm0, %v942_v20 }
  0xe3   :  { %1098 = vmatprep.mubr.f32.mxu0 %v6170_v0 }
  0xe6   :  { %3675 = vmatmul.mubr.msk.f32.gmra.mxu0 %vm214_vm0, %v943_v21 }
  0xe7   :  { %1104 = vmatprep.mubr.f32.mxu0 %v6170_v0 }
  0xea   :  { %3676 = vmatmul.mubr.msk.f32.gmra.mxu0 %vm214_vm0, %v944_v22 }
  0xeb   :  { %1110 = vmatprep.mubr.f32.mxu0 %v6170_v0 }
  0xee   :  { %3677 = vmatmul.mubr.msk.f32.gmra.mxu0 %vm214_vm0, %v945_v23 }
  0xef   :  { %1116 = vmatprep.mubr.f32.mxu0 %v6170_v0 }
  0xf2   :  { %3678 = vmatmul.mubr.msk.f32.gmra.mxu0 %vm214_vm0, %v946_v24 }
 0x13e   :  { %v311_v25 = vpop.f32.mrf.mxu0 }
 0x13f   :  { %v466_v26 = vpop.f32.mrf.mxu1 }
 0x140   :  { %v467_v27 = vadd.f32 %v466_v26, %v311_v25  ;;  %v313_v28 = vpop.f32.mrf.mxu0 }
 0x141   :  { %v468_v29 = vpop.f32.mrf.mxu1 }
 0x142   :  { %v469_v30 = vadd.f32 %v468_v29, %v313_v28  ;;  %v317_v31 = vpop.f32.mrf.mxu0 }
 0x143   :  { %v472_v32 = vpop.f32.mrf.mxu1 }
 0x144   :  { %v473_v33 = vadd.f32 %v472_v32, %v317_v31  ;;  %v319_v34 = vpop.f32.mrf.mxu0  ;;  %v1449_v31 = vld [vmem:[%s6155_s5 + $0x70] sm:$0xff] }
 0x145   :  { %v474_v35 = vpop.f32.mrf.mxu1 }
 0x146   :  { %v475_v36 = vadd.f32 %v474_v35, %v319_v34  ;;  %v323_v37 = vpop.f32.mrf.mxu0  ;;  %v1448_v35 = vld [vmem:[%s6155_s5 + $0x68] sm:$0xff] }
 0x147   :  { %v478_v38 = vpop.f32.mrf.mxu1 }
 0x148   :  { %v479_v39 = vadd.f32 %v478_v38, %v323_v37  ;;  %v325_v40 = vpop.f32.mrf.mxu0  ;;  %v1447_v38 = vld [vmem:[%s6155_s5 + $0x60] sm:$0xff] }
 0x149   :  { %v480_v41 = vpop.f32.mrf.mxu1 }
 0x14a   :  { %v481_v42 = vadd.f32 %v480_v41, %v325_v40  ;;  %v329_v43 = vpop.f32.mrf.mxu0 }
 0x14b   :  { %v484_v44 = vpop.f32.mrf.mxu1 }
 0x14c   :  { %v485_v45 = vadd.f32 %v484_v44, %v329_v43  ;;  %v331_v46 = vpop.f32.mrf.mxu0  ;;  %v1445_v44 = vld [vmem:[%s6155_s5 + $0x50] sm:$0xff] }
 0x14d   :  { %v486_v47 = vpop.f32.mrf.mxu1 }
 0x14e   :  { %v487_v48 = vadd.f32 %v486_v47, %v331_v46  ;;  %v335_v49 = vpop.f32.mrf.mxu0  ;;  %v1444_v47 = vld [vmem:[%s6155_s5 + $0x48] sm:$0xff] }
 0x14f   :  { %v490_v50 = vpop.f32.mrf.mxu1 }
 0x150   :  { %v491_v51 = vadd.f32 %v490_v50, %v335_v49  ;;  %v337_v52 = vpop.f32.mrf.mxu0  ;;  %v1443_v49 = vld [vmem:[%s6155_s5 + $0x40] sm:$0xff] }
 0x151   :  { %v492_v53 = vpop.f32.mrf.mxu1 }
 0x152   :  { %v493_v54 = vadd.f32 %v492_v53, %v337_v52  ;;  %v5042_v55 = vpop.f32.mrf.mxu0  ;;  %v1442_v52 = vld [vmem:[%s6155_s5 + $0x38] sm:$0xff] }
 0x153   :  { %v5044_v56 = vpop.f32.mrf.mxu1 }
 0x154   :  { %v5046_v57 = vpop.f32.mrf.mxu0 }
 0x155   :  { %v5048_v58 = vpop.f32.mrf.mxu1 }
 0x156   :  { %v5050_v59 = vpop.f32.mrf.mxu0 }
 0x157   :  { %v5052_v60 = vpop.f32.mrf.mxu1 }
 0x158   :  { %v5054_v61 = vpop.f32.mrf.mxu0 }
 0x159   :  { %v5056_v62 = vpop.f32.mrf.mxu1 }
 0x15a   :  { %v5058_v63 = vpop.f32.mrf.mxu0 }
 0x15b   :  { %v5060_v1 = vpop.f32.mrf.mxu1 }
 0x15c   :  { %v5062_v2 = vpop.f32.mrf.mxu0 }
 0x15d   :  { %v5064_v3 = vpop.f32.mrf.mxu1 }
 0x15e   :  { %v5066_v4 = vpop.f32.mrf.mxu0 }
 0x15f   :  { %v5068_v5 = vpop.f32.mrf.mxu1 }
 0x160   :  { %v5070_v6 = vpop.f32.mrf.mxu0 }
 0x161   :  { %v5072_v7 = vpop.f32.mrf.mxu1 }
 0x162   :  { %v5074_v8 = vpop.f32.mrf.mxu0 }
 0x163   :  { %v5076_v9 = vpop.f32.mrf.mxu1 }
 0x164   :  { %v5078_v10 = vpop.f32.mrf.mxu0 }
 0x165   :  { %v5080_v11 = vpop.f32.mrf.mxu1 }
 0x166   :  { %v652_v12 = vpop.f32.mrf.mxu0 }
 0x167   :  { %v5082_v13 = vpop.f32.mrf.mxu1  ;;  %v5084_v14 = vadd.f32 %v652_v12, %v467_v27 }
 0x168   :  { %6176 = vst [vmem:[#allocation21_spill] sm:$0xff] %v5082_v13  ;;  %v654_v15 = vpop.f32.mrf.mxu0 }
 0x169   :  { %6177 = vst [vmem:[#allocation22_spill] sm:$0xff] %v5084_v14  ;;  %v5086_v16 = vpop.f32.mrf.mxu1  ;;  %v5088_v17 = vadd.f32 %v654_v15, %v469_v30  ;;  %v1450_v30 = vld [vmem:[%s6155_s5 + $0x78] sm:$0xff] }
 0x16a   :  { %6178 = vst [vmem:[#allocation23_spill] sm:$0xff] %v5086_v16  ;;  %v658_v18 = vpop.f32.mrf.mxu0  ;;  %1476 = vmatpush1.msra.mxu0 %v1450_v30 }
 0x16b   :  { %6179 = vst [vmem:[#allocation24_spill] sm:$0xff] %v5088_v17  ;;  %v5090_v19 = vadd.f32 %v658_v18, %v473_v33  ;;  %v5092_v21 = vpop.f32.mrf.mxu1  ;;  %1477 = vmatprep.subr.mxu0 %v6170_v0  ;;  %v1440_v18 = vld [vmem:[%s6155_s5 + $0x28] sm:$0xff]  ;;  %v1145_v17 = vlaneseq }
 0x16c   :  { %v660_v20 = vpop.f32.mrf.mxu0  ;;  %6181 = vst [vmem:[#allocation26_spill] sm:$0xff] %v5092_v21  ;;  %1478 = vmatpush1.msra.mxu0 %v1449_v31 }
 0x16d   :  { %6180 = vst [vmem:[#allocation25_spill] sm:$0xff] %v5090_v19  ;;  %v5094_v22 = vadd.f32 %v660_v20, %v475_v36  ;;  %v5098_v25 = vpop.f32.mrf.mxu1  ;;  %1479 = vmatprep.subr.mxu0 %v6170_v0  ;;  %v517_v19 = vadd.f32 %v5072_v7, %v5070_v6  ;;  %v509_v6 = vadd.f32 %v5060_v1, %v5058_v63 }
 0x16e   :  { %v664_v23 = vpop.f32.mrf.mxu0  ;;  %6184 = vst [vmem:[#allocation29_spill] sm:$0xff] %v5098_v25  ;;  %1480 = vmatpush1.msra.mxu0 %v1448_v35  ;;  %v515_v25 = vadd.f32 %v5068_v5, %v5066_v4  ;;  %v505_v4 = vadd.f32 %v5056_v62, %v5054_v61  ;;  %v497_v62 = vadd.f32 %v5044_v56, %v5042_v55 }
 0x16f   :  { %6182 = vst [vmem:[#allocation27_spill] sm:$0xff] %v5094_v22  ;;  %v5096_v24 = vadd.f32 %v664_v23, %v479_v39  ;;  %v5110_v32 = vpop.f32.mrf.mxu1  ;;  %1481 = vmatprep.subr.mxu0 %v6170_v0 }
 0x170   :  { %v666_v26 = vpop.f32.mrf.mxu0  ;;  %6186 = vst [vmem:[#allocation31_spill] sm:$0xff] %v5110_v32  ;;  %1482 = vmatpush1.msra.mxu0 %v1447_v38 }
 0x171   :  { %6183 = vst [vmem:[#allocation28_spill] sm:$0xff] %v5096_v24  ;;  %v5100_v27 = vadd.f32 %v666_v26, %v481_v42  ;;  %v5124_v39 = vpop.f32.mrf.mxu1  ;;  %v1446_v42 = vld [vmem:[%s6155_s5 + $0x58] sm:$0xff]  ;;  %1483 = vmatprep.subr.mxu0 %v6170_v0  ;;  %v511_v24 = vadd.f32 %v5064_v3, %v5062_v2  ;;  %v503_v2 = vadd.f32 %v5052_v60, %v5050_v59 }
 0x172   :  { %v670_v28 = vpop.f32.mrf.mxu0  ;;  %6187 = vst [vmem:[#allocation32_spill] sm:$0xff] %v5124_v39  ;;  %1484 = vmatpush1.msra.mxu0 %v1446_v42 }
 0x173   :  { %6185 = vst [vmem:[#allocation30_spill] sm:$0xff] %v5100_v27  ;;  %v5102_v29 = vadd.f32 %v670_v28, %v485_v45  ;;  %v5138_v45 = vpop.f32.mrf.mxu1  ;;  %1485 = vmatprep.subr.mxu0 %v6170_v0 }
 0x174   :  { %v672_v33 = vpop.f32.mrf.mxu0  ;;  %1486 = vmatpush1.msra.mxu0 %v1445_v44 }
 0x175   :  { %v5112_v34 = vadd.f32 %v672_v33, %v487_v48  ;;  %1487 = vmatprep.subr.mxu0 %v6170_v0  ;;  %v5152_v50 = vpop.f32.mrf.mxu1 }
 0x176   :  { %v676_v36 = vpop.f32.mrf.mxu0  ;;  %1488 = vmatpush1.msra.mxu0 %v1444_v47 }
 0x177   :  { %v5118_v37 = vadd.f32 %v676_v36, %v491_v51  ;;  %1489 = vmatprep.subr.mxu0 %v6170_v0  ;;  %v5164_v12 = vpop.f32.mrf.mxu1 }
 0x178   :  { %v678_v40 = vpop.f32.mrf.mxu0  ;;  %1490 = vmatpush1.msra.mxu0 %v1443_v49 }
 0x179   :  { %v5126_v41 = vadd.f32 %v678_v40, %v493_v54  ;;  %1491 = vmatprep.subr.mxu0 %v6170_v0  ;;  %v1441_v54 = vld [vmem:[%s6155_s5 + $0x30] sm:$0xff]  ;;  %v5171_v23 = vpop.f32.mrf.mxu1 }
 0x17a   :  { %v5132_v43 = vpop.f32.mrf.mxu0  ;;  %1492 = vmatpush1.msra.mxu0 %v1442_v52 }
 0x17b   :  { %1493 = vmatprep.subr.mxu0 %v6170_v0  ;;  %v5174_v30 = vpop.f32.mrf.mxu1 }
 0x17c   :  { %v5140_v46 = vpop.f32.mrf.mxu0  ;;  %1494 = vmatpush1.msra.mxu0 %v1441_v54 }
 0x17d   :  { %1495 = vmatprep.subr.mxu0 %v6170_v0  ;;  %v5178_v35 = vpop.f32.mrf.mxu1 }
 0x17e   :  { %v5146_v48 = vpop.f32.mrf.mxu0  ;;  %1496 = vmatpush1.msra.mxu0 %v1440_v18 }
 0x17f   :  { %1497 = vmatprep.subr.mxu0 %v6170_v0  ;;  %v5184_v40 = vpop.f32.mrf.mxu1 }
 0x180   :  { %v5154_v51 = vpop.f32.mrf.mxu0 }
 0x181   :  { %v896_v47 = vpop.f32.mrf.mxu1  ;;  %v724_v63 = vadd.f32 %v5154_v51, %v505_v4  ;;  %v721_v51 = vadd.f32 %v5132_v43, %v497_v62 }
 0x182   :  { %v694_v53 = vpop.f32.mrf.mxu0 }
 0x183   :  { %v900_v54 = vpop.f32.mrf.mxu1  ;;  %v725_v3 = vadd.f32 %v694_v53, %v509_v6  ;;  %v930_v55 = vadd.f32 %v896_v47, %v724_v63 }
 0x184   :  { %v696_v15 = vpop.f32.mrf.mxu0 }
 0x185   :  { %v726_v5 = vadd.f32 %v696_v15, %v511_v24 }
 0x186   :  { %v700_v20 = vpop.f32.mrf.mxu0 }
 0x187   :  { %v727_v7 = vadd.f32 %v700_v20, %v515_v25  ;;  %v1143_v20 = vld [vmem:[#allocation3] sm:$0x3] }
 0x188   :  { %v702_v26 = vpop.f32.mrf.mxu0 }
 0x189   :  { %v728_v39 = vadd.f32 %v702_v26, %v517_v19 }
 0x18a   :  { %v706_v28 = vpop.f32.mrf.mxu0 }
 0x18c   :  { %v708_v31 = vpop.f32.mrf.mxu0 }
 0x18e   :  { %v5176_v33 = vpop.f32.mrf.mxu0 }
 0x18f   :  { %6188 = vst [vmem:[#allocation33_spill] sm:$0xff] %v5176_v33  ;;  %v902_v33 = vpop.f32.mrf.mxu1 }
 0x190   :  { %v5180_v36 = vpop.f32.mrf.mxu0  ;;  %v932_v24 = vadd.f32 %v902_v33, %v726_v5 }
 0x191   :  { %6189 = vst [vmem:[#allocation34_spill] sm:$0xff] %v5180_v36  ;;  %v906_v13 = vpop.f32.mrf.mxu1 }
 0x192   :  { %v5182_v38 = vpop.f32.mrf.mxu0  ;;  %v933_v59 = vadd.f32 %v906_v13, %v727_v7 }
 0x193   :  { %6190 = vst [vmem:[#allocation35_spill] sm:$0xff] %v5182_v38  ;;  %v908_v16 = vpop.f32.mrf.mxu1 }
 0x194   :  { %v5186_v42 = vpop.f32.mrf.mxu0  ;;  %v934_v1 = vadd.f32 %v908_v16, %v728_v39  ;;  %v931_v16 = vadd.f32 %v900_v54, %v725_v3  ;;  %v927_v54 = vadd.f32 %v5174_v30, %v721_v51 }
 0x195   :  { %6191 = vst [vmem:[#allocation36_spill] sm:$0xff] %v5186_v42  ;;  %v912_v22 = vpop.f32.mrf.mxu1 }
 0x196   :  { %v5188_v44 = vpop.f32.mrf.mxu0 }
 0x197   :  { %6192 = vst [vmem:[#allocation37_spill] sm:$0xff] %v5188_v44 }
 0x198   :  { %v5190_v49 = vpop.f32.mrf.mxu0 }
 0x199   :  { %6193 = vst [vmem:[#allocation38_spill] sm:$0xff] %v5190_v49  ;;  %v521_v49 = vadd.f32 %v5076_v9, %v5074_v8 }
 0x19a   :  { %v5192_v52 = vpop.f32.mrf.mxu0 }
 0x19b   :  { %6194 = vst [vmem:[#allocation39_spill] sm:$0xff] %v5192_v52  ;;  %v5208_v52 = vshrl.u32 %v1145_v17, 7  ;;  %v729_v27 = vadd.f32 %v706_v28, %v521_v49  ;;  %v499_v17 = vadd.f32 %v5048_v58, %v5046_v57  ;;  %v723_v58 = vadd.f32 %v5146_v48, %v503_v2 }
 0x19c   :  { %v5194_v18 = vpop.f32.mrf.mxu0 }
 0x19d   :  { %6195 = vst [vmem:[#allocation40_spill] sm:$0xff] %v5194_v18  ;;  %v523_v18 = vadd.f32 %v5080_v11, %v5078_v10  ;;  %v914_v10 = vpop.f32.mrf.mxu1  ;;  %v1147_v11 = vsub.s32 0, %v5208_v52  ;;  %v935_v25 = vadd.f32 %v912_v22, %v729_v27  ;;  %v1151_v61 = vsub.s32 1, %v5208_v52 }
 0x19e   :  { %v5196_v0 = vpop.f32.mrf.mxu0  ;;  %v722_v57 = vadd.f32 %v5140_v46, %v499_v17  ;;  %v929_v48 = vadd.f32 %v5184_v40, %v723_v58 }
 0x19f   :  { %v730_v9 = vadd.f32 %v708_v31, %v523_v18  ;;  %v5232_v22 = vrot.slane %v1143_v20, %v1147_v11  ;;  %v5236_v56 = vrot.slane %v1143_v20, %v1151_v61 }
 0x1a0   :  { %v5198_v36 = vpop.f32.mrf.mxu0  ;;  %v928_v43 = vadd.f32 %v5178_v35, %v722_v57  ;;  %v6204_v62 = vld [vmem:[#allocation38_spill] sm:$0xff] }
 0x1a1   :  { %v936_v53 = vadd.f32 %v914_v10, %v730_v9 }
 0x1a2   :  { %v5200_v38 = vpop.f32.mrf.mxu0  ;;  %v6201_v3 = vld [vmem:[#allocation39_spill] sm:$0xff] }
 0x1a3   :  { %v1133_v7 = vadd.f32 %v5200_v38, %v927_v54 }
 0x1a4   :  { %v1096_v14 = vpop.f32.mrf.mxu0  ;;  %v6198_v5 = vld [vmem:[#allocation40_spill] sm:$0xff] }
 0x1a5   :  { %v1134_v40 = vadd.f32 %v1096_v14, %v928_v43  ;;  %v6211_v43 = vld [vmem:[#allocation22_spill] sm:$0xff] }
 0x1a6   :  { %v1100_v42 = vpop.f32.mrf.mxu0 }
 0x1a7   :  { %v1135_v18 = vadd.f32 %v1100_v42, %v929_v48  ;;  %v5288_v17 = vadd.f32 %v5236_v56, %v1134_v40 }
 0x1a8   :  { %v1102_v44 = vpop.f32.mrf.mxu0 }
 0x1a9   :  { %v1136_v33 = vadd.f32 %v1102_v44, %v930_v55  ;;  %v925_v44 = vadd.f32 %v5164_v12, %v5118_v37  ;;  %v923_v37 = vadd.f32 %v5138_v45, %v5102_v29  ;;  %v5279_v38 = vadd.f32 %v5232_v22, %v1135_v18  ;;  %v6200_v45 = vld [vmem:[#allocation31_spill] sm:$0xff] }
 0x1aa   :  { %v1106_v21 = vpop.f32.mrf.mxu0  ;;  %v6213_v18 = vld [vmem:[#allocation35_spill] sm:$0xff] }
 0x1ab   :  { %v1137_v28 = vadd.f32 %v1106_v21, %v931_v16  ;;  %v926_v21 = vadd.f32 %v5171_v23, %v5126_v41  ;;  %v5270_v41 = vadd.f32 %v5236_v56, %v1136_v33  ;;  %v1131_v12 = vadd.f32 %v5196_v0, %v925_v44  ;;  %v6199_v0 = vld [vmem:[#allocation28_spill] sm:$0xff]  ;;  %v6212_v33 = vld [vmem:[#allocation21_spill] sm:$0xff] }
 0x1ac   :  { %v1108_v32 = vpop.f32.mrf.mxu0  ;;  %v921_v2 = vadd.f32 %v6200_v45, %v6199_v0  ;;  %v1129_v10 = vadd.f32 %v6201_v3, %v923_v37  ;;  %v1187_v16 = vmax.f32 %v5279_v38, 0.0  ;;  %v917_v54 = vadd.f32 %v6212_v33, %v6211_v43  ;;  %v1457_v43 = vld [vmem:[%s6155_s5 + $0xb0] sm:$0xff] }
 0x1ad   :  { %v1138_v13 = vadd.f32 %v1108_v32, %v932_v24  ;;  %v5263_v30 = vadd.f32 %v5232_v22, %v1137_v28  ;;  %v1132_v14 = vadd.f32 %v5198_v36, %v926_v21  ;;  %v6197_v36 = vld [vmem:[#allocation32_spill] sm:$0xff]  ;;  %v6206_v24 = vld [vmem:[#allocation26_spill] sm:$0xff]  ;;  %v5315_v51 = vadd.f32 %v5232_v22, %v1131_v12 }
 0x1ae   :  { %v1112_v8 = vpop.f32.mrf.mxu0  ;;  %v1186_v28 = vmax.f32 %v5288_v17, 0.0  ;;  %v1161_v40 = vadd.f32 %v5232_v22, %v1129_v10  ;;  %v1587_v33 = vld [vmem:[%s6156_s6 + $0xb0] sm:$0xff] }
 0x1af   :  { %v1139_v27 = vadd.f32 %v1112_v8, %v933_v59  ;;  %v5256_v6 = vadd.f32 %v5236_v56, %v1138_v13  ;;  %v924_v8 = vadd.f32 %v5152_v50, %v5112_v34  ;;  %v6196_v50 = vld [vmem:[#allocation30_spill] sm:$0xff]  ;;  %v1189_v63 = vmax.f32 %v5263_v30, 0.0  ;;  %v6210_v13 = vld [vmem:[#allocation36_spill] sm:$0xff] }
 0x1b0   :  { %v1114_v19 = vpop.f32.mrf.mxu0  ;;  %v922_v4 = vadd.f32 %v6197_v36, %v6196_v50  ;;  %v5306_v58 = vadd.f32 %v5236_v56, %v1132_v14  ;;  %v1188_v59 = vmax.f32 %v5270_v41, 0.0  ;;  %v6215_v41 = vld [vmem:[#allocation33_spill] sm:$0xff]  ;;  %v1183_v38 = vmax.f32 %v5315_v51, 0.0 }
 0x1b1   :  { %v1140_v15 = vadd.f32 %v1114_v19, %v934_v1  ;;  %v5251_v32 = vadd.f32 %v5232_v22, %v1139_v27  ;;  %v1130_v9 = vadd.f32 %v6198_v5, %v924_v8  ;;  %v1190_v29 = vmax.f32 %v5256_v6, 0.0  ;;  %v6202_v1 = vld [vmem:[#allocation27_spill] sm:$0xff]  ;;  %v6208_v27 = vld [vmem:[#allocation24_spill] sm:$0xff]  ;;  %v1580_v6 = vld [vmem:[%s6156_s6 + $0x78] sm:$0xff] }
 0x1b2   :  { %v1118_v60 = vpop.f32.mrf.mxu0  ;;  %v5297_v19 = vadd.f32 %v5232_v22, %v1133_v7  ;;  %v1128_v57 = vadd.f32 %v6204_v62, %v922_v4  ;;  %v6214_v7 = vld [vmem:[#allocation34_spill] sm:$0xff]  ;;  %v1184_v14 = vmax.f32 %v5306_v58, 0.0  ;;  %v1123_v37 = vadd.f32 %v6215_v41, %v917_v54  ;;  %v1574_v62 = vld [vmem:[%s6156_s6 + $0x48] sm:$0xff] }
 0x1b3   :  { %v1141_v26 = vadd.f32 %v1118_v60, %v935_v25  ;;  %v5244_v49 = vadd.f32 %v5236_v56, %v1140_v15  ;;  %v1191_v34 = vmax.f32 %v5251_v32, 0.0  ;;  %v6203_v25 = vld [vmem:[#allocation29_spill] sm:$0xff]  ;;  %v1162_v48 = vadd.f32 %v5236_v56, %v1130_v9  ;;  %v1310_v32 = vld [vmem:[#allocation5] sm:$0xff] }
 0x1b4   :  { %v1120_v39 = vpop.f32.mrf.mxu0  ;;  %v920_v20 = vadd.f32 %v6203_v25, %v6202_v1  ;;  %v6205_v60 = vld [vmem:[#allocation25_spill] sm:$0xff]  ;;  %v1185_v44 = vmax.f32 %v5297_v19, 0.0  ;;  %v1160_v8 = vadd.f32 %v5236_v56, %v1128_v57  ;;  %v1181_v5 = vmax.f32 %v1161_v40, 0.0  ;;  %v1195_v1 = vld [vmem:[%s6153_s3] sm:$0xff]  ;;  %v1314_v58 = vld [vmem:[#allocation5 + $0x20] sm:$0xf] }
 0x1b5   :  { %v1142_v46 = vadd.f32 %v1120_v39, %v936_v53  ;;  %v5240_v31 = vadd.f32 %v5232_v22, %v1141_v26  ;;  %v1192_v23 = vmax.f32 %v5244_v49, 0.0  ;;  %v919_v53 = vadd.f32 %v6206_v24, %v6205_v60  ;;  %v6207_v15 = vld [vmem:[#allocation37_spill] sm:$0xff]  ;;  %v6209_v39 = vld [vmem:[#allocation23_spill] sm:$0xff] }
 0x1b6   :  { %v1127_v26 = vadd.f32 %v6207_v15, %v921_v2  ;;  %v918_v55 = vadd.f32 %v6209_v39, %v6208_v27  ;;  %v1182_v36 = vmax.f32 %v1162_v48, 0.0  ;;  %v1180_v17 = vmax.f32 %v1160_v8, 0.0  ;;  %v1198_v49 = vld [vmem:[%s6153_s3 + $0x18] sm:$0xff]  ;;  %v1575_v25 = vld [vmem:[%s6156_s6 + $0x50] sm:$0xff]  ;;  %v1573_v57 = vld [vmem:[%s6156_s6 + $0x40] sm:$0xff] }
 0x1b7   :  { %v5247_v47 = vadd.f32 %v5236_v56, %v1142_v46  ;;  %v1193_v42 = vmax.f32 %v5240_v31, 0.0  ;;  %v1126_v46 = vadd.f32 %v6210_v13, %v920_v20  ;;  %v1125_v21 = vadd.f32 %v6213_v18, %v919_v53  ;;  %v1197_v31 = vld [vmem:[%s6153_s3 + $0x10] sm:$0xff]  ;;  %v1313_v20 = vld [vmem:[#allocation5 + $0x18] sm:$0xff]  ;;  %v1568_v51 = vld [vmem:[%s6156_s6 + $0x18] sm:$0xff] }
 0x1b8   :  { %v1124_v30 = vadd.f32 %v6214_v7, %v918_v55  ;;  %v1159_v12 = vadd.f32 %v5232_v22, %v1127_v26  ;;  %v1155_v0 = vadd.f32 %v5232_v22, %v1123_v37  ;;  %v1571_v60 = vld [vmem:[%s6156_s6 + $0x30] sm:$0xff]  ;;  %v1570_v24 = vld [vmem:[%s6156_s6 + $0x28] sm:$0xff]  ;;  %v1439_v53 = vld [vmem:[%s6155_s5 + $0x20] sm:$0xff] }
 0x1b9   :  { %v1194_v35 = vmax.f32 %v5247_v47, 0.0  ;;  %v1158_v50 = vadd.f32 %v5236_v56, %v1126_v46  ;;  %v1157_v4 = vadd.f32 %v5232_v22, %v1125_v21  ;;  %v6216_v22 = vmov 0.0   ;;  %v1199_v47 = vld [vmem:[%s6153_s3 + $0x20] sm:$0xf]  ;;  %1498 = vmatpush1.msra.mxu0 %v1439_v53  ;;  %v1438_v26 = vld [vmem:[%s6155_s5 + $0x18] sm:$0xff]  ;;  %v1567_v27 = vld [vmem:[%s6156_s6 + $0x10] sm:$0xff] }
 0x1ba   :  { %v1156_v9 = vadd.f32 %v5236_v56, %v1124_v30  ;;  %v1179_v45 = vmax.f32 %v1159_v12, 0.0  ;;  %v1175_v19 = vmax.f32 %v1155_v0, 0.0  ;;  %v1196_v56 = vld [vmem:[%s6153_s3 + $0x8] sm:$0xff]  ;;  %v1569_v15 = vld [vmem:[%s6156_s6 + $0x20] sm:$0xff]  ;;  %1499 = vmatprep.subr.mxu0 %v6216_v22  ;;  %v1458_v48 = vld [vmem:[%s6155_s5 + $0xb8] sm:$0xff] }
 0x1bb   :  { %1227 = vmatprep.subr.mxu1 %v1194_v35  ;;  %v1178_v2 = vmax.f32 %v1158_v50, 0.0  ;;  %v1177_v3 = vmax.f32 %v1157_v4, 0.0  ;;  %1500 = vmatpush1.msra.mxu0 %v1438_v26  ;;  %v1436_v39 = vld [vmem:[%s6155_s5 + $0x8] sm:$0xff]  ;;  %v1435_v13 = vld [vmem:[%s6155_s5] sm:$0xff]  ;;  %v1584_v7 = vld [vmem:[%s6156_s6 + $0x98] sm:$0xff] }
 0x1bc   :  { %1228 = vmatpush1.msra.mxu1 %v1193_v42  ;;  %v1176_v10 = vmax.f32 %v1156_v9, 0.0  ;;  %1501 = vmatprep.subr.mxu0 %v6216_v22  ;;  %v1566_v55 = vld [vmem:[%s6156_s6 + $0x8] sm:$0xff]  ;;  %v1565_v46 = vld [vmem:[%s6156_s6] sm:$0xff]  ;;  %v1453_v30 = vld [vmem:[%s6155_s5 + $0x90] sm:$0xff] }
 0x1bd   :  { %1229 = vmatprep.subr.mxu1 %v1192_v23  ;;  %v1456_v54 = vld [vmem:[%s6155_s5 + $0xa8] sm:$0xff]  ;;  %v1455_v21 = vld [vmem:[%s6155_s5 + $0xa0] sm:$0xff]  ;;  %v1583_v8 = vld [vmem:[%s6156_s6 + $0x90] sm:$0xff] }
 0x1be   :  { %1230 = vmatpush1.msra.mxu1 %v1191_v34  ;;  %v1586_v18 = vld [vmem:[%s6156_s6 + $0xa8] sm:$0xff]  ;;  %v1585_v40 = vld [vmem:[%s6156_s6 + $0xa0] sm:$0xff] }
 0x1bf   :  { %1231 = vmatprep.subr.mxu1 %v1190_v29  ;;  %v1582_v41 = vld [vmem:[%s6156_s6 + $0x88] sm:$0xff]  ;;  %v1451_v37 = vld [vmem:[%s6155_s5 + $0x80] sm:$0xff] }
 0x1c0   :  { %1232 = vmatpush1.msra.mxu1 %v1189_v63  ;;  %v1581_v12 = vld [vmem:[%s6156_s6 + $0x80] sm:$0xff]  ;;  %v1723_v50 = vld [vmem:[#allocation7 + $0xb8] sm:$0xff] }
 0x1c1   :  { %1233 = vmatprep.subr.mxu1 %v1188_v59  ;;  %v1702_v53 = vld [vmem:[#allocation7 + $0x38] sm:$0xff] }
 0x1c2   :  { %1234 = vmatpush1.msra.mxu1 %v1187_v16 }
 0x1c3   :  { %1235 = vmatprep.subr.mxu1 %v1186_v28 }
 0x1c4   :  { %1236 = vmatpush1.msra.mxu1 %v1185_v44 }
 0x1c5   :  { %1237 = vmatprep.subr.mxu1 %v1184_v14 }
 0x1c6   :  { %1238 = vmatpush1.msra.mxu1 %v1183_v38 }
 0x1c7   :  { %1239 = vmatprep.subr.mxu1 %v1182_v36 }
 0x1c8   :  { %1240 = vmatpush1.msra.mxu1 %v1181_v5 }
 0x1c9   :  { %1241 = vmatprep.subr.mxu1 %v1180_v17 }
 0x1ca   :  { %1242 = vmatpush1.msra.mxu1 %v1179_v45 }
 0x1cb   :  { %1243 = vmatprep.subr.mxu1 %v1178_v2 }
 0x1cc   :  { %1244 = vmatpush1.msra.mxu1 %v1177_v3 }
 0x1cd   :  { %1245 = vmatprep.subr.mxu1 %v1176_v10 }
 0x1ce   :  { %1246 = vmatpush1.msra.mxu1 %v1175_v19 }
 0x1cf   :  { %3679 = vmatmul.mubr.msk.f32.vlgmr.msra.gmra.mxu1 %vm214_vm0, %v1195_v1  ;;  %1342 = vmatprep.subr.mxu1 %v1194_v35  ;;  %v1579_v35 = vld [vmem:[%s6156_s6 + $0x70] sm:$0xff] }
 0x1d0   :  { %1343 = vmatpush1.msra.mxu1 %v1193_v42  ;;  %1285 = vmatprep.mubr.f32.mxu1 %v6216_v22  ;;  %v1311_v42 = vld [vmem:[#allocation5 + $0x8] sm:$0xff] }
 0x1d1   :  { %1344 = vmatprep.subr.mxu1 %v1192_v23  ;;  %v1578_v23 = vld [vmem:[%s6156_s6 + $0x68] sm:$0xff] }
 0x1d2   :  { %1345 = vmatpush1.msra.mxu1 %v1191_v34  ;;  %v1577_v34 = vld [vmem:[%s6156_s6 + $0x60] sm:$0xff] }
 0x1d3   :  { %3680 = vmatmul.mubr.msk.f32.gmra.mxu1 %vm214_vm0, %v1196_v56  ;;  %1346 = vmatprep.subr.mxu1 %v1190_v29  ;;  %v1312_v29 = vld [vmem:[#allocation5 + $0x10] sm:$0xff] }
 0x1d4   :  { %1347 = vmatpush1.msra.mxu1 %v1189_v63  ;;  %1291 = vmatprep.mubr.f32.mxu1 %v6216_v22  ;;  %v1576_v63 = vld [vmem:[%s6156_s6 + $0x58] sm:$0xff] }
 0x1d5   :  { %1348 = vmatprep.subr.mxu1 %v1188_v59  ;;  %v1572_v59 = vld [vmem:[%s6156_s6 + $0x38] sm:$0xff] }
 0x1d6   :  { %1349 = vmatpush1.msra.mxu1 %v1187_v16  ;;  %v1437_v16 = vld [vmem:[%s6155_s5 + $0x10] sm:$0xff] }
 0x1d7   :  { %3681 = vmatmul.mubr.msk.f32.gmra.mxu1 %vm214_vm0, %v1197_v31  ;;  %1350 = vmatprep.subr.mxu1 %v1186_v28  ;;  %v1588_v28 = vld [vmem:[%s6156_s6 + $0xb8] sm:$0xff] }
 0x1d8   :  { %1351 = vmatpush1.msra.mxu1 %v1185_v44  ;;  %1297 = vmatprep.mubr.f32.mxu1 %v6216_v22  ;;  %v1454_v44 = vld [vmem:[%s6155_s5 + $0x98] sm:$0xff] }
 0x1d9   :  { %1352 = vmatprep.subr.mxu1 %v1184_v14  ;;  %1502 = vmatpush1.msra.mxu0 %v1437_v16  ;;  %v1452_v14 = vld [vmem:[%s6155_s5 + $0x88] sm:$0xff]  ;;  %v1720_v16 = vld [vmem:[#allocation7 + $0xa0] sm:$0xff] }
 0x1da   :  { %1353 = vmatpush1.msra.mxu1 %v1183_v38  ;;  %1503 = vmatprep.subr.mxu0 %v6216_v22  ;;  %v1706_v38 = vld [vmem:[#allocation7 + $0x58] sm:$0xff] }
 0x1db   :  { %3682 = vmatmul.mubr.msk.f32.gmra.mxu1 %vm214_vm0, %v1198_v49  ;;  %1354 = vmatprep.subr.mxu1 %v1182_v36 }
 0x1dc   :  { %1355 = vmatpush1.msra.mxu1 %v1181_v5  ;;  %1303 = vmatprep.mubr.f32.mxu1 %v6216_v22 }
 0x1dd   :  { %1356 = vmatprep.subr.mxu1 %v1180_v17  ;;  %1504 = vmatpush1.msra.mxu0 %v1436_v39  ;;  %v1719_v39 = vld [vmem:[#allocation7 + $0x98] sm:$0xff] }
 0x1de   :  { %1357 = vmatpush1.msra.mxu1 %v1179_v45  ;;  %1505 = vmatprep.subr.mxu0 %v6216_v22 }
 0x1df   :  { %3683 = vmatmul.mubr.msk.f32.gmra.mxu1 %vm214_vm0, %v1199_v47  ;;  %1358 = vmatprep.subr.mxu1 %v1178_v2  ;;  %v1705_v47 = vld [vmem:[#allocation7 + $0x50] sm:$0xff] }
 0x1e0   :  { %1359 = vmatpush1.msra.mxu1 %v1177_v3  ;;  %1394 = vmatprep.mubr.f32.mxu1 %v6216_v22 }
 0x1e1   :  { %1360 = vmatprep.subr.mxu1 %v1176_v10  ;;  %1506 = vmatpush1.msra.mxu0 %v1435_v13  ;;  %v1718_v13 = vld [vmem:[#allocation7 + $0x90] sm:$0xff] }
 0x1e2   :  { %1361 = vmatpush1.msra.mxu1 %v1175_v19  ;;  %1523 = vmatprep.subr.mxu0 %v6216_v22 }
 0x1e3   :  { %3684 = vmatmul.mubr.msk.f32.vlgmr.msra.gmra.mxu1 %vm214_vm0, %v1310_v32  ;;  %1589 = vmatprep.subr.mxu1 %v6216_v22  ;;  %v1722_v32 = vld [vmem:[#allocation7 + $0xb0] sm:$0xff] }
 0x1e4   :  { %1400 = vmatprep.mubr.f32.mxu1 %v6216_v22  ;;  %1590 = vmatpush1.msra.mxu1 %v1580_v6 }
 0x1e5   :  { %1591 = vmatprep.subr.mxu1 %v6216_v22  ;;  %1524 = vmatpush2.msra.mxu0 %v1458_v48  ;;  %v1717_v48 = vld [vmem:[#allocation7 + $0x88] sm:$0xff] }
 0x1e6   :  { %1592 = vmatpush1.msra.mxu1 %v1579_v35  ;;  %1525 = vmatprep.subr.mxu0 %v6216_v22 }
 0x1e7   :  { %3685 = vmatmul.mubr.msk.f32.gmra.mxu1 %vm214_vm0, %v1311_v42  ;;  %1593 = vmatprep.subr.mxu1 %v6216_v22 }
 0x1e8   :  { %1406 = vmatprep.mubr.f32.mxu1 %v6216_v22  ;;  %1594 = vmatpush1.msra.mxu1 %v1578_v23 }
 0x1e9   :  { %1595 = vmatprep.subr.mxu1 %v6216_v22  ;;  %1526 = vmatpush2.msra.mxu0 %v1457_v43  ;;  %v1716_v43 = vld [vmem:[#allocation7 + $0x80] sm:$0xff] }
 0x1ea   :  { %1596 = vmatpush1.msra.mxu1 %v1577_v34  ;;  %1527 = vmatprep.subr.mxu0 %v6216_v22  ;;  %v1704_v34 = vld [vmem:[#allocation7 + $0x48] sm:$0xff] }
 0x1eb   :  { %3686 = vmatmul.mubr.msk.f32.gmra.mxu1 %vm214_vm0, %v1312_v29  ;;  %1597 = vmatprep.subr.mxu1 %v6216_v22  ;;  %v1721_v29 = vld [vmem:[#allocation7 + $0xa8] sm:$0xff] }
 0x1ec   :  { %1412 = vmatprep.mubr.f32.mxu1 %v6216_v22  ;;  %1598 = vmatpush1.msra.mxu1 %v1576_v63 }
 0x1ed   :  { %1599 = vmatprep.subr.mxu1 %v6216_v22  ;;  %1528 = vmatpush2.msra.mxu0 %v1456_v54  ;;  %v1715_v54 = vld [vmem:[#allocation7 + $0x78] sm:$0xff] }
 0x1ee   :  { %1600 = vmatpush1.msra.mxu1 %v1575_v25  ;;  %1529 = vmatprep.subr.mxu0 %v6216_v22 }
 0x1ef   :  { %3687 = vmatmul.mubr.msk.f32.gmra.mxu1 %vm214_vm0, %v1313_v20  ;;  %1601 = vmatprep.subr.mxu1 %v6216_v22 }
 0x1f0   :  { %1418 = vmatprep.mubr.f32.mxu1 %v6216_v22  ;;  %1602 = vmatpush1.msra.mxu1 %v1574_v62 }
 0x1f1   :  { %1603 = vmatprep.subr.mxu1 %v6216_v22  ;;  %1530 = vmatpush2.msra.mxu0 %v1455_v21  ;;  %v1714_v21 = vld [vmem:[#allocation7 + $0x70] sm:$0xff] }
 0x1f2   :  { %1604 = vmatpush1.msra.mxu1 %v1573_v57  ;;  %1531 = vmatprep.subr.mxu0 %v6216_v22  ;;  %v1703_v57 = vld [vmem:[#allocation7 + $0x40] sm:$0xff] }
 0x1f3   :  { %3688 = vmatmul.mubr.msk.f32.gmra.mxu1 %vm214_vm0, %v1314_v58  ;;  %1605 = vmatprep.subr.mxu1 %v6216_v22 }
 0x1f4   :  { %1606 = vmatpush1.msra.mxu1 %v1572_v59  ;;  %1532 = vmatpush2.msra.mxu0 %v1454_v44  ;;  %v1713_v44 = vld [vmem:[#allocation7 + $0x68] sm:$0xff] }
 0x1f5   :  { %1607 = vmatprep.subr.mxu1 %v6216_v22  ;;  %1533 = vmatprep.subr.mxu0 %v6216_v22 }
 0x1f6   :  { %1608 = vmatpush1.msra.mxu1 %v1571_v60  ;;  %1534 = vmatpush2.msra.mxu0 %v1453_v30  ;;  %v1712_v30 = vld [vmem:[#allocation7 + $0x60] sm:$0xff] }
 0x1f7   :  { %1609 = vmatprep.subr.mxu1 %v6216_v22  ;;  %1535 = vmatprep.subr.mxu0 %v6216_v22 }
 0x1f8   :  { %1610 = vmatpush1.msra.mxu1 %v1570_v24  ;;  %1536 = vmatpush2.msra.mxu0 %v1452_v14 }
 0x1f9   :  { %1611 = vmatprep.subr.mxu1 %v6216_v22  ;;  %1537 = vmatprep.subr.mxu0 %v6216_v22 }
 0x1fa   :  { %1612 = vmatpush1.msra.mxu1 %v1569_v15  ;;  %1538 = vmatpush2.msra.mxu0 %v1451_v37 }
 0x1fb   :  { %1613 = vmatprep.subr.mxu1 %v6216_v22  ;;  %3924 = vmatprep.subr.mxu0 %v1723_v50 }
 0x1fc   :  { %1614 = vmatpush1.msra.mxu1 %v1568_v51 }
 0x1fd   :  { %1615 = vmatprep.subr.mxu1 %v6216_v22 }
 0x1fe   :  { %1616 = vmatpush1.msra.mxu1 %v1567_v27  ;;  %v1701_v27 = vld [vmem:[#allocation7 + $0x30] sm:$0xff] }
 0x1ff   :  { %1617 = vmatprep.subr.mxu1 %v6216_v22 }
 0x200   :  { %1618 = vmatpush1.msra.mxu1 %v1566_v55  ;;  %v1700_v55 = vld [vmem:[#allocation7 + $0x28] sm:$0xff] }
 0x201   :  { %1619 = vmatprep.subr.mxu1 %v6216_v22 }
 0x202   :  { %1620 = vmatpush1.msra.mxu1 %v1565_v46  ;;  %v1699_v46 = vld [vmem:[#allocation7 + $0x20] sm:$0xff] }
 0x203   :  { %1637 = vmatprep.subr.mxu1 %v6216_v22 }
 0x204   :  { %1638 = vmatpush2.msra.mxu1 %v1588_v28  ;;  %v1698_v28 = vld [vmem:[#allocation7 + $0x18] sm:$0xff] }
 0x205   :  { %1639 = vmatprep.subr.mxu1 %v6216_v22 }
 0x206   :  { %1640 = vmatpush2.msra.mxu1 %v1587_v33  ;;  %v1697_v33 = vld [vmem:[#allocation7 + $0x10] sm:$0xff] }
 0x207   :  { %1641 = vmatprep.subr.mxu1 %v6216_v22 }
 0x208   :  { %1642 = vmatpush2.msra.mxu1 %v1586_v18  ;;  %v1696_v18 = vld [vmem:[#allocation7 + $0x8] sm:$0xff] }
 0x209   :  { %1643 = vmatprep.subr.mxu1 %v6216_v22 }
 0x20a   :  { %1644 = vmatpush2.msra.mxu1 %v1585_v40  ;;  %v1695_v40 = vld [vmem:[#allocation7] sm:$0xff] }
 0x20b   :  { %1645 = vmatprep.subr.mxu1 %v6216_v22 }
 0x20c   :  { %1646 = vmatpush2.msra.mxu1 %v1584_v7  ;;  %v2052_v7 = vld [vmem:[#allocation7 + $0x178] sm:$0xff] }
 0x20d   :  { %1647 = vmatprep.subr.mxu1 %v6216_v22 }
 0x20e   :  { %1648 = vmatpush2.msra.mxu1 %v1583_v8  ;;  %v1934_v8 = vld [vmem:[#allocation7 + $0x118] sm:$0xff] }
 0x20f   :  { %1649 = vmatprep.subr.mxu1 %v6216_v22 }
 0x210   :  { %1650 = vmatpush2.msra.mxu1 %v1582_v41 }
 0x211   :  { %1651 = vmatprep.subr.mxu1 %v6216_v22 }
 0x212   :  { %1652 = vmatpush2.msra.mxu1 %v1581_v12 }
 0x213   :  { %3954 = vmatprep.subr.mxu1 %v1706_v38 }
 0x28f   :  { %v1281_v36 = vpop.f32.mrf.mxu1 }
 0x291   :  { %v1283_v4 = vpop.f32.mrf.mxu1 }
 0x293   :  { %v1287_v5 = vpop.f32.mrf.mxu1 }
 0x295   :  { %v1289_v9 = vpop.f32.mrf.mxu1 }
 0x297   :  { %v1293_v17 = vpop.f32.mrf.mxu1 }
 0x299   :  { %v1295_v0 = vpop.f32.mrf.mxu1 }
 0x29b   :  { %v1299_v45 = vpop.f32.mrf.mxu1 }
 0x29d   :  { %v1301_v2 = vpop.f32.mrf.mxu1 }
 0x29f   :  { %v1305_v3 = vpop.f32.mrf.mxu1 }
 0x2a1   :  { %v1307_v10 = vpop.f32.mrf.mxu1 }
 0x2a3   :  { %v1396_v19 = vpop.f32.mrf.mxu1 }
 0x2a4   :  { %v1425_v31 = vmax.f32 %v1281_v36, %v1396_v19 }
 0x2a5   :  { %v1398_v1 = vpop.f32.mrf.mxu1 }
 0x2a6   :  { %v1426_v56 = vmax.f32 %v1283_v4, %v1398_v1 }
 0x2a7   :  { %v1402_v49 = vpop.f32.mrf.mxu1 }
 0x2a8   :  { %3689 = vmatprep.mubr.msk.f32.mxu0 %vm1459_vm1, %v1426_v56  ;;  %3694 = vmatprep.mubr.msk.f32.mxu1 %vm1459_vm1, %v1426_v56  ;;  %v1427_v42 = vmax.f32 %v1287_v5, %v1402_v49 }
 0x2a9   :  { %v1404_v6 = vpop.f32.mrf.mxu1  ;;  %1540 = vmatmul.mubr.f32.vlgmr.msra.gmra.mxu0 %v1425_v31  ;;  %1654 = vmatmul.mubr.f32.vlgmr.msra.gmra.mxu1 %v1425_v31 }
 0x2aa   :  { %v1428_v35 = vmax.f32 %v1289_v9, %v1404_v6  ;;  %3955 = vmatpush3.msra.mxu1 %v1706_v38  ;;  %3925 = vmatpush3.msra.mxu0 %v1723_v50  ;;  %v2051_v6 = vld [vmem:[#allocation7 + $0x170] sm:$0xff] }
 0x2ab   :  { %v1408_v23 = vpop.f32.mrf.mxu1  ;;  %3956 = vmatprep.subr.mxu1 %v1705_v47  ;;  %3926 = vmatprep.subr.mxu0 %v1722_v32 }
 0x2ac   :  { %3690 = vmatprep.mubr.msk.f32.mxu0 %vm1459_vm1, %v1428_v35  ;;  %3695 = vmatprep.mubr.msk.f32.mxu1 %vm1459_vm1, %v1428_v35  ;;  %v1429_v20 = vmax.f32 %v1293_v17, %v1408_v23  ;;  %v2050_v23 = vld [vmem:[#allocation7 + $0x168] sm:$0xff] }
 0x2ad   :  { %v1410_v63 = vpop.f32.mrf.mxu1  ;;  %1545 = vmatmul.mubr.f32.gmra.mxu0 %v1427_v42  ;;  %1659 = vmatmul.mubr.f32.gmra.mxu1 %v1427_v42 }
 0x2ae   :  { %v1430_v25 = vmax.f32 %v1295_v0, %v1410_v63  ;;  %3957 = vmatpush3.msra.mxu1 %v1705_v47  ;;  %3927 = vmatpush3.msra.mxu0 %v1722_v32 }
 0x2af   :  { %v1414_v62 = vpop.f32.mrf.mxu1  ;;  %3958 = vmatprep.subr.mxu1 %v1704_v34  ;;  %3928 = vmatprep.subr.mxu0 %v1721_v29 }
 0x2b0   :  { %3691 = vmatprep.mubr.msk.f32.mxu0 %vm1459_vm1, %v1430_v25  ;;  %3696 = vmatprep.mubr.msk.f32.mxu1 %vm1459_vm1, %v1430_v25  ;;  %v1431_v60 = vmax.f32 %v1299_v45, %v1414_v62  ;;  %v1933_v62 = vld [vmem:[#allocation7 + $0x110] sm:$0xff] }
 0x2b1   :  { %v1416_v58 = vpop.f32.mrf.mxu1  ;;  %1550 = vmatmul.mubr.f32.gmra.mxu0 %v1429_v20  ;;  %1664 = vmatmul.mubr.f32.gmra.mxu1 %v1429_v20 }
 0x2b2   :  { %v1432_v59 = vmax.f32 %v1301_v2, %v1416_v58  ;;  %3959 = vmatpush3.msra.mxu1 %v1704_v34  ;;  %3929 = vmatpush3.msra.mxu0 %v1721_v29  ;;  %v1932_v58 = vld [vmem:[#allocation7 + $0x108] sm:$0xff] }
 0x2b3   :  { %v1420_v24 = vpop.f32.mrf.mxu1  ;;  %3960 = vmatprep.subr.mxu1 %v1703_v57  ;;  %3930 = vmatprep.subr.mxu0 %v1720_v16 }
 0x2b4   :  { %3692 = vmatprep.mubr.msk.f32.mxu0 %vm1459_vm1, %v1432_v59  ;;  %3697 = vmatprep.mubr.msk.f32.mxu1 %vm1459_vm1, %v1432_v59  ;;  %v1433_v51 = vmax.f32 %v1305_v3, %v1420_v24  ;;  %v2048_v59 = vld [vmem:[#allocation7 + $0x158] sm:$0xff] }
 0x2b5   :  { %v1422_v15 = vpop.f32.mrf.mxu1  ;;  %1555 = vmatmul.mubr.f32.gmra.mxu0 %v1431_v60  ;;  %1669 = vmatmul.mubr.f32.gmra.mxu1 %v1431_v60 }
 0x2b6   :  { %v1434_v26 = vmax.f32 %v1307_v10, %v1422_v15  ;;  %3961 = vmatpush3.msra.mxu1 %v1703_v57  ;;  %3931 = vmatpush3.msra.mxu0 %v1720_v16  ;;  %v2049_v57 = vld [vmem:[#allocation7 + $0x160] sm:$0xff]  ;;  %v2047_v15 = vld [vmem:[#allocation7 + $0x150] sm:$0xff]  ;;  %v2046_v16 = vld [vmem:[#allocation7 + $0x148] sm:$0xff] }
 0x2b7   :  { %3962 = vmatprep.subr.mxu1 %v1702_v53  ;;  %3932 = vmatprep.subr.mxu0 %v1719_v39 }
 0x2b8   :  { %3693 = vmatprep.mubr.msk.f32.mxu0 %vm1459_vm1, %v1434_v26  ;;  %3698 = vmatprep.mubr.msk.f32.mxu1 %vm1459_vm1, %v1434_v26 }
 0x2b9   :  { %1560 = vmatmul.mubr.f32.gmra.mxu0 %v1433_v51  ;;  %1674 = vmatmul.mubr.f32.gmra.mxu1 %v1433_v51  ;;  %v1930_v51 = vld [vmem:[#allocation7 + $0xf8] sm:$0xff] }
 0x2ba   :  { %3963 = vmatpush3.msra.mxu1 %v1702_v53  ;;  %3933 = vmatpush3.msra.mxu0 %v1719_v39  ;;  %v1931_v53 = vld [vmem:[#allocation7 + $0x100] sm:$0xff]  ;;  %v1929_v39 = vld [vmem:[#allocation7 + $0xf0] sm:$0xff] }
 0x2bb   :  { %3964 = vmatprep.subr.mxu1 %v1701_v27  ;;  %3934 = vmatprep.subr.mxu0 %v1718_v13 }
 0x2bc   :  { %3965 = vmatpush3.msra.mxu1 %v1701_v27  ;;  %3935 = vmatpush3.msra.mxu0 %v1718_v13 }
 0x2bd   :  { %3966 = vmatprep.subr.mxu1 %v1700_v55  ;;  %3936 = vmatprep.subr.mxu0 %v1717_v48 }
 0x2be   :  { %3967 = vmatpush3.msra.mxu1 %v1700_v55  ;;  %3937 = vmatpush3.msra.mxu0 %v1717_v48  ;;  %v2045_v55 = vld [vmem:[#allocation7 + $0x140] sm:$0xff]  ;;  %v2044_v48 = vld [vmem:[#allocation7 + $0x138] sm:$0xff] }
 0x2bf   :  { %3968 = vmatprep.subr.mxu1 %v1699_v46  ;;  %3938 = vmatprep.subr.mxu0 %v1716_v43 }
 0x2c0   :  { %3969 = vmatpush3.msra.mxu1 %v1699_v46  ;;  %3939 = vmatpush3.msra.mxu0 %v1716_v43  ;;  %v1928_v46 = vld [vmem:[#allocation7 + $0xe8] sm:$0xff]  ;;  %v2043_v43 = vld [vmem:[#allocation7 + $0x130] sm:$0xff] }
 0x2c1   :  { %3970 = vmatprep.subr.mxu1 %v1698_v28  ;;  %3940 = vmatprep.subr.mxu0 %v1715_v54 }
 0x2c2   :  { %3971 = vmatpush3.msra.mxu1 %v1698_v28  ;;  %3941 = vmatpush3.msra.mxu0 %v1715_v54  ;;  %v1927_v28 = vld [vmem:[#allocation7 + $0xe0] sm:$0xff]  ;;  %v2042_v54 = vld [vmem:[#allocation7 + $0x128] sm:$0xff] }
 0x2c3   :  { %3972 = vmatprep.subr.mxu1 %v1697_v33  ;;  %3942 = vmatprep.subr.mxu0 %v1714_v21 }
 0x2c4   :  { %3973 = vmatpush3.msra.mxu1 %v1697_v33  ;;  %3943 = vmatpush3.msra.mxu0 %v1714_v21  ;;  %v1926_v33 = vld [vmem:[#allocation7 + $0xd8] sm:$0xff]  ;;  %v2041_v21 = vld [vmem:[#allocation7 + $0x120] sm:$0xff] }
 0x2c5   :  { %3974 = vmatprep.subr.mxu1 %v1696_v18  ;;  %3944 = vmatprep.subr.mxu0 %v1713_v44 }
 0x2c6   :  { %3975 = vmatpush3.msra.mxu1 %v1696_v18  ;;  %3945 = vmatpush3.msra.mxu0 %v1713_v44  ;;  %v1925_v18 = vld [vmem:[#allocation7 + $0xd0] sm:$0xff] }
 0x2c7   :  { %3976 = vmatprep.subr.mxu1 %v1695_v40  ;;  %3946 = vmatprep.subr.mxu0 %v1712_v30 }
 0x2c8   :  { %3977 = vmatpush3.msra.mxu1 %v1695_v40  ;;  %3947 = vmatpush3.msra.mxu0 %v1712_v30  ;;  %v1924_v40 = vld [vmem:[#allocation7 + $0xc8] sm:$0xff] }
 0x2c9   :  { %4014 = vmatprep.subr.mxu1 %v2052_v7  ;;  %3984 = vmatprep.subr.mxu0 %v1934_v8 }
 0x369   :  { %v1541_v14 = vpop.f32.mrf.mxu0  ;;  %v1655_v41 = vpop.f32.mrf.mxu1 }
 0x36a   :  { %v1679_v37 = vmax.f32 %v1541_v14, %v1655_v41 }
 0x36b   :  { %v1543_v12 = vpop.f32.mrf.mxu0  ;;  %v1657_v38 = vpop.f32.mrf.mxu1 }
 0x36c   :  { %1685 = vst.msk [vmem:[#allocation2] sm:$0xff] %vm1684_vm2, %v1679_v37  ;;  %v2169_v12 = vld [vmem:[#allocation7 + $0x1d0] sm:$0xff]  ;;  %v2168_v38 = vld [vmem:[#allocation7 + $0x1c8] sm:$0xff] }
 0x36d   :  { %v1546_v50 = vpop.f32.mrf.mxu0  ;;  %v1660_v36 = vpop.f32.mrf.mxu1 }
 0x36e   :  { %v1680_v4 = vmax.f32 %v1546_v50, %v1660_v36  ;;  %v2167_v36 = vld [vmem:[#allocation7 + $0x1c0] sm:$0xff] }
 0x36f   :  { %v1548_v5 = vpop.f32.mrf.mxu0  ;;  %v1662_v9 = vpop.f32.mrf.mxu1 }
 0x370   :  { %1686 = vst.msk [vmem:[#allocation2 + $0x8] sm:$0xff] %vm1684_vm2, %v1680_v4  ;;  %v2166_v5 = vld [vmem:[#allocation7 + $0x1b8] sm:$0xff]  ;;  %v2165_v9 = vld [vmem:[#allocation7 + $0x1b0] sm:$0xff] }
 0x371   :  { %v1551_v17 = vpop.f32.mrf.mxu0  ;;  %v1665_v0 = vpop.f32.mrf.mxu1 }
 0x372   :  { %v1681_v45 = vmax.f32 %v1551_v17, %v1665_v0  ;;  %v2164_v17 = vld [vmem:[#allocation7 + $0x1a8] sm:$0xff]  ;;  %v2163_v0 = vld [vmem:[#allocation7 + $0x1a0] sm:$0xff] }
 0x373   :  { %v1553_v2 = vpop.f32.mrf.mxu0  ;;  %v1667_v3 = vpop.f32.mrf.mxu1  ;;  %v1691_v10 = vld [vmem:[#allocation2] sm:$0xff] }
 0x374   :  { %1687 = vst.msk [vmem:[#allocation2 + $0x10] sm:$0xff] %vm1684_vm2, %v1681_v45  ;;  %3978 = vmatprep.mubr.msk.f32.mxu1 %vm1684_vm2, %v1691_v10  ;;  %v2162_v45 = vld [vmem:[#allocation7 + $0x198] sm:$0xff]  ;;  %v2161_v2 = vld [vmem:[#allocation7 + $0x190] sm:$0xff]  ;;  %v2160_v3 = vld [vmem:[#allocation7 + $0x188] sm:$0xff] }
 0x375   :  { %v1556_v19 = vpop.f32.mrf.mxu0  ;;  %v1670_v1 = vpop.f32.mrf.mxu1  ;;  %v2159_v10 = vld [vmem:[#allocation7 + $0x180] sm:$0xff] }
 0x376   :  { %v1682_v56 = vmax.f32 %v1556_v19, %v1670_v1 }
 0x377   :  { %v1558_v31 = vpop.f32.mrf.mxu0  ;;  %v1672_v49 = vpop.f32.mrf.mxu1  ;;  %v1707_v47 = vld [vmem:[#allocation2 + $0x1] sm:$0xff] }
 0x378   :  { %v1692_v32 = vld [vmem:[#allocation2 + $0x8] sm:$0xff]  ;;  %1688 = vst.msk [vmem:[#allocation2 + $0x18] sm:$0xff] %vm1684_vm2, %v1682_v56  ;;  %3948 = vmatprep.mubr.msk.f32.mxu0 %vm1684_vm2, %v1707_v47 }
 0x379   :  { %3979 = vmatmul.mubr.msk.f32.vlgmr.msra.gmra.mxu1 %vm1684_vm2, %v1692_v32  ;;  %v1561_v35 = vpop.f32.mrf.mxu0  ;;  %v1675_v42 = vpop.f32.mrf.mxu1  ;;  %v2036_v26 = vld [vmem:[#allocation2 + $0x3] sm:$0xff] }
 0x37a   :  { %4015 = vmatpush3.msra.mxu1 %v2052_v7  ;;  %v1683_v34 = vmax.f32 %v1561_v35, %v1675_v42  ;;  %v1918_v13 = vld [vmem:[#allocation2 + $0x2] sm:$0xff]  ;;  %v1923_v7 = vld [vmem:[#allocation7 + $0xc0] sm:$0xff] }
 0x37b   :  { %4016 = vmatprep.subr.mxu1 %v2051_v6  ;;  %v1563_v29 = vpop.f32.mrf.mxu0  ;;  %v1677_v63 = vpop.f32.mrf.mxu1  ;;  %v1708_v25 = vld [vmem:[#allocation2 + $0x9] sm:$0xff] }
 0x37c   :  { %4017 = vmatpush3.msra.mxu1 %v2051_v6  ;;  %v1693_v20 = vld [vmem:[#allocation2 + $0x10] sm:$0xff]  ;;  %1690 = vst.msk [vmem:[#allocation2 + $0x20] sm:$0xf] %vm1689_vm3, %v1683_v34  ;;  %3949 = vmatmul.mubr.msk.f32.vlgmr.msra.gmra.mxu0 %vm1684_vm2, %v1708_v25  ;;  %v2154_v4 = vld [vmem:[#allocation2 + $0x4] sm:$0xff] }
 0x37d   :  { %4018 = vmatprep.subr.mxu1 %v2050_v23  ;;  %3981 = vmatprep.mubr.msk.f32.mxu1 %vm1684_vm2, %v1693_v20  ;;  %v2037_v44 = vld [vmem:[#allocation2 + $0xb] sm:$0xff] }
 0x37e   :  { %3985 = vmatpush3.msra.mxu0 %v1934_v8  ;;  %4019 = vmatpush3.msra.mxu1 %v2050_v23  ;;  %v2170_v8 = vld [vmem:[#allocation7 + $0x1d8] sm:$0xff] }
 0x37f   :  { %3986 = vmatprep.subr.mxu0 %v1933_v62  ;;  %4020 = vmatprep.subr.mxu1 %v2049_v57  ;;  %v1709_v60 = vld [vmem:[#allocation2 + $0x11] sm:$0xff] }
 0x380   :  { %3987 = vmatpush3.msra.mxu0 %v1933_v62  ;;  %v1694_v24 = vld [vmem:[#allocation2 + $0x18] sm:$0xff]  ;;  %4021 = vmatpush3.msra.mxu1 %v2049_v57  ;;  %v1919_v14 = vld [vmem:[#allocation2 + $0xa] sm:$0xff] }
 0x381   :  { %3988 = vmatprep.subr.mxu0 %v1932_v58  ;;  %4022 = vmatprep.subr.mxu1 %v2048_v59  ;;  %v2038_v30 = vld [vmem:[#allocation2 + $0x13] sm:$0xff] }
 0x382   :  { %3951 = vmatprep.mubr.msk.f32.mxu0 %vm1684_vm2, %v1709_v60  ;;  %3982 = vmatmul.mubr.msk.f32.gmra.mxu1 %vm1684_vm2, %v1694_v24  ;;  %v1920_v37 = vld [vmem:[#allocation2 + $0x12] sm:$0xff] }
 0x383   :  { %3989 = vmatpush3.msra.mxu0 %v1932_v58  ;;  %4023 = vmatpush3.msra.mxu1 %v2048_v59  ;;  %v1710_v27 = vld [vmem:[#allocation2 + $0x19] sm:$0xff]  ;;  %v2155_v19 = vld [vmem:[#allocation2 + $0xc] sm:$0xff] }
 0x384   :  { %3990 = vmatprep.subr.mxu0 %v1931_v53  ;;  %4024 = vmatprep.subr.mxu1 %v2047_v15  ;;  %v2039_v41 = vld [vmem:[#allocation2 + $0x1b] sm:$0xff] }
 0x385   :  { %4038 = vmatprep.mubr.msk.f32.mxu1 %vm1684_vm2, %v2036_v26  ;;  %3991 = vmatpush3.msra.mxu0 %v1931_v53  ;;  %v1921_v50 = vld [vmem:[#allocation2 + $0x1a] sm:$0xff] }
 0x386   :  { %4025 = vmatpush3.msra.mxu1 %v2047_v15  ;;  %3992 = vmatprep.subr.mxu0 %v1930_v51  ;;  %v2156_v1 = vld [vmem:[#allocation2 + $0x14] sm:$0xff]  ;;  %v2157_v56 = vld [vmem:[#allocation2 + $0x1c] sm:$0xff] }
 0x387   :  { %4026 = vmatprep.subr.mxu1 %v2046_v16  ;;  %3952 = vmatmul.mubr.msk.f32.gmra.mxu0 %vm1684_vm2, %v1710_v27 }
 0x388   :  { %4027 = vmatpush3.msra.mxu1 %v2046_v16  ;;  %3993 = vmatpush3.msra.mxu0 %v1930_v51 }
 0x389   :  { %4008 = vmatprep.mubr.msk.f32.mxu0 %vm1684_vm2, %v1918_v13  ;;  %3994 = vmatprep.subr.mxu0 %v1929_v39 }
 0x38a   :  { %4028 = vmatprep.subr.mxu1 %v2045_v55  ;;  %3995 = vmatpush3.msra.mxu0 %v1929_v39 }
 0x38b   :  { %4029 = vmatpush3.msra.mxu1 %v2045_v55  ;;  %3996 = vmatprep.subr.mxu0 %v1928_v46 }
 0x38c   :  { %4030 = vmatprep.subr.mxu1 %v2044_v48  ;;  %3997 = vmatpush3.msra.mxu0 %v1928_v46 }
 0x38d   :  { %4031 = vmatpush3.msra.mxu1 %v2044_v48  ;;  %3998 = vmatprep.subr.mxu0 %v1927_v28 }
 0x38e   :  { %4032 = vmatprep.subr.mxu1 %v2043_v43  ;;  %3999 = vmatpush3.msra.mxu0 %v1927_v28 }
 0x38f   :  { %4033 = vmatpush3.msra.mxu1 %v2043_v43  ;;  %4000 = vmatprep.subr.mxu0 %v1926_v33 }
 0x390   :  { %4034 = vmatprep.subr.mxu1 %v2042_v54  ;;  %4001 = vmatpush3.msra.mxu0 %v1926_v33 }
 0x391   :  { %4035 = vmatpush3.msra.mxu1 %v2042_v54  ;;  %4002 = vmatprep.subr.mxu0 %v1925_v18  ;;  %v3719_v54 = vld [vmem:[%s6158_s8] ss:$0 sm:$0xff] }
 0x392   :  { %4036 = vmatprep.subr.mxu1 %v2041_v21  ;;  %4003 = vmatpush3.msra.mxu0 %v1925_v18 }
 0x393   :  { %4037 = vmatpush3.msra.mxu1 %v2041_v21  ;;  %4004 = vmatprep.subr.mxu0 %v1924_v40 }
 0x394   :  { %4039 = vmatmul.mubr.msk.f32.vlgmr.msra.gmra.mxu1 %vm1684_vm2, %v2037_v44  ;;  %4005 = vmatpush3.msra.mxu0 %v1924_v40 }
 0x395   :  { %4041 = vmatprep.mubr.msk.f32.mxu1 %vm1684_vm2, %v2038_v30  ;;  %4006 = vmatprep.subr.mxu0 %v1923_v7 }
 0x396   :  { %4074 = vmatprep.subr.mxu1 %v6216_v22  ;;  %4007 = vmatpush3.msra.mxu0 %v1923_v7 }
 0x397   :  { %4009 = vmatmul.mubr.msk.f32.vlgmr.msra.gmra.mxu0 %vm1684_vm2, %v1919_v14  ;;  %4044 = vmatprep.subr.mxu0 %v2170_v8 }
 0x398   :  { %4042 = vmatmul.mubr.msk.f32.gmra.mxu1 %vm1684_vm2, %v2039_v41  ;;  %4011 = vmatprep.mubr.msk.f32.mxu0 %vm1684_vm2, %v1920_v37 }
 0x399   :  { %4045 = vmatpush3.msra.mxu0 %v2170_v8  ;;  %4082 = vmatprep.mubr.msk.f32.mxu1 %vm4369_vm4, %v6216_v22 }
 0x39a   :  { %4046 = vmatprep.subr.mxu0 %v2169_v12 }
 0x39b   :  { %4047 = vmatpush3.msra.mxu0 %v2169_v12 }
 0x39c   :  { %4012 = vmatmul.mubr.msk.f32.gmra.mxu0 %vm1684_vm2, %v1921_v50  ;;  %4048 = vmatprep.subr.mxu0 %v2168_v38  ;;  %v2362_v50 = vld [vmem:[#allocation10] sm:$0xff] }
 0x39d   :  { %4049 = vmatpush3.msra.mxu0 %v2168_v38  ;;  %4068 = vmatprep.mubr.msk.f32.mxu0 %vm1684_vm2, %v2154_v4  ;;  %v2287_v38 = vld [vmem:[#allocation8] sm:$0xff] }
 0x39e   :  { %4050 = vmatprep.subr.mxu0 %v2167_v36  ;;  %v2538_v4 = vld [vmem:[%s6162_s12 + $0x78] sm:$0xff] }
 0x39f   :  { %4051 = vmatpush3.msra.mxu0 %v2167_v36  ;;  %v2452_v36 = vld [vmem:[%s6161_s11 + $0x78] sm:$0xff] }
 0x3a0   :  { %4052 = vmatprep.subr.mxu0 %v2166_v5 }
 0x3a1   :  { %4053 = vmatpush3.msra.mxu0 %v2166_v5  ;;  %v2451_v5 = vld [vmem:[%s6161_s11 + $0x70] sm:$0xff] }
 0x3a2   :  { %4054 = vmatprep.subr.mxu0 %v2165_v9 }
 0x3a3   :  { %4055 = vmatpush3.msra.mxu0 %v2165_v9  ;;  %v2537_v9 = vld [vmem:[%s6162_s12 + $0x70] sm:$0xff] }
 0x3a4   :  { %4056 = vmatprep.subr.mxu0 %v2164_v17 }
 0x3a5   :  { %4057 = vmatpush3.msra.mxu0 %v2164_v17  ;;  %v2450_v17 = vld [vmem:[%s6161_s11 + $0x68] sm:$0xff] }
 0x3a6   :  { %4058 = vmatprep.subr.mxu0 %v2163_v0 }
 0x3a7   :  { %4059 = vmatpush3.msra.mxu0 %v2163_v0  ;;  %v2536_v0 = vld [vmem:[%s6162_s12 + $0x68] sm:$0xff] }
 0x3a8   :  { %4060 = vmatprep.subr.mxu0 %v2162_v45 }
 0x3a9   :  { %4061 = vmatpush3.msra.mxu0 %v2162_v45  ;;  %v2449_v45 = vld [vmem:[%s6161_s11 + $0x60] sm:$0xff] }
 0x3aa   :  { %4062 = vmatprep.subr.mxu0 %v2161_v2 }
 0x3ab   :  { %4063 = vmatpush3.msra.mxu0 %v2161_v2  ;;  %v2535_v2 = vld [vmem:[%s6162_s12 + $0x60] sm:$0xff] }
 0x3ac   :  { %4064 = vmatprep.subr.mxu0 %v2160_v3 }
 0x3ad   :  { %4065 = vmatpush3.msra.mxu0 %v2160_v3  ;;  %v2448_v3 = vld [vmem:[%s6161_s11 + $0x58] sm:$0xff] }
 0x3ae   :  { %4066 = vmatprep.subr.mxu0 %v2159_v10 }
 0x3af   :  { %4067 = vmatpush3.msra.mxu0 %v2159_v10  ;;  %v2534_v10 = vld [vmem:[%s6162_s12 + $0x58] sm:$0xff] }
 0x3b0   :  { %4069 = vmatmul.mubr.msk.f32.vlgmr.msra.gmra.mxu0 %vm1684_vm2, %v2155_v19  ;;  %4085 = vmatprep.subr.mxu0 %v6216_v22  ;;  %v2447_v19 = vld [vmem:[%s6161_s11 + $0x50] sm:$0xff] }
 0x3b1   :  { %4071 = vmatprep.mubr.msk.f32.mxu0 %vm1684_vm2, %v2156_v1  ;;  %v2533_v1 = vld [vmem:[%s6162_s12 + $0x50] sm:$0xff] }
 0x3b4   :  { %4072 = vmatmul.mubr.msk.f32.gmra.mxu0 %vm1684_vm2, %v2157_v56  ;;  %v2446_v56 = vld [vmem:[%s6161_s11 + $0x48] sm:$0xff] }
 0x3b5   :  { %4093 = vmatprep.mubr.msk.f32.mxu0 %vm4369_vm4, %v6216_v22 }
 0x439   :  { %v3980_v47 = vpop.f32.mrf.mxu1 }
 0x43b   :  { %v1899_v6 = vpop.f32.mrf.mxu1 }
 0x43c   :  { %v3950_v31 = vpop.f32.mrf.mxu0 }
 0x43d   :  { %v1905_v62 = vadd.f32 %v3980_v47, %v3950_v31  ;;  %v2532_v31 = vld [vmem:[%s6162_s12 + $0x48] sm:$0xff]  ;;  %v2531_v47 = vld [vmem:[%s6162_s12 + $0x40] sm:$0xff] }
 0x43e   :  { %v1802_v49 = vpop.f32.mrf.mxu0 }
 0x43f   :  { %v1900_v59 = vadd.f32 %v1899_v6, %v1802_v49  ;;  %v2445_v49 = vld [vmem:[%s6161_s11 + $0x40] sm:$0xff]  ;;  %v2530_v6 = vld [vmem:[%s6162_s12 + $0x38] sm:$0xff] }
 0x442   :  { %v3983_v42 = vpop.f32.mrf.mxu1 }
 0x444   :  { %v1909_v34 = vpop.f32.mrf.mxu1 }
 0x447   :  { %v3953_v32 = vpop.f32.mrf.mxu0 }
 0x448   :  { %v1915_v57 = vadd.f32 %v3983_v42, %v3953_v32  ;;  %v2444_v32 = vld [vmem:[%s6161_s11 + $0x38] sm:$0xff]  ;;  %v2529_v42 = vld [vmem:[%s6162_s12 + $0x30] sm:$0xff] }
 0x449   :  { %v1812_v35 = vpop.f32.mrf.mxu0 }
 0x44a   :  { %v1910_v60 = vadd.f32 %v1909_v34, %v1812_v35  ;;  %v2443_v35 = vld [vmem:[%s6161_s11 + $0x30] sm:$0xff]  ;;  %v2528_v34 = vld [vmem:[%s6162_s12 + $0x28] sm:$0xff] }
 0x454   :  { %v4040_v63 = vpop.f32.mrf.mxu1 }
 0x456   :  { %v2131_v20 = vpop.f32.mrf.mxu1 }
 0x457   :  { %v4010_v23 = vpop.f32.mrf.mxu0 }
 0x458   :  { %v2033_v24 = vadd.f32 %v4010_v23, %v1905_v62  ;;  %v4043_v15 = vpop.f32.mrf.mxu1  ;;  %v2442_v23 = vld [vmem:[%s6161_s11 + $0x28] sm:$0xff]  ;;  %v2439_v62 = vld [vmem:[%s6161_s11 + $0x10] sm:$0xff] }
 0x459   :  { %v2013_v29 = vpop.f32.mrf.mxu0 }
 0x45a   :  { %v2032_v51 = vadd.f32 %v2013_v29, %v1900_v59  ;;  %v2151_v39 = vadd.f32 %v4040_v63, %v2033_v24  ;;  %v2141_v13 = vpop.f32.mrf.mxu1  ;;  %v2441_v29 = vld [vmem:[%s6161_s11 + $0x20] sm:$0xff]  ;;  %v2524_v59 = vld [vmem:[%s6162_s12 + $0x8] sm:$0xff] }
 0x45b   :  { %v2527_v63 = vld [vmem:[%s6162_s12 + $0x20] sm:$0xff] }
 0x45c   :  { %v4013_v25 = vpop.f32.mrf.mxu0  ;;  %v2150_v28 = vadd.f32 %v2131_v20, %v2032_v51  ;;  %v2526_v20 = vld [vmem:[%s6162_s12 + $0x18] sm:$0xff]  ;;  %v2523_v24 = vld [vmem:[%s6162_s12] sm:$0xff] }
 0x45d   :  { %v2035_v53 = vadd.f32 %v4013_v25, %v1915_v57  ;;  %v2440_v25 = vld [vmem:[%s6161_s11 + $0x18] sm:$0xff]  ;;  %v2525_v57 = vld [vmem:[%s6162_s12 + $0x10] sm:$0xff] }
 0x45e   :  { %v2023_v58 = vpop.f32.mrf.mxu0 }
 0x45f   :  { %v2034_v16 = vadd.f32 %v2023_v58, %v1910_v60  ;;  %v2153_v55 = vadd.f32 %v4043_v15, %v2035_v53  ;;  %v2438_v58 = vld [vmem:[%s6161_s11 + $0x8] sm:$0xff]  ;;  %v2437_v60 = vld [vmem:[%s6161_s11] sm:$0xff] }
 0x461   :  { %v2152_v33 = vadd.f32 %v2141_v13, %v2034_v16  ;;  %v2685_v13 = vld [vmem:[#allocation13] sm:$0xf] }
 0x470   :  { %v4070_v26 = vpop.f32.mrf.mxu0 }
 0x471   :  { %v2269_v48 = vadd.f32 %v4070_v26, %v2151_v39 }
 0x472   :  { %v2249_v27 = vpop.f32.mrf.mxu0 }
 0x473   :  { %v2268_v21 = vadd.f32 %v2249_v27, %v2150_v28  ;;  %v2280_v7 = vadd.f32 %v3719_v54, %v2269_v48 }
 0x474   :  { %v4073_v46 = vpop.f32.mrf.mxu0 }
 0x475   :  { %v2271_v43 = vadd.f32 %v4073_v46, %v2153_v55  ;;  %v2279_v14 = vadd.f32 %v3719_v54, %v2268_v21  ;;  %v2284_v37 = vmax.f32 %v2280_v7, 0.0  ;;  %v2610_v46 = vld [vmem:[#allocation11] sm:$0xf]  ;;  %v3773_v21 = vld [vmem:[%s6165_s15 + $0x388] sm:$0xff]  ;;  %v3774_v7 = vld [vmem:[%s6165_s15 + $0x390] sm:$0xff] }
 0x476   :  { %v2259_v18 = vpop.f32.mrf.mxu0 }
 0x477   :  { %v2282_v40 = vadd.f32 %v3719_v54, %v2271_v43  ;;  %v2270_v44 = vadd.f32 %v2259_v18, %v2152_v33  ;;  %v2283_v12 = vmax.f32 %v2279_v14, 0.0  ;;  %v3781_v43 = vld [vmem:[%s6165_s15 + $0x3c8] sm:$0xff]  ;;  %v3783_v33 = vld [vmem:[%s6165_s15 + $0x3d8] sm:$0xff]  ;;  %v3782_v18 = vld [vmem:[%s6165_s15 + $0x3d0] sm:$0xff] }
 0x478   :  { %v3764_v14 = vld [vmem:[%s6165_s15 + $0x340] sm:$0xff] }
 0x479   :  { %v2286_v30 = vmax.f32 %v2282_v40, 0.0  ;;  %v2281_v8 = vadd.f32 %v3719_v54, %v2270_v44  ;;  %v3780_v54 = vld [vmem:[%s6165_s15 + $0x3c0] sm:$0xff]  ;;  %v3775_v40 = vld [vmem:[%s6165_s15 + $0x398] sm:$0xff] }
 0x47a   :  { %v3772_v44 = vld [vmem:[%s6165_s15 + $0x380] sm:$0xff] }
 0x47b   :  { %v2285_v41 = vmax.f32 %v2281_v8, 0.0  ;;  %4075 = vmatpush3.msra.mxu1 %v2286_v30  ;;  %4086 = vmatpush3.msra.mxu0 %v2286_v30  ;;  %v3765_v30 = vld [vmem:[%s6165_s15 + $0x348] sm:$0xff]  ;;  %v3767_v8 = vld [vmem:[%s6165_s15 + $0x358] sm:$0xff] }
 0x47c   :  { %4076 = vmatprep.subr.mxu1 %v6216_v22  ;;  %4087 = vmatprep.subr.mxu0 %v6216_v22 }
 0x47d   :  { %4077 = vmatpush3.msra.mxu1 %v2285_v41  ;;  %4088 = vmatpush3.msra.mxu0 %v2285_v41  ;;  %v3766_v41 = vld [vmem:[%s6165_s15 + $0x350] sm:$0xff] }
 0x47e   :  { %4078 = vmatprep.subr.mxu1 %v6216_v22  ;;  %4089 = vmatprep.subr.mxu0 %v6216_v22 }
 0x47f   :  { %4079 = vmatpush3.msra.mxu1 %v2284_v37  ;;  %4090 = vmatpush3.msra.mxu0 %v2284_v37  ;;  %v3757_v37 = vld [vmem:[%s6165_s15 + $0x308] sm:$0xff] }
 0x480   :  { %4080 = vmatprep.subr.mxu1 %v6216_v22  ;;  %4091 = vmatprep.subr.mxu0 %v6216_v22 }
 0x481   :  { %4081 = vmatpush3.msra.mxu1 %v2283_v12  ;;  %4092 = vmatpush3.msra.mxu0 %v2283_v12  ;;  %v3759_v12 = vld [vmem:[%s6165_s15 + $0x318] sm:$0xff] }
 0x482   :  { %4083 = vmatmul.mubr.msk.f32.vlgmr.msra.gmra.mxu1 %vm2288_vm5, %v2287_v38  ;;  %4094 = vmatmul.mubr.msk.f32.vlgmr.msra.gmra.mxu0 %vm2288_vm5, %v2362_v50  ;;  %v3756_v38 = vld [vmem:[%s6165_s15 + $0x300] sm:$0xff]  ;;  %v3758_v50 = vld [vmem:[%s6165_s15 + $0x310] sm:$0xff] }
 0x483   :  { %4096 = vmatprep.subr.mxu1 %v6216_v22  ;;  %4131 = vmatprep.subr.mxu0 %v6216_v22 }
 0x484   :  { %4097 = vmatpush3.msra.mxu1 %v2452_v36  ;;  %4132 = vmatpush3.msra.mxu0 %v2538_v4  ;;  %v3749_v36 = vld [vmem:[%s6165_s15 + $0x2c8] sm:$0xff]  ;;  %v3751_v4 = vld [vmem:[%s6165_s15 + $0x2d8] sm:$0xff] }
 0x485   :  { %4098 = vmatprep.subr.mxu1 %v6216_v22  ;;  %4133 = vmatprep.subr.mxu0 %v6216_v22 }
 0x486   :  { %4099 = vmatpush3.msra.mxu1 %v2451_v5  ;;  %4134 = vmatpush3.msra.mxu0 %v2537_v9  ;;  %v3748_v5 = vld [vmem:[%s6165_s15 + $0x2c0] sm:$0xff]  ;;  %v3750_v9 = vld [vmem:[%s6165_s15 + $0x2d0] sm:$0xff] }
 0x487   :  { %4100 = vmatprep.subr.mxu1 %v6216_v22  ;;  %4135 = vmatprep.subr.mxu0 %v6216_v22 }
 0x488   :  { %4101 = vmatpush3.msra.mxu1 %v2450_v17  ;;  %4136 = vmatpush3.msra.mxu0 %v2536_v0  ;;  %v3741_v17 = vld [vmem:[%s6165_s15 + $0x288] sm:$0xff]  ;;  %v3743_v0 = vld [vmem:[%s6165_s15 + $0x298] sm:$0xff] }
 0x489   :  { %4102 = vmatprep.subr.mxu1 %v6216_v22  ;;  %4137 = vmatprep.subr.mxu0 %v6216_v22 }
 0x48a   :  { %4103 = vmatpush3.msra.mxu1 %v2449_v45  ;;  %4138 = vmatpush3.msra.mxu0 %v2535_v2  ;;  %v3740_v45 = vld [vmem:[%s6165_s15 + $0x280] sm:$0xff]  ;;  %v3742_v2 = vld [vmem:[%s6165_s15 + $0x290] sm:$0xff] }
 0x48b   :  { %4104 = vmatprep.subr.mxu1 %v6216_v22  ;;  %4139 = vmatprep.subr.mxu0 %v6216_v22 }
 0x48c   :  { %4105 = vmatpush3.msra.mxu1 %v2448_v3  ;;  %4140 = vmatpush3.msra.mxu0 %v2534_v10  ;;  %v3733_v3 = vld [vmem:[%s6165_s15 + $0x248] sm:$0xff]  ;;  %v3735_v10 = vld [vmem:[%s6165_s15 + $0x258] sm:$0xff] }
 0x48d   :  { %4106 = vmatprep.subr.mxu1 %v6216_v22  ;;  %4141 = vmatprep.subr.mxu0 %v6216_v22 }
 0x48e   :  { %4107 = vmatpush3.msra.mxu1 %v2447_v19  ;;  %4142 = vmatpush3.msra.mxu0 %v2533_v1  ;;  %v3732_v19 = vld [vmem:[%s6165_s15 + $0x240] sm:$0xff]  ;;  %v3734_v1 = vld [vmem:[%s6165_s15 + $0x250] sm:$0xff] }
 0x48f   :  { %4108 = vmatprep.subr.mxu1 %v6216_v22  ;;  %4143 = vmatprep.subr.mxu0 %v6216_v22 }
 0x490   :  { %4109 = vmatpush3.msra.mxu1 %v2446_v56  ;;  %4144 = vmatpush3.msra.mxu0 %v2532_v31  ;;  %v3725_v56 = vld [vmem:[%s6165_s15 + $0x208] sm:$0xff]  ;;  %v3727_v31 = vld [vmem:[%s6165_s15 + $0x218] sm:$0xff] }
 0x491   :  { %4110 = vmatprep.subr.mxu1 %v6216_v22  ;;  %4145 = vmatprep.subr.mxu0 %v6216_v22 }
 0x492   :  { %4111 = vmatpush3.msra.mxu1 %v2445_v49  ;;  %4146 = vmatpush3.msra.mxu0 %v2531_v47  ;;  %v3724_v49 = vld [vmem:[%s6165_s15 + $0x200] sm:$0xff]  ;;  %v3726_v47 = vld [vmem:[%s6165_s15 + $0x210] sm:$0xff] }
 0x493   :  { %4112 = vmatprep.subr.mxu1 %v6216_v22  ;;  %4147 = vmatprep.subr.mxu0 %v6216_v22 }
 0x494   :  { %4113 = vmatpush3.msra.mxu1 %v2444_v32  ;;  %4148 = vmatpush3.msra.mxu0 %v2530_v6  ;;  %v3785_v32 = vld [vmem:[%s6165_s15 + $0x3e8] sm:$0xff]  ;;  %v3787_v6 = vld [vmem:[%s6165_s15 + $0x3f8] sm:$0xff] }
 0x495   :  { %4114 = vmatprep.subr.mxu1 %v6216_v22  ;;  %4149 = vmatprep.subr.mxu0 %v6216_v22 }
 0x496   :  { %4115 = vmatpush3.msra.mxu1 %v2443_v35  ;;  %4150 = vmatpush3.msra.mxu0 %v2529_v42  ;;  %v3784_v35 = vld [vmem:[%s6165_s15 + $0x3e0] sm:$0xff]  ;;  %v3786_v42 = vld [vmem:[%s6165_s15 + $0x3f0] sm:$0xff] }
 0x497   :  { %4116 = vmatprep.subr.mxu1 %v6216_v22  ;;  %4151 = vmatprep.subr.mxu0 %v6216_v22 }
 0x498   :  { %4117 = vmatpush3.msra.mxu1 %v2442_v23  ;;  %4152 = vmatpush3.msra.mxu0 %v2528_v34  ;;  %v3777_v34 = vld [vmem:[%s6165_s15 + $0x3a8] sm:$0xff] }
 0x499   :  { %4118 = vmatprep.subr.mxu1 %v6216_v22  ;;  %4153 = vmatprep.subr.mxu0 %v6216_v22 }
 0x49a   :  { %4119 = vmatpush3.msra.mxu1 %v2441_v29  ;;  %4154 = vmatpush3.msra.mxu0 %v2527_v63  ;;  %v3779_v29 = vld [vmem:[%s6165_s15 + $0x3b8] sm:$0xff] }
 0x49b   :  { %4120 = vmatprep.subr.mxu1 %v6216_v22  ;;  %4155 = vmatprep.subr.mxu0 %v6216_v22 }
 0x49c   :  { %4121 = vmatpush3.msra.mxu1 %v2440_v25  ;;  %4156 = vmatpush3.msra.mxu0 %v2526_v20  ;;  %v3776_v25 = vld [vmem:[%s6165_s15 + $0x3a0] sm:$0xff]  ;;  %v3778_v20 = vld [vmem:[%s6165_s15 + $0x3b0] sm:$0xff] }
 0x49d   :  { %4122 = vmatprep.subr.mxu1 %v6216_v22  ;;  %4157 = vmatprep.subr.mxu0 %v6216_v22 }
 0x49e   :  { %4123 = vmatpush3.msra.mxu1 %v2439_v62  ;;  %4158 = vmatpush3.msra.mxu0 %v2525_v57  ;;  %v3769_v62 = vld [vmem:[%s6165_s15 + $0x368] sm:$0xff]  ;;  %v3771_v57 = vld [vmem:[%s6165_s15 + $0x378] sm:$0xff] }
 0x49f   :  { %4124 = vmatprep.subr.mxu1 %v6216_v22  ;;  %4159 = vmatprep.subr.mxu0 %v6216_v22 }
 0x4a0   :  { %4128 = vmatprep.mubr.msk.f32.mxu1 %vm4369_vm4, %v6216_v22  ;;  %4163 = vmatprep.mubr.msk.f32.mxu0 %vm4369_vm4, %v6216_v22 }
 0x4a1   :  { %4125 = vmatpush3.msra.mxu1 %v2438_v58  ;;  %4160 = vmatpush3.msra.mxu0 %v2524_v59 }
 0x4a2   :  { %4126 = vmatprep.subr.mxu1 %v6216_v22  ;;  %4161 = vmatprep.subr.mxu0 %v6216_v22 }
 0x4a3   :  { %4127 = vmatpush3.msra.mxu1 %v2437_v60  ;;  %4162 = vmatpush3.msra.mxu0 %v2523_v24  ;;  %v3768_v60 = vld [vmem:[%s6165_s15 + $0x360] sm:$0xff]  ;;  %v3770_v24 = vld [vmem:[%s6165_s15 + $0x370] sm:$0xff] }
 0x4a4   :  { %4171 = vmatprep.subr.mxu0 %v6216_v22  ;;  %4166 = vmatprep.subr.mxu1 %v6216_v22 }
 0x542   :  { %v2358_v53 = vpop.f32.mrf.mxu1  ;;  %v2432_v15 = vpop.f32.mrf.mxu0 }
 0x543   :  { %v2436_v26 = vmax.f32 %v2358_v53, %v2432_v15  ;;  %v3761_v53 = vld [vmem:[%s6165_s15 + $0x328] sm:$0xff]  ;;  %v3763_v15 = vld [vmem:[%s6165_s15 + $0x338] sm:$0xff] }
 0x544   :  { %v4084_v51 = vpop.f32.mrf.mxu1  ;;  %v4095_v16 = vpop.f32.mrf.mxu0 }
 0x545   :  { %4129 = vmatmul.mubr.f32.vlgmr.msra.gmra.mxu1 %v2436_v26  ;;  %4164 = vmatmul.mubr.f32.vlgmr.msra.gmra.mxu0 %v2436_v26  ;;  %v3760_v26 = vld [vmem:[%s6165_s15 + $0x320] sm:$0xff]  ;;  %v3762_v51 = vld [vmem:[%s6165_s15 + $0x330] sm:$0xff]  ;;  %v3753_v16 = vld [vmem:[%s6165_s15 + $0x2e8] sm:$0xff] }
 0x546   :  { %4173 = vmatprep.mubr.msk.f32.mxu0 %vm4369_vm4, %v6216_v22  ;;  %4168 = vmatprep.mubr.msk.f32.mxu1 %vm4369_vm4, %v6216_v22 }
 0x605   :  { %v2519_v27 = vpop.f32.mrf.mxu1  ;;  %v2605_v39 = vpop.f32.mrf.mxu0 }
 0x606   :  { %v2609_v55 = vmax.f32 %v2519_v27, %v2605_v39  ;;  %v3755_v27 = vld [vmem:[%s6165_s15 + $0x2f8] sm:$0xff]  ;;  %v3752_v39 = vld [vmem:[%s6165_s15 + $0x2e0] sm:$0xff] }
 0x607   :  { %v4130_v48 = vpop.f32.mrf.mxu1  ;;  %v4165_v28 = vpop.f32.mrf.mxu0 }
 0x608   :  { %4172 = vmatpush3.msra.mxu0 %v2609_v55  ;;  %4167 = vmatpush3.msra.mxu1 %v2609_v55  ;;  %v3754_v55 = vld [vmem:[%s6165_s15 + $0x2f0] sm:$0xff]  ;;  %v3744_v48 = vld [vmem:[%s6165_s15 + $0x2a0] sm:$0xff] }
 0x609   :  { %4174 = vmatmul.mubr.msk.f32.vlgmr.msra.gmra.mxu0 %vm2611_vm6, %v2685_v13  ;;  %4169 = vmatmul.mubr.msk.f32.vlgmr.msra.gmra.mxu1 %vm2611_vm6, %v2610_v46  ;;  %v3745_v13 = vld [vmem:[%s6165_s15 + $0x2a8] sm:$0xff]  ;;  %v3747_v46 = vld [vmem:[%s6165_s15 + $0x2b8] sm:$0xff]  ;;  %v3746_v28 = vld [vmem:[%s6165_s15 + $0x2b0] sm:$0xff] }
 0x60a   :  { %2907 = vmatprep.subr.mxu1 %v3781_v43  ;;  %2978 = vmatprep.subr.mxu0 %v3783_v33  ;;  %v3737_v43 = vld [vmem:[%s6165_s15 + $0x268] sm:$0xff]  ;;  %v3739_v33 = vld [vmem:[%s6165_s15 + $0x278] sm:$0xff] }
 0x60b   :  { %2908 = vmatpush1.msra.mxu1 %v3780_v54  ;;  %2979 = vmatpush1.msra.mxu0 %v3782_v18  ;;  %v3736_v54 = vld [vmem:[%s6165_s15 + $0x260] sm:$0xff]  ;;  %v3738_v18 = vld [vmem:[%s6165_s15 + $0x270] sm:$0xff] }
 0x60c   :  { %2909 = vmatprep.subr.mxu1 %v3773_v21  ;;  %2980 = vmatprep.subr.mxu0 %v3775_v40  ;;  %v3729_v21 = vld [vmem:[%s6165_s15 + $0x228] sm:$0xff]  ;;  %v3731_v40 = vld [vmem:[%s6165_s15 + $0x238] sm:$0xff] }
 0x60d   :  { %2910 = vmatpush1.msra.mxu1 %v3772_v44  ;;  %2981 = vmatpush1.msra.mxu0 %v3774_v7  ;;  %v3728_v44 = vld [vmem:[%s6165_s15 + $0x220] sm:$0xff]  ;;  %v3730_v7 = vld [vmem:[%s6165_s15 + $0x230] sm:$0xff] }
 0x60e   :  { %2911 = vmatprep.subr.mxu1 %v3765_v30  ;;  %2982 = vmatprep.subr.mxu0 %v3767_v8  ;;  %v2816_v30 = vld [vmem:[%s6165_s15 + $0x1c8] sm:$0xff]  ;;  %v2818_v8 = vld [vmem:[%s6165_s15 + $0x1d8] sm:$0xff] }
 0x60f   :  { %2912 = vmatpush1.msra.mxu1 %v3764_v14  ;;  %2983 = vmatpush1.msra.mxu0 %v3766_v41  ;;  %v2815_v14 = vld [vmem:[%s6165_s15 + $0x1c0] sm:$0xff]  ;;  %v2817_v41 = vld [vmem:[%s6165_s15 + $0x1d0] sm:$0xff] }
 0x610   :  { %2913 = vmatprep.subr.mxu1 %v3757_v37  ;;  %2984 = vmatprep.subr.mxu0 %v3759_v12  ;;  %v2808_v37 = vld [vmem:[%s6165_s15 + $0x188] sm:$0xff]  ;;  %v2810_v12 = vld [vmem:[%s6165_s15 + $0x198] sm:$0xff] }
 0x611   :  { %2914 = vmatpush1.msra.mxu1 %v3756_v38  ;;  %2985 = vmatpush1.msra.mxu0 %v3758_v50  ;;  %v2807_v38 = vld [vmem:[%s6165_s15 + $0x180] sm:$0xff]  ;;  %v2809_v50 = vld [vmem:[%s6165_s15 + $0x190] sm:$0xff] }
 0x612   :  { %2915 = vmatprep.subr.mxu1 %v3749_v36  ;;  %2986 = vmatprep.subr.mxu0 %v3751_v4  ;;  %v2800_v36 = vld [vmem:[%s6165_s15 + $0x148] sm:$0xff]  ;;  %v2802_v4 = vld [vmem:[%s6165_s15 + $0x158] sm:$0xff] }
 0x613   :  { %2916 = vmatpush1.msra.mxu1 %v3748_v5  ;;  %2987 = vmatpush1.msra.mxu0 %v3750_v9  ;;  %v2799_v5 = vld [vmem:[%s6165_s15 + $0x140] sm:$0xff]  ;;  %v2801_v9 = vld [vmem:[%s6165_s15 + $0x150] sm:$0xff] }
 0x614   :  { %2917 = vmatprep.subr.mxu1 %v3741_v17  ;;  %2988 = vmatprep.subr.mxu0 %v3743_v0  ;;  %v2792_v17 = vld [vmem:[%s6165_s15 + $0x108] sm:$0xff]  ;;  %v2794_v0 = vld [vmem:[%s6165_s15 + $0x118] sm:$0xff] }
 0x615   :  { %2918 = vmatpush1.msra.mxu1 %v3740_v45  ;;  %2989 = vmatpush1.msra.mxu0 %v3742_v2  ;;  %v2791_v45 = vld [vmem:[%s6165_s15 + $0x100] sm:$0xff]  ;;  %v2793_v2 = vld [vmem:[%s6165_s15 + $0x110] sm:$0xff] }
 0x616   :  { %2919 = vmatprep.subr.mxu1 %v3733_v3  ;;  %2990 = vmatprep.subr.mxu0 %v3735_v10  ;;  %v2784_v3 = vld [vmem:[%s6165_s15 + $0xc8] sm:$0xff]  ;;  %v2786_v10 = vld [vmem:[%s6165_s15 + $0xd8] sm:$0xff] }
 0x617   :  { %2920 = vmatpush1.msra.mxu1 %v3732_v19  ;;  %2991 = vmatpush1.msra.mxu0 %v3734_v1  ;;  %v2783_v19 = vld [vmem:[%s6165_s15 + $0xc0] sm:$0xff]  ;;  %v2785_v1 = vld [vmem:[%s6165_s15 + $0xd0] sm:$0xff] }
 0x618   :  { %2921 = vmatprep.subr.mxu1 %v3725_v56  ;;  %2992 = vmatprep.subr.mxu0 %v3727_v31  ;;  %v2776_v56 = vld [vmem:[%s6165_s15 + $0x88] sm:$0xff]  ;;  %v2778_v31 = vld [vmem:[%s6165_s15 + $0x98] sm:$0xff] }
 0x619   :  { %2922 = vmatpush1.msra.mxu1 %v3724_v49  ;;  %2993 = vmatpush1.msra.mxu0 %v3726_v47  ;;  %v2775_v49 = vld [vmem:[%s6165_s15 + $0x80] sm:$0xff]  ;;  %v2777_v47 = vld [vmem:[%s6165_s15 + $0x90] sm:$0xff] }
 0x61a   :  { %2955 = vmatprep.mubr.f32.mxu1 %v6216_v22  ;;  %3026 = vmatprep.mubr.f32.mxu0 %v6216_v22 }
 0x61b   :  { %3049 = vmatprep.subr.mxu1 %v3785_v32  ;;  %3120 = vmatprep.subr.mxu0 %v3787_v6  ;;  %v2768_v32 = vld [vmem:[%s6165_s15 + $0x48] sm:$0xff]  ;;  %v2770_v6 = vld [vmem:[%s6165_s15 + $0x58] sm:$0xff] }
 0x6c9   :  { %v5826_v23 = vpop.f32.mrf.mxu0  ;;  %v5834_v63 = vpop.f32.mrf.mxu1 }
 0x6ca   :  { %3788 = vmatmul.mubr.msk.f32.vlgmr.msra.gmra.mxu1 %vm1459_vm1, %v5826_v23  ;;  %3789 = vmatmul.mubr.msk.f32.vlgmr.msra.gmra.mxu0 %vm1459_vm1, %v5826_v23 }
 0x6cb   :  { %3050 = vmatpush1.msra.mxu1 %v3784_v35  ;;  %3121 = vmatpush1.msra.mxu0 %v3786_v42  ;;  %v4175_v58 = vpop.f32.mrf.mxu0  ;;  %v4170_v59 = vpop.f32.mrf.mxu1  ;;  %v2767_v35 = vld [vmem:[%s6165_s15 + $0x40] sm:$0xff]  ;;  %v2769_v42 = vld [vmem:[%s6165_s15 + $0x50] sm:$0xff] }
 0x6cc   :  { %3051 = vmatprep.subr.mxu1 %v3777_v34  ;;  %3122 = vmatprep.subr.mxu0 %v3779_v29  ;;  %v2762_v34 = vld [vmem:[%s6165_s15 + $0x18] sm:$0xff]  ;;  %v2759_v29 = vld [vmem:[%s6165_s15] sm:$0xff]  ;;  %v2821_v58 = vld [vmem:[%s6165_s15 + $0x1f0] sm:$0xff] }
 0x6cd   :  { %3052 = vmatpush1.msra.mxu1 %v3776_v25  ;;  %3123 = vmatpush1.msra.mxu0 %v3778_v20  ;;  %v2761_v25 = vld [vmem:[%s6165_s15 + $0x10] sm:$0xff]  ;;  %v2820_v20 = vld [vmem:[%s6165_s15 + $0x1e8] sm:$0xff] }
 0x6ce   :  { %3053 = vmatprep.subr.mxu1 %v3769_v62  ;;  %3124 = vmatprep.subr.mxu0 %v3771_v57  ;;  %v2822_v62 = vld [vmem:[%s6165_s15 + $0x1f8] sm:$0xff]  ;;  %v2819_v57 = vld [vmem:[%s6165_s15 + $0x1e0] sm:$0xff]  ;;  %v2812_v59 = vld [vmem:[%s6165_s15 + $0x1a8] sm:$0xff] }
 0x6cf   :  { %3054 = vmatpush1.msra.mxu1 %v3768_v60  ;;  %3125 = vmatpush1.msra.mxu0 %v3770_v24  ;;  %v2814_v60 = vld [vmem:[%s6165_s15 + $0x1b8] sm:$0xff]  ;;  %v2811_v24 = vld [vmem:[%s6165_s15 + $0x1a0] sm:$0xff] }
 0x6d0   :  { %3055 = vmatprep.subr.mxu1 %v3761_v53  ;;  %3126 = vmatprep.subr.mxu0 %v3763_v15  ;;  %v2813_v53 = vld [vmem:[%s6165_s15 + $0x1b0] sm:$0xff]  ;;  %v2804_v15 = vld [vmem:[%s6165_s15 + $0x168] sm:$0xff] }
 0x6d1   :  { %3056 = vmatpush1.msra.mxu1 %v3760_v26  ;;  %3127 = vmatpush1.msra.mxu0 %v3762_v51  ;;  %v2806_v26 = vld [vmem:[%s6165_s15 + $0x178] sm:$0xff]  ;;  %v2803_v51 = vld [vmem:[%s6165_s15 + $0x160] sm:$0xff] }
 0x6d2   :  { %3057 = vmatprep.subr.mxu1 %v3753_v16  ;;  %3128 = vmatprep.subr.mxu0 %v3755_v27  ;;  %v2805_v16 = vld [vmem:[%s6165_s15 + $0x170] sm:$0xff]  ;;  %v2796_v27 = vld [vmem:[%s6165_s15 + $0x128] sm:$0xff] }
 0x6d3   :  { %3058 = vmatpush1.msra.mxu1 %v3752_v39  ;;  %3129 = vmatpush1.msra.mxu0 %v3754_v55  ;;  %v2798_v39 = vld [vmem:[%s6165_s15 + $0x138] sm:$0xff]  ;;  %v2795_v55 = vld [vmem:[%s6165_s15 + $0x120] sm:$0xff] }
 0x6d4   :  { %3059 = vmatprep.subr.mxu1 %v3745_v13  ;;  %3130 = vmatprep.subr.mxu0 %v3747_v46  ;;  %v2797_v13 = vld [vmem:[%s6165_s15 + $0x130] sm:$0xff]  ;;  %v2788_v46 = vld [vmem:[%s6165_s15 + $0xe8] sm:$0xff] }
 0x6d5   :  { %3060 = vmatpush1.msra.mxu1 %v3744_v48  ;;  %3131 = vmatpush1.msra.mxu0 %v3746_v28  ;;  %v2790_v48 = vld [vmem:[%s6165_s15 + $0xf8] sm:$0xff]  ;;  %v2787_v28 = vld [vmem:[%s6165_s15 + $0xe0] sm:$0xff] }
 0x6d6   :  { %3061 = vmatprep.subr.mxu1 %v3737_v43  ;;  %3132 = vmatprep.subr.mxu0 %v3739_v33  ;;  %v2789_v43 = vld [vmem:[%s6165_s15 + $0xf0] sm:$0xff]  ;;  %v2780_v33 = vld [vmem:[%s6165_s15 + $0xa8] sm:$0xff] }
 0x6d7   :  { %3062 = vmatpush1.msra.mxu1 %v3736_v54  ;;  %3133 = vmatpush1.msra.mxu0 %v3738_v18  ;;  %v2782_v54 = vld [vmem:[%s6165_s15 + $0xb8] sm:$0xff]  ;;  %v2779_v18 = vld [vmem:[%s6165_s15 + $0xa0] sm:$0xff] }
 0x6d8   :  { %3063 = vmatprep.subr.mxu1 %v3729_v21  ;;  %3134 = vmatprep.subr.mxu0 %v3731_v40  ;;  %v2781_v21 = vld [vmem:[%s6165_s15 + $0xb0] sm:$0xff]  ;;  %v2772_v40 = vld [vmem:[%s6165_s15 + $0x68] sm:$0xff] }
 0x6d9   :  { %3064 = vmatpush1.msra.mxu1 %v3728_v44  ;;  %3135 = vmatpush1.msra.mxu0 %v3730_v7  ;;  %v2774_v44 = vld [vmem:[%s6165_s15 + $0x78] sm:$0xff]  ;;  %v2771_v7 = vld [vmem:[%s6165_s15 + $0x60] sm:$0xff] }
 0x6da   :  { %3097 = vmatprep.mubr.f32.mxu1 %v6216_v22  ;;  %3168 = vmatprep.mubr.f32.mxu0 %v6216_v22 }
 0x6db   :  { %3194 = vmatprep.subr.mxu1 %v2816_v30  ;;  %3265 = vmatprep.subr.mxu0 %v2818_v8  ;;  %v2773_v30 = vld [vmem:[%s6165_s15 + $0x70] sm:$0xff]  ;;  %v2764_v8 = vld [vmem:[%s6165_s15 + $0x28] sm:$0xff] }
 0x6dc   :  { %3790 = vmatmul.mubr.msk.f32.vlgmr.msra.gmra.mxu1 %vm1459_vm1, %v5826_v23  ;;  %3791 = vmatmul.mubr.msk.f32.vlgmr.msra.gmra.mxu0 %vm1459_vm1, %v5826_v23  ;;  %v2760_v23 = vld [vmem:[%s6165_s15 + $0x8] sm:$0xff] }
 0x6dd   :  { %3195 = vmatpush1.msra.mxu1 %v2815_v14  ;;  %3266 = vmatpush1.msra.mxu0 %v2817_v41  ;;  %v2766_v14 = vld [vmem:[%s6165_s15 + $0x38] sm:$0xff]  ;;  %v2763_v41 = vld [vmem:[%s6165_s15 + $0x20] sm:$0xff] }
 0x6de   :  { %3196 = vmatprep.subr.mxu1 %v2808_v37  ;;  %3267 = vmatprep.subr.mxu0 %v2810_v12  ;;  %v2765_v37 = vld [vmem:[%s6165_s15 + $0x30] sm:$0xff] }
 0x6df   :  { %3197 = vmatpush1.msra.mxu1 %v2807_v38  ;;  %3268 = vmatpush1.msra.mxu0 %v2809_v50 }
 0x6e0   :  { %3198 = vmatprep.subr.mxu1 %v2800_v36  ;;  %3269 = vmatprep.subr.mxu0 %v2802_v4 }
 0x6e1   :  { %3199 = vmatpush1.msra.mxu1 %v2799_v5  ;;  %3270 = vmatpush1.msra.mxu0 %v2801_v9  ;;  %v3474_v9 = vsub.s32 2, %v5208_v52 }
 0x6e2   :  { %3200 = vmatprep.subr.mxu1 %v2792_v17  ;;  %3271 = vmatprep.subr.mxu0 %v2794_v0  ;;  %v3462_v17 = vld [vmem:[#allocation14] sm:$0xff]  ;;  %v3478_v0 = vsub.s32 3, %v5208_v52 }
 0x6e3   :  { %3201 = vmatpush1.msra.mxu1 %v2791_v45  ;;  %3272 = vmatpush1.msra.mxu0 %v2793_v2 }
 0x6e4   :  { %3202 = vmatprep.subr.mxu1 %v2784_v3  ;;  %3273 = vmatprep.subr.mxu0 %v2786_v10  ;;  %v3475_v3 = vrot.slane %v3462_v17, %v3474_v9 }
 0x6e5   :  { %3203 = vmatpush1.msra.mxu1 %v2783_v19  ;;  %3274 = vmatpush1.msra.mxu0 %v2785_v1 }
 0x6e6   :  { %3204 = vmatprep.subr.mxu1 %v2776_v56  ;;  %3275 = vmatprep.subr.mxu0 %v2778_v31  ;;  %v3471_v56 = vrot.slane %v3462_v17, %v1151_v61  ;;  %v3479_v31 = vrot.slane %v3462_v17, %v3478_v0  ;;  %v3482_v61 = vsub.s32 4, %v5208_v52 }
 0x6e7   :  { %3205 = vmatpush1.msra.mxu1 %v2775_v49  ;;  %3276 = vmatpush1.msra.mxu0 %v2777_v47 }
 0x6e8   :  { %3206 = vmatprep.subr.mxu1 %v2768_v32  ;;  %3277 = vmatprep.subr.mxu0 %v2770_v6 }
 0x6e9   :  { %3207 = vmatpush1.msra.mxu1 %v2767_v35  ;;  %3278 = vmatpush1.msra.mxu0 %v2769_v42 }
 0x6ea   :  { %3208 = vmatprep.subr.mxu1 %v2760_v23  ;;  %3279 = vmatprep.subr.mxu0 %v2762_v34 }
 0x6eb   :  { %3209 = vmatpush1.msra.mxu1 %v2759_v29  ;;  %3242 = vmatprep.mubr.f32.mxu1 %v6216_v22 }
 0x6ec   :  { %3280 = vmatpush1.msra.mxu0 %v2761_v25  ;;  %3313 = vmatprep.mubr.f32.mxu0 %v6216_v22 }
 0x6ed   :  { %3792 = vmatmul.mubr.msk.f32.vlgmr.msra.gmra.mxu1 %vm1459_vm1, %v5834_v63  ;;  %3793 = vmatmul.mubr.msk.f32.vlgmr.msra.gmra.mxu0 %vm1459_vm1, %v5834_v63 }
 0x6ee   :  { %3336 = vmatprep.subr.mxu1 %v2820_v20  ;;  %3407 = vmatprep.subr.mxu0 %v2822_v62 }
 0x6ef   :  { %3337 = vmatpush1.msra.mxu1 %v2819_v57  ;;  %3408 = vmatpush1.msra.mxu0 %v2821_v58  ;;  %v3490_v58 = vsub.s32 6, %v5208_v52 }
 0x6f0   :  { %3338 = vmatprep.subr.mxu1 %v2812_v59  ;;  %3409 = vmatprep.subr.mxu0 %v2814_v60  ;;  %v3486_v59 = vsub.s32 5, %v5208_v52  ;;  %v3494_v60 = vsub.s32 7, %v5208_v52 }
 0x6f1   :  { %3339 = vmatpush1.msra.mxu1 %v2811_v24  ;;  %3410 = vmatpush1.msra.mxu0 %v2813_v53  ;;  %v3483_v24 = vrot.slane %v3462_v17, %v3482_v61  ;;  %v3491_v53 = vrot.slane %v3462_v17, %v3490_v58 }
 0x6f2   :  { %3340 = vmatprep.subr.mxu1 %v2804_v15  ;;  %3411 = vmatprep.subr.mxu0 %v2806_v26 }
 0x6f3   :  { %3341 = vmatpush1.msra.mxu1 %v2803_v51  ;;  %3412 = vmatpush1.msra.mxu0 %v2805_v16 }
 0x6f4   :  { %3342 = vmatprep.subr.mxu1 %v2796_v27  ;;  %3413 = vmatprep.subr.mxu0 %v2798_v39  ;;  %v3487_v27 = vrot.slane %v3462_v17, %v3486_v59  ;;  %v3495_v39 = vrot.slane %v3462_v17, %v3494_v60 }
 0x6f5   :  { %3343 = vmatpush1.msra.mxu1 %v2795_v55  ;;  %3414 = vmatpush1.msra.mxu0 %v2797_v13 }
 0x6f6   :  { %3344 = vmatprep.subr.mxu1 %v2788_v46  ;;  %3415 = vmatprep.subr.mxu0 %v2790_v48 }
 0x6f7   :  { %3345 = vmatpush1.msra.mxu1 %v2787_v28  ;;  %3416 = vmatpush1.msra.mxu0 %v2789_v43 }
 0x6f8   :  { %3346 = vmatprep.subr.mxu1 %v2780_v33  ;;  %3417 = vmatprep.subr.mxu0 %v2782_v54 }
 0x6f9   :  { %3347 = vmatpush1.msra.mxu1 %v2779_v18  ;;  %3418 = vmatpush1.msra.mxu0 %v2781_v21 }
 0x6fa   :  { %3348 = vmatprep.subr.mxu1 %v2772_v40  ;;  %3419 = vmatprep.subr.mxu0 %v2774_v44 }
 0x6fb   :  { %3349 = vmatpush1.msra.mxu1 %v2771_v7  ;;  %3420 = vmatpush1.msra.mxu0 %v2773_v30 }
 0x6fc   :  { %3350 = vmatprep.subr.mxu1 %v2764_v8  ;;  %3421 = vmatprep.subr.mxu0 %v2766_v14 }
 0x6fd   :  { %3351 = vmatpush1.msra.mxu1 %v2763_v41  ;;  %3384 = vmatprep.mubr.f32.mxu1 %v6216_v22 }
 0x6fe   :  { %3422 = vmatpush1.msra.mxu0 %v2765_v37  ;;  %3455 = vmatprep.mubr.f32.mxu0 %v6216_v22  ;;  %v3467_v22 = vrot.slane %v3462_v17, %v1147_v11 }
 0x6ff   :  { %3794 = vmatmul.mubr.msk.f32.vlgmr.msra.gmra.mxu1 %vm1459_vm1, %v5834_v63  ;;  %3795 = vmatmul.mubr.msk.f32.vlgmr.msra.gmra.mxu0 %vm1459_vm1, %v5834_v63 }
 0x78a   :  { %v2957_v12 = vpop.f32.mrf.mxu1  ;;  %v3028_v38 = vpop.f32.mrf.mxu0 }
 0x78c   :  { %v2959_v50 = vpop.f32.mrf.mxu1  ;;  %v3030_v36 = vpop.f32.mrf.mxu0 }
 0x79c   :  { %v3099_v4 = vpop.f32.mrf.mxu1  ;;  %v3170_v5 = vpop.f32.mrf.mxu0 }
 0x79e   :  { %v3101_v45 = vpop.f32.mrf.mxu1  ;;  %v3172_v2 = vpop.f32.mrf.mxu0 }
 0x7ad   :  { %v3244_v10 = vpop.f32.mrf.mxu1  ;;  %v3315_v19 = vpop.f32.mrf.mxu0 }
 0x7ae   :  { %v3245_v63 = vadd.f32 %v3244_v10, %v2957_v12  ;;  %v3316_v1 = vadd.f32 %v3315_v19, %v3028_v38 }
 0x7af   :  { %v3246_v49 = vpop.f32.mrf.mxu1  ;;  %v3317_v47 = vpop.f32.mrf.mxu0 }
 0x7b0   :  { %v3504_v32 = vadd.f32 %v3467_v22, %v3245_v63  ;;  %v3506_v6 = vadd.f32 %v3475_v3, %v3316_v1  ;;  %v3247_v35 = vadd.f32 %v3246_v49, %v2959_v50  ;;  %v3318_v42 = vadd.f32 %v3317_v47, %v3030_v36 }
 0x7b2   :  { %v3505_v23 = vadd.f32 %v3471_v56, %v3247_v35  ;;  %v3507_v34 = vadd.f32 %v3479_v31, %v3318_v42  ;;  %v3512_v29 = vmax.f32 %v3504_v32, 0.0  ;;  %v3514_v25 = vmax.f32 %v3506_v6, 0.0 }
 0x7b4   :  { %v3513_v11 = vmax.f32 %v3505_v23, 0.0  ;;  %v3515_v20 = vmax.f32 %v3507_v34, 0.0 }
 0x7b6   :  { %v3528_v62 = vcombine.low %v3512_v29, %v3513_v11  ;;  %v3529_v57 = vcombine.low %v3514_v25, %v3515_v20 }
 0x7b8   :  { %3536 = vst [vmem:[%s6167_s17] sm:$0xff] %v3528_v62  ;;  %3537 = vst [vmem:[%s6167_s17 + $0x8] sm:$0xff] %v3529_v57 }
 0x7bf   :  { %v3386_v15 = vpop.f32.mrf.mxu1  ;;  %v3457_v26 = vpop.f32.mrf.mxu0 }
 0x7c0   :  { %v3387_v51 = vadd.f32 %v3386_v15, %v3099_v4  ;;  %v3458_v16 = vadd.f32 %v3457_v26, %v3170_v5 }
 0x7c1   :  { %v3388_v55 = vpop.f32.mrf.mxu1  ;;  %v3459_v13 = vpop.f32.mrf.mxu0 }
 0x7c2   :  { %v3508_v46 = vadd.f32 %v3483_v24, %v3387_v51  ;;  %v3510_v48 = vadd.f32 %v3491_v53, %v3458_v16  ;;  %v3389_v28 = vadd.f32 %v3388_v55, %v3101_v45  ;;  %v3460_v43 = vadd.f32 %v3459_v13, %v3172_v2 }
 0x7c4   :  { %v3509_v33 = vadd.f32 %v3487_v27, %v3389_v28  ;;  %v3511_v54 = vadd.f32 %v3495_v39, %v3460_v43  ;;  %v3516_v18 = vmax.f32 %v3508_v46, 0.0  ;;  %v3518_v21 = vmax.f32 %v3510_v48, 0.0 }
 0x7c6   :  { %v3517_v40 = vmax.f32 %v3509_v33, 0.0  ;;  %v3519_v52 = vmax.f32 %v3511_v54, 0.0 }
 0x7c8   :  { %v3530_v44 = vcombine.low %v3516_v18, %v3517_v40  ;;  %v3531_v7 = vcombine.low %v3518_v21, %v3519_v52 }
 0x7ca   :  { %3538 = vst [vmem:[%s6167_s17 + $0x10] sm:$0xff] %v3530_v44  ;;  %3539 = vst [vmem:[%s6167_s17 + $0x18] sm:$0xff] %v3531_v7 }
 0x7cb   :  { %3544 = vsyncpa [#allocation4], 1 }
 0x7cc   :  { %3545 = vsyncpa [#allocation6], 1 }
 0x7cd   :  { %3546 = vsyncpa [#allocation9], 1 }
 0x7ce   :  { %3547 = vsyncpa [#allocation12], 1 }
 0x7cf   :  { %3548 = vsyncpa [#allocation15], 1 }

</bundles_post_ra>
